<compile_context>
chip_gen: v5e
topology: v5e:2x2
jax: 0.10.0
libtpu: 0.0.40
codegen_flags: <defaults>
</compile_context>

<pallas_src>
import functools

import jax
import jax.numpy as jnp
from jax import lax
from jax.experimental import pallas as pl
from jax.experimental.pallas import tpu as pltpu


def _round_up(x, m):
    return ((x + m - 1) // m) * m


def _intra_scl_kernel(n_valid, n_pad, tm, tn,
                      q_ref, k_ref, labr_ref, labc_ref, rinvr_ref, rinvc_ref,
                      cnt_ref, out_ref, m_sc, l_sc, ps_sc):
    """One (row-tile, col-tile) step of the online masked log-softmax.

    q_ref    [TM, Dp]  bf16   row-tile features
    k_ref    [TN, Dp]  bf16   col-tile features (same array, natural layout)
    labr_ref [TM, 1]   int32  row labels (-1 for padded rows)
    labc_ref [1,  TN]  int32  col labels (-1 for padded cols)
    rinvr/c  rsqrt(class prob) per row / col (1.0 for padded entries)
    cnt_ref  [TM, 1]   f32    #positives per row (precomputed in wrapper)
    out_ref  [TM, 128] f32    per-row loss broadcast across lanes
    scratch: running max, running denominator, running positive-logit sum
    """
    i = pl.program_id(0)
    j = pl.program_id(1)
    nj = pl.num_programs(1)

    @pl.when(j == 0)
    def _init():
        # -inf init is NaN-safe here: every tile produces finite logits
        # (features are zero-padded), so m_new is finite and
        # alpha = exp(-inf - finite) == 0 on the first column step.
        m_sc[...] = jnp.full_like(m_sc, -jnp.inf)
        l_sc[...] = jnp.zeros_like(l_sc)
        ps_sc[...] = jnp.zeros_like(ps_sc)

    # [TM, TN] similarity tile on the MXU: bf16 operands in natural [rows, D]
    # layout, contracting the trailing D dims, f32 accumulation.
    s = lax.dot_general(q_ref[...], k_ref[...],
                        dimension_numbers=(((1,), (1,)), ((), ())),
                        preferred_element_type=jnp.float32)

    # Per-pair inverse temperature rebuilt from O(N) vectors:
    #   1 / clamp(sqrt(p_i*p_j), min=0.07) == min(rsqrt(p_i)*rsqrt(p_j), 1/0.07)
    s = s * jnp.minimum(rinvr_ref[...] * rinvc_ref[...], 1.0 / 0.07)

    # Online-softmax statistics.  The running max may include the diagonal and
    # the padded (zero) columns: shifting the max leaves ps/cnt - m - log(l)
    # unchanged, so the max reduction needs no masking at all.
    m_prev = m_sc[...]
    m_new = jnp.maximum(m_prev, jnp.max(s, axis=1, keepdims=True))
    alpha = jnp.exp(m_prev - m_new)
    m_sc[...] = m_new

    labels_eq = labr_ref[...] == labc_ref[...]           # positive candidates

    # Specialization: with tm == tn the diagonal only occurs on i == j tiles,
    # and padded columns only in the last column tile (a Python-time fact).
    # Every other tile runs the mask-free fast path (no iota, no select on the
    # denominator exp).
    has_col_pad = n_pad > n_valid                        # Python constant
    if has_col_pad:
        needs_mask = jnp.logical_or(i == j, j == nj - 1)
    else:
        needs_mask = i == j

    @pl.when(needs_mask)
    def _masked_update():
        row_ids = i * tm + lax.broadcasted_iota(jnp.int32, (tm, tn), 0)
        col_ids = j * tn + lax.broadcasted_iota(jnp.int32, (tm, tn), 1)
        keep = row_ids != col_ids                        # diag out of denom
        if has_col_pad:
            keep = jnp.logical_and(keep, col_ids < n_valid)
        p = jnp.where(keep, jnp.exp(s - m_new), 0.0)
        pos = jnp.logical_and(labels_eq, keep)
        l_sc[...] = alpha * l_sc[...] + jnp.sum(p, axis=1, keepdims=True)
        ps_sc[...] = ps_sc[...] + jnp.sum(jnp.where(pos, s, 0.0),
                                          axis=1, keepdims=True)

    @pl.when(jnp.logical_not(needs_mask))
    def _fast_update():
        p = jnp.exp(s - m_new)
        l_sc[...] = alpha * l_sc[...] + jnp.sum(p, axis=1, keepdims=True)
        # Padded columns never reach this path, and their label (-1) never
        # matches a real row label, so labels_eq alone is the positive mask.
        ps_sc[...] = ps_sc[...] + jnp.sum(jnp.where(labels_eq, s, 0.0),
                                          axis=1, keepdims=True)

    @pl.when(j == nj - 1)
    def _finalize():
        # Exact division by the (small-integer) positive count; no denominator
        # floor — degenerate inputs would produce -inf/NaN in the PyTorch
        # reference as well.
        mean_lp = ps_sc[...] / cnt_ref[...] - m_sc[...] - jnp.log(l_sc[...])
        loss_row = -mean_lp                              # [TM, 1]
        if n_pad > n_valid:
            row_ids1 = i * tm + lax.broadcasted_iota(jnp.int32, (tm, 1), 0)
            loss_row = jnp.where(row_ids1 < n_valid, loss_row, 0.0)
        out_ref[...] = jnp.broadcast_to(loss_row, out_ref.shape)   # lane-dense


def intra_scl_loss(features, targets, cls_probs, *, tm=256, tn=256):
    """features: [B, 2, D] float, targets: [B] int32, cls_probs: [C] (sums to 1)."""
    B, V, D = features.shape
    assert V == 2, "IntraSCL expects exactly 2 views per sample"
    assert tm == tn, "diagonal specialization assumes square tiles"
    N = 2 * B
    C = cls_probs.shape[0]

    # Don't use tiles far larger than the problem (keeps tiny demos cheap);
    # tiles stay square and (8,128)-aligned.
    tile = min(tm, max(128, _round_up(N, 128)))
    tm = tn = tile

    n_pad = _round_up(N, tm)
    d_pad = _round_up(D, 128)

    # --- cheap O(N) / O(N*D) glue in plain JAX ---
    feats = jnp.concatenate([features[:, 0], features[:, 1]], axis=0)
    feats = feats.astype(jnp.float32)
    feats = jnp.pad(feats, ((0, n_pad - N), (0, d_pad - D)))
    feats_bf = feats.astype(jnp.bfloat16)            # single bf16 HBM copy,
                                                     # used for both operands

    t2 = jnp.concatenate([targets, targets]).astype(jnp.int32)
    t2 = jnp.pad(t2, (0, n_pad - N), constant_values=-1)
    t2_safe = jnp.clip(t2, 0, C - 1)

    pvec = cls_probs.astype(jnp.float32)[t2_safe]
    rinv = jnp.where(t2 >= 0, lax.rsqrt(pvec), 1.0)

    # #positives per row = 2 * (#samples with the same label) - 1 (self excluded)
    counts = jnp.zeros((C,), jnp.float32).at[targets].add(1.0)
    pos_cnt = jnp.where(t2 >= 0, 2.0 * counts[t2_safe] - 1.0, 1.0)

    lab_rows, lab_cols = t2.reshape(n_pad, 1), t2.reshape(1, n_pad)
    rinv_rows, rinv_cols = rinv.reshape(n_pad, 1), rinv.reshape(1, n_pad)
    cnt_rows = pos_cnt.reshape(n_pad, 1)

    grid = (n_pad // tm, n_pad // tn)
    kernel = functools.partial(_intra_scl_kernel, N, n_pad, tm, tn)

    # Scoped-VMEM budget: double-buffered bf16 q/k tiles + out + scratch, with
    # headroom, clamped below the v7x 64 MiB physical ceiling.
    est = 2 * (tm * d_pad + tn * d_pad) * 2          # q/k bf16, double-buffered
    est += 2 * tm * 128 * 4 + 3 * tm * 128 * 4       # out + scratch (generous)
    vmem_limit = int(min(48 * 1024 * 1024, max(16 * 1024 * 1024, 4 * est)))

    out = pl.pallas_call(
        kernel,
        out_shape=jax.ShapeDtypeStruct((n_pad, 128), jnp.float32),
        grid=grid,
        in_specs=[
            pl.BlockSpec((tm, d_pad), lambda i, j: (i, 0)),   # row features
            pl.BlockSpec((tn, d_pad), lambda i, j: (j, 0)),   # col features
            pl.BlockSpec((tm, 1), lambda i, j: (i, 0)),       # row labels
            pl.BlockSpec((1, tn), lambda i, j: (0, j)),       # col labels
            pl.BlockSpec((tm, 1), lambda i, j: (i, 0)),       # row rsqrt(prob)
            pl.BlockSpec((1, tn), lambda i, j: (0, j)),       # col rsqrt(prob)
            pl.BlockSpec((tm, 1), lambda i, j: (i, 0)),       # row positive cnt
        ],
        out_specs=pl.BlockSpec((tm, 128), lambda i, j: (i, 0)),
        scratch_shapes=[pltpu.VMEM((tm, 1), jnp.float32)] * 3,
        compiler_params=pltpu.CompilerParams(
            dimension_semantics=("parallel", "arbitrary"),
            vmem_limit_bytes=vmem_limit,
        ),
    )(feats_bf, feats_bf, lab_rows, lab_cols, rinv_rows, rinv_cols, cnt_rows)

    # final scalar mean over the 2B real rows (== loss.view(2, B).mean())
    return jnp.sum(out[:N, 0]) / N


def _intra_scl_reference(features, targets, cls_probs):
    """Pure-JAX f32 reference mirroring the PyTorch forward, for validation."""
    B = features.shape[0]
    N = 2 * B
    feats = jnp.concatenate([features[:, 0], features[:, 1]], axis=0)
    feats = feats.astype(jnp.float32)
    t2 = jnp.concatenate([targets, targets])
    mask = (t2[:, None] == t2[None, :]).astype(jnp.float32)
    logits_mask = 1.0 - jnp.eye(N, dtype=jnp.float32)
    mask = mask * logits_mask
    logits = feats @ feats.T
    tv = cls_probs[t2].reshape(-1, 1).astype(jnp.float32)
    temp = jnp.maximum(jnp.sqrt(tv @ tv.T), 0.07)
    logits = logits / temp
    logits = logits - jnp.max(logits, axis=1, keepdims=True)
    exp_logits = jnp.exp(logits) * logits_mask
    log_prob = logits - jnp.log(jnp.sum(exp_logits, axis=1, keepdims=True))
    mlpp = jnp.sum(mask * log_prob, axis=1) / jnp.sum(mask, axis=1)
    return jnp.mean(-mlpp)


if __name__ == "__main__":
    key = jax.random.PRNGKey(0)
    # N = 2B = 400 -> padded to 512 -> a 2x2 grid of 256x256 tiles, exercising
    # the fast path (i=1,j=0), the diagonal path (0,0)/(1,1) and the padded
    # column tile (j=1); 2 row tiles also keep both v7x TensorCores busy.
    B, D, C = 200, 96, 10

    kf, kt = jax.random.split(key)
    features = jax.random.normal(kf, (B, 2, D), dtype=jnp.float32)
    # SCL consumes L2-normalized embeddings; this also keeps the masked softmax
    # denominator well away from underflow (raw unnormalized features break the
    # PyTorch reference in exactly the same way).
    features = features / jnp.linalg.norm(features, axis=-1, keepdims=True)
    targets = jax.random.randint(kt, (B,), 0, C, dtype=jnp.int32)

    # deterministic "cls_num_list", normalized like the module's __init__
    cls_num_list = jnp.arange(1, C + 1, dtype=jnp.float32) * 10.0
    cls_probs = cls_num_list / jnp.sum(cls_num_list)

    loss = jax.block_until_ready(intra_scl_loss(features, targets, cls_probs))
    ref = jax.block_until_ready(_intra_scl_reference(features, targets, cls_probs))

    assert jnp.isfinite(loss), f"loss is not finite: {loss}"
    # bf16 MXU operands -> compare against the f32 reference with a loose tolerance
    assert jnp.allclose(loss, ref, rtol=2e-2, atol=2e-2), (loss, ref)

    print("KERNEL_OK")
</pallas_src>

<mosaic_0001>
module attributes {stable_mosaic.version = 11 : i64} {
  func.func @_intra_scl_kernel(%arg0: i32, %arg1: i32, %arg2: memref<256x128xbf16, #tpu.memory_space<vmem>>, %arg3: memref<256x128xbf16, #tpu.memory_space<vmem>>, %arg4: memref<256x1xi32, #tpu.memory_space<vmem>>, %arg5: memref<1x256xi32, #tpu.memory_space<vmem>>, %arg6: memref<256x1xf32, #tpu.memory_space<vmem>>, %arg7: memref<1x256xf32, #tpu.memory_space<vmem>>, %arg8: memref<256x1xf32, #tpu.memory_space<vmem>>, %arg9: memref<256x128xf32, #tpu.memory_space<vmem>>, %arg10: memref<256x1xf32, #tpu.memory_space<vmem>>, %arg11: memref<256x1xf32, #tpu.memory_space<vmem>>, %arg12: memref<256x1xf32, #tpu.memory_space<vmem>>) attributes {dimension_semantics = [#tpu.dimension_semantics<parallel>, #tpu.dimension_semantics<arbitrary>], iteration_bounds = array<i64: 2, 2>, scalar_prefetch = 0 : i64, scratch_operands = 3 : i64, tpu.core_type = #tpu.core_type<tc>, window_params = [{transform_indices = @transform_0, window_bounds = array<i64: 256, 128>}, {transform_indices = @transform_1, window_bounds = array<i64: 256, 128>}, {transform_indices = @transform_2, window_bounds = array<i64: 256, 1>}, {transform_indices = @transform_3, window_bounds = array<i64: 1, 256>}, {transform_indices = @transform_4, window_bounds = array<i64: 256, 1>}, {transform_indices = @transform_5, window_bounds = array<i64: 1, 256>}, {transform_indices = @transform_6, window_bounds = array<i64: 256, 1>}, {transform_indices = @transform_7, window_bounds = array<i64: 256, 128>}]} {
    %c0_i32 = arith.constant 0 : i32
    %0 = arith.cmpi eq, %arg1, %c0_i32 : i32
    %1 = arith.extui %0 : i1 to i32
    %c0_i32_0 = arith.constant 0 : i32
    %2 = arith.cmpi ne, %1, %c0_i32_0 : i32
    scf.if %2 {
      %cst_22 = arith.constant 0xFF800000 : f32
      %37 = vector.broadcast %cst_22 : f32 to vector<256x1xf32>
      %c0_23 = arith.constant 0 : index
      %c0_24 = arith.constant 0 : index
      %38 = vector.load %arg10[%c0_23, %c0_24] : memref<256x1xf32, #tpu.memory_space<vmem>>, vector<256x1xf32>
      tpu.vector_store %arg10[%c0_23, %c0_24], %37 {strides = array<i32>} : memref<256x1xf32, #tpu.memory_space<vmem>>, vector<256x1xf32>,
      %cst_25 = arith.constant 0.000000e+00 : f32
      %39 = vector.broadcast %cst_25 : f32 to vector<256x1xf32>
      %c0_26 = arith.constant 0 : index
      %c0_27 = arith.constant 0 : index
      %40 = vector.load %arg11[%c0_26, %c0_27] : memref<256x1xf32, #tpu.memory_space<vmem>>, vector<256x1xf32>
      tpu.vector_store %arg11[%c0_26, %c0_27], %39 {strides = array<i32>} : memref<256x1xf32, #tpu.memory_space<vmem>>, vector<256x1xf32>,
      %cst_28 = arith.constant 0.000000e+00 : f32
      %41 = vector.broadcast %cst_28 : f32 to vector<256x1xf32>
      %c0_29 = arith.constant 0 : index
      %c0_30 = arith.constant 0 : index
      %42 = vector.load %arg12[%c0_29, %c0_30] : memref<256x1xf32, #tpu.memory_space<vmem>>, vector<256x1xf32>
      tpu.vector_store %arg12[%c0_29, %c0_30], %41 {strides = array<i32>} : memref<256x1xf32, #tpu.memory_space<vmem>>, vector<256x1xf32>,
    } else {
    }
    %c0 = arith.constant 0 : index
    %c0_1 = arith.constant 0 : index
    %3 = vector.load %arg2[%c0, %c0_1] : memref<256x128xbf16, #tpu.memory_space<vmem>>, vector<256x128xbf16>
    %c0_2 = arith.constant 0 : index
    %c0_3 = arith.constant 0 : index
    %4 = vector.load %arg3[%c0_2, %c0_3] : memref<256x128xbf16, #tpu.memory_space<vmem>>, vector<256x128xbf16>
    %cst = arith.constant dense<0.000000e+00> : vector<256x256xf32>
    %5 = tpu.matmul %3, %4, %cst {dimension_numbers = #tpu.dot_dimension_numbers<[1], [1], [0], [0], [0, 0, 1, 0], [], []>} : vector<256x128xbf16>, vector<256x128xbf16>, vector<256x256xf32> -> vector<256x256xf32>
    %c0_4 = arith.constant 0 : index
    %c0_5 = arith.constant 0 : index
    %6 = vector.load %arg6[%c0_4, %c0_5] : memref<256x1xf32, #tpu.memory_space<vmem>>, vector<256x1xf32>
    %c0_6 = arith.constant 0 : index
    %c0_7 = arith.constant 0 : index
    %7 = vector.load %arg7[%c0_6, %c0_7] : memref<1x256xf32, #tpu.memory_space<vmem>>, vector<1x256xf32>
    %8 = vector.broadcast %6 : vector<256x1xf32> to vector<256x256xf32>
    %9 = vector.broadcast %7 : vector<1x256xf32> to vector<256x256xf32>
    %10 = arith.mulf %8, %9 : vector<256x256xf32>
    %cst_8 = arith.constant 14.2857141 : f32
    %11 = vector.broadcast %cst_8 : f32 to vector<256x256xf32>
    %12 = arith.minimumf %10, %11 : vector<256x256xf32>
    %13 = arith.mulf %5, %12 : vector<256x256xf32>
    %c0_9 = arith.constant 0 : index
    %c0_10 = arith.constant 0 : index
    %14 = vector.load %arg10[%c0_9, %c0_10] : memref<256x1xf32, #tpu.memory_space<vmem>>, vector<256x1xf32>
    %cst_11 = arith.constant dense<0xFF800000> : vector<256xf32>
    %15 = vector.multi_reduction <maximumf>, %13, %cst_11 [1] : vector<256x256xf32> to vector<256xf32>
    %16 = vector.shape_cast %15 : vector<256xf32> to vector<256x1xf32>
    %17 = arith.maximumf %14, %16 : vector<256x1xf32>
    %18 = arith.subf %14, %17 : vector<256x1xf32>
    %19 = math.exp %18 : vector<256x1xf32>
    %c0_12 = arith.constant 0 : index
    %c0_13 = arith.constant 0 : index
    %20 = vector.load %arg10[%c0_12, %c0_13] : memref<256x1xf32, #tpu.memory_space<vmem>>, vector<256x1xf32>
    tpu.vector_store %arg10[%c0_12, %c0_13], %17 {strides = array<i32>} : memref<256x1xf32, #tpu.memory_space<vmem>>, vector<256x1xf32>,
    %c0_14 = arith.constant 0 : index
    %c0_15 = arith.constant 0 : index
    %21 = vector.load %arg4[%c0_14, %c0_15] : memref<256x1xi32, #tpu.memory_space<vmem>>, vector<256x1xi32>
    %c0_16 = arith.constant 0 : index
    %c0_17 = arith.constant 0 : index
    %22 = vector.load %arg5[%c0_16, %c0_17] : memref<1x256xi32, #tpu.memory_space<vmem>>, vector<1x256xi32>
    %23 = vector.broadcast %21 : vector<256x1xi32> to vector<256x256xi32>
    %24 = vector.broadcast %22 : vector<1x256xi32> to vector<256x256xi32>
    %25 = arith.cmpi eq, %23, %24 : vector<256x256xi32>
    %26 = arith.cmpi eq, %arg0, %arg1 : i32
    %c1_i32 = arith.constant 1 : i32
    %27 = arith.cmpi eq, %arg1, %c1_i32 : i32
    %28 = arith.ori %26, %27 : i1
    %29 = arith.extui %28 : i1 to i32
    %c0_i32_18 = arith.constant 0 : i32
    %30 = arith.cmpi ne, %29, %c0_i32_18 : i32
    scf.if %30 {
      %c256_i32 = arith.constant 256 : i32
      %37 = arith.muli %arg0, %c256_i32 : i32
      %38 = tpu.iota {dimensions = array<i32: 0>} : vector<256x256xi32>
      %39 = vector.broadcast %37 : i32 to vector<256x256xi32>
      %40 = arith.addi %39, %38 : vector<256x256xi32>
      %c256_i32_22 = arith.constant 256 : i32
      %41 = arith.muli %arg1, %c256_i32_22 : i32
      %42 = tpu.iota {dimensions = array<i32: 1>} : vector<256x256xi32>
      %43 = vector.broadcast %41 : i32 to vector<256x256xi32>
      %44 = arith.addi %43, %42 : vector<256x256xi32>
      %45 = arith.cmpi ne, %40, %44 : vector<256x256xi32>
      %c400_i32 = arith.constant 400 : i32
      %46 = vector.broadcast %c400_i32 : i32 to vector<256x256xi32>
      %47 = arith.cmpi slt, %44, %46 : vector<256x256xi32>
      %48 = arith.andi %45, %47 : vector<256x256xi1>
      %49 = vector.broadcast %17 : vector<256x1xf32> to vector<256x256xf32>
      %50 = arith.subf %13, %49 : vector<256x256xf32>
      %51 = math.exp %50 : vector<256x256xf32>
      %cst_23 = arith.constant 0.000000e+00 : f32
      %52 = vector.broadcast %cst_23 : f32 to vector<256x256xf32>
      %53 = arith.select %48, %51, %52 : vector<256x256xi1>, vector<256x256xf32>
      %54 = arith.andi %25, %48 : vector<256x256xi1>
      %c0_24 = arith.constant 0 : index
      %c0_25 = arith.constant 0 : index
      %55 = vector.load %arg11[%c0_24, %c0_25] : memref<256x1xf32, #tpu.memory_space<vmem>>, vector<256x1xf32>
      %56 = arith.mulf %19, %55 : vector<256x1xf32>
      %cst_26 = arith.constant dense<0.000000e+00> : vector<256xf32>
      %57 = vector.multi_reduction <add>, %53, %cst_26 [1] : vector<256x256xf32> to vector<256xf32>
      %58 = vector.shape_cast %57 : vector<256xf32> to vector<256x1xf32>
      %59 = arith.addf %56, %58 : vector<256x1xf32>
      %c0_27 = arith.constant 0 : index
      %c0_28 = arith.constant 0 : index
      %60 = vector.load %arg11[%c0_27, %c0_28] : memref<256x1xf32, #tpu.memory_space<vmem>>, vector<256x1xf32>
      tpu.vector_store %arg11[%c0_27, %c0_28], %59 {strides = array<i32>} : memref<256x1xf32, #tpu.memory_space<vmem>>, vector<256x1xf32>,
      %c0_29 = arith.constant 0 : index
      %c0_30 = arith.constant 0 : index
      %61 = vector.load %arg12[%c0_29, %c0_30] : memref<256x1xf32, #tpu.memory_space<vmem>>, vector<256x1xf32>
      %cst_31 = arith.constant 0.000000e+00 : f32
      %62 = vector.broadcast %cst_31 : f32 to vector<256x256xf32>
      %63 = arith.select %54, %13, %62 : vector<256x256xi1>, vector<256x256xf32>
      %cst_32 = arith.constant dense<0.000000e+00> : vector<256xf32>
      %64 = vector.multi_reduction <add>, %63, %cst_32 [1] : vector<256x256xf32> to vector<256xf32>
      %65 = vector.shape_cast %64 : vector<256xf32> to vector<256x1xf32>
      %66 = arith.addf %61, %65 : vector<256x1xf32>
      %c0_33 = arith.constant 0 : index
      %c0_34 = arith.constant 0 : index
      %67 = vector.load %arg12[%c0_33, %c0_34] : memref<256x1xf32, #tpu.memory_space<vmem>>, vector<256x1xf32>
      tpu.vector_store %arg12[%c0_33, %c0_34], %66 {strides = array<i32>} : memref<256x1xf32, #tpu.memory_space<vmem>>, vector<256x1xf32>,
    } else {
    }
    %true = arith.constant true
    %31 = arith.xori %28, %true : i1
    %32 = arith.extui %31 : i1 to i32
    %c0_i32_19 = arith.constant 0 : i32
    %33 = arith.cmpi ne, %32, %c0_i32_19 : i32
    scf.if %33 {
      %37 = vector.broadcast %17 : vector<256x1xf32> to vector<256x256xf32>
      %38 = arith.subf %13, %37 : vector<256x256xf32>
      %39 = math.exp %38 : vector<256x256xf32>
      %c0_22 = arith.constant 0 : index
      %c0_23 = arith.constant 0 : index
      %40 = vector.load %arg11[%c0_22, %c0_23] : memref<256x1xf32, #tpu.memory_space<vmem>>, vector<256x1xf32>
      %41 = arith.mulf %19, %40 : vector<256x1xf32>
      %cst_24 = arith.constant dense<0.000000e+00> : vector<256xf32>
      %42 = vector.multi_reduction <add>, %39, %cst_24 [1] : vector<256x256xf32> to vector<256xf32>
      %43 = vector.shape_cast %42 : vector<256xf32> to vector<256x1xf32>
      %44 = arith.addf %41, %43 : vector<256x1xf32>
      %c0_25 = arith.constant 0 : index
      %c0_26 = arith.constant 0 : index
      %45 = vector.load %arg11[%c0_25, %c0_26] : memref<256x1xf32, #tpu.memory_space<vmem>>, vector<256x1xf32>
      tpu.vector_store %arg11[%c0_25, %c0_26], %44 {strides = array<i32>} : memref<256x1xf32, #tpu.memory_space<vmem>>, vector<256x1xf32>,
      %c0_27 = arith.constant 0 : index
      %c0_28 = arith.constant 0 : index
      %46 = vector.load %arg12[%c0_27, %c0_28] : memref<256x1xf32, #tpu.memory_space<vmem>>, vector<256x1xf32>
      %cst_29 = arith.constant 0.000000e+00 : f32
      %47 = vector.broadcast %cst_29 : f32 to vector<256x256xf32>
      %48 = arith.select %25, %13, %47 : vector<256x256xi1>, vector<256x256xf32>
      %cst_30 = arith.constant dense<0.000000e+00> : vector<256xf32>
      %49 = vector.multi_reduction <add>, %48, %cst_30 [1] : vector<256x256xf32> to vector<256xf32>
      %50 = vector.shape_cast %49 : vector<256xf32> to vector<256x1xf32>
      %51 = arith.addf %46, %50 : vector<256x1xf32>
      %c0_31 = arith.constant 0 : index
      %c0_32 = arith.constant 0 : index
      %52 = vector.load %arg12[%c0_31, %c0_32] : memref<256x1xf32, #tpu.memory_space<vmem>>, vector<256x1xf32>
      tpu.vector_store %arg12[%c0_31, %c0_32], %51 {strides = array<i32>} : memref<256x1xf32, #tpu.memory_space<vmem>>, vector<256x1xf32>,
    } else {
    }
    %c1_i32_20 = arith.constant 1 : i32
    %34 = arith.cmpi eq, %arg1, %c1_i32_20 : i32
    %35 = arith.extui %34 : i1 to i32
    %c0_i32_21 = arith.constant 0 : i32
    %36 = arith.cmpi ne, %35, %c0_i32_21 : i32
    scf.if %36 {
      %c0_22 = arith.constant 0 : index
      %c0_23 = arith.constant 0 : index
      %37 = vector.load %arg12[%c0_22, %c0_23] : memref<256x1xf32, #tpu.memory_space<vmem>>, vector<256x1xf32>
      %c0_24 = arith.constant 0 : index
      %c0_25 = arith.constant 0 : index
      %38 = vector.load %arg8[%c0_24, %c0_25] : memref<256x1xf32, #tpu.memory_space<vmem>>, vector<256x1xf32>
      %39 = arith.divf %37, %38 : vector<256x1xf32>
      %c0_26 = arith.constant 0 : index
      %c0_27 = arith.constant 0 : index
      %40 = vector.load %arg10[%c0_26, %c0_27] : memref<256x1xf32, #tpu.memory_space<vmem>>, vector<256x1xf32>
      %41 = arith.subf %39, %40 : vector<256x1xf32>
      %c0_28 = arith.constant 0 : index
      %c0_29 = arith.constant 0 : index
      %42 = vector.load %arg11[%c0_28, %c0_29] : memref<256x1xf32, #tpu.memory_space<vmem>>, vector<256x1xf32>
      %43 = math.log %42 : vector<256x1xf32>
      %44 = arith.subf %41, %43 : vector<256x1xf32>
      %cst_30 = arith.constant 0.000000e+00 : f32
      %45 = vector.broadcast %cst_30 : f32 to vector<256x1xf32>
      %46 = arith.subf %45, %44 : vector<256x1xf32>
      %c256_i32 = arith.constant 256 : i32
      %47 = arith.muli %arg0, %c256_i32 : i32
      %48 = tpu.iota {dimensions = array<i32: 0>} : vector<256x1xi32>
      %49 = vector.broadcast %47 : i32 to vector<256x1xi32>
      %50 = arith.addi %49, %48 : vector<256x1xi32>
      %c400_i32 = arith.constant 400 : i32
      %51 = vector.broadcast %c400_i32 : i32 to vector<256x1xi32>
      %52 = arith.cmpi slt, %50, %51 : vector<256x1xi32>
      %cst_31 = arith.constant 0.000000e+00 : f32
      %53 = vector.broadcast %cst_31 : f32 to vector<256x1xf32>
      %54 = arith.select %52, %46, %53 : vector<256x1xi1>, vector<256x1xf32>
      %55 = vector.shape_cast %54 : vector<256x1xf32> to vector<256x1xf32>
      %56 = vector.broadcast %55 : vector<256x1xf32> to vector<256x128xf32>
      %c0_32 = arith.constant 0 : index
      %c0_33 = arith.constant 0 : index
      %57 = vector.load %arg9[%c0_32, %c0_33] : memref<256x128xf32, #tpu.memory_space<vmem>>, vector<256x128xf32>
      tpu.vector_store %arg9[%c0_32, %c0_33], %56 {strides = array<i32>} : memref<256x128xf32, #tpu.memory_space<vmem>>, vector<256x128xf32>,
    } else {
    }
    return
  }
  func.func @transform_0(%arg0: i32, %arg1: i32) -> (i32, i32) {
    %c0_i32 = arith.constant 0 : i32
    %c0_i32_0 = arith.constant 0 : i32
    return %arg0, %c0_i32 : i32, i32
  }
  func.func @transform_1(%arg0: i32, %arg1: i32) -> (i32, i32) {
    %c0_i32 = arith.constant 0 : i32
    %c0_i32_0 = arith.constant 0 : i32
    return %arg1, %c0_i32 : i32, i32
  }
  func.func @transform_2(%arg0: i32, %arg1: i32) -> (i32, i32) {
    %c0_i32 = arith.constant 0 : i32
    %c0_i32_0 = arith.constant 0 : i32
    return %arg0, %c0_i32 : i32, i32
  }
  func.func @transform_3(%arg0: i32, %arg1: i32) -> (i32, i32) {
    %c0_i32 = arith.constant 0 : i32
    %c0_i32_0 = arith.constant 0 : i32
    return %c0_i32, %arg1 : i32, i32
  }
  func.func @transform_4(%arg0: i32, %arg1: i32) -> (i32, i32) {
    %c0_i32 = arith.constant 0 : i32
    %c0_i32_0 = arith.constant 0 : i32
    return %arg0, %c0_i32 : i32, i32
  }
  func.func @transform_5(%arg0: i32, %arg1: i32) -> (i32, i32) {
    %c0_i32 = arith.constant 0 : i32
    %c0_i32_0 = arith.constant 0 : i32
    return %c0_i32, %arg1 : i32, i32
  }
  func.func @transform_6(%arg0: i32, %arg1: i32) -> (i32, i32) {
    %c0_i32 = arith.constant 0 : i32
    %c0_i32_0 = arith.constant 0 : i32
    return %arg0, %c0_i32 : i32, i32
  }
  func.func @transform_7(%arg0: i32, %arg1: i32) -> (i32, i32) {
    %c0_i32 = arith.constant 0 : i32
    %c0_i32_0 = arith.constant 0 : i32
    return %arg0, %c0_i32 : i32, i32
  }
}

</mosaic_0001>

<bundles_post_ra>
// kernel: tpu_custom_call.1
= control target key start
LH: loop header
LB: loop body
LE: loop exit
PB: predicated region body
PF: predicated region fallthrough
CT: control target
= control target key end

     0   :  { %s10483_s0 = inlined_call_operand.vmem [shape: bf16[512,128], index: 0, kind: input, shape index: {}]   ;;  %s10484_s1 = inlined_call_operand.vmem [shape: bf16[512,128], index: 1, kind: input, shape index: {}]   ;;  %s10485_s2 = inlined_call_operand.vmem [shape: s32[512,1], index: 2, kind: input, shape index: {}]   ;;  %s10486_s3 = inlined_call_operand.vmem [shape: s32[1,512], index: 3, kind: input, shape index: {}]   ;;  %s10487_s4 = inlined_call_operand.vmem [shape: f32[512,1], index: 4, kind: input, shape index: {}]   ;;  %s10488_s5 = inlined_call_operand.vmem [shape: f32[1,512], index: 5, kind: input, shape index: {}]   ;;  %s10489_s6 = inlined_call_operand.vmem [shape: f32[512,1], index: 6, kind: input, shape index: {}]   ;;  %s10490_s7 = inlined_call_operand.hbm [shape: f32[512,128], index: 7, kind: output, shape index: {}]  }
   0x1   :  { %10877 = sst [smem:[#allocation198_spill]] %s10483_s0 }
   0x2   :  { %12 = vsyncpa [#allocation6], 0 }
   0x3   :  { %14 = vsyncpa [#allocation6 + $0x1], 0  ;;  %s5969_s24 = smov 0   ;;  %s5971_s25 = smov 0  }
   0x4   :  { %s5973_s26 = smov 0   ;;  %s5975_s27 = smov 0  }
   0x5   :  { %s5977_s28 = smov 0   ;;  %s5979_s29 = smov 0  }
   0x6   :  { %s5981_s30 = smov 0   ;;  %s5983_s8 = smov 0  }
   0x7 LB: > { %10878 = sst [smem:[#allocation8_spill]] %s5891_s24  ;;  %s5081_s9 = sadd.s32 4294967295, %s5919_s8   ;;  %s5919_s8 = sphi %s5983_s8, %s20_s8   ;;  %s5915_s30 = sphi %s5981_s30, %s12144_s30   ;;  %s5911_s29 = sphi %s5979_s29, %s12143_s29   ;;  %s5907_s28 = sphi %s5977_s28, %s12142_s28   ;;  %s5903_s27 = sphi %s5975_s27, %s12147_s27   ;;  %s5899_s26 = sphi %s5973_s26, %s12140_s26   ;;  %s5895_s25 = sphi %s5971_s25, %s12146_s25   ;;  %s5891_s24 = sphi %s5969_s24, %s12145_s24  }
   0x8   : > { %10879 = sst [smem:[#allocation9_spill]] %s5899_s26  ;;  %s5082_s10 = sadd.s32 4294967294, %s5919_s8  }
   0x9   : > { %10880 = sst [smem:[#allocation10_spill]] %s5911_s29  ;;  %s29_s11 = sadd.s32 1, %s5911_s29 }
   0xa   : > { %10881 = sst [smem:[#allocation11_spill]] %s5915_s30  ;;  %p30_p0 = scmp.ge.s32.totalorder %s29_s11, 2 }
   0xb   : > { %s32_s12 = sadd.s32 1, %s5915_s30  ;;  %p231_p1 = scmp.ne.s32.totalorder %s5899_s26, %s5895_s25 }
   0xc   : > { %p232_p2 = scmp.eq.s32.totalorder %s5081_s9, 3  ;;  %s12149_s11 = smov (%p30_p0, %s29_s11), 0 }
   0xd   : > { %10882 = sst [smem:[#allocation12_spill]] %s12149_s11  ;;  %s12151_s12 = smov (!%p30_p0, %s32_s12), %s5915_s30 }
   0xe   : > { %p6018_p3 = por %p232_p2, %p231_p1  ;;  %p237_p4 = scmp.ne.s32.totalorder %s5895_s25, %s5891_s24 }
   0xf   : > { %p34_p5 = scmp.ge.s32.totalorder %s12151_s12, 2  ;;  %p238_p6 = scmp.eq.s32.totalorder %s5082_s10, 3 }
  0x10   : > { %p5085_p7 = scmp.ge.s32.totalorder %s5919_s8, 1  ;;  %p317_p8 = scmp.lt.s32.totalorder %s5919_s8, 5 }
  0x11   : > { %s12153_s12 = smov (%p34_p5, %s12151_s12), 0  ;;  %p6028_p9 = por %p238_p6, %p237_p4 }
  0x12   : > { %10884 = sst [smem:[#allocation13_spill]] %s12153_s12  ;;  %p318_p10 = pnand %p5085_p7, %p317_p8 }
  0x13   : > { %s10885_s14 = scalar_select %p6028_p9, 1, 0 }
  0x14   : > { %s218_s15 = ssub.s32 %s5915_s30, %s12153_s12  ;;  %s221_s16 = sadd.s32 1, %s5899_s26 }
  0x15   : > { %10886 = sst [smem:[#allocation14_spill]] %s10885_s14  ;;  %p219_p11 = scmp.eq.s32.totalorder %s218_s15, 0 }
  0x16   : > { %321 = sbr.rel (%p318_p10) target bundleno = 1887 (0x75f), region = 48 }
  0x17   : > { %s6036_s17 = scalar_select %p219_p11, %s5899_s26, %s221_s16  }
  0x19   : > { %10887 = sst [smem:[#allocation15_spill]] %s6036_s17 }
  0x1b   : > { %s10493_s18 = sand.u32 1, %s5895_s25   ;;  %s5087_s19 = sshll.u32 %s5907_s28, 5 }
  0x1c   : > { %s5086_s20 = sshll.u32 %s10493_s18, 8  ;;  %p378_p12 = scmp.lt.s32.totalorder %s5087_s19, 63 }
  0x1d   : > { %s5089_s21 = sshll.u32 %s5903_s27, 5  ;;  %s5093_s22 = sshll.u32 %s5903_s27, 1 }
  0x1e   : > { %s12155_s19 = smov (!%p378_p12, %s5087_s19), 63  ;;  %p384_p13 = scmp.lt.s32.totalorder %s5089_s21, 63 }
  0x1f   : > { %s5088_s23 = sshll.u32 %s12155_s19, 2  ;;  %s5092_s9 = sshll.u32 %s12155_s19, 3 }
  0x20   : > { %s10888_s0 = sld [smem:[#allocation198_spill]]  ;;  %s6052_s30 = scalar_lea.vmem %s10485_s2, %s5092_s9 }
  0x21   : > { %s12157_s21 = smov (!%p384_p13, %s5089_s21), 63  ;;  %p396_p0 = scmp.lt.s32.totalorder %s5093_s22, 3 }
  0x22   : > { %s6057_s17 = scalar_lea.vmem %s10487_s4, %s5092_s9  ;;  %s5090_s26 = sshll.u32 %s12157_s21, 2 }
  0x23   : > { %s6062_s24 = scalar_lea.vmem %s10489_s6, %s5092_s9  ;;  %s6067_s15 = scalar_lea.vmem %s10484_s1, %s5090_s26 }
  0x24   : > { %s12159_s22 = smov (!%p396_p0, %s5093_s22), 3  ;;  %s6079_s14 = scalar_lea.vmem [#allocation5], %s5086_s20 }
  0x25   : > { %s398_s29 = scalar_lea.vmem %s10486_s3, %s12159_s22  ;;  %p5099_p1 = scmp.ne.s32.totalorder %s5903_s27, 0 }
  0x26   : > { %s6047_s16 = scalar_lea.vmem %s10888_s0, %s5088_s23  ;;  %s409_s0 = scalar_lea.vmem %s10488_s5, %s12159_s22 }
  0x27   : > { %421 = sbr.rel (%p5099_p1) target bundleno = 141 (0x8d), region = 52 }
  0x2c   : > { %vm422_vm0 = vcmask 7168   ;;  %v5921_v0 = vmov -inf   ;;  %v5922_v1 = vmov 0.0  }
  0x2d   : > { %423 = vst.msk [vmem:[#allocation2] sm:$0xff] %vm422_vm0, %v5921_v0 }
  0x2e   : > { %424 = vst.msk [vmem:[#allocation2 + $0x8] sm:$0xff] %vm422_vm0, %v5921_v0 }
  0x2f   : > { %425 = vst.msk [vmem:[#allocation2 + $0x10] sm:$0xff] %vm422_vm0, %v5921_v0 }
  0x30   : > { %426 = vst.msk [vmem:[#allocation2 + $0x18] sm:$0xff] %vm422_vm0, %v5921_v0 }
  0x31   : > { %427 = vst.msk [vmem:[#allocation2 + $0x20] sm:$0xff] %vm422_vm0, %v5921_v0 }
  0x32   : > { %428 = vst.msk [vmem:[#allocation2 + $0x28] sm:$0xff] %vm422_vm0, %v5921_v0 }
  0x33   : > { %429 = vst.msk [vmem:[#allocation2 + $0x30] sm:$0xff] %vm422_vm0, %v5921_v0 }
  0x34   : > { %430 = vst.msk [vmem:[#allocation2 + $0x38] sm:$0xff] %vm422_vm0, %v5921_v0 }
  0x35   : > { %431 = vst.msk [vmem:[#allocation2 + $0x40] sm:$0xff] %vm422_vm0, %v5921_v0 }
  0x36   : > { %432 = vst.msk [vmem:[#allocation2 + $0x48] sm:$0xff] %vm422_vm0, %v5921_v0 }
  0x37   : > { %433 = vst.msk [vmem:[#allocation2 + $0x50] sm:$0xff] %vm422_vm0, %v5921_v0 }
  0x38   : > { %434 = vst.msk [vmem:[#allocation2 + $0x58] sm:$0xff] %vm422_vm0, %v5921_v0 }
  0x39   : > { %435 = vst.msk [vmem:[#allocation2 + $0x60] sm:$0xff] %vm422_vm0, %v5921_v0 }
  0x3a   : > { %436 = vst.msk [vmem:[#allocation2 + $0x68] sm:$0xff] %vm422_vm0, %v5921_v0 }
  0x3b   : > { %437 = vst.msk [vmem:[#allocation2 + $0x70] sm:$0xff] %vm422_vm0, %v5921_v0 }
  0x3c   : > { %438 = vst.msk [vmem:[#allocation2 + $0x78] sm:$0xff] %vm422_vm0, %v5921_v0 }
  0x3d   : > { %439 = vst.msk [vmem:[#allocation2 + $0x80] sm:$0xff] %vm422_vm0, %v5921_v0 }
  0x3e   : > { %440 = vst.msk [vmem:[#allocation2 + $0x88] sm:$0xff] %vm422_vm0, %v5921_v0 }
  0x3f   : > { %441 = vst.msk [vmem:[#allocation2 + $0x90] sm:$0xff] %vm422_vm0, %v5921_v0 }
  0x40   : > { %442 = vst.msk [vmem:[#allocation2 + $0x98] sm:$0xff] %vm422_vm0, %v5921_v0 }
  0x41   : > { %443 = vst.msk [vmem:[#allocation2 + $0xa0] sm:$0xff] %vm422_vm0, %v5921_v0 }
  0x42   : > { %444 = vst.msk [vmem:[#allocation2 + $0xa8] sm:$0xff] %vm422_vm0, %v5921_v0 }
  0x43   : > { %445 = vst.msk [vmem:[#allocation2 + $0xb0] sm:$0xff] %vm422_vm0, %v5921_v0 }
  0x44   : > { %446 = vst.msk [vmem:[#allocation2 + $0xb8] sm:$0xff] %vm422_vm0, %v5921_v0 }
  0x45   : > { %447 = vst.msk [vmem:[#allocation2 + $0xc0] sm:$0xff] %vm422_vm0, %v5921_v0 }
  0x46   : > { %448 = vst.msk [vmem:[#allocation2 + $0xc8] sm:$0xff] %vm422_vm0, %v5921_v0 }
  0x47   : > { %449 = vst.msk [vmem:[#allocation2 + $0xd0] sm:$0xff] %vm422_vm0, %v5921_v0 }
  0x48   : > { %450 = vst.msk [vmem:[#allocation2 + $0xd8] sm:$0xff] %vm422_vm0, %v5921_v0 }
  0x49   : > { %451 = vst.msk [vmem:[#allocation2 + $0xe0] sm:$0xff] %vm422_vm0, %v5921_v0 }
  0x4a   : > { %452 = vst.msk [vmem:[#allocation2 + $0xe8] sm:$0xff] %vm422_vm0, %v5921_v0 }
  0x4b   : > { %453 = vst.msk [vmem:[#allocation2 + $0xf0] sm:$0xff] %vm422_vm0, %v5921_v0 }
  0x4c   : > { %454 = vst.msk [vmem:[#allocation2 + $0xf8] sm:$0xff] %vm422_vm0, %v5921_v0 }
  0x4d   : > { %455 = vst.msk [vmem:[#allocation3] sm:$0xff] %vm422_vm0, %v5922_v1 }
  0x4e   : > { %456 = vst.msk [vmem:[#allocation3 + $0x8] sm:$0xff] %vm422_vm0, %v5922_v1 }
  0x4f   : > { %457 = vst.msk [vmem:[#allocation3 + $0x10] sm:$0xff] %vm422_vm0, %v5922_v1 }
  0x50   : > { %458 = vst.msk [vmem:[#allocation3 + $0x18] sm:$0xff] %vm422_vm0, %v5922_v1 }
  0x51   : > { %459 = vst.msk [vmem:[#allocation3 + $0x20] sm:$0xff] %vm422_vm0, %v5922_v1 }
  0x52   : > { %460 = vst.msk [vmem:[#allocation3 + $0x28] sm:$0xff] %vm422_vm0, %v5922_v1 }
  0x53   : > { %461 = vst.msk [vmem:[#allocation3 + $0x30] sm:$0xff] %vm422_vm0, %v5922_v1 }
  0x54   : > { %462 = vst.msk [vmem:[#allocation3 + $0x38] sm:$0xff] %vm422_vm0, %v5922_v1 }
  0x55   : > { %463 = vst.msk [vmem:[#allocation3 + $0x40] sm:$0xff] %vm422_vm0, %v5922_v1 }
  0x56   : > { %464 = vst.msk [vmem:[#allocation3 + $0x48] sm:$0xff] %vm422_vm0, %v5922_v1 }
  0x57   : > { %465 = vst.msk [vmem:[#allocation3 + $0x50] sm:$0xff] %vm422_vm0, %v5922_v1 }
  0x58   : > { %466 = vst.msk [vmem:[#allocation3 + $0x58] sm:$0xff] %vm422_vm0, %v5922_v1 }
  0x59   : > { %467 = vst.msk [vmem:[#allocation3 + $0x60] sm:$0xff] %vm422_vm0, %v5922_v1 }
  0x5a   : > { %468 = vst.msk [vmem:[#allocation3 + $0x68] sm:$0xff] %vm422_vm0, %v5922_v1 }
  0x5b   : > { %469 = vst.msk [vmem:[#allocation3 + $0x70] sm:$0xff] %vm422_vm0, %v5922_v1 }
  0x5c   : > { %470 = vst.msk [vmem:[#allocation3 + $0x78] sm:$0xff] %vm422_vm0, %v5922_v1 }
  0x5d   : > { %471 = vst.msk [vmem:[#allocation3 + $0x80] sm:$0xff] %vm422_vm0, %v5922_v1 }
  0x5e   : > { %472 = vst.msk [vmem:[#allocation3 + $0x88] sm:$0xff] %vm422_vm0, %v5922_v1 }
  0x5f   : > { %473 = vst.msk [vmem:[#allocation3 + $0x90] sm:$0xff] %vm422_vm0, %v5922_v1 }
  0x60   : > { %474 = vst.msk [vmem:[#allocation3 + $0x98] sm:$0xff] %vm422_vm0, %v5922_v1 }
  0x61   : > { %475 = vst.msk [vmem:[#allocation3 + $0xa0] sm:$0xff] %vm422_vm0, %v5922_v1 }
  0x62   : > { %476 = vst.msk [vmem:[#allocation3 + $0xa8] sm:$0xff] %vm422_vm0, %v5922_v1 }
  0x63   : > { %477 = vst.msk [vmem:[#allocation3 + $0xb0] sm:$0xff] %vm422_vm0, %v5922_v1 }
  0x64   : > { %478 = vst.msk [vmem:[#allocation3 + $0xb8] sm:$0xff] %vm422_vm0, %v5922_v1 }
  0x65   : > { %479 = vst.msk [vmem:[#allocation3 + $0xc0] sm:$0xff] %vm422_vm0, %v5922_v1 }
  0x66   : > { %480 = vst.msk [vmem:[#allocation3 + $0xc8] sm:$0xff] %vm422_vm0, %v5922_v1 }
  0x67   : > { %481 = vst.msk [vmem:[#allocation3 + $0xd0] sm:$0xff] %vm422_vm0, %v5922_v1 }
  0x68   : > { %482 = vst.msk [vmem:[#allocation3 + $0xd8] sm:$0xff] %vm422_vm0, %v5922_v1 }
  0x69   : > { %483 = vst.msk [vmem:[#allocation3 + $0xe0] sm:$0xff] %vm422_vm0, %v5922_v1 }
  0x6a   : > { %484 = vst.msk [vmem:[#allocation3 + $0xe8] sm:$0xff] %vm422_vm0, %v5922_v1 }
  0x6b   : > { %485 = vst.msk [vmem:[#allocation3 + $0xf0] sm:$0xff] %vm422_vm0, %v5922_v1 }
  0x6c   : > { %486 = vst.msk [vmem:[#allocation3 + $0xf8] sm:$0xff] %vm422_vm0, %v5922_v1 }
  0x6d   : > { %487 = vst.msk [vmem:[#allocation4] sm:$0xff] %vm422_vm0, %v5922_v1 }
  0x6e   : > { %488 = vst.msk [vmem:[#allocation4 + $0x8] sm:$0xff] %vm422_vm0, %v5922_v1 }
  0x6f   : > { %489 = vst.msk [vmem:[#allocation4 + $0x10] sm:$0xff] %vm422_vm0, %v5922_v1 }
  0x70   : > { %490 = vst.msk [vmem:[#allocation4 + $0x18] sm:$0xff] %vm422_vm0, %v5922_v1 }
  0x71   : > { %491 = vst.msk [vmem:[#allocation4 + $0x20] sm:$0xff] %vm422_vm0, %v5922_v1 }
  0x72   : > { %492 = vst.msk [vmem:[#allocation4 + $0x28] sm:$0xff] %vm422_vm0, %v5922_v1 }
  0x73   : > { %493 = vst.msk [vmem:[#allocation4 + $0x30] sm:$0xff] %vm422_vm0, %v5922_v1 }
  0x74   : > { %494 = vst.msk [vmem:[#allocation4 + $0x38] sm:$0xff] %vm422_vm0, %v5922_v1 }
  0x75   : > { %495 = vst.msk [vmem:[#allocation4 + $0x40] sm:$0xff] %vm422_vm0, %v5922_v1 }
  0x76   : > { %496 = vst.msk [vmem:[#allocation4 + $0x48] sm:$0xff] %vm422_vm0, %v5922_v1 }
  0x77   : > { %497 = vst.msk [vmem:[#allocation4 + $0x50] sm:$0xff] %vm422_vm0, %v5922_v1 }
  0x78   : > { %498 = vst.msk [vmem:[#allocation4 + $0x58] sm:$0xff] %vm422_vm0, %v5922_v1 }
  0x79   : > { %499 = vst.msk [vmem:[#allocation4 + $0x60] sm:$0xff] %vm422_vm0, %v5922_v1 }
  0x7a   : > { %500 = vst.msk [vmem:[#allocation4 + $0x68] sm:$0xff] %vm422_vm0, %v5922_v1 }
  0x7b   : > { %501 = vst.msk [vmem:[#allocation4 + $0x70] sm:$0xff] %vm422_vm0, %v5922_v1 }
  0x7c   : > { %502 = vst.msk [vmem:[#allocation4 + $0x78] sm:$0xff] %vm422_vm0, %v5922_v1 }
  0x7d   : > { %503 = vst.msk [vmem:[#allocation4 + $0x80] sm:$0xff] %vm422_vm0, %v5922_v1 }
  0x7e   : > { %504 = vst.msk [vmem:[#allocation4 + $0x88] sm:$0xff] %vm422_vm0, %v5922_v1 }
  0x7f   : > { %505 = vst.msk [vmem:[#allocation4 + $0x90] sm:$0xff] %vm422_vm0, %v5922_v1 }
  0x80   : > { %506 = vst.msk [vmem:[#allocation4 + $0x98] sm:$0xff] %vm422_vm0, %v5922_v1 }
  0x81   : > { %507 = vst.msk [vmem:[#allocation4 + $0xa0] sm:$0xff] %vm422_vm0, %v5922_v1 }
  0x82   : > { %508 = vst.msk [vmem:[#allocation4 + $0xa8] sm:$0xff] %vm422_vm0, %v5922_v1 }
  0x83   : > { %509 = vst.msk [vmem:[#allocation4 + $0xb0] sm:$0xff] %vm422_vm0, %v5922_v1 }
  0x84   : > { %510 = vst.msk [vmem:[#allocation4 + $0xb8] sm:$0xff] %vm422_vm0, %v5922_v1 }
  0x85   : > { %511 = vst.msk [vmem:[#allocation4 + $0xc0] sm:$0xff] %vm422_vm0, %v5922_v1 }
  0x86   : > { %512 = vst.msk [vmem:[#allocation4 + $0xc8] sm:$0xff] %vm422_vm0, %v5922_v1 }
  0x87   : > { %513 = vst.msk [vmem:[#allocation4 + $0xd0] sm:$0xff] %vm422_vm0, %v5922_v1 }
  0x88   : > { %514 = vst.msk [vmem:[#allocation4 + $0xd8] sm:$0xff] %vm422_vm0, %v5922_v1 }
  0x89   : > { %515 = vst.msk [vmem:[#allocation4 + $0xe0] sm:$0xff] %vm422_vm0, %v5922_v1 }
  0x8a   : > { %516 = vst.msk [vmem:[#allocation4 + $0xe8] sm:$0xff] %vm422_vm0, %v5922_v1 }
  0x8b   : > { %517 = vst.msk [vmem:[#allocation4 + $0xf0] sm:$0xff] %vm422_vm0, %v5922_v1 }
  0x8c   : > { %518 = vst.msk [vmem:[#allocation4 + $0xf8] sm:$0xff] %vm422_vm0, %v5922_v1 }
  0x8d PF: > { %v957_v2 = vld [vmem:[%s6057_s17 + $0x20] sm:$0xff]  ;;  %v955_v3 = vld [vmem:[%s6057_s17 + $0x10] sm:$0xff]  ;;  %v5923_v5 = vmov 0   ;;  %v5260_v6 = vld [vmem:[%s6067_s15 + $0x38] sm:$0xff]  ;;  %vm10721_vm6 = vcmask 7168   ;;  %p1827_p2 = scmp.eq.s32.totalorder %s5907_s28, %s5903_s27  ;;  %p1828_p4 = scmp.eq.s32.totalorder %s5903_s27, 1 }
  0x8e   : > { %v953_v4 = vld [vmem:[%s6057_s17] sm:$0xff]  ;;  %5367 = vset.pattern.permute.xlu2 %v5923_v5  ;;  %5366 = vset.pattern.permute.xlu1 %v5923_v5  ;;  %v5268_v7 = vld [vmem:[%s6067_s15 + $0x78] sm:$0xff]  ;;  %v958_v8 = vld [vmem:[%s6057_s17 + $0x28] sm:$0xff] }
  0x8f   : > { %5365 = vset.pattern.permute.xlu0 %v5923_v5  ;;  %1008 = vperm.xlu2 %5367, %v957_v2   ;;  %v956_v9 = vld [vmem:[%s6057_s17 + $0x18] sm:$0xff]  ;;  %v954_v10 = vld [vmem:[%s6057_s17 + $0x8] sm:$0xff]  ;;  %v5259_v11 = vld [vmem:[%s6067_s15 + $0x30] sm:$0xff]  ;;  %p7062_p5 = por %p1828_p4, %p1827_p2 }
  0x90   : > { %998 = vperm.xlu1 %5366, %v955_v3   ;;  %988 = vperm.xlu0 %5365, %v953_v4   ;;  %v5267_v12 = vld [vmem:[%s6067_s15 + $0x70] sm:$0xff]  ;;  %v961_v13 = vld [vmem:[%s6057_s17 + $0x40] sm:$0xff]  ;;  %v960_v14 = vld [vmem:[%s6057_s17 + $0x38] sm:$0xff] }
  0x91   : > { %775 = vmatpush.bf16.xpose.msra.mxu0 %v5260_v6  ;;  %5270 = vmatpush.bf16.xpose.msra.mxu2 %v5260_v6  ;;  %v959_v15 = vld [vmem:[%s6057_s17 + $0x30] sm:$0xff]  ;;  %v5258_v16 = vld [vmem:[%s6067_s15 + $0x28] sm:$0xff]  ;;  %v964_v18 = vld [vmem:[%s6057_s17 + $0x58] sm:$0xff] }
  0x92   : > { %864 = vmatpush.bf16.xpose.msra.mxu1 %v5268_v7  ;;  %5278 = vmatpush.bf16.xpose.msra.mxu3 %v5268_v7  ;;  %v5266_v17 = vld [vmem:[%s6067_s15 + $0x68] sm:$0xff]  ;;  %v963_v19 = vld [vmem:[%s6057_s17 + $0x50] sm:$0xff]  ;;  %v5257_v21 = vld [vmem:[%s6067_s15 + $0x20] sm:$0xff] }
  0x93   : > { %v962_v20 = vld [vmem:[%s6057_s17 + $0x48] sm:$0xff]  ;;  %v5265_v22 = vld [vmem:[%s6067_s15 + $0x60] sm:$0xff]  ;;  %v967_v23 = vld [vmem:[%s6057_s17 + $0x70] sm:$0xff] }
  0x94   : > { %v966_v24 = vld [vmem:[%s6057_s17 + $0x68] sm:$0xff]  ;;  %v965_v25 = vld [vmem:[%s6057_s17 + $0x60] sm:$0xff]  ;;  %v5256_v26 = vld [vmem:[%s6067_s15 + $0x18] sm:$0xff] }
  0x95   : > { %v5264_v27 = vld [vmem:[%s6067_s15 + $0x58] sm:$0xff]  ;;  %v970_v28 = vld [vmem:[%s6057_s17 + $0x88] sm:$0xff]  ;;  %v969_v29 = vld [vmem:[%s6057_s17 + $0x80] sm:$0xff] }
  0x96   : > { %v968_v30 = vld [vmem:[%s6057_s17 + $0x78] sm:$0xff]  ;;  %v5255_v31 = vld [vmem:[%s6067_s15 + $0x10] sm:$0xff]  ;;  %v973_v33 = vld [vmem:[%s6057_s17 + $0xa0] sm:$0xff] }
  0x97   : > { %1013 = vperm.xlu2 %5367, %v958_v8   ;;  %v5263_v32 = vld [vmem:[%s6067_s15 + $0x50] sm:$0xff]  ;;  %v972_v34 = vld [vmem:[%s6057_s17 + $0x98] sm:$0xff]  ;;  %v5254_v36 = vld [vmem:[%s6067_s15 + $0x8] sm:$0xff] }
  0x98   : > { %1003 = vperm.xlu1 %5366, %v956_v9   ;;  %993 = vperm.xlu0 %5365, %v954_v10   ;;  %v971_v35 = vld [vmem:[%s6057_s17 + $0x90] sm:$0xff]  ;;  %v5262_v37 = vld [vmem:[%s6067_s15 + $0x48] sm:$0xff]  ;;  %v976_v38 = vld [vmem:[%s6057_s17 + $0xb8] sm:$0xff] }
  0x99   : > { %776 = vmatpush.bf16.xpose.msra.mxu0 %v5259_v11  ;;  %5271 = vmatpush.bf16.xpose.msra.mxu2 %v5259_v11  ;;  %v975_v39 = vld [vmem:[%s6057_s17 + $0xb0] sm:$0xff]  ;;  %v974_v40 = vld [vmem:[%s6057_s17 + $0xa8] sm:$0xff]  ;;  %v5253_v41 = vld [vmem:[%s6067_s15] sm:$0xff] }
  0x9a   : > { %865 = vmatpush.bf16.xpose.msra.mxu1 %v5267_v12  ;;  %5279 = vmatpush.bf16.xpose.msra.mxu3 %v5267_v12  ;;  %v5261_v42 = vld [vmem:[%s6067_s15 + $0x40] sm:$0xff]  ;;  %v979_v43 = vld [vmem:[%s6057_s17 + $0xd0] sm:$0xff]  ;;  %v978_v44 = vld [vmem:[%s6057_s17 + $0xc8] sm:$0xff] }
  0x9b   : > { %v977_v45 = vld [vmem:[%s6057_s17 + $0xc0] sm:$0xff]  ;;  %v982_v48 = vld [vmem:[%s6057_s17 + $0xe8] sm:$0xff]  ;;  %v980_v50 = vld [vmem:[%s6057_s17 + $0xd8] sm:$0xff] }
  0x9c   : > { %v5237_v46 = vld [vmem:[%s6047_s16] sm:$0xff]  ;;  %v1634_v51 = vld [vmem:[%s6052_s30 + $0x10] sm:$0xff]  ;;  %v984_v52 = vld [vmem:[%s6057_s17 + $0xf8] sm:$0xff] }
  0x9d   : > { %v5245_v47 = vld [vmem:[%s6047_s16 + $0x40] sm:$0xff]  ;;  %v983_v53 = vld [vmem:[%s6057_s17 + $0xf0] sm:$0xff]  ;;  %v5238_v54 = vld [vmem:[%s6047_s16 + $0x8] sm:$0xff] }
  0x9e   : > { %v981_v49 = vld [vmem:[%s6057_s17 + $0xe0] sm:$0xff]  ;;  %v5246_v55 = vld [vmem:[%s6047_s16 + $0x48] sm:$0xff]  ;;  %v1638_v56 = vld [vmem:[%s6052_s30 + $0x30] sm:$0xff] }
  0x9f   : > { %1028 = vperm.xlu2 %5367, %v961_v13   ;;  %v1633_v57 = vld [vmem:[%s6052_s30 + $0x8] sm:$0xff]  ;;  %v1632_v58 = vld [vmem:[%s6052_s30] sm:$0xff]  ;;  %v1635_v62 = vld [vmem:[%s6052_s30 + $0x18] sm:$0xff] }
  0xa0   : > { %1023 = vperm.xlu1 %5366, %v960_v14   ;;  %1018 = vperm.xlu0 %5365, %v959_v15   ;;  %v1641_v60 = vld [vmem:[%s6052_s30 + $0x48] sm:$0xff]  ;;  %v1636_v61 = vld [vmem:[%s6052_s30 + $0x20] sm:$0xff]  ;;  %v5239_v63 = vld [vmem:[%s6047_s16 + $0x10] sm:$0xff] }
  0xa1   : > { %777 = vmatpush.bf16.xpose.msra.mxu0 %v5258_v16  ;;  %5272 = vmatpush.bf16.xpose.msra.mxu2 %v5258_v16  ;;  %v5247_v0 = vld [vmem:[%s6047_s16 + $0x50] sm:$0xff]  ;;  %v1644_v2 = vld [vmem:[%s6052_s30 + $0x60] sm:$0xff]  ;;  %v1639_v3 = vld [vmem:[%s6052_s30 + $0x38] sm:$0xff] }
  0xa2   : > { %866 = vmatpush.bf16.xpose.msra.mxu1 %v5266_v17  ;;  %5280 = vmatpush.bf16.xpose.msra.mxu3 %v5266_v17  ;;  %v1637_v4 = vld [vmem:[%s6052_s30 + $0x28] sm:$0xff]  ;;  %v1647_v6 = vld [vmem:[%s6052_s30 + $0x78] sm:$0xff]  ;;  %v1642_v7 = vld [vmem:[%s6052_s30 + $0x50] sm:$0xff] }
  0xa3   : > { %v1640_v8 = vld [vmem:[%s6052_s30 + $0x40] sm:$0xff]  ;;  %v5240_v9 = vld [vmem:[%s6047_s16 + $0x18] sm:$0xff]  ;;  %v1650_v14 = vld [vmem:[%s6052_s30 + $0x90] sm:$0xff] }
  0xa4   : > { %v5248_v10 = vld [vmem:[%s6047_s16 + $0x58] sm:$0xff]  ;;  %v1645_v15 = vld [vmem:[%s6052_s30 + $0x68] sm:$0xff] }
  0xa5   : > { %v1643_v16 = vld [vmem:[%s6052_s30 + $0x58] sm:$0xff] }
  0xa7   : > { %1043 = vperm.xlu2 %5367, %v964_v18  }
  0xa8   : > { %1038 = vperm.xlu1 %5366, %v963_v19   ;;  %1033 = vperm.xlu0 %5365, %v962_v20   ;;  %v1653_v20 = vld [vmem:[%s6052_s30 + $0xa8] sm:$0xff] }
  0xa9   : > { %778 = vmatpush.bf16.xpose.msra.mxu0 %v5257_v21  ;;  %5273 = vmatpush.bf16.xpose.msra.mxu2 %v5257_v21  ;;  %v1648_v21 = vld [vmem:[%s6052_s30 + $0x80] sm:$0xff] }
  0xaa   : > { %867 = vmatpush.bf16.xpose.msra.mxu1 %v5265_v22  ;;  %5281 = vmatpush.bf16.xpose.msra.mxu3 %v5265_v22  ;;  %v1646_v22 = vld [vmem:[%s6052_s30 + $0x70] sm:$0xff] }
  0xaf   : > { %1058 = vperm.xlu2 %5367, %v967_v23   ;;  %v5241_v23 = vld [vmem:[%s6047_s16 + $0x20] sm:$0xff] }
  0xb0   : > { %1053 = vperm.xlu1 %5366, %v966_v24   ;;  %1048 = vperm.xlu0 %5365, %v965_v25   ;;  %v5249_v24 = vld [vmem:[%s6047_s16 + $0x60] sm:$0xff] }
  0xb1   : > { %779 = vmatpush.bf16.xpose.msra.mxu0 %v5256_v26  ;;  %5274 = vmatpush.bf16.xpose.msra.mxu2 %v5256_v26 }
  0xb2   : > { %868 = vmatpush.bf16.xpose.msra.mxu1 %v5264_v27  ;;  %5282 = vmatpush.bf16.xpose.msra.mxu3 %v5264_v27 }
  0xb7   : > { %1073 = vperm.xlu2 %5367, %v970_v28   ;;  %v1651_v28 = vld [vmem:[%s6052_s30 + $0x98] sm:$0xff] }
  0xb8   : > { %1068 = vperm.xlu1 %5366, %v969_v29   ;;  %1063 = vperm.xlu0 %5365, %v968_v30   ;;  %v1649_v29 = vld [vmem:[%s6052_s30 + $0x88] sm:$0xff] }
  0xb9   : > { %780 = vmatpush.bf16.xpose.msra.mxu0 %v5255_v31  ;;  %5275 = vmatpush.bf16.xpose.msra.mxu2 %v5255_v31 }
  0xba   : > { %869 = vmatpush.bf16.xpose.msra.mxu1 %v5263_v32  ;;  %5283 = vmatpush.bf16.xpose.msra.mxu3 %v5263_v32 }
  0xbf   : > { %1088 = vperm.xlu2 %5367, %v973_v33   ;;  %v1654_v33 = vld [vmem:[%s6052_s30 + $0xb0] sm:$0xff] }
  0xc0   : > { %1083 = vperm.xlu1 %5366, %v972_v34   ;;  %1078 = vperm.xlu0 %5365, %v971_v35   ;;  %v1652_v34 = vld [vmem:[%s6052_s30 + $0xa0] sm:$0xff]  ;;  %v5242_v35 = vld [vmem:[%s6047_s16 + $0x28] sm:$0xff] }
  0xc1   : > { %781 = vmatpush.bf16.xpose.msra.mxu0 %v5254_v36  ;;  %5276 = vmatpush.bf16.xpose.msra.mxu2 %v5254_v36  ;;  %v5250_v36 = vld [vmem:[%s6047_s16 + $0x68] sm:$0xff] }
  0xc2   : > { %870 = vmatpush.bf16.xpose.msra.mxu1 %v5262_v37  ;;  %5284 = vmatpush.bf16.xpose.msra.mxu3 %v5262_v37 }
  0xc7   : > { %1103 = vperm.xlu2 %5367, %v976_v38  }
  0xc8   : > { %1098 = vperm.xlu1 %5366, %v975_v39   ;;  %1093 = vperm.xlu0 %5365, %v974_v40  }
  0xc9   : > { %782 = vmatpush.bf16.xpose.msra.mxu0 %v5253_v41  ;;  %5277 = vmatpush.bf16.xpose.msra.mxu2 %v5253_v41 }
  0xca   : > { %871 = vmatpush.bf16.xpose.msra.mxu1 %v5261_v42  ;;  %5285 = vmatpush.bf16.xpose.msra.mxu3 %v5261_v42 }
  0xcf   : > { %1118 = vperm.xlu2 %5367, %v979_v43   ;;  %v5243_v43 = vld [vmem:[%s6047_s16 + $0x30] sm:$0xff] }
  0xd0   : > { %1113 = vperm.xlu1 %5366, %v978_v44   ;;  %1108 = vperm.xlu0 %5365, %v977_v45   ;;  %v5251_v44 = vld [vmem:[%s6047_s16 + $0x70] sm:$0xff] }
  0xd1   : > { %783 = vmatmul.bf16.vlgmr.msra.gmra.mxu0 %v5237_v46  ;;  %823 = vmatmul.bf16.vlgmr.msra.gmra.mxu2 %v5245_v47 }
  0xd2   : > { %872 = vmatmul.bf16.vlgmr.msra.gmra.mxu1 %v5237_v46  ;;  %912 = vmatmul.bf16.vlgmr.msra.gmra.mxu3 %v5245_v47 }
  0xd7   : > { %1133 = vperm.xlu2 %5367, %v982_v48   ;;  %v1664_v48 = vld [vmem:[%s398_s29] sm:$0x3] }
  0xd8   : > { %1128 = vperm.xlu1 %5366, %v981_v49   ;;  %1123 = vperm.xlu0 %5365, %v980_v50   ;;  %v6378_v49 = vperm.slane %v1664_v48, 0  ;;  %v6380_v50 = vperm.slane %v1664_v48, 1 }
  0xdf   : > { %1672 = vperm.xlu2 %5367, %v1634_v51  }
  0xe0   : > { %1143 = vperm.xlu1 %5366, %v984_v52   ;;  %1138 = vperm.xlu0 %5365, %v983_v53  }
  0xe1   : > { %788 = vmatmul.bf16.gmra.mxu0 %v5238_v54  ;;  %828 = vmatmul.bf16.gmra.mxu2 %v5246_v55 }
  0xe2   : > { %877 = vmatmul.bf16.gmra.mxu1 %v5238_v54  ;;  %917 = vmatmul.bf16.gmra.mxu3 %v5246_v55  ;;  %v5244_v54 = vld [vmem:[%s6047_s16 + $0x38] sm:$0xff] }
  0xe3   : > { %v5252_v55 = vld [vmem:[%s6047_s16 + $0x78] sm:$0xff] }
  0xe7   : > { %1684 = vperm.xlu2 %5367, %v1638_v56  }
  0xe8   : > { %1669 = vperm.xlu1 %5366, %v1633_v57   ;;  %1666 = vperm.xlu0 %5365, %v1632_v58  }
  0xe9   : > { %v6298_v59 = vpop.permute.xlu2 %1008 }
  0xef   : > { %1693 = vperm.xlu2 %5367, %v1641_v60   ;;  %v985_v60 = vld [vmem:[%s409_s0] sm:$0x3] }
  0xf0   : > { %1678 = vperm.xlu1 %5366, %v1636_v61   ;;  %1675 = vperm.xlu0 %5365, %v1635_v62   ;;  %v6409_v61 = vperm.slane %v985_v60, 0  ;;  %v6411_v62 = vperm.slane %v985_v60, 1 }
  0xf1   : > { %793 = vmatmul.bf16.gmra.mxu0 %v5239_v63  ;;  %833 = vmatmul.bf16.gmra.mxu2 %v5247_v0  ;;  %v6305_v1 = vpop.permute.xlu2 %1013 }
  0xf2   : > { %882 = vmatmul.bf16.gmra.mxu1 %v5239_v63  ;;  %922 = vmatmul.bf16.gmra.mxu3 %v5247_v0 }
  0xf7   : > { %1702 = vperm.xlu2 %5367, %v1644_v2  }
  0xf8   : > { %1687 = vperm.xlu1 %5366, %v1639_v3   ;;  %1681 = vperm.xlu0 %5365, %v1637_v4  }
  0xf9   : > { %v6310_v5 = vpop.permute.xlu2 %1028 }
  0xff   : > { %1711 = vperm.xlu2 %5367, %v1647_v6  }
 0x100   : > { %1696 = vperm.xlu1 %5366, %v1642_v7   ;;  %1690 = vperm.xlu0 %5365, %v1640_v8  }
 0x101   : > { %798 = vmatmul.bf16.gmra.mxu0 %v5240_v9  ;;  %838 = vmatmul.bf16.gmra.mxu2 %v5248_v10  ;;  %v6317_v11 = vpop.permute.xlu2 %1043 }
 0x102   : > { %887 = vmatmul.bf16.gmra.mxu1 %v5240_v9  ;;  %927 = vmatmul.bf16.gmra.mxu3 %v5248_v10  ;;  %v6319_v12 = vpop.permute.xlu1 %998  ;;  %v6321_v13 = vpop.permute.xlu0 %988 }
 0x103   : > { %v1151_v63 = vmul.f32 %v6409_v61, %v6321_v13  ;;  %v1152_v2 = vmul.f32 %v6411_v62, %v6321_v13 }
 0x105   : > { %v1215_v6 = vmin.f32 %v1151_v63, 14.285714  ;;  %v1216_v7 = vmin.f32 %v1152_v2, 14.285714  ;;  %v1155_v63 = vmul.f32 %v6409_v61, %v6319_v12  ;;  %v1156_v2 = vmul.f32 %v6411_v62, %v6319_v12 }
 0x107   : > { %1720 = vperm.xlu2 %5367, %v1650_v14  }
 0x108   : > { %1705 = vperm.xlu1 %5366, %v1645_v15   ;;  %1699 = vperm.xlu0 %5365, %v1643_v16  }
 0x109   : > { %v6326_v17 = vpop.permute.xlu2 %1058 }
 0x10a   : > { %v6328_v18 = vpop.permute.xlu1 %1003  ;;  %v6330_v19 = vpop.permute.xlu0 %993 }
 0x10b   : > { %v1153_v16 = vmul.f32 %v6409_v61, %v6330_v19 }
 0x10f   : > { %1729 = vperm.xlu2 %5367, %v1653_v20  }
 0x110   : > { %1714 = vperm.xlu1 %5366, %v1648_v21   ;;  %1708 = vperm.xlu0 %5365, %v1646_v22   ;;  %v1154_v21 = vmul.f32 %v6411_v62, %v6330_v19 }
 0x111   : > { %803 = vmatmul.bf16.gmra.mxu0 %v5241_v23  ;;  %843 = vmatmul.bf16.gmra.mxu2 %v5249_v24  ;;  %v6337_v25 = vpop.permute.xlu2 %1073 }
 0x112   : > { %892 = vmatmul.bf16.gmra.mxu1 %v5241_v23  ;;  %932 = vmatmul.bf16.gmra.mxu3 %v5249_v24  ;;  %v6339_v26 = vpop.permute.xlu1 %1023  ;;  %v6341_v27 = vpop.permute.xlu0 %1018  ;;  %v1218_v19 = vmin.f32 %v1154_v21, 14.285714 }
 0x118   : > { %1723 = vperm.xlu1 %5366, %v1651_v28   ;;  %1717 = vperm.xlu0 %5365, %v1649_v29  }
 0x119   : > { %v6345_v30 = vpop.permute.xlu2 %1088 }
 0x11a   : > { %v6347_v31 = vpop.permute.xlu1 %1038  ;;  %v6349_v32 = vpop.permute.xlu0 %1033 }
 0x120   : > { %1732 = vperm.xlu1 %5366, %v1654_v33   ;;  %1726 = vperm.xlu0 %5365, %v1652_v34   ;;  %v1217_v34 = vmin.f32 %v1153_v16, 14.285714  ;;  %v1219_v16 = vmin.f32 %v1155_v63, 14.285714 }
 0x121   : > { %808 = vmatmul.bf16.gmra.mxu0 %v5242_v35  ;;  %848 = vmatmul.bf16.gmra.mxu2 %v5250_v36  ;;  %v6355_v37 = vpop.permute.xlu2 %1103 }
 0x122   : > { %897 = vmatmul.bf16.gmra.mxu1 %v5242_v35  ;;  %937 = vmatmul.bf16.gmra.mxu3 %v5250_v36  ;;  %v6357_v38 = vpop.permute.xlu1 %1053  ;;  %v6359_v39 = vpop.permute.xlu0 %1048 }
 0x129   : > { %v6361_v40 = vpop.permute.xlu2 %1118 }
 0x12a   : > { %v1069_v41 = vpop.permute.xlu1 %1068  ;;  %v6363_v42 = vpop.permute.xlu0 %1063 }
 0x12b   : > { %v1183_v14 = vmul.f32 %v6409_v61, %v1069_v41  ;;  %v1184_v13 = vmul.f32 %v6411_v62, %v1069_v41 }
 0x12d   : > { %v1247_v28 = vmin.f32 %v1183_v14, 14.285714  ;;  %v1248_v29 = vmin.f32 %v1184_v13, 14.285714 }
 0x131   : > { %813 = vmatmul.bf16.gmra.mxu0 %v5243_v43  ;;  %853 = vmatmul.bf16.gmra.mxu2 %v5251_v44  ;;  %v6367_v45 = vpop.permute.xlu2 %1133 }
 0x132   : > { %902 = vmatmul.bf16.gmra.mxu1 %v5243_v43  ;;  %942 = vmatmul.bf16.gmra.mxu3 %v5251_v44  ;;  %v6369_v46 = vpop.permute.xlu1 %1083  ;;  %v6371_v47 = vpop.permute.xlu0 %1078 }
 0x139   : > { %v6382_v51 = vpop.permute.xlu2 %1672 }
 0x13a   : > { %10889 = vst [vmem:[#allocation16_spill] sm:$0xff] %v6382_v51  ;;  %v6388_v52 = vpop.permute.xlu1 %1098  ;;  %v6390_v53 = vpop.permute.xlu0 %1093 }
 0x141   : > { %818 = vmatmul.bf16.gmra.mxu0 %v5244_v54  ;;  %858 = vmatmul.bf16.gmra.mxu2 %v5252_v55  ;;  %v6394_v56 = vpop.permute.xlu2 %1684 }
 0x142   : > { %10890 = vst [vmem:[#allocation17_spill] sm:$0xff] %v6394_v56  ;;  %907 = vmatmul.bf16.gmra.mxu1 %v5244_v54  ;;  %947 = vmatmul.bf16.gmra.mxu3 %v5252_v55  ;;  %v6400_v57 = vpop.permute.xlu1 %1113  ;;  %v6402_v58 = vpop.permute.xlu0 %1108  ;;  %v1185_v54 = vmul.f32 %v6409_v61, %v6337_v25  ;;  %v1186_v55 = vmul.f32 %v6411_v62, %v6337_v25 }
 0x144   : > { %v1249_v12 = vmin.f32 %v1185_v54, 14.285714  ;;  %v1250_v14 = vmin.f32 %v1186_v55, 14.285714 }
 0x149   : > { %v6415_v0 = vpop.permute.xlu2 %1693 }
 0x14a   : > { %10891 = vst [vmem:[#allocation18_spill] sm:$0xff] %v6415_v0  ;;  %v6423_v3 = vpop.permute.xlu1 %1128  ;;  %v6425_v4 = vpop.permute.xlu0 %1123 }
 0x14e   : > { %v784_v8 = vpop.f32.mrf.mxu0 }
 0x14f   : > { %v6427_v9 = vmul.f32 %v1215_v6, %v784_v8  ;;  %v873_v10 = vpop.f32.mrf.mxu1 }
 0x150   : > { %v6431_v15 = vmul.f32 %v1216_v7, %v873_v10 }
 0x151   : > { %10892 = vst [vmem:[#allocation19_spill] sm:$0xff] %v6427_v9  ;;  %v6435_v20 = vpop.permute.xlu2 %1702 }
 0x152   : > { %10893 = vst [vmem:[#allocation20_spill] sm:$0xff] %v6431_v15  ;;  %v6443_v22 = vpop.permute.xlu1 %1143  ;;  %v6445_v23 = vpop.permute.xlu0 %1138  ;;  %v1375_v24 = vmax.f32 %v6427_v9, %v6431_v15 }
 0x153   : > { %10894 = vst [vmem:[#allocation21_spill] sm:$0xff] %v6435_v20 }
 0x154   : > { %1376 = vmax.xlane.f32.xlu2 %v1375_v24  ;;  %v824_v33 = vpop.f32.mrf.mxu2  ;;  %v1220_v24 = vmin.f32 %v1156_v2, 14.285714 }
 0x155   : > { %v913_v35 = vpop.f32.mrf.mxu3  ;;  %v6449_v36 = vmul.f32 %v1247_v28, %v824_v33 }
 0x156   : > { %v6451_v41 = vmul.f32 %v1248_v29, %v913_v35  ;;  %v786_v43 = vpop.f32.mrf.mxu0 }
 0x157   : > { %10895 = vst [vmem:[#allocation22_spill] sm:$0xff] %v6449_v36  ;;  %v6453_v44 = vmul.f32 %v1217_v34, %v786_v43  ;;  %v875_v48 = vpop.f32.mrf.mxu1  ;;  %v1188_v43 = vmul.f32 %v6411_v62, %v6371_v47 }
 0x158   : > { %10896 = vst [vmem:[#allocation23_spill] sm:$0xff] %v6451_v41  ;;  %v6459_v60 = vmul.f32 %v1218_v19, %v875_v48  ;;  %v1423_v25 = vmax.f32 %v6449_v36, %v6451_v41  ;;  %v1187_v19 = vmul.f32 %v6409_v61, %v6371_v47 }
 0x159   : > { %10897 = vst [vmem:[#allocation24_spill] sm:$0xff] %v6453_v44  ;;  %v6465_v6 = vpop.permute.xlu2 %1711 }
 0x15a   : > { %10898 = vst [vmem:[#allocation25_spill] sm:$0xff] %v6459_v60  ;;  %v6471_v7 = vpop.permute.xlu1 %1669  ;;  %v6473_v8 = vpop.permute.xlu0 %1666  ;;  %v1378_v10 = vmax.f32 %v6453_v44, %v6459_v60 }
 0x15b   : > { %10899 = vst [vmem:[#allocation26_spill] sm:$0xff] %v6465_v6  ;;  %v1655_v6 = vld [vmem:[%s6052_s30 + $0xb8] sm:$0xff] }
 0x15c   : > { %10900 = vst [vmem:[#allocation27_spill] sm:$0xff] %v6471_v7  ;;  %1424 = vmax.xlane.f32.xlu2 %v1423_v25  ;;  %1379 = vmax.xlane.f32.xlu0 %v1378_v10  ;;  %v826_v13 = vpop.f32.mrf.mxu2  ;;  %v1251_v25 = vmin.f32 %v1187_v19, 14.285714  ;;  %v1252_v10 = vmin.f32 %v1188_v43, 14.285714  ;;  %v1657_v7 = vld [vmem:[%s6052_s30 + $0xc8] sm:$0xff] }
 0x15d   : > { %10901 = vst [vmem:[#allocation28_spill] sm:$0xff] %v6473_v8  ;;  %v915_v21 = vpop.f32.mrf.mxu3  ;;  %v6487_v28 = vmul.f32 %v1249_v12, %v826_v13 }
 0x15e   : > { %v6489_v29 = vmul.f32 %v1250_v14, %v915_v21  ;;  %v789_v33 = vpop.f32.mrf.mxu0 }
 0x15f   : > { %10902 = vst [vmem:[#allocation29_spill] sm:$0xff] %v6487_v28  ;;  %v6491_v34 = vmul.f32 %v1219_v16, %v789_v33  ;;  %v878_v35 = vpop.f32.mrf.mxu1 }
 0x160   : > { %10903 = vst [vmem:[#allocation30_spill] sm:$0xff] %v6489_v29  ;;  %v6497_v48 = vmul.f32 %v1220_v24, %v878_v35  ;;  %v1426_v2 = vmax.f32 %v6487_v28, %v6489_v29 }
 0x161   : > { %10904 = vst [vmem:[#allocation31_spill] sm:$0xff] %v6491_v34  ;;  %v6499_v54 = vpop.permute.xlu2 %1720 }
 0x162   : > { %10905 = vst [vmem:[#allocation32_spill] sm:$0xff] %v6497_v48  ;;  %v6505_v55 = vpop.permute.xlu1 %1678  ;;  %v6507_v63 = vpop.permute.xlu0 %1675  ;;  %v1381_v47 = vmax.f32 %v6491_v34, %v6497_v48 }
 0x163   : > { %10906 = vst [vmem:[#allocation33_spill] sm:$0xff] %v6499_v54 }
 0x164   : > { %10907 = vst [vmem:[#allocation34_spill] sm:$0xff] %v6505_v55  ;;  %1427 = vmax.xlane.f32.xlu0 %v1426_v2  ;;  %1382 = vmax.xlane.f32.xlu1 %v1381_v47  ;;  %v829_v12 = vpop.f32.mrf.mxu2  ;;  %v1165_v55 = vmul.f32 %v6409_v61, %v6339_v26 }
 0x165   : > { %10908 = vst [vmem:[#allocation35_spill] sm:$0xff] %v6507_v63  ;;  %v918_v14 = vpop.f32.mrf.mxu3  ;;  %v6521_v13 = vmul.f32 %v1251_v25, %v829_v12  ;;  %v1656_v12 = vld [vmem:[%s6052_s30 + $0xc0] sm:$0xff] }
 0x166   : > { %v6523_v16 = vmul.f32 %v1252_v10, %v918_v14  ;;  %v6525_v21 = vpop.f32.mrf.mxu0 }
 0x167   : > { %10909 = vst [vmem:[#allocation36_spill] sm:$0xff] %v6521_v13  ;;  %v6527_v24 = vpop.f32.mrf.mxu1 }
 0x168   : > { %10910 = vst [vmem:[#allocation37_spill] sm:$0xff] %v6523_v16  ;;  %v1429_v43 = vmax.f32 %v6521_v13, %v6523_v16 }
 0x169   : > { %v6529_v33 = vpop.permute.xlu2 %1729 }
 0x16a   : > { %10911 = vst [vmem:[#allocation38_spill] sm:$0xff] %v6529_v33  ;;  %v6535_v35 = vpop.permute.xlu1 %1687  ;;  %v6537_v19 = vpop.permute.xlu0 %1681 }
 0x16b   : > { %10912 = vst [vmem:[#allocation39_spill] sm:$0xff] %v6535_v35 }
 0x16c   : > { %10913 = vst [vmem:[#allocation40_spill] sm:$0xff] %v6537_v19  ;;  %1430 = vmax.xlane.f32.xlu1 %v1429_v43  ;;  %v6549_v2 = vpop.f32.mrf.mxu2 }
 0x16d   : > { %v6551_v47 = vpop.f32.mrf.mxu3 }
 0x16e   : > { %v6553_v25 = vpop.f32.mrf.mxu0 }
 0x16f   : > { %v6555_v10 = vpop.f32.mrf.mxu1 }
 0x172   : > { %v6558_v14 = vpop.permute.xlu1 %1696  ;;  %v6560_v33 = vpop.permute.xlu0 %1690 }
 0x173   : > { %10914 = vst [vmem:[#allocation41_spill] sm:$0xff] %v6558_v14 }
 0x174   : > { %10915 = vst [vmem:[#allocation42_spill] sm:$0xff] %v6560_v33  ;;  %1738 = vperm.xlu2 %5367, %v1656_v12   ;;  %v6570_v43 = vpop.f32.mrf.mxu2  ;;  %v1195_v33 = vmul.f32 %v6409_v61, %v6388_v52 }
 0x175   : > { %v6572_v54 = vpop.f32.mrf.mxu3 }
 0x176   : > { %v6575_v19 = vpop.f32.mrf.mxu0  ;;  %v1259_v56 = vmin.f32 %v1195_v33, 14.285714  ;;  %v1229_v33 = vmin.f32 %v1165_v55, 14.285714 }
 0x177   : > { %v6577_v20 = vpop.f32.mrf.mxu1 }
 0x178   : > { %1735 = vperm.xlu0 %5365, %v1655_v6  }
 0x17a   : > { %v6579_v51 = vpop.permute.xlu1 %1705  ;;  %v6581_v0 = vpop.permute.xlu0 %1699 }
 0x17b   : > { %10916 = vst [vmem:[#allocation43_spill] sm:$0xff] %v6579_v51  ;;  %v1196_v51 = vmul.f32 %v6411_v62, %v6388_v52 }
 0x17c   : > { %10917 = vst [vmem:[#allocation44_spill] sm:$0xff] %v6581_v0  ;;  %v6591_v12 = vpop.f32.mrf.mxu2  ;;  %v1166_v0 = vmul.f32 %v6411_v62, %v6339_v26 }
 0x17d   : > { %v6593_v6 = vpop.f32.mrf.mxu3  ;;  %v1260_v26 = vmin.f32 %v1196_v51, 14.285714 }
 0x17e   : > { %v6597_v14 = vpop.f32.mrf.mxu0  ;;  %v1230_v41 = vmin.f32 %v1166_v0, 14.285714  ;;  %v1157_v0 = vmul.f32 %v6409_v61, %v6328_v18 }
 0x17f   : > { %v6599_v63 = vpop.f32.mrf.mxu1 }
 0x182   : > { %v6607_v35 = vpop.permute.xlu1 %1714  ;;  %v6609_v8 = vpop.permute.xlu0 %1708 }
 0x183   : > { %10918 = vst [vmem:[#allocation45_spill] sm:$0xff] %v6607_v35 }
 0x184   : > { %10919 = vst [vmem:[#allocation46_spill] sm:$0xff] %v6609_v8  ;;  %v839_v52 = vpop.f32.mrf.mxu2 }
 0x185   : > { %v6620_v16 = vmul.f32 %v1259_v56, %v839_v52  ;;  %v928_v13 = vpop.f32.mrf.mxu3  ;;  %1741 = vperm.xlu1 %5366, %v1657_v7   ;;  %v1660_v56 = vld [vmem:[%s6052_s30 + $0xe0] sm:$0xff] }
 0x186   : > { %v6622_v36 = vmul.f32 %v1260_v26, %v928_v13  ;;  %v801_v29 = vpop.f32.mrf.mxu0  ;;  %v1221_v13 = vmin.f32 %v1157_v0, 14.285714  ;;  %v1192_v26 = vmul.f32 %v6411_v62, %v6345_v30  ;;  %v1189_v0 = vmul.f32 %v6409_v61, %v6369_v46 }
 0x187   : > { %10920 = vst [vmem:[#allocation47_spill] sm:$0xff] %v6620_v16  ;;  %v6624_v28 = vmul.f32 %v1229_v33, %v801_v29  ;;  %v890_v35 = vpop.f32.mrf.mxu1 }
 0x188   : > { %10921 = vst [vmem:[#allocation48_spill] sm:$0xff] %v6622_v36  ;;  %v6626_v60 = vmul.f32 %v1230_v41, %v890_v35  ;;  %v1158_v41 = vmul.f32 %v6411_v62, %v6328_v18  ;;  %v1191_v18 = vmul.f32 %v6409_v61, %v6345_v30  ;;  %v6666_v52 = vmul.f32 %v1221_v13, %v6525_v21 }
 0x189   : > { %v1253_v13 = vmin.f32 %v1189_v0, 14.285714  ;;  %v1160_v0 = vmul.f32 %v6411_v62, %v6298_v59 }
 0x18a   : > { %v6630_v44 = vpop.permute.xlu1 %1723  ;;  %v6632_v51 = vpop.permute.xlu0 %1717  ;;  %v1222_v35 = vmin.f32 %v1158_v41, 14.285714  ;;  %10926 = vst [vmem:[#allocation53_spill] sm:$0xff] %v6666_v52  ;;  %v1190_v41 = vmul.f32 %v6411_v62, %v6369_v46  ;;  %v1255_v8 = vmin.f32 %v1191_v18, 14.285714  ;;  %v1162_v46 = vmul.f32 %v6411_v62, %v6305_v1 }
 0x18b   : > { %10922 = vst [vmem:[#allocation49_spill] sm:$0xff] %v6630_v44  ;;  %v6692_v18 = vmul.f32 %v1253_v13, %v6549_v2  ;;  %v1224_v44 = vmin.f32 %v1160_v0, 14.285714 }
 0x18c   : > { %10923 = vst [vmem:[#allocation50_spill] sm:$0xff] %v6632_v51  ;;  %v6669_v33 = vmul.f32 %v1222_v35, %v6527_v24  ;;  %v6682_v21 = vmul.f32 %v1255_v8, %v6570_v43  ;;  %v1254_v35 = vmin.f32 %v1190_v41, 14.285714  ;;  %v1161_v51 = vmul.f32 %v6409_v61, %v6305_v1 }
 0x18d   : > { %1750 = vperm.xlu1 %5366, %v1660_v56   ;;  %v6671_v56 = vpop.f32.mrf.mxu2  ;;  %v6673_v7 = vpop.f32.mrf.mxu3  ;;  %10930 = vst [vmem:[#allocation57_spill] sm:$0xff] %v6692_v18  ;;  %v1226_v41 = vmin.f32 %v1162_v46, 14.285714 }
 0x18e   : > { %10927 = vst [vmem:[#allocation54_spill] sm:$0xff] %v6669_v33  ;;  %v1384_v30 = vmax.f32 %v6666_v52, %v6669_v33  ;;  %v6697_v8 = vpop.f32.mrf.mxu0  ;;  %v1225_v1 = vmin.f32 %v1161_v51, 14.285714 }
 0x18f   : > { %10928 = vst [vmem:[#allocation55_spill] sm:$0xff] %v6682_v21  ;;  %v6699_v43 = vpop.f32.mrf.mxu1 }
 0x190   : > { %v6710_v13 = vmul.f32 %v1225_v1, %v6575_v19  ;;  %v1193_v19 = vmul.f32 %v6409_v61, %v6390_v53 }
 0x192   : > { %v6649_v29 = vpop.permute.xlu1 %1732  ;;  %v6651_v55 = vpop.permute.xlu0 %1726  ;;  %10932 = vst [vmem:[#allocation59_spill] sm:$0xff] %v6710_v13 }
 0x193   : > { %10924 = vst [vmem:[#allocation51_spill] sm:$0xff] %v6649_v29 }
 0x194   : > { %10925 = vst [vmem:[#allocation52_spill] sm:$0xff] %v6651_v55  ;;  %v1256_v55 = vmin.f32 %v1192_v26, 14.285714  ;;  %v6695_v26 = vmul.f32 %v1254_v35, %v6551_v47  ;;  %v6713_v35 = vmul.f32 %v1226_v41, %v6577_v20  ;;  %v1194_v20 = vmul.f32 %v6411_v62, %v6390_v53 }
 0x195   : > { %v844_v2 = vpop.f32.mrf.mxu2  ;;  %v1163_v53 = vmul.f32 %v6409_v61, %v6341_v27  ;;  %v1164_v41 = vmul.f32 %v6411_v62, %v6341_v27 }
 0x196   : > { %v6685_v24 = vmul.f32 %v1256_v55, %v6572_v54  ;;  %10931 = vst [vmem:[#allocation58_spill] sm:$0xff] %v6695_v26  ;;  %v1159_v55 = vmul.f32 %v6409_v61, %v6298_v59  ;;  %v1432_v47 = vmax.f32 %v6692_v18, %v6695_v26  ;;  %v6719_v59 = vmul.f32 %v1224_v44, %v6555_v10  ;;  %v806_v46 = vpop.f32.mrf.mxu0 }
 0x197   : > { %10933 = vst [vmem:[#allocation60_spill] sm:$0xff] %v6713_v35  ;;  %v1390_v51 = vmax.f32 %v6710_v13, %v6713_v35  ;;  %v1257_v44 = vmin.f32 %v1193_v19, 14.285714  ;;  %v1258_v10 = vmin.f32 %v1194_v20, 14.285714 }
 0x198   : > { %10929 = vst [vmem:[#allocation56_spill] sm:$0xff] %v6685_v24  ;;  %v1435_v54 = vmax.f32 %v6682_v21, %v6685_v24  ;;  %v1223_v29 = vmin.f32 %v1159_v55, 14.285714  ;;  %v1659_v21 = vld [vmem:[%s6052_s30 + $0xd8] sm:$0xff] }
 0x199   : > { %10935 = vst [vmem:[#allocation62_spill] sm:$0xff] %v6719_v59  ;;  %v6734_v0 = vmul.f32 %v1257_v44, %v6591_v12  ;;  %v6737_v1 = vmul.f32 %v1258_v10, %v6593_v6  ;;  %v1228_v6 = vmin.f32 %v1164_v41, 14.285714  ;;  %v1199_v10 = vmul.f32 %v6409_v61, %v6402_v58 }
 0x19a   : > { %v6716_v24 = vmul.f32 %v1223_v29, %v6553_v25 }
 0x19b   : > { %10936 = vst [vmem:[#allocation63_spill] sm:$0xff] %v6734_v0  ;;  %v1438_v19 = vmax.f32 %v6734_v0, %v6737_v1  ;;  %v6757_v27 = vmul.f32 %v1228_v6, %v6599_v63  ;;  %v1658_v0 = vld [vmem:[%s6052_s30 + $0xd0] sm:$0xff] }
 0x19c   : > { %10934 = vst [vmem:[#allocation61_spill] sm:$0xff] %v6716_v24  ;;  %v1387_v55 = vmax.f32 %v6716_v24, %v6719_v59 }
 0x19d   : > { %1385 = vmax.xlane.f32.xlu2 %v1384_v30  ;;  %v933_v30 = vpop.f32.mrf.mxu3  ;;  %v6729_v25 = vpop.f32.mrf.mxu2  ;;  %10937 = vst [vmem:[#allocation64_spill] sm:$0xff] %v6737_v1  ;;  %v1200_v1 = vmul.f32 %v6411_v62, %v6402_v58  ;;  %v1169_v58 = vmul.f32 %v6409_v61, %v6349_v32 }
 0x19e   : > { %10939 = vst [vmem:[#allocation66_spill] sm:$0xff] %v6757_v27 }
 0x1a2   : > { %1436 = vmax.xlane.f32.xlu0 %v1435_v54  ;;  %v895_v54 = vpop.f32.mrf.mxu1 }
 0x1a5   : > { %1433 = vmax.xlane.f32.xlu2 %v1432_v47  ;;  %v6731_v29 = vpop.f32.mrf.mxu3  ;;  %v6743_v47 = vpop.f32.mrf.mxu0 }
 0x1a6   : > { %v6749_v20 = vpop.f32.mrf.mxu2 }
 0x1aa   : > { %1391 = vmax.xlane.f32.xlu0 %v1390_v51  ;;  %v6745_v51 = vpop.f32.mrf.mxu1 }
 0x1ad   : > { %1388 = vmax.xlane.f32.xlu2 %v1387_v55  ;;  %v6751_v12 = vpop.f32.mrf.mxu3  ;;  %v1227_v55 = vmin.f32 %v1163_v53, 14.285714  ;;  %v6766_v53 = vpop.f32.mrf.mxu0 }
 0x1ae   : > { %v851_v63 = vpop.f32.mrf.mxu2 }
 0x1af   : > { %v6754_v44 = vmul.f32 %v1227_v55, %v6597_v14  ;;  %v1263_v14 = vmin.f32 %v1199_v10, 14.285714 }
 0x1b1   : > { %10938 = vst [vmem:[#allocation65_spill] sm:$0xff] %v6754_v44  ;;  %v1393_v26 = vmax.f32 %v6754_v44, %v6757_v27  ;;  %v6770_v6 = vmul.f32 %v1263_v14, %v844_v2  ;;  %v1170_v27 = vmul.f32 %v6411_v62, %v6349_v32  ;;  %v1343_v44 = vld [vmem:[#allocation2] sm:$0xff] }
 0x1b2   : > { %v6768_v41 = vpop.f32.mrf.mxu1 }
 0x1b3   : > { %10940 = vst [vmem:[#allocation67_spill] sm:$0xff] %v6770_v6 }
 0x1b5   : > { %v940_v55 = vpop.f32.mrf.mxu3  ;;  %v814_v2 = vpop.f32.mrf.mxu0 }
 0x1b6   : > { %v6787_v52 = vpop.f32.mrf.mxu2 }
 0x1b7   : > { %1439 = vmax.xlane.f32.xlu1 %v1438_v19  ;;  %v1264_v19 = vmin.f32 %v1200_v1, 14.285714  ;;  %v1233_v1 = vmin.f32 %v1169_v58, 14.285714  ;;  %v1206_v58 = vmul.f32 %v6411_v62, %v6425_v4 }
 0x1b9   : > { %v6772_v18 = vmul.f32 %v1264_v19, %v933_v30  ;;  %v6783_v19 = vmul.f32 %v1233_v1, %v806_v46  ;;  %v1359_v46 = vld [vmem:[#allocation2 + $0x80] sm:$0xff]  ;;  %v1344_v1 = vld [vmem:[#allocation2 + $0x8] sm:$0xff] }
 0x1ba   : > { %v903_v30 = vpop.f32.mrf.mxu1 }
 0x1bb   : > { %10941 = vst [vmem:[#allocation68_spill] sm:$0xff] %v6772_v18 }
 0x1bc   : > { %10943 = vst [vmem:[#allocation70_spill] sm:$0xff] %v6783_v19 }
 0x1bd   : > { %v6789_v32 = vpop.f32.mrf.mxu3 }
 0x1be   : > { %1744 = vperm.xlu0 %5365, %v1658_v0   ;;  %v1447_v0 = vmax.f32 %v6770_v6, %v6772_v18 }
 0x1bf   : > { %1394 = vmax.xlane.f32.xlu1 %v1393_v26  ;;  %v1234_v26 = vmin.f32 %v1170_v27, 14.285714  ;;  %v1205_v27 = vmul.f32 %v6409_v61, %v6425_v4 }
 0x1c1   : > { %v6785_v33 = vmul.f32 %v1234_v26, %v895_v54  ;;  %v1269_v26 = vmin.f32 %v1205_v27, 14.285714 }
 0x1c2   : > { %v6808_v4 = vpop.f32.mrf.mxu1 }
 0x1c3   : > { %10944 = vst [vmem:[#allocation71_spill] sm:$0xff] %v6785_v33  ;;  %v1402_v54 = vmax.f32 %v6783_v19, %v6785_v33  ;;  %v6804_v9 = vmul.f32 %v1269_v26, %v851_v63  ;;  %v1176_v63 = vmul.f32 %v6411_v62, %v6359_v39  ;;  %v1360_v26 = vld [vmem:[#allocation2 + $0x88] sm:$0xff] }
 0x1c5   : > { %1747 = vperm.xlu2 %5367, %v1659_v21   ;;  %10947 = vst [vmem:[#allocation74_spill] sm:$0xff] %v6804_v9  ;;  %v1240_v19 = vmin.f32 %v1176_v63, 14.285714 }
 0x1c7   : > { %v1377_v10 = vpop.xlane.xlu2 %1376  ;;  %1448 = vmax.xlane.f32.xlu1 %v1447_v0 }
 0x1c8   : > { %v6781_v14 = vmax.f32 %v1343_v44, %v1377_v10  ;;  %v1270_v10 = vmin.f32 %v1206_v58, 14.285714  ;;  %v6824_v58 = vpop.f32.mrf.mxu2 }
 0x1ca   : > { %10942 = vst [vmem:[#allocation69_spill] sm:$0xff] %v6781_v14  ;;  %v1503_v21 = vsub.f32 %v1343_v44, %v6781_v14  ;;  %v6806_v48 = vmul.f32 %v1270_v10, %v940_v55  ;;  %v1345_v10 = vld [vmem:[#allocation2 + $0x10] sm:$0xff] }
 0x1cb   : > { %1600 = vst.msk [vmem:[#allocation2] sm:$0xff] %vm10721_vm6, %v6781_v14 }
 0x1cc   : > { %v1535_v0 = vmul.f32 1.442695, %v1503_v21  ;;  %10948 = vst [vmem:[#allocation75_spill] sm:$0xff] %v6806_v48  ;;  %v6810_v21 = vpop.f32.mrf.mxu0 }
 0x1ce   : > { %5368 = vpow2.f32 %v1535_v0  ;;  %v6826_v0 = vpop.f32.mrf.mxu3 }
 0x1cf   : > { %v1425_v18 = vpop.xlane.xlu2 %1424  ;;  %v1380_v44 = vpop.xlane.xlu0 %1379  ;;  %1403 = vmax.xlane.f32.xlu1 %v1402_v54 }
 0x1d0   : > { %v6800_v6 = vmax.f32 %v1359_v46, %v1425_v18  ;;  %v6802_v15 = vmax.f32 %v1344_v1, %v1380_v44  ;;  %v1175_v18 = vmul.f32 %v6409_v61, %v6359_v39 }
 0x1d2   : > { %10945 = vst [vmem:[#allocation72_spill] sm:$0xff] %v6800_v6  ;;  %v1519_v33 = vsub.f32 %v1359_v46, %v6800_v6  ;;  %v1504_v27 = vsub.f32 %v1344_v1, %v6802_v15  ;;  %v1456_v1 = vmax.f32 %v6804_v9, %v6806_v48  ;;  %v1239_v44 = vmin.f32 %v1175_v18, 14.285714  ;;  %v859_v48 = vpop.f32.mrf.mxu2 }
 0x1d3   : > { %10946 = vst [vmem:[#allocation73_spill] sm:$0xff] %v6802_v15 }
 0x1d4   : > { %1616 = vst.msk [vmem:[#allocation2 + $0x80] sm:$0xff] %vm10721_vm6, %v6800_v6  ;;  %v6822_v55 = vpop.eup %5368  ;;  %v1567_v46 = vmul.f32 1.442695, %v1519_v33  ;;  %v1537_v54 = vmul.f32 1.442695, %v1504_v27 }
 0x1d5   : > { %1601 = vst.msk [vmem:[#allocation2 + $0x8] sm:$0xff] %vm10721_vm6, %v6802_v15 }
 0x1d6   : > { %10949 = vst [vmem:[#allocation76_spill] sm:$0xff] %v6822_v55  ;;  %5370 = vpow2.f32 %v1567_v46  ;;  %v6838_v55 = vmul.f32 %v1239_v44, %v814_v2  ;;  %v6840_v46 = vmul.f32 %v1240_v19, %v903_v30  ;;  %v1197_v30 = vmul.f32 %v6409_v61, %v6355_v37  ;;  %v6862_v44 = vpop.f32.mrf.mxu0  ;;  %v948_v9 = vpop.f32.mrf.mxu3 }
 0x1d7   : > { %5372 = vpow2.f32 %v1537_v54  ;;  %v6830_v39 = vpop.permute.xlu2 %1738  ;;  %v1428_v34 = vpop.xlane.xlu0 %1427  ;;  %1457 = vmax.xlane.f32.xlu1 %v1456_v1  ;;  %v1211_v54 = vmul.f32 %v6409_v61, %v6445_v23  ;;  %v1212_v1 = vmul.f32 %v6411_v62, %v6445_v23  ;;  %v1198_v19 = vmul.f32 %v6411_v62, %v6355_v37 }
 0x1d8   : > { %10950 = vst [vmem:[#allocation77_spill] sm:$0xff] %v6830_v39  ;;  %v6836_v33 = vmax.f32 %v1360_v26, %v1428_v34  ;;  %v1383_v27 = vpop.xlane.xlu1 %1382  ;;  %v1261_v37 = vmin.f32 %v1197_v30, 14.285714 }
 0x1d9   : > { %10952 = vst [vmem:[#allocation79_spill] sm:$0xff] %v6838_v55  ;;  %v6842_v18 = vmax.f32 %v1345_v10, %v1383_v27  ;;  %v1275_v35 = vmin.f32 %v1211_v54, 14.285714  ;;  %v1276_v13 = vmin.f32 %v1212_v1, 14.285714  ;;  %v1181_v54 = vmul.f32 %v6409_v61, %v6363_v42 }
 0x1da   : > { %10951 = vst [vmem:[#allocation78_spill] sm:$0xff] %v6836_v33  ;;  %v1520_v63 = vsub.f32 %v1360_v26, %v6836_v33  ;;  %v6860_v26 = vpop.f32.mrf.mxu1  ;;  %v1262_v59 = vmin.f32 %v1198_v19, 14.285714  ;;  %v1182_v1 = vmul.f32 %v6411_v62, %v6363_v42 }
 0x1db   : > { %10953 = vst [vmem:[#allocation80_spill] sm:$0xff] %v6840_v46  ;;  %v1505_v34 = vsub.f32 %v1345_v10, %v6842_v18  ;;  %v1411_v10 = vmax.f32 %v6838_v55, %v6840_v46  ;;  %v6868_v6 = vmul.f32 %v1275_v35, %v859_v48  ;;  %v1167_v48 = vmul.f32 %v6409_v61, %v6310_v5 }
 0x1dc   : > { %10954 = vst [vmem:[#allocation81_spill] sm:$0xff] %v6842_v18  ;;  %v6854_v2 = vpop.eup %5370  ;;  %v1569_v27 = vmul.f32 1.442695, %v1520_v63  ;;  %v6870_v63 = vmul.f32 %v1276_v13, %v948_v9  ;;  %v6878_v46 = vmul.f32 %v1262_v59, %v6673_v7  ;;  %v1168_v7 = vmul.f32 %v6411_v62, %v6310_v5 }
 0x1dd   : > { %1617 = vst.msk [vmem:[#allocation2 + $0x88] sm:$0xff] %vm10721_vm6, %v6836_v33  ;;  %v6864_v39 = vpop.eup %5372  ;;  %v1539_v23 = vmul.f32 1.442695, %v1505_v34  ;;  %v6875_v34 = vmul.f32 %v1261_v37, %v6671_v56  ;;  %v1246_v19 = vmin.f32 %v1182_v1, 14.285714  ;;  %v1204_v1 = vmul.f32 %v6411_v62, %v6361_v40 }
 0x1de   : > { %1602 = vst.msk [vmem:[#allocation2 + $0x10] sm:$0xff] %vm10721_vm6, %v6842_v18  ;;  %5374 = vpow2.f32 %v1569_v27  ;;  %v1465_v13 = vmax.f32 %v6868_v6, %v6870_v63  ;;  %v821_v35 = vpop.f32.mrf.mxu0  ;;  %v1231_v27 = vmin.f32 %v1167_v48, 14.285714 }
 0x1df   : > { %10955 = vst [vmem:[#allocation82_spill] sm:$0xff] %v6854_v2  ;;  %v1361_v2 = vld [vmem:[#allocation2 + $0x90] sm:$0xff]  ;;  %5376 = vpow2.f32 %v1539_v23  ;;  %1412 = vmax.xlane.f32.xlu1 %v1411_v10  ;;  %v1444_v59 = vmax.f32 %v6875_v34, %v6878_v46  ;;  %v1232_v23 = vmin.f32 %v1168_v7, 14.285714 }
 0x1e0   : > { %10956 = vst [vmem:[#allocation83_spill] sm:$0xff] %v6864_v39  ;;  %v1431_v24 = vpop.xlane.xlu1 %1430  ;;  %v6904_v37 = vmul.f32 %v1231_v27, %v6697_v8 }
 0x1e1   : > { %10957 = vst [vmem:[#allocation84_spill] sm:$0xff] %v6868_v6  ;;  %v6872_v39 = vmax.f32 %v1361_v2, %v1431_v24 }
 0x1e2   : > { %10958 = vst [vmem:[#allocation85_spill] sm:$0xff] %v6870_v63  ;;  %v910_v42 = vpop.f32.mrf.mxu1 }
 0x1e3   : > { %10959 = vst [vmem:[#allocation86_spill] sm:$0xff] %v6872_v39  ;;  %v1521_v30 = vsub.f32 %v1361_v2, %v6872_v39  ;;  %v1245_v2 = vmin.f32 %v1181_v54, 14.285714  ;;  %v6899_v10 = vmul.f32 %v1246_v19, %v910_v42  ;;  %v1203_v54 = vmul.f32 %v6409_v61, %v6361_v40 }
 0x1e4   : > { %10960 = vst [vmem:[#allocation87_spill] sm:$0xff] %v6875_v34  ;;  %v6887_v9 = vpop.eup %5374  ;;  %v1201_v42 = vmul.f32 %v6409_v61, %v6400_v57  ;;  %v1202_v40 = vmul.f32 %v6411_v62, %v6400_v57  ;;  %v1174_v19 = vmul.f32 %v6411_v62, %v6317_v11 }
 0x1e5   : > { %10961 = vst [vmem:[#allocation88_spill] sm:$0xff] %v6878_v46  ;;  %v6893_v56 = vpop.eup %5376  ;;  %v1571_v24 = vmul.f32 1.442695, %v1521_v30  ;;  %v6901_v5 = vmul.f32 %v1245_v2, %v821_v35  ;;  %v6907_v30 = vmul.f32 %v1232_v23, %v6699_v43  ;;  %v10970_v43 = vmax.f32 %v6620_v16, %v6622_v36 }
 0x1e6   : > { %1618 = vst.msk [vmem:[#allocation2 + $0x90] sm:$0xff] %vm10721_vm6, %v6872_v39  ;;  %v1173_v2 = vmul.f32 %v6409_v61, %v6317_v11  ;;  %v1265_v27 = vmin.f32 %v1201_v42, 14.285714  ;;  %v1266_v23 = vmin.f32 %v1202_v40, 14.285714  ;;  %v1171_v11 = vmul.f32 %v6409_v61, %v6347_v31 }
 0x1e7   : > { %10962 = vst [vmem:[#allocation89_spill] sm:$0xff] %v6887_v9  ;;  %5378 = vpow2.f32 %v1571_v24  ;;  %1466 = vmax.xlane.f32.xlu1 %v1465_v13  ;;  %v1420_v8 = vmax.f32 %v6901_v5, %v6899_v10  ;;  %v1399_v7 = vmax.f32 %v6904_v37, %v6907_v30  ;;  %v1267_v24 = vmin.f32 %v1203_v54, 14.285714 }
 0x1e8   : > { %10963 = vst [vmem:[#allocation90_spill] sm:$0xff] %v6893_v56  ;;  %1445 = vmax.xlane.f32.xlu0 %v1444_v59  ;;  %v1268_v13 = vmin.f32 %v1204_v1, 14.285714  ;;  %v10973_v54 = vmax.f32 %v6624_v28, %v6626_v60  ;;  %v1238_v1 = vmin.f32 %v1174_v19, 14.285714 }
 0x1e9   : > { %10964 = vst [vmem:[#allocation91_spill] sm:$0xff] %v6899_v10  ;;  %v6933_v35 = vmul.f32 %v1267_v24, %v6749_v20  ;;  %v1237_v20 = vmin.f32 %v1173_v2, 14.285714  ;;  %v1235_v40 = vmin.f32 %v1171_v11, 14.285714  ;;  %v1663_v11 = vld [vmem:[%s6052_s30 + $0xf8] sm:$0xff] }
 0x1ea   : > { %10965 = vst [vmem:[#allocation92_spill] sm:$0xff] %v6901_v5  ;;  %v6909_v9 = vpop.permute.xlu0 %1735  ;;  %v6936_v59 = vmul.f32 %v1268_v13, %v6751_v12  ;;  %v6950_v12 = vmul.f32 %v1265_v27, %v6729_v25  ;;  %v6967_v25 = vmul.f32 %v1238_v1, %v6768_v41  ;;  %v1210_v13 = vmul.f32 %v6411_v62, %v6367_v45 }
 0x1eb   : > { %10966 = vst [vmem:[#allocation93_spill] sm:$0xff] %v6904_v37  ;;  %v6964_v24 = vmul.f32 %v1237_v20, %v6766_v53  ;;  %v6980_v27 = vmul.f32 %v1235_v40, %v6743_v47  ;;  %v1180_v20 = vmul.f32 %v6411_v62, %v6326_v17  ;;  %v1178_v40 = vmul.f32 %v6411_v62, %v6357_v38 }
 0x1ec   : > { %10967 = vst [vmem:[#allocation94_spill] sm:$0xff] %v6907_v30  ;;  %v1453_v57 = vmax.f32 %v6933_v35, %v6936_v59  ;;  %v1274_v19 = vmin.f32 %v1210_v13, 14.285714 }
 0x1ed   : > { %10968 = vst [vmem:[#allocation95_spill] sm:$0xff] %v6909_v9  ;;  %v6919_v48 = vpop.eup %5378  ;;  %v1244_v13 = vmin.f32 %v1180_v20, 14.285714  ;;  %v1214_v20 = vmul.f32 %v6411_v62, %v6443_v22 }
 0x1ee   : > { %10969 = vst [vmem:[#allocation96_spill] sm:$0xff] %v6919_v48  ;;  %1442 = vmax.xlane.f32.xlu2 %v10970_v43  ;;  %v6953_v43 = vmul.f32 %v1266_v23, %v6731_v29  ;;  %v1209_v29 = vmul.f32 %v6409_v61, %v6367_v45  ;;  %v1207_v45 = vmul.f32 %v6409_v61, %v6423_v3 }
 0x1ef   : > { %1421 = vmax.xlane.f32.xlu1 %v1420_v8  ;;  %10971 = vst [vmem:[#allocation97_spill] sm:$0xff] %v6933_v35  ;;  %v6997_v47 = vmul.f32 %v1274_v19, %v6826_v0  ;;  %v1346_v19 = vld [vmem:[#allocation2 + $0x18] sm:$0xff] }
 0x1f0   : > { %1400 = vmax.xlane.f32.xlu0 %v1399_v7  ;;  %10972 = vst [vmem:[#allocation98_spill] sm:$0xff] %v6936_v59  ;;  %v1172_v7 = vmul.f32 %v6411_v62, %v6347_v31  ;;  %v1450_v42 = vmax.f32 %v6950_v12, %v6953_v43  ;;  %v1408_v31 = vmax.f32 %v6964_v24, %v6967_v25  ;;  %v1273_v53 = vmin.f32 %v1209_v29, 14.285714 }
 0x1f1   : > { %10975 = vst [vmem:[#allocation100_spill] sm:$0xff] %v6950_v12 }
 0x1f2   : > { %10976 = vst [vmem:[#allocation101_spill] sm:$0xff] %v6953_v43  ;;  %v1236_v2 = vmin.f32 %v1172_v7, 14.285714  ;;  %v1271_v7 = vmin.f32 %v1207_v45, 14.285714 }
 0x1f3   : > { %10977 = vst [vmem:[#allocation102_spill] sm:$0xff] %v6964_v24 }
 0x1f4   : > { %10978 = vst [vmem:[#allocation103_spill] sm:$0xff] %v6967_v25  ;;  %v6983_v23 = vmul.f32 %v1236_v2, %v6745_v51  ;;  %v1179_v51 = vmul.f32 %v6409_v61, %v6326_v17  ;;  %v7009_v0 = vmul.f32 %v1271_v7, %v6787_v52  ;;  %v1177_v17 = vmul.f32 %v6409_v61, %v6357_v38  ;;  %v950_v7 = vpop.f32.mrf.mxu3 }
 0x1f5   : > { %10982 = vst [vmem:[#allocation107_spill] sm:$0xff] %v6997_v47  ;;  %v7019_v2 = vmul.f32 %v1244_v13, %v6860_v26 }
 0x1f6   : > { %1397 = vmax.xlane.f32.xlu2 %v10973_v54  ;;  %10980 = vst [vmem:[#allocation105_spill] sm:$0xff] %v6983_v23  ;;  %v1208_v54 = vmul.f32 %v6411_v62, %v6423_v3  ;;  %v1405_v1 = vmax.f32 %v6980_v27, %v6983_v23  ;;  %v1362_v62 = vld [vmem:[#allocation2 + $0x98] sm:$0xff] }
 0x1f7   : > { %v6947_v8 = vpop.permute.xlu1 %1741  ;;  %10983 = vst [vmem:[#allocation108_spill] sm:$0xff] %v7009_v0 }
 0x1f8   : > { %10974 = vst [vmem:[#allocation99_spill] sm:$0xff] %v6947_v8  ;;  %1454 = vmax.xlane.f32.xlu0 %v1453_v57  ;;  %v6994_v57 = vmul.f32 %v1273_v53, %v6824_v58  ;;  %v1272_v29 = vmin.f32 %v1208_v54, 14.285714  ;;  %v1243_v58 = vmin.f32 %v1179_v51, 14.285714  ;;  %v1213_v51 = vmul.f32 %v6409_v61, %v6443_v22 }
 0x1f9   : > { %10985 = vst [vmem:[#allocation110_spill] sm:$0xff] %v7019_v2  ;;  %v1241_v53 = vmin.f32 %v1177_v17, 14.285714 }
 0x1fa   : > { %10981 = vst [vmem:[#allocation106_spill] sm:$0xff] %v6994_v57  ;;  %v1462_v3 = vmax.f32 %v6994_v57, %v6997_v47  ;;  %v1277_v61 = vmin.f32 %v1213_v51, 14.285714 }
 0x1fb   : > { %v7032_v38 = vmul.f32 %v1241_v53, %v6810_v21 }
 0x1fd   : > { %10988 = vst [vmem:[#allocation113_spill] sm:$0xff] %v7032_v38 }
 0x1fe   : > { %1451 = vmax.xlane.f32.xlu2 %v1450_v42  ;;  %v7012_v42 = vmul.f32 %v1272_v29, %v6789_v32  ;;  %v1242_v32 = vmin.f32 %v1178_v40, 14.285714 }
 0x1ff   : > { %v6977_v41 = vpop.permute.xlu1 %1750 }
 0x200   : > { %10979 = vst [vmem:[#allocation104_spill] sm:$0xff] %v6977_v41  ;;  %1409 = vmax.xlane.f32.xlu0 %v1408_v31  ;;  %v7022_v31 = vmul.f32 %v1243_v58, %v6862_v44  ;;  %v1459_v52 = vmax.f32 %v7009_v0, %v7012_v42  ;;  %v7029_v54 = vmul.f32 %v1242_v32, %v6808_v4  ;;  %v1363_v4 = vld [vmem:[#allocation2 + $0xa0] sm:$0xff]  ;;  %v1278_v58 = vmin.f32 %v1214_v20, 14.285714 }
 0x201   : > { %10984 = vst [vmem:[#allocation109_spill] sm:$0xff] %v7012_v42 }
 0x202   : > { %10986 = vst [vmem:[#allocation111_spill] sm:$0xff] %v7022_v31  ;;  %v1417_v45 = vmax.f32 %v7022_v31, %v7019_v2  ;;  %v1414_v21 = vmax.f32 %v7032_v38, %v7029_v54  ;;  %v7049_v17 = vmul.f32 %v1278_v58, %v950_v7 }
 0x203   : > { %10987 = vst [vmem:[#allocation112_spill] sm:$0xff] %v7029_v54 }
 0x204   : > { %10992 = vst [vmem:[#allocation117_spill] sm:$0xff] %v7049_v17 }
 0x206   : > { %1406 = vmax.xlane.f32.xlu2 %v1405_v1 }
 0x208   : > { %1463 = vmax.xlane.f32.xlu0 %v1462_v3  ;;  %1759 = vperm.xlu1 %5366, %v1663_v11   ;;  %v861_v11 = vpop.f32.mrf.mxu2 }
 0x209   : > { %v7047_v22 = vmul.f32 %v1277_v61, %v861_v11  ;;  %v1347_v11 = vld [vmem:[#allocation2 + $0x20] sm:$0xff] }
 0x20b   : > { %10991 = vst [vmem:[#allocation116_spill] sm:$0xff] %v7047_v22 }
 0x20e   : > { %1460 = vmax.xlane.f32.xlu2 %v1459_v52 }
 0x210   : > { %v1386_v26 = vpop.xlane.xlu2 %1385  ;;  %1418 = vmax.xlane.f32.xlu0 %v1417_v45  ;;  %v1348_v45 = vld [vmem:[#allocation2 + $0x28] sm:$0xff] }
 0x211   : > { %v7034_v44 = vmax.f32 %v1346_v19, %v1386_v26  ;;  %v1468_v26 = vmax.f32 %v7047_v22, %v7049_v17 }
 0x213   : > { %10989 = vst [vmem:[#allocation114_spill] sm:$0xff] %v7034_v44  ;;  %v1506_v1 = vsub.f32 %v1346_v19, %v7034_v44 }
 0x214   : > { %1603 = vst.msk [vmem:[#allocation2 + $0x18] sm:$0xff] %vm10721_vm6, %v7034_v44 }
 0x215   : > { %v1541_v29 = vmul.f32 1.442695, %v1506_v1  ;;  %v1437_v3 = vpop.xlane.xlu0 %1436 }
 0x216   : > { %v7045_v13 = vmax.f32 %v1363_v4, %v1437_v3  ;;  %1415 = vmax.xlane.f32.xlu2 %v1414_v21  ;;  %v1661_v3 = vld [vmem:[%s6052_s30 + $0xe8] sm:$0xff] }
 0x217   : > { %5380 = vpow2.f32 %v1541_v29 }
 0x218   : > { %10990 = vst [vmem:[#allocation115_spill] sm:$0xff] %v7045_v13  ;;  %v1523_v40 = vsub.f32 %v1363_v4, %v7045_v13  ;;  %v1434_v52 = vpop.xlane.xlu2 %1433 }
 0x219   : > { %1620 = vst.msk [vmem:[#allocation2 + $0xa0] sm:$0xff] %vm10721_vm6, %v7045_v13  ;;  %v7054_v53 = vmax.f32 %v1362_v62, %v1434_v52 }
 0x21a   : > { %v1575_v32 = vmul.f32 1.442695, %v1523_v40 }
 0x21b   : > { %10993 = vst [vmem:[#allocation118_spill] sm:$0xff] %v7054_v53  ;;  %v1522_v19 = vsub.f32 %v1362_v62, %v7054_v53 }
 0x21c   : > { %1619 = vst.msk [vmem:[#allocation2 + $0x98] sm:$0xff] %vm10721_vm6, %v7054_v53  ;;  %5382 = vpow2.f32 %v1575_v32 }
 0x21d   : > { %v7068_v51 = vpop.eup %5380  ;;  %v1573_v20 = vmul.f32 1.442695, %v1522_v19  ;;  %v1392_v1 = vpop.xlane.xlu0 %1391  ;;  %v1364_v19 = vld [vmem:[#allocation2 + $0xa8] sm:$0xff] }
 0x21e   : > { %10995 = vst [vmem:[#allocation119_spill] sm:$0xff] %v7068_v51  ;;  %v7070_v4 = vmax.f32 %v1348_v45, %v1392_v1  ;;  %1469 = vmax.xlane.f32.xlu2 %v1468_v26 }
 0x21f   : > { %5384 = vpow2.f32 %v1573_v20 }
 0x220   : > { %10996 = vst [vmem:[#allocation120_spill] sm:$0xff] %v7070_v4  ;;  %v1508_v21 = vsub.f32 %v1348_v45, %v7070_v4  ;;  %v1389_v7 = vpop.xlane.xlu2 %1388 }
 0x221   : > { %1605 = vst.msk [vmem:[#allocation2 + $0x28] sm:$0xff] %vm10721_vm6, %v7070_v4  ;;  %v7075_v29 = vmax.f32 %v1347_v11, %v1389_v7 }
 0x222   : > { %v7078_v61 = vpop.eup %5382  ;;  %v1545_v58 = vmul.f32 1.442695, %v1508_v21 }
 0x223   : > { %10997 = vst [vmem:[#allocation121_spill] sm:$0xff] %v7075_v29  ;;  %v1507_v62 = vsub.f32 %v1347_v11, %v7075_v29 }
 0x224   : > { %10998 = vst [vmem:[#allocation122_spill] sm:$0xff] %v7078_v61  ;;  %5386 = vpow2.f32 %v1545_v58  ;;  %1753 = vperm.xlu0 %5365, %v1661_v3   ;;  %v1349_v3 = vld [vmem:[#allocation2 + $0x30] sm:$0xff] }
 0x225   : > { %1604 = vst.msk [vmem:[#allocation2 + $0x20] sm:$0xff] %vm10721_vm6, %v7075_v29  ;;  %v7083_v40 = vpop.eup %5384  ;;  %v1543_v52 = vmul.f32 1.442695, %v1507_v62 }
 0x226   : > { %10999 = vst [vmem:[#allocation123_spill] sm:$0xff] %v7083_v40 }
 0x227   : > { %5388 = vpow2.f32 %v1543_v52  ;;  %v1662_v52 = vld [vmem:[%s6052_s30 + $0xf0] sm:$0xff] }
 0x228   : > { %v7085_v32 = vpop.permute.xlu2 %1747 }
 0x229   : > { %11000 = vst [vmem:[#allocation124_spill] sm:$0xff] %v7085_v32 }
 0x22a   : > { %v7091_v45 = vpop.eup %5386  ;;  %v1440_v26 = vpop.xlane.xlu1 %1439 }
 0x22b   : > { %11001 = vst [vmem:[#allocation125_spill] sm:$0xff] %v7091_v45  ;;  %v7093_v20 = vmax.f32 %v1364_v19, %v1440_v26 }
 0x22d   : > { %11002 = vst [vmem:[#allocation126_spill] sm:$0xff] %v7093_v20  ;;  %v7095_v1 = vpop.eup %5388  ;;  %v1524_v11 = vsub.f32 %v1364_v19, %v7093_v20 }
 0x22e   : > { %11003 = vst [vmem:[#allocation127_spill] sm:$0xff] %v7095_v1 }
 0x22f   : > { %1621 = vst.msk [vmem:[#allocation2 + $0xa8] sm:$0xff] %vm10721_vm6, %v7093_v20  ;;  %v1577_v21 = vmul.f32 1.442695, %v1524_v11 }
 0x230   : > { %v7100_v7 = vpop.permute.xlu0 %1744 }
 0x231   : > { %11004 = vst [vmem:[#allocation128_spill] sm:$0xff] %v7100_v7  ;;  %5390 = vpow2.f32 %v1577_v21  ;;  %v1367_v21 = vld [vmem:[#allocation2 + $0xc0] sm:$0xff]  ;;  %v1352_v7 = vld [vmem:[#allocation2 + $0x48] sm:$0xff] }
 0x232   : > { %v1395_v58 = vpop.xlane.xlu1 %1394 }
 0x233   : > { %v7106_v62 = vmax.f32 %v1349_v3, %v1395_v58 }
 0x235   : > { %11005 = vst [vmem:[#allocation129_spill] sm:$0xff] %v7106_v62  ;;  %v1509_v19 = vsub.f32 %v1349_v3, %v7106_v62 }
 0x236   : > { %1606 = vst.msk [vmem:[#allocation2 + $0x30] sm:$0xff] %vm10721_vm6, %v7106_v62  ;;  %1756 = vperm.xlu2 %5367, %v1662_v52  }
 0x237   : > { %v7112_v26 = vpop.eup %5390  ;;  %v1547_v11 = vmul.f32 1.442695, %v1509_v19 }
 0x238   : > { %11006 = vst [vmem:[#allocation130_spill] sm:$0xff] %v7112_v26 }
 0x239   : > { %5392 = vpow2.f32 %v1547_v11 }
 0x23a   : > { %v1449_v40 = vpop.xlane.xlu1 %1448 }
 0x23b   : > { %v7114_v61 = vmax.f32 %v1367_v21, %v1449_v40 }
 0x23d   : > { %11007 = vst [vmem:[#allocation131_spill] sm:$0xff] %v7114_v61  ;;  %v1527_v48 = vsub.f32 %v1367_v21, %v7114_v61  ;;  %v1370_v21 = vld [vmem:[#allocation2 + $0xd8] sm:$0xff] }
 0x23e   : > { %1624 = vst.msk [vmem:[#allocation2 + $0xc0] sm:$0xff] %vm10721_vm6, %v7114_v61 }
 0x23f   : > { %v7119_v58 = vpop.eup %5392  ;;  %v1583_v3 = vmul.f32 1.442695, %v1527_v48 }
 0x240   : > { %11008 = vst [vmem:[#allocation132_spill] sm:$0xff] %v7119_v58 }
 0x241   : > { %5394 = vpow2.f32 %v1583_v3 }
 0x242   : > { %v1404_v9 = vpop.xlane.xlu1 %1403 }
 0x243   : > { %v7121_v52 = vmax.f32 %v1352_v7, %v1404_v9 }
 0x245   : > { %11009 = vst [vmem:[#allocation133_spill] sm:$0xff] %v7121_v52  ;;  %v1512_v19 = vsub.f32 %v1352_v7, %v7121_v52  ;;  %v1355_v7 = vld [vmem:[#allocation2 + $0x60] sm:$0xff] }
 0x246   : > { %1609 = vst.msk [vmem:[#allocation2 + $0x48] sm:$0xff] %vm10721_vm6, %v7121_v52 }
 0x247   : > { %v7126_v40 = vpop.eup %5394  ;;  %v1553_v11 = vmul.f32 1.442695, %v1512_v19 }
 0x248   : > { %11010 = vst [vmem:[#allocation134_spill] sm:$0xff] %v7126_v40  ;;  %v1366_v40 = vld [vmem:[#allocation2 + $0xb8] sm:$0xff] }
 0x249   : > { %5396 = vpow2.f32 %v1553_v11 }
 0x24a   : > { %v1458_v26 = vpop.xlane.xlu1 %1457 }
 0x24b   : > { %v7128_v32 = vmax.f32 %v1370_v21, %v1458_v26 }
 0x24d   : > { %11011 = vst [vmem:[#allocation135_spill] sm:$0xff] %v7128_v32  ;;  %v1530_v48 = vsub.f32 %v1370_v21, %v7128_v32  ;;  %v1373_v21 = vld [vmem:[#allocation2 + $0xf0] sm:$0xff] }
 0x24e   : > { %1627 = vst.msk [vmem:[#allocation2 + $0xd8] sm:$0xff] %vm10721_vm6, %v7128_v32 }
 0x24f   : > { %v7133_v9 = vpop.eup %5396  ;;  %v1589_v3 = vmul.f32 1.442695, %v1530_v48 }
 0x250   : > { %11012 = vst [vmem:[#allocation136_spill] sm:$0xff] %v7133_v9 }
 0x251   : > { %5398 = vpow2.f32 %v1589_v3 }
 0x252   : > { %v1413_v1 = vpop.xlane.xlu1 %1412 }
 0x253   : > { %v7135_v41 = vmax.f32 %v1355_v7, %v1413_v1 }
 0x255   : > { %11013 = vst [vmem:[#allocation137_spill] sm:$0xff] %v7135_v41  ;;  %v1515_v19 = vsub.f32 %v1355_v7, %v7135_v41 }
 0x256   : > { %1612 = vst.msk [vmem:[#allocation2 + $0x60] sm:$0xff] %vm10721_vm6, %v7135_v41 }
 0x257   : > { %v7140_v26 = vpop.eup %5398  ;;  %v1559_v11 = vmul.f32 1.442695, %v1515_v19 }
 0x258   : > { %11014 = vst [vmem:[#allocation138_spill] sm:$0xff] %v7140_v26 }
 0x259   : > { %5400 = vpow2.f32 %v1559_v11  ;;  %v1365_v11 = vld [vmem:[#allocation2 + $0xb0] sm:$0xff] }
 0x25a   : > { %v1467_v45 = vpop.xlane.xlu1 %1466 }
 0x25b   : > { %v7142_v58 = vmax.f32 %v1373_v21, %v1467_v45  ;;  %v1446_v48 = vpop.xlane.xlu0 %1445  ;;  %v1358_v45 = vld [vmem:[#allocation2 + $0x78] sm:$0xff] }
 0x25c   : > { %v7144_v9 = vmax.f32 %v1366_v40, %v1446_v48  ;;  %v1351_v48 = vld [vmem:[#allocation2 + $0x40] sm:$0xff] }
 0x25d   : > { %11015 = vst [vmem:[#allocation139_spill] sm:$0xff] %v7142_v58  ;;  %v1533_v1 = vsub.f32 %v1373_v21, %v7142_v58 }
 0x25e   : > { %11016 = vst [vmem:[#allocation140_spill] sm:$0xff] %v7144_v9  ;;  %v1526_v3 = vsub.f32 %v1366_v40, %v7144_v9 }
 0x25f   : > { %1630 = vst.msk [vmem:[#allocation2 + $0xf0] sm:$0xff] %vm10721_vm6, %v7142_v58  ;;  %v7152_v7 = vpop.eup %5400  ;;  %v1595_v19 = vmul.f32 1.442695, %v1533_v1 }
 0x260   : > { %1623 = vst.msk [vmem:[#allocation2 + $0xb8] sm:$0xff] %vm10721_vm6, %v7144_v9  ;;  %v1581_v26 = vmul.f32 1.442695, %v1526_v3 }
 0x261   : > { %11017 = vst [vmem:[#allocation141_spill] sm:$0xff] %v7152_v7  ;;  %5402 = vpow2.f32 %v1595_v19  ;;  %v1443_v8 = vpop.xlane.xlu2 %1442 }
 0x262   : > { %5404 = vpow2.f32 %v1581_v26  ;;  %v7154_v51 = vmax.f32 %v1365_v11, %v1443_v8  ;;  %v1422_v21 = vpop.xlane.xlu1 %1421 }
 0x263   : > { %v7156_v56 = vmax.f32 %v1358_v45, %v1422_v21  ;;  %v1401_v17 = vpop.xlane.xlu0 %1400 }
 0x264   : > { %11018 = vst [vmem:[#allocation142_spill] sm:$0xff] %v7154_v51  ;;  %v1525_v40 = vsub.f32 %v1365_v11, %v7154_v51  ;;  %v7161_v7 = vmax.f32 %v1351_v48, %v1401_v17  ;;  %v1350_v11 = vld [vmem:[#allocation2 + $0x38] sm:$0xff] }
 0x265   : > { %11019 = vst [vmem:[#allocation143_spill] sm:$0xff] %v7156_v56  ;;  %v1518_v1 = vsub.f32 %v1358_v45, %v7156_v56  ;;  %v1369_v45 = vld [vmem:[#allocation2 + $0xd0] sm:$0xff] }
 0x266   : > { %1622 = vst.msk [vmem:[#allocation2 + $0xb0] sm:$0xff] %vm10721_vm6, %v7154_v51  ;;  %v1579_v3 = vmul.f32 1.442695, %v1525_v40  ;;  %v1511_v8 = vsub.f32 %v1351_v48, %v7161_v7 }
 0x267   : > { %11020 = vst [vmem:[#allocation144_spill] sm:$0xff] %v7161_v7  ;;  %v7169_v26 = vpop.eup %5402  ;;  %v1565_v19 = vmul.f32 1.442695, %v1518_v1 }
 0x268   : > { %1615 = vst.msk [vmem:[#allocation2 + $0x78] sm:$0xff] %vm10721_vm6, %v7156_v56  ;;  %v7171_v21 = vpop.eup %5404  ;;  %5406 = vpow2.f32 %v1579_v3  ;;  %v1551_v17 = vmul.f32 1.442695, %v1511_v8 }
 0x269   : > { %1608 = vst.msk [vmem:[#allocation2 + $0x40] sm:$0xff] %vm10721_vm6, %v7161_v7  ;;  %5408 = vpow2.f32 %v1565_v19  ;;  %v1398_v22 = vpop.xlane.xlu2 %1397 }
 0x26a   : > { %11021 = vst [vmem:[#allocation145_spill] sm:$0xff] %v7169_v26  ;;  %5410 = vpow2.f32 %v1551_v17  ;;  %v7173_v63 = vmax.f32 %v1350_v11, %v1398_v22  ;;  %v1368_v22 = vld [vmem:[#allocation2 + $0xc8] sm:$0xff] }
 0x26b   : > { %11022 = vst [vmem:[#allocation146_spill] sm:$0xff] %v7171_v21  ;;  %v1455_v40 = vpop.xlane.xlu0 %1454  ;;  %v1354_v21 = vld [vmem:[#allocation2 + $0x58] sm:$0xff] }
 0x26c   : > { %11023 = vst [vmem:[#allocation147_spill] sm:$0xff] %v7173_v63  ;;  %v1510_v48 = vsub.f32 %v1350_v11, %v7173_v63  ;;  %v7178_v6 = vmax.f32 %v1369_v45, %v1455_v40 }
 0x26d   : > { %1607 = vst.msk [vmem:[#allocation2 + $0x38] sm:$0xff] %vm10721_vm6, %v7173_v63 }
 0x26e   : > { %11024 = vst [vmem:[#allocation148_spill] sm:$0xff] %v7178_v6  ;;  %v7180_v1 = vpop.eup %5406  ;;  %v1549_v26 = vmul.f32 1.442695, %v1510_v48  ;;  %v1529_v3 = vsub.f32 %v1369_v45, %v7178_v6 }
 0x26f   : > { %11025 = vst [vmem:[#allocation149_spill] sm:$0xff] %v7180_v1  ;;  %v7185_v8 = vpop.eup %5408 }
 0x270   : > { %1626 = vst.msk [vmem:[#allocation2 + $0xd0] sm:$0xff] %vm10721_vm6, %v7178_v6  ;;  %v7187_v19 = vpop.eup %5410  ;;  %5412 = vpow2.f32 %v1549_v26  ;;  %v1587_v11 = vmul.f32 1.442695, %v1529_v3  ;;  %v1353_v26 = vld [vmem:[#allocation2 + $0x50] sm:$0xff] }
 0x271   : > { %11026 = vst [vmem:[#allocation150_spill] sm:$0xff] %v7185_v8  ;;  %v1452_v17 = vpop.xlane.xlu2 %1451 }
 0x272   : > { %11027 = vst [vmem:[#allocation151_spill] sm:$0xff] %v7187_v19  ;;  %5414 = vpow2.f32 %v1587_v11  ;;  %v7189_v40 = vmax.f32 %v1368_v22, %v1452_v17 }
 0x273   : > { %v1410_v42 = vpop.xlane.xlu0 %1409 }
 0x274   : > { %11028 = vst [vmem:[#allocation152_spill] sm:$0xff] %v7189_v40  ;;  %v1528_v48 = vsub.f32 %v1368_v22, %v7189_v40  ;;  %v7194_v45 = vmax.f32 %v1354_v21, %v1410_v42  ;;  %v1372_v22 = vld [vmem:[#allocation2 + $0xe8] sm:$0xff] }
 0x275   : > { %1625 = vst.msk [vmem:[#allocation2 + $0xc8] sm:$0xff] %vm10721_vm6, %v7189_v40 }
 0x276   : > { %11029 = vst [vmem:[#allocation153_spill] sm:$0xff] %v7194_v45  ;;  %v7196_v1 = vpop.eup %5412  ;;  %v1585_v8 = vmul.f32 1.442695, %v1528_v48  ;;  %v1514_v19 = vsub.f32 %v1354_v21, %v7194_v45 }
 0x277   : > { %11030 = vst [vmem:[#allocation154_spill] sm:$0xff] %v7196_v1 }
 0x278   : > { %1611 = vst.msk [vmem:[#allocation2 + $0x58] sm:$0xff] %vm10721_vm6, %v7194_v45  ;;  %v7201_v3 = vpop.eup %5414  ;;  %5416 = vpow2.f32 %v1585_v8  ;;  %v1557_v11 = vmul.f32 1.442695, %v1514_v19 }
 0x279   : > { %11031 = vst [vmem:[#allocation155_spill] sm:$0xff] %v7201_v3  ;;  %v1407_v17 = vpop.xlane.xlu2 %1406  ;;  %v1371_v3 = vld [vmem:[#allocation2 + $0xe0] sm:$0xff] }
 0x27a   : > { %5418 = vpow2.f32 %v1557_v11  ;;  %v7203_v0 = vmax.f32 %v1353_v26, %v1407_v17  ;;  %v7205_v42 = vpop.permute.xlu1 %1759 }
 0x27b   : > { %11033 = vst [vmem:[#allocation157_spill] sm:$0xff] %v7205_v42  ;;  %v1464_v21 = vpop.xlane.xlu0 %1463 }
 0x27c   : > { %11032 = vst [vmem:[#allocation156_spill] sm:$0xff] %v7203_v0  ;;  %v1513_v48 = vsub.f32 %v1353_v26, %v7203_v0  ;;  %v7214_v8 = vmax.f32 %v1372_v22, %v1464_v21  ;;  %v1357_v26 = vld [vmem:[#allocation2 + $0x70] sm:$0xff] }
 0x27d   : > { %1610 = vst.msk [vmem:[#allocation2 + $0x50] sm:$0xff] %vm10721_vm6, %v7203_v0 }
 0x27e   : > { %11034 = vst [vmem:[#allocation158_spill] sm:$0xff] %v7214_v8  ;;  %v7216_v19 = vpop.eup %5416  ;;  %v1555_v11 = vmul.f32 1.442695, %v1513_v48  ;;  %v1532_v17 = vsub.f32 %v1372_v22, %v7214_v8 }
 0x27f   : > { %11035 = vst [vmem:[#allocation159_spill] sm:$0xff] %v7216_v19 }
 0x280   : > { %1629 = vst.msk [vmem:[#allocation2 + $0xe8] sm:$0xff] %vm10721_vm6, %v7214_v8  ;;  %v7221_v1 = vpop.eup %5418  ;;  %5420 = vpow2.f32 %v1555_v11  ;;  %v1593_v42 = vmul.f32 1.442695, %v1532_v17  ;;  %v1356_v11 = vld [vmem:[#allocation2 + $0x68] sm:$0xff] }
 0x281   : > { %11036 = vst [vmem:[#allocation160_spill] sm:$0xff] %v7221_v1  ;;  %v1461_v43 = vpop.xlane.xlu2 %1460 }
 0x282   : > { %5422 = vpow2.f32 %v1593_v42  ;;  %v7223_v12 = vmax.f32 %v1371_v3, %v1461_v43 }
 0x283   : > { %v1419_v21 = vpop.xlane.xlu0 %1418 }
 0x284   : > { %11037 = vst [vmem:[#allocation161_spill] sm:$0xff] %v7223_v12  ;;  %v1531_v47 = vsub.f32 %v1371_v3, %v7223_v12  ;;  %v7228_v22 = vmax.f32 %v1357_v26, %v1419_v21 }
 0x285   : > { %1628 = vst.msk [vmem:[#allocation2 + $0xe0] sm:$0xff] %vm10721_vm6, %v7223_v12 }
 0x286   : > { %11038 = vst [vmem:[#allocation162_spill] sm:$0xff] %v7228_v22  ;;  %v7230_v48 = vpop.eup %5420  ;;  %v1591_v19 = vmul.f32 1.442695, %v1531_v47  ;;  %v1517_v1 = vsub.f32 %v1357_v26, %v7228_v22 }
 0x287   : > { %11039 = vst [vmem:[#allocation163_spill] sm:$0xff] %v7230_v48  ;;  %v1374_v48 = vld [vmem:[#allocation2 + $0xf8] sm:$0xff] }
 0x288   : > { %1614 = vst.msk [vmem:[#allocation2 + $0x70] sm:$0xff] %vm10721_vm6, %v7228_v22  ;;  %v7235_v42 = vpop.eup %5422  ;;  %5424 = vpow2.f32 %v1591_v19  ;;  %v1563_v43 = vmul.f32 1.442695, %v1517_v1 }
 0x289   : > { %11040 = vst [vmem:[#allocation164_spill] sm:$0xff] %v7235_v42  ;;  %v1416_v17 = vpop.xlane.xlu2 %1415 }
 0x28a   : > { %5426 = vpow2.f32 %v1563_v43  ;;  %v7237_v3 = vmax.f32 %v1356_v11, %v1416_v17 }
 0x28c   : > { %11041 = vst [vmem:[#allocation165_spill] sm:$0xff] %v7237_v3  ;;  %v1516_v21 = vsub.f32 %v1356_v11, %v7237_v3 }
 0x28d   : > { %1613 = vst.msk [vmem:[#allocation2 + $0x68] sm:$0xff] %vm10721_vm6, %v7237_v3 }
 0x28e   : > { %v7242_v47 = vpop.eup %5424  ;;  %v1561_v26 = vmul.f32 1.442695, %v1516_v21 }
 0x28f   : > { %11042 = vst [vmem:[#allocation166_spill] sm:$0xff] %v7242_v47 }
 0x290   : > { %v7244_v36 = vpop.eup %5426  ;;  %5428 = vpow2.f32 %v1561_v26 }
 0x291   : > { %11043 = vst [vmem:[#allocation167_spill] sm:$0xff] %v7244_v36  ;;  %v1470_v16 = vpop.xlane.xlu2 %1469 }
 0x292   : > { %v7246_v42 = vmax.f32 %v1374_v48, %v1470_v16 }
 0x294   : > { %11044 = vst [vmem:[#allocation168_spill] sm:$0xff] %v7246_v42  ;;  %v1534_v1 = vsub.f32 %v1374_v48, %v7246_v42 }
 0x295   : > { %1631 = vst.msk [vmem:[#allocation2 + $0xf8] sm:$0xff] %vm10721_vm6, %v7246_v42 }
 0x296   : > { %v7251_v19 = vpop.eup %5428  ;;  %v1597_v11 = vmul.f32 1.442695, %v1534_v1  ;;  %v7253_v43 = vpop.permute.xlu0 %1753 }
 0x297   : > { %11045 = vst [vmem:[#allocation169_spill] sm:$0xff] %v7251_v19 }
 0x298   : > { %11046 = vst [vmem:[#allocation170_spill] sm:$0xff] %v7253_v43  ;;  %5430 = vpow2.f32 %v1597_v11 }
 0x299   : > { %v7259_v17 = vpop.permute.xlu2 %1756 }
 0x29a   : > { %11047 = vst [vmem:[#allocation171_spill] sm:$0xff] %v7259_v17 }
 0x29b   : > { %1832 = sbr.rel (!%p7062_p5) target bundleno = 1128 (0x468), region = 56 }
 0x29e   : > { %v7265_v16 = vpop.eup %5430 }
 0x29f   : > { %11048 = vst [vmem:[#allocation172_spill] sm:$0xff] %v7265_v16 }
 0x2a0   : > { %v5924_v48 = vmov 0   ;;  %v11049_v21 = vld [vmem:[#allocation72_spill] sm:$0xff]  ;;  %v1834_v1 = vlaneseq  ;;  %s5228_s30 = sshll.u32 %s5907_s28, 8  ;;  %s5229_s22 = sshll.u32 %s5903_s27, 8  ;;  %v11062_v47 = vmov 0 }
 0x2a1   : > { %5434 = vset.pattern.permute.xlu2 %v5924_v48  ;;  %5433 = vset.pattern.permute.xlu1 %v5924_v48 }
 0x2a2   : > { %5432 = vset.pattern.permute.xlu0 %v5924_v48  ;;  %2059 = vperm.xlu2 %5434, %v7075_v29   ;;  %v7301_v48 = vshrl.u32 %v1834_v1, 7 }
 0x2a3   : > { %2049 = vperm.xlu1 %5433, %v6842_v18   ;;  %2039 = vperm.xlu0 %5432, %v6781_v14  }
 0x2a4   : > { %v1838_v14 = vadd.s32 24, %v7301_v48 }
 0x2aa   : > { %2064 = vperm.xlu2 %5434, %v7070_v4  }
 0x2ab   : > { %2054 = vperm.xlu1 %5433, %v7034_v44   ;;  %2044 = vperm.xlu0 %5432, %v6802_v15   ;;  %v11060_v44 = vmov 0 }
 0x2b2   : > { %2079 = vperm.xlu2 %5434, %v7161_v7   ;;  %v11059_v7 = vld [vmem:[#allocation20_spill] sm:$0xff] }
 0x2b3   : > { %2074 = vperm.xlu1 %5433, %v7173_v63   ;;  %2069 = vperm.xlu0 %5432, %v7106_v62   ;;  %v11058_v62 = vld [vmem:[#allocation19_spill] sm:$0xff] }
 0x2ba   : > { %2094 = vperm.xlu2 %5434, %v7194_v45  }
 0x2bb   : > { %2089 = vperm.xlu1 %5433, %v7203_v0   ;;  %2084 = vperm.xlu0 %5432, %v7121_v52   ;;  %v11057_v0 = vld [vmem:[#allocation32_spill] sm:$0xff] }
 0x2c2   : > { %2109 = vperm.xlu2 %5434, %v7228_v22  }
 0x2c3   : > { %2104 = vperm.xlu1 %5433, %v7237_v3   ;;  %2099 = vperm.xlu0 %5432, %v7135_v41  }
 0x2ca   : > { %2124 = vperm.xlu2 %5434, %v6836_v33  }
 0x2cb   : > { %2119 = vperm.xlu1 %5433, %v11049_v21   ;;  %2114 = vperm.xlu0 %5432, %v7156_v56   ;;  %v1902_v21 = vand.u32 127, %v1834_v1  ;;  %v1840_v1 = vadd.s32 40, %v7301_v48 }
 0x2d2   : > { %2139 = vperm.xlu2 %5434, %v7045_v13  }
 0x2d3   : > { %2134 = vperm.xlu1 %5433, %v7054_v53   ;;  %2129 = vperm.xlu0 %5432, %v6872_v39   ;;  %v11053_v53 = vld [vmem:[#allocation60_spill] sm:$0xff] }
 0x2da   : > { %2154 = vperm.xlu2 %5434, %v7144_v9   ;;  %v7309_v9 = vstv %s5228_s30 }
 0x2db   : > { %2149 = vperm.xlu1 %5433, %v7154_v51   ;;  %2144 = vperm.xlu0 %5432, %v7093_v20   ;;  %v11051_v20 = vld [vmem:[#allocation62_spill] sm:$0xff]  ;;  %v11052_v51 = vld [vmem:[#allocation59_spill] sm:$0xff]  ;;  %v1873_v52 = vadd.s32 %v7309_v9, %v1840_v1  ;;  %v1836_v1 = vadd.s32 8, %v7301_v48 }
 0x2dd   : > { %v7391_v43 = vadd.s32 %v7309_v9, %v1836_v1 }
 0x2e2   : > { %2169 = vperm.xlu2 %5434, %v7178_v6   ;;  %v11050_v6 = vld [vmem:[#allocation61_spill] sm:$0xff] }
 0x2e3   : > { %2164 = vperm.xlu1 %5433, %v7189_v40   ;;  %2159 = vperm.xlu0 %5432, %v7114_v61  }
 0x2ea   : > { %2184 = vperm.xlu2 %5434, %v7214_v8   ;;  %v1903_v8 = vadd.s32 128, %v1902_v21 }
 0x2eb   : > { %2179 = vperm.xlu1 %5433, %v7223_v12   ;;  %2174 = vperm.xlu0 %5432, %v7128_v32   ;;  %v1839_v12 = vadd.s32 32, %v7301_v48 }
 0x2ed   : > { %v1872_v41 = vadd.s32 %v7309_v9, %v1839_v12 }
 0x2f3   : > { %2194 = vperm.xlu1 %5433, %v7246_v42   ;;  %2189 = vperm.xlu0 %5432, %v7142_v58   ;;  %v1904_v58 = vstv %s5229_s22 }
 0x2f4   : > { %v7313_v33 = vadd.s32 %v1904_v58, %v1902_v21 }
 0x2f6   : > { %vm10781_vm7 = vcmp.lt.s32.totalorder %v7313_v33, 400  ;;  %vm1915_vm6 = vcmp.ne.s32.totalorder %v1872_v41, %v7313_v33  ;;  %vm1917_vm0 = vcmp.ne.s32.totalorder %v1873_v52, %v7313_v33 }
 0x2f7   : > { %vm7346_vm4 = vmand %vm1915_vm6, %vm10781_vm7 }
 0x2fc   : > { %v2060_v26 = vpop.permute.xlu2 %2059 }
 0x2fd   : > { %v2205_v40 = vsub.f32 %v11050_v6, %v2060_v26  ;;  %v2206_v61 = vsub.f32 %v11051_v20, %v2060_v26  ;;  %v7315_v26 = vadd.s32 %v1904_v58, %v1903_v8 }
 0x2ff   : > { %v2277_v32 = vmul.f32 1.442695, %v2205_v40  ;;  %v2279_v39 = vmul.f32 1.442695, %v2206_v61  ;;  %v1837_v40 = vadd.s32 16, %v7301_v48  ;;  %v1843_v61 = vadd.s32 64, %v7301_v48 }
 0x300   : > { %vm10779_vm8 = vcmp.lt.s32.totalorder %v7315_v26, 400  ;;  %vm1916_vm5 = vcmp.ne.s32.totalorder %v1872_v41, %v7315_v26  ;;  %vm1918_vm15 = vcmp.ne.s32.totalorder %v1873_v52, %v7315_v26  ;;  %v1849_v41 = vadd.s32 112, %v7301_v48 }
 0x301   : > { %5435 = vpow2.f32 %v2277_v32  ;;  %v7326_v12 = vadd.s32 %v7309_v9, %v1837_v40  ;;  %v7334_v32 = vadd.s32 %v7309_v9, %v1843_v61  ;;  %v11056_v61 = vld [vmem:[#allocation31_spill] sm:$0xff]  ;;  %vm7358_vm9 = vmand %vm1916_vm5, %vm10779_vm8  ;;  %v1841_v52 = vadd.s32 48, %v7301_v48 }
 0x302   : > { %5437 = vpow2.f32 %v2279_v39  ;;  %v1846_v39 = vadd.s32 88, %v7301_v48  ;;  %v11061_v44 = vsel %vm7358_vm9, 4294967295, %v11060_v44  ;;  %vm7378_vm5 = vmand %vm1917_vm0, %vm10781_vm7  ;;  %v7414_v19 = vadd.s32 %v7309_v9, %v1849_v41  ;;  %v11071_v41 = vld [vmem:[#allocation25_spill] sm:$0xff] }
 0x303   : > { %vm1911_vm6 = vcmp.ne.s32.totalorder %v7326_v12, %v7313_v33  ;;  %vm1912_vm10 = vcmp.ne.s32.totalorder %v7326_v12, %v7315_v26  ;;  %v11063_v47 = vsel %vm7378_vm5, 4294967295, %v11062_v47  ;;  %vm1923_vm3 = vcmp.ne.s32.totalorder %v7334_v32, %v7313_v33  ;;  %vm7397_vm0 = vmand %vm1918_vm15, %vm10779_vm8 }
 0x304   : > { %v2065_v11 = vpop.permute.xlu2 %2064  ;;  %11064 = vst [vmem:[#allocation173_spill] sm:$0xff] %v11063_v47  ;;  %vm1924_vm2 = vcmp.ne.s32.totalorder %v7334_v32, %v7315_v26  ;;  %vm7433_vm13 = vmand %vm1911_vm6, %vm10781_vm7  ;;  %v11088_v32 = vld [vmem:[#allocation65_spill] sm:$0xff] }
 0x305   : > { %v2207_v42 = vsub.f32 %v11052_v51, %v2065_v11  ;;  %v2208_v13 = vsub.f32 %v11053_v53, %v2065_v11  ;;  %vm7448_vm15 = vmand %vm1912_vm10, %vm10779_vm8  ;;  %v1852_v53 = vadd.s32 136, %v7301_v48  ;;  %vm11100_vm10 = vcmp.ne.s32.totalorder %v7391_v43, %v7315_v26 }
 0x307   : > { %v2281_v3 = vmul.f32 1.442695, %v2207_v42  ;;  %v2283_v22 = vmul.f32 1.442695, %v2208_v13  ;;  %v5436_v58 = vpop.eup %5435 }
 0x308   : > { %v5438_v40 = vpop.eup %5437 }
 0x309   : > { %5439 = vpow2.f32 %v2281_v3  ;;  %v7338_v3 = vadd.s32 %v7309_v9, %v7301_v48 }
 0x30a   : > { %5441 = vpow2.f32 %v2283_v22  ;;  %v11054_v22 = vmov 0 }
 0x30b   : > { %v11055_v22 = vsel %vm7346_vm4, 4294967295, %v11054_v22  ;;  %vm1907_vm1 = vcmp.ne.s32.totalorder %v7338_v3, %v7313_v33  ;;  %vm1908_vm14 = vcmp.ne.s32.totalorder %v7338_v3, %v7315_v26 }
 0x30c   : > { %v2080_v56 = vpop.permute.xlu2 %2079  ;;  %vm7460_vm12 = vmand %vm1907_vm1, %vm10781_vm7 }
 0x30d   : > { %v2213_v11 = vsub.f32 %v6904_v37, %v2080_v56  ;;  %v2214_v4 = vsub.f32 %v6907_v30, %v2080_v56  ;;  %v11069_v30 = vld [vmem:[#allocation54_spill] sm:$0xff]  ;;  %vm7481_vm1 = vmand %vm1908_vm14, %vm10779_vm8 }
 0x30e   : > { %vm7500_vm14 = vmand %vm1923_vm3, %vm10781_vm7 }
 0x30f   : > { %v2293_v8 = vmul.f32 1.442695, %v2213_v11  ;;  %v5440_v29 = vpop.eup %5439  ;;  %vm7517_vm3 = vmand %vm1924_vm2, %vm10779_vm8 }
 0x310   : > { %v2399_v17 = vsel %vm7378_vm5, %v5440_v29, 0.0  ;;  %v11072_v29 = vmov 0  ;;  %vm11124_vm5 = vcmp.lt.s32.totalorder %v7313_v33, 400 }
 0x311   : > { %5443 = vpow2.f32 %v2293_v8  ;;  %v11073_v29 = vsel %vm7433_vm13, 4294967295, %v11072_v29 }
 0x312   : > { %11074 = vst [vmem:[#allocation175_spill] sm:$0xff] %v11073_v29 }
 0x314   : > { %v7330_v13 = vpop.permute.xlu2 %2094 }
 0x315   : > { %v2050_v42 = vpop.permute.xlu1 %2049  ;;  %v2040_v21 = vpop.permute.xlu0 %2039  ;;  %v2219_v16 = vsub.f32 %v6964_v24, %v7330_v13 }
 0x316   : > { %v2201_v11 = vsub.f32 %v11056_v61, %v2050_v42  ;;  %v2202_v45 = vsub.f32 %v11057_v0, %v2050_v42  ;;  %v2197_v63 = vsub.f32 %v11058_v62, %v2040_v21  ;;  %v2198_v15 = vsub.f32 %v11059_v7, %v2040_v21 }
 0x317   : > { %v7367_v42 = vadd.s32 %v7309_v9, %v1846_v39  ;;  %v2398_v39 = vsel %vm7358_vm9, %v5438_v40, 0.0  ;;  %v2295_v40 = vmul.f32 1.442695, %v2214_v4  ;;  %v2305_v36 = vmul.f32 1.442695, %v2219_v16 }
 0x318   : > { %v2269_v18 = vmul.f32 1.442695, %v2201_v11  ;;  %v2271_v21 = vmul.f32 1.442695, %v2202_v45  ;;  %v2261_v56 = vmul.f32 1.442695, %v2197_v63  ;;  %v5442_v11 = vpop.eup %5441  ;;  %v2220_v16 = vsub.f32 %v6967_v25, %v7330_v13 }
 0x319   : > { %v2397_v45 = vsel %vm7346_vm4, %v5436_v58, 0.0  ;;  %v2263_v63 = vmul.f32 1.442695, %v2198_v15  ;;  %v11065_v58 = vmov 0  ;;  %v7406_v15 = vadd.s32 %v7309_v9, %v1838_v14 }
 0x31a   : > { %v11066_v58 = vsel %vm7397_vm0, 4294967295, %v11065_v58  ;;  %5445 = vpow2.f32 %v2269_v18  ;;  %v7411_v1 = vadd.f32 %v2398_v39, %v2397_v45  ;;  %v2400_v14 = vsel %vm7397_vm0, %v5442_v11, 0.0  ;;  %v11070_v45 = vld [vmem:[#allocation24_spill] sm:$0xff]  ;;  %v7441_v11 = vpop.eup %5443 }
 0x31b   : > { %11067 = vst [vmem:[#allocation174_spill] sm:$0xff] %v11066_v58  ;;  %5447 = vpow2.f32 %v2271_v21  ;;  %v11068_v21 = vld [vmem:[#allocation53_spill] sm:$0xff]  ;;  %vm1913_vm11 = vcmp.ne.s32.totalorder %v7406_v15, %v7313_v33  ;;  %v7467_v12 = vadd.f32 %v2400_v14, %v2399_v17  ;;  %vm11093_vm6 = vcmp.ne.s32.totalorder %v7406_v15, %v7315_v26 }
 0x31c   : > { %v7408_v8 = vpop.permute.xlu2 %2109  ;;  %5449 = vpow2.f32 %v2261_v56  ;;  %vm7535_vm2 = vmand %vm1913_vm11, %vm10781_vm7  ;;  %vm11097_vm11 = vcmp.ne.s32.totalorder %v7391_v43, %v7313_v33 }
 0x31d   : > { %v2055_v4 = vpop.permute.xlu1 %2054  ;;  %v2045_v18 = vpop.permute.xlu0 %2044  ;;  %5451 = vpow2.f32 %v2263_v63  ;;  %v2225_v51 = vsub.f32 %v7022_v31, %v7408_v8  ;;  %v2226_v14 = vsub.f32 %v7019_v2, %v7408_v8  ;;  %vm7550_vm0 = vmand %vm11093_vm6, %vm10779_vm8 }
 0x31e   : > { %v2203_v24 = vsub.f32 %v11068_v21, %v2055_v4  ;;  %v2204_v37 = vsub.f32 %v11069_v30, %v2055_v4  ;;  %v2199_v39 = vsub.f32 %v11070_v45, %v2045_v18  ;;  %5453 = vpow2.f32 %v2295_v40  ;;  %v11089_v30 = vld [vmem:[#allocation66_spill] sm:$0xff]  ;;  %vm7566_vm6 = vmand %vm11097_vm11, %vm10781_vm7 }
 0x31f   : > { %v2200_v56 = vsub.f32 %v11071_v41, %v2045_v18  ;;  %v11075_v40 = vmov 0  ;;  %v1842_v4 = vadd.s32 56, %v7301_v48  ;;  %5455 = vpow2.f32 %v2305_v36 }
 0x320   : > { %v2273_v13 = vmul.f32 1.442695, %v2203_v24  ;;  %v2275_v63 = vmul.f32 1.442695, %v2204_v37  ;;  %v11076_v40 = vsel %vm7448_vm15, 4294967295, %v11075_v40  ;;  %v5446_v18 = vpop.eup %5445  ;;  %v7465_v24 = vadd.s32 %v7309_v9, %v1841_v52 }
 0x321   : > { %11077 = vst [vmem:[#allocation176_spill] sm:$0xff] %v11076_v40  ;;  %v2265_v25 = vmul.f32 1.442695, %v2199_v39  ;;  %v5448_v39 = vpop.eup %5447  ;;  %v2267_v58 = vmul.f32 1.442695, %v2200_v56  ;;  %v2393_v47 = vsel %vm7433_vm13, %v5446_v18, 0.0  ;;  %v7505_v8 = vadd.s32 %v7309_v9, %v1842_v4 }
 0x322   : > { %v5450_v36 = vpop.eup %5449  ;;  %v2307_v52 = vmul.f32 1.442695, %v2220_v16  ;;  %5457 = vpow2.f32 %v2273_v13  ;;  %v2394_v56 = vsel %vm7448_vm15, %v5448_v39, 0.0  ;;  %v11082_v16 = vmov 0 }
 0x323   : > { %v5452_v18 = vpop.eup %5451  ;;  %5459 = vpow2.f32 %v2275_v63  ;;  %v2587_v31 = vadd.f32 %v2394_v56, %v2393_v47  ;;  %v2389_v3 = vsel %vm7460_vm12, %v5450_v36, 0.0  ;;  %v11083_v16 = vsel %vm7500_vm14, 4294967295, %v11082_v16 }
 0x324   : > { %v7493_v0 = vpop.permute.xlu2 %2124  ;;  %11084 = vst [vmem:[#allocation177_spill] sm:$0xff] %v11083_v16  ;;  %v5454_v47 = vpop.eup %5453  ;;  %5461 = vpow2.f32 %v2265_v25  ;;  %v2390_v13 = vsel %vm7481_vm1, %v5452_v18, 0.0  ;;  %v1844_v36 = vadd.s32 72, %v7301_v48  ;;  %v11085_v4 = vmov 0 }
 0x325   : > { %v2075_v63 = vpop.permute.xlu1 %2074  ;;  %v2070_v39 = vpop.permute.xlu0 %2069  ;;  %v11086_v4 = vsel %vm7517_vm3, 4294967295, %v11085_v4  ;;  %v7524_v25 = vadd.s32 %v7309_v9, %v1852_v53  ;;  %v2317_v56 = vmul.f32 1.442695, %v2225_v51  ;;  %5463 = vpow2.f32 %v2267_v58  ;;  %2588 = vadd.xlane.f32.xlu1 %v2587_v31  ;;  %v11092_v51 = vld [vmem:[#allocation29_spill] sm:$0xff] }
 0x326   : > { %11087 = vst [vmem:[#allocation178_spill] sm:$0xff] %v11086_v4  ;;  %v2581_v18 = vadd.f32 %v2390_v13, %v2389_v3  ;;  %5465 = vpow2.f32 %v2307_v52  ;;  %v2319_v2 = vmul.f32 1.442695, %v2226_v14  ;;  %v2209_v61 = vsub.f32 %v11088_v32, %v2070_v39  ;;  %v7541_v31 = vpop.eup %5455 }
 0x327   : > { %v2210_v21 = vsub.f32 %v11089_v30, %v2070_v39  ;;  %v11090_v53 = vmov 0  ;;  %v2231_v58 = vsub.f32 %v11092_v51, %v7493_v0  ;;  %v11094_v52 = vmov 0 }
 0x328   : > { %v11091_v53 = vsel %vm7535_vm2, 4294967295, %v11090_v53  ;;  %2582 = vadd.xlane.f32.xlu2 %v2581_v18  ;;  %v11095_v52 = vsel %vm7550_vm0, 4294967295, %v11094_v52  ;;  %v2405_v14 = vsel %vm7500_vm14, %v7441_v11, 0.0  ;;  %v2406_v3 = vsel %vm7517_vm3, %v5454_v47, 0.0  ;;  %v5458_v39 = vpop.eup %5457  ;;  %vm7580_vm3 = vmand %vm11100_vm10, %vm10779_vm8 }
 0x329   : > { %11096 = vst [vmem:[#allocation179_spill] sm:$0xff] %v11095_v52  ;;  %v1845_v13 = vadd.s32 80, %v7301_v48  ;;  %v2211_v18 = vsub.f32 %v6624_v28, %v2075_v63  ;;  %v2285_v51 = vmul.f32 1.442695, %v2209_v61  ;;  %v7571_v11 = vadd.s32 %v7309_v9, %v1844_v36  ;;  %v5460_v4 = vpop.eup %5459 }
 0x32a   : > { %v1855_v47 = vadd.s32 160, %v7301_v48  ;;  %5467 = vpow2.f32 %v2317_v56  ;;  %v2212_v16 = vsub.f32 %v6626_v60, %v2075_v63  ;;  %v2287_v20 = vmul.f32 1.442695, %v2210_v21  ;;  %v5462_v6 = vpop.eup %5461  ;;  %v11103_v63 = vld [vmem:[#allocation30_spill] sm:$0xff] }
 0x32b   : > { %v2395_v36 = vsel %vm7535_vm2, %v5458_v39, 0.0  ;;  %5469 = vpow2.f32 %v2319_v2  ;;  %v2232_v21 = vsub.f32 %v11103_v63, %v7493_v0  ;;  %v2396_v56 = vsel %vm7550_vm0, %v5460_v4, 0.0  ;;  %v5464_v43 = vpop.eup %5463 }
 0x32c   : > { %v7592_v40 = vadd.f32 %v2406_v3, %v2405_v14  ;;  %v2329_v29 = vmul.f32 1.442695, %v2231_v58  ;;  %v2391_v39 = vsel %vm7566_vm6, %v5462_v6, 0.0  ;;  %v2590_v7 = vadd.f32 %v2396_v56, %v2395_v36  ;;  %v7598_v62 = vpop.permute.xlu2 %2139  ;;  %v5466_v4 = vpop.eup %5465 }
 0x32d   : > { %vm11104_vm11 = vcmp.ne.s32.totalorder %v7367_v42, %v7313_v33  ;;  %v11105_v0 = vmov 0  ;;  %v7610_v2 = vadd.s32 %v7309_v9, %v1845_v13  ;;  %v2289_v6 = vmul.f32 1.442695, %v2211_v18  ;;  %v2090_v14 = vpop.permute.xlu1 %2089  ;;  %v2085_v3 = vpop.permute.xlu0 %2084 }
 0x32e   : > { %vm7605_vm8 = vmand %vm11104_vm11, %vm10781_vm7  ;;  %5471 = vpow2.f32 %v2285_v51  ;;  %v2392_v58 = vsel %vm7580_vm3, %v5464_v43, 0.0  ;;  %vm11108_vm14 = vcmp.lt.s32.totalorder %v7315_v26, 400  ;;  %vm11109_vm11 = vcmp.ne.s32.totalorder %v7367_v42, %v7315_v26  ;;  %v11113_v43 = vld [vmem:[#allocation70_spill] sm:$0xff]  ;;  %v11114_v42 = vld [vmem:[#allocation71_spill] sm:$0xff] }
 0x32f   : > { %v11106_v0 = vsel %vm7605_vm8, 4294967295, %v11105_v0  ;;  %vm7621_vm7 = vmand %vm11109_vm11, %vm11108_vm14  ;;  %v11110_v36 = vmov 0  ;;  %v7628_v13 = vadd.s32 %v7309_v9, %v1855_v47  ;;  %v2291_v51 = vmul.f32 1.442695, %v2212_v16 }
 0x330   : > { %11107 = vst [vmem:[#allocation180_spill] sm:$0xff] %v11106_v0  ;;  %v11111_v36 = vsel %vm7621_vm7, 4294967295, %v11110_v36  ;;  %5473 = vpow2.f32 %v2287_v20  ;;  %v2584_v18 = vadd.f32 %v2392_v58, %v2391_v39  ;;  %v2331_v56 = vmul.f32 1.442695, %v2232_v21  ;;  %v7646_v16 = vpop.eup %5467  ;;  %2591 = vadd.xlane.f32.xlu2 %v2590_v7  ;;  %v11132_v0 = vld [vmem:[#allocation56_spill] sm:$0xff] }
 0x331   : > { %11112 = vst [vmem:[#allocation181_spill] sm:$0xff] %v11111_v36  ;;  %v2215_v63 = vsub.f32 %v11113_v43, %v2085_v3  ;;  %v2216_v52 = vsub.f32 %v11114_v42, %v2085_v3  ;;  %v1847_v30 = vadd.s32 96, %v7301_v48  ;;  %vm11115_vm11 = vcmp.lt.s32.totalorder %v7313_v33, 400 }
 0x332   : > { %vm11116_vm10 = vcmp.ne.s32.totalorder %v7414_v19, %v7313_v33  ;;  %v11117_v20 = vmov 0  ;;  %5475 = vpow2.f32 %v2329_v29  ;;  %2585 = vadd.xlane.f32.xlu0 %v2584_v18  ;;  %v2217_v47 = vsub.f32 %v6980_v27, %v2090_v14  ;;  %v5470_v29 = vpop.eup %5469 }
 0x333   : > { %vm7642_vm15 = vmand %vm11116_vm10, %vm11115_vm11  ;;  %v2411_v21 = vsel %vm7605_vm8, %v7541_v31, 0.0  ;;  %v2412_v39 = vsel %vm7621_vm7, %v5466_v4, 0.0  ;;  %vm11120_vm10 = vcmp.ne.s32.totalorder %v7414_v19, %v7315_v26  ;;  %v11121_v58 = vmov 0  ;;  %v11128_v4 = vld [vmem:[#allocation55_spill] sm:$0xff] }
 0x334   : > { %v11118_v20 = vsel %vm7642_vm15, 4294967295, %v11117_v20  ;;  %vm7659_vm11 = vmand %vm11120_vm10, %vm11108_vm14  ;;  %5477 = vpow2.f32 %v2289_v6  ;;  %v2218_v7 = vsub.f32 %v6983_v23, %v2090_v14  ;;  %v2297_v3 = vmul.f32 1.442695, %v2215_v63  ;;  %v5472_v14 = vpop.eup %5471  ;;  %v2155_v23 = vpop.permute.xlu2 %2154 }
 0x335   : > { %11119 = vst [vmem:[#allocation182_spill] sm:$0xff] %v11118_v20  ;;  %v11122_v58 = vsel %vm7659_vm11, 4294967295, %v11121_v58  ;;  %vm11125_vm8 = vcmp.ne.s32.totalorder %v7465_v24, %v7313_v33  ;;  %v11126_v31 = vmov 0  ;;  %v1850_v19 = vadd.s32 120, %v7301_v48 }
 0x336   : > { %11123 = vst [vmem:[#allocation183_spill] sm:$0xff] %v11122_v58  ;;  %vm7669_vm7 = vmand %vm11125_vm8, %vm11124_vm5  ;;  %5479 = vpow2.f32 %v2291_v51  ;;  %v2237_v18 = vsub.f32 %v11128_v4, %v7598_v62  ;;  %v2299_v36 = vmul.f32 1.442695, %v2216_v52  ;;  %vm11129_vm10 = vcmp.ne.s32.totalorder %v7465_v24, %v7315_v26  ;;  %v5474_v24 = vpop.eup %5473 }
 0x337   : > { %v11127_v31 = vsel %vm7669_vm7, 4294967295, %v11126_v31  ;;  %vm7681_vm13 = vmand %vm11129_vm10, %vm11108_vm14  ;;  %v11130_v63 = vmov 0  ;;  %v1848_v6 = vadd.s32 104, %v7301_v48  ;;  %5481 = vpow2.f32 %v2331_v56 }
 0x338   : > { %v11131_v63 = vsel %vm7681_vm13, 4294967295, %v11130_v63  ;;  %v2238_v51 = vsub.f32 %v11132_v0, %v7598_v62  ;;  %v7689_v42 = vadd.s32 %v7309_v9, %v1847_v30  ;;  %v7691_v52 = vadd.f32 %v2412_v39, %v2411_v21  ;;  %v2100_v39 = vpop.permute.xlu0 %2099  ;;  %vm11133_vm14 = vmmov %vm11124_vm5  ;;  %2594 = vadd.xlane.f32.xlu2 %v7411_v1 }
 0x339   : > { %v2301_v4 = vmul.f32 1.442695, %v2217_v47  ;;  %v2401_v43 = vsel %vm7669_vm7, %v5472_v14, 0.0  ;;  %v2417_v62 = vsel %vm7642_vm15, %v7646_v16, 0.0  ;;  %v2418_v30 = vsel %vm7659_vm11, %v5470_v29, 0.0  ;;  %v2105_v47 = vpop.permute.xlu1 %2104  ;;  %v7718_v29 = vpop.eup %5475 }
 0x33a   : > { %v2303_v56 = vmul.f32 1.442695, %v2218_v7  ;;  %5483 = vpow2.f32 %v2297_v3  ;;  %v2402_v21 = vsel %vm7681_vm13, %v5474_v24, 0.0  ;;  %vm11134_vm10 = vcmp.ne.s32.totalorder %v7505_v8, %v7313_v33  ;;  %v5478_v58 = vpop.eup %5477  ;;  %2597 = vadd.xlane.f32.xlu0 %v7467_v12 }
 0x33b   : > { %vm7711_vm5 = vmand %vm11134_vm10, %vm11133_vm14  ;;  %v7716_v16 = vadd.s32 %v7309_v9, %v1850_v19  ;;  %v2341_v7 = vmul.f32 1.442695, %v2237_v18  ;;  %5485 = vpow2.f32 %v2299_v36  ;;  %v2599_v3 = vadd.f32 %v2402_v21, %v2401_v43  ;;  %v11141_v36 = vld [vmem:[#allocation80_spill] sm:$0xff] }
 0x33c   : > { %vm11137_vm8 = vcmp.lt.s32.totalorder %v7315_v26, 400  ;;  %vm11138_vm11 = vcmp.ne.s32.totalorder %v7505_v8, %v7315_v26  ;;  %v11139_v24 = vmov 0  ;;  %v7730_v0 = vadd.s32 %v7309_v9, %v1848_v6  ;;  %v5480_v21 = vpop.eup %5479 }
 0x33d   : > { %vm7725_vm15 = vmand %vm11138_vm11, %vm11137_vm8  ;;  %v2343_v19 = vmul.f32 1.442695, %v2238_v51  ;;  %v2243_v20 = vsub.f32 %v6875_v34, %v2155_v23  ;;  %v2221_v18 = vsub.f32 %v6838_v55, %v2100_v39  ;;  %v2222_v43 = vsub.f32 %v11141_v36, %v2100_v39  ;;  %2600 = vadd.xlane.f32.xlu1 %v2599_v3 }
 0x33e   : > { %v11140_v24 = vsel %vm7725_vm15, 4294967295, %v11139_v24  ;;  %vm11142_vm10 = vcmp.ne.s32.totalorder %v7524_v25, %v7313_v33  ;;  %v11143_v8 = vmov 0  ;;  %5487 = vpow2.f32 %v2301_v4  ;;  %vm11146_vm2 = vmmov %vm11137_vm8  ;;  %v5482_v4 = vpop.eup %5481 }
 0x33f   : > { %vm7740_vm11 = vmand %vm11142_vm10, %vm11133_vm14  ;;  %v2223_v6 = vsub.f32 %v7032_v38, %v2105_v47  ;;  %vm11147_vm14 = vcmp.ne.s32.totalorder %v7524_v25, %v7315_v26  ;;  %v11148_v51 = vmov 0  ;;  %5489 = vpow2.f32 %v2303_v56 }
 0x340   : > { %v11144_v8 = vsel %vm7740_vm11, 4294967295, %v11143_v8  ;;  %vm7755_vm10 = vmand %vm11147_vm14, %vm11146_vm2  ;;  %v2224_v12 = vsub.f32 %v7029_v54, %v2105_v47  ;;  %v2309_v39 = vmul.f32 1.442695, %v2221_v18  ;;  %vm11151_vm8 = vcmp.lt.s32.totalorder %v7313_v33, 400  ;;  %v5484_v47 = vpop.eup %5483  ;;  %v2115_v36 = vpop.permute.xlu0 %2114 }
 0x341   : > { %11145 = vst [vmem:[#allocation184_spill] sm:$0xff] %v11144_v8  ;;  %v11149_v51 = vsel %vm7755_vm10, 4294967295, %v11148_v51  ;;  %vm11152_vm0 = vcmp.ne.s32.totalorder %v7571_v11, %v7313_v33  ;;  %v11153_v3 = vmov 0  ;;  %v7770_v25 = vadd.f32 %v2418_v30, %v2417_v62 }
 0x342   : > { %11150 = vst [vmem:[#allocation185_spill] sm:$0xff] %v11149_v51  ;;  %vm7766_vm13 = vmand %vm11152_vm0, %vm11151_vm8  ;;  %5491 = vpow2.f32 %v2341_v7  ;;  %v2244_v34 = vsub.f32 %v6878_v46, %v2155_v23  ;;  %v2311_v56 = vmul.f32 1.442695, %v2222_v43  ;;  %vm11155_vm14 = vcmp.ne.s32.totalorder %v7571_v11, %v7315_v26  ;;  %v5486_v11 = vpop.eup %5485  ;;  %v7792_v43 = vpop.permute.xlu2 %2169  ;;  %2606 = vadd.xlane.f32.xlu0 %v7592_v40 }
 0x343   : > { %v11154_v3 = vsel %vm7766_vm13, 4294967295, %v11153_v3  ;;  %vm7778_vm9 = vmand %vm11155_vm14, %vm11146_vm2  ;;  %v11156_v1 = vmov 0  ;;  %5493 = vpow2.f32 %v2343_v19  ;;  %v2353_v62 = vmul.f32 1.442695, %v2243_v20 }
 0x344   : > { %v11157_v1 = vsel %vm7778_vm9, 4294967295, %v11156_v1  ;;  %v2403_v30 = vsel %vm7711_vm5, %v5478_v58, 0.0  ;;  %v2404_v23 = vsel %vm7725_vm15, %v5480_v21, 0.0  ;;  %v2313_v7 = vmul.f32 1.442695, %v2223_v6  ;;  %v2120_v21 = vpop.permute.xlu1 %2119  ;;  %v5488_v55 = vpop.eup %5487  ;;  %vm11158_vm2 = vmmov %vm11151_vm8 }
 0x345   : > { %v2407_v18 = vsel %vm7766_vm13, %v5484_v47, 0.0  ;;  %v1853_v46 = vadd.s32 144, %v7301_v48  ;;  %v2423_v20 = vsel %vm7740_vm11, %v7718_v29, 0.0  ;;  %v2315_v58 = vmul.f32 1.442695, %v2224_v12  ;;  %v5490_v12 = vpop.eup %5489 }
 0x346   : > { %5495 = vpow2.f32 %v2309_v39  ;;  %v2408_v19 = vsel %vm7778_vm9, %v5486_v11, 0.0  ;;  %v2424_v6 = vsel %vm7755_vm10, %v5482_v4, 0.0  ;;  %v2355_v47 = vmul.f32 1.442695, %v2244_v34 }
 0x347   : > { %5497 = vpow2.f32 %v2311_v56  ;;  %v2608_v54 = vadd.f32 %v2408_v19, %v2407_v18  ;;  %v2602_v38 = vadd.f32 %v2404_v23, %v2403_v30  ;;  %vm11159_vm14 = vcmp.ne.s32.totalorder %v7610_v2, %v7313_v33  ;;  %v11166_v23 = vld [vmem:[#allocation22_spill] sm:$0xff] }
 0x348   : > { %vm7807_vm8 = vmand %vm11159_vm14, %vm11158_vm2  ;;  %v11160_v29 = vmov 0  ;;  %5499 = vpow2.f32 %v2353_v62  ;;  %v2227_v39 = vsub.f32 %v6901_v5, %v2115_v36  ;;  %v2228_v4 = vsub.f32 %v6899_v10, %v2115_v36  ;;  %v7825_v30 = vpop.eup %5491 }
 0x349   : > { %v11161_v29 = vsel %vm7807_vm8, 4294967295, %v11160_v29  ;;  %vm11162_vm0 = vcmp.lt.s32.totalorder %v7315_v26, 400  ;;  %vm11163_vm10 = vcmp.ne.s32.totalorder %v7610_v2, %v7315_v26  ;;  %v11164_v34 = vmov 0  ;;  %2609 = vadd.xlane.f32.xlu1 %v2608_v54  ;;  %v7835_v62 = vpop.eup %5493  ;;  %2603 = vadd.xlane.f32.xlu2 %v2602_v38 }
 0x34a   : > { %vm7818_vm11 = vmand %vm11163_vm10, %vm11162_vm0  ;;  %v1851_v56 = vadd.s32 128, %v7301_v48  ;;  %5501 = vpow2.f32 %v2313_v7  ;;  %v2249_v36 = vsub.f32 %v6933_v35, %v7792_v43  ;;  %v7833_v2 = vadd.s32 %v7309_v9, %v1853_v46  ;;  %v11172_v46 = vld [vmem:[#allocation23_spill] sm:$0xff]  ;;  %v7900_v5 = vpop.permute.xlu2 %2184  ;;  %2615 = vadd.xlane.f32.xlu0 %v7691_v52 }
 0x34b   : > { %v11165_v34 = vsel %vm7818_vm11, 4294967295, %v11164_v34  ;;  %5503 = vpow2.f32 %v2315_v58  ;;  %v2229_v11 = vsub.f32 %v11166_v23, %v2120_v21  ;;  %v2321_v18 = vmul.f32 1.442695, %v2227_v39  ;;  %vm11167_vm0 = vmmov %vm11158_vm2 }
 0x34c   : > { %vm11168_vm14 = vcmp.ne.s32.totalorder %v7689_v42, %v7313_v33  ;;  %v11169_v54 = vmov 0  ;;  %v7847_v40 = vadd.f32 %v2424_v6, %v2423_v20  ;;  %v2230_v7 = vsub.f32 %v11172_v46, %v2120_v21  ;;  %v5496_v20 = vpop.eup %5495 }
 0x34d   : > { %vm7843_vm2 = vmand %vm11168_vm14, %vm11167_vm0  ;;  %v2323_v19 = vmul.f32 1.442695, %v2228_v4  ;;  %vm11173_vm10 = vcmp.lt.s32.totalorder %v7315_v26, 400  ;;  %vm11174_vm9 = vcmp.ne.s32.totalorder %v7689_v42, %v7315_v26  ;;  %v11175_v38 = vmov 0  ;;  %v5498_v4 = vpop.eup %5497 }
 0x34e   : > { %v11170_v54 = vsel %vm7843_vm2, 4294967295, %v11169_v54  ;;  %vm7855_vm13 = vmand %vm11174_vm9, %vm11173_vm10  ;;  %v2409_v58 = vsel %vm7807_vm8, %v5488_v55, 0.0  ;;  %v2410_v39 = vsel %vm7818_vm11, %v5490_v12, 0.0  ;;  %5505 = vpow2.f32 %v2355_v47  ;;  %v7875_v55 = vpop.eup %5499 }
 0x34f   : > { %11171 = vst [vmem:[#allocation186_spill] sm:$0xff] %v11170_v54  ;;  %v11176_v38 = vsel %vm7855_vm13, 4294967295, %v11175_v38  ;;  %v2250_v21 = vsub.f32 %v6936_v59, %v7792_v43  ;;  %v7866_v6 = vadd.s32 %v7309_v9, %v1851_v56  ;;  %v1856_v42 = vadd.s32 168, %v7301_v48  ;;  %v2135_v56 = vpop.permute.xlu1 %2134  ;;  %v2130_v59 = vpop.permute.xlu0 %2129  ;;  %vm11183_vm10 = vmmov %vm11167_vm0  ;;  %v11211_v54 = vld [vmem:[#allocation64_spill] sm:$0xff] }
 0x350   : > { %11177 = vst [vmem:[#allocation187_spill] sm:$0xff] %v11176_v38  ;;  %v2365_v35 = vmul.f32 1.442695, %v2249_v36  ;;  %v2413_v51 = vsel %vm7843_vm2, %v5496_v20, 0.0  ;;  %v2325_v47 = vmul.f32 1.442695, %v2229_v11  ;;  %5507 = vpow2.f32 %v2321_v18  ;;  %v5502_v20 = vpop.eup %5501 }
 0x351   : > { %v2414_v43 = vsel %vm7855_vm13, %v5498_v4, 0.0  ;;  %v2611_v12 = vadd.f32 %v2410_v39, %v2409_v58  ;;  %vm11178_vm14 = vcmp.ne.s32.totalorder %v7716_v16, %v7313_v33  ;;  %v11179_v36 = vmov 0  ;;  %v11182_v18 = vld [vmem:[#allocation57_spill] sm:$0xff]  ;;  %v5504_v39 = vpop.eup %5503  ;;  %v11209_v38 = vld [vmem:[#allocation47_spill] sm:$0xff] }
 0x352   : > { %vm7884_vm2 = vmand %vm11178_vm14, %vm11167_vm0  ;;  %v2327_v8 = vmul.f32 1.442695, %v2230_v7  ;;  %5509 = vpow2.f32 %v2323_v19  ;;  %v2617_v11 = vadd.f32 %v2414_v43, %v2413_v51  ;;  %v2235_v10 = vsub.f32 %v11182_v18, %v2135_v56  ;;  %v11187_v7 = vld [vmem:[#allocation36_spill] sm:$0xff]  ;;  %v11188_v19 = vld [vmem:[#allocation37_spill] sm:$0xff]  ;;  %2624 = vadd.xlane.f32.xlu0 %v7770_v25 }
 0x353   : > { %v11180_v36 = vsel %vm7884_vm2, 4294967295, %v11179_v36  ;;  %vm11184_vm9 = vcmp.ne.s32.totalorder %v7730_v0, %v7313_v33  ;;  %v11185_v58 = vmov 0  ;;  %v2367_v4 = vmul.f32 1.442695, %v2250_v21  ;;  %2612 = vadd.xlane.f32.xlu2 %v2611_v12  ;;  %v11221_v25 = vld [vmem:[#allocation107_spill] sm:$0xff] }
 0x354   : > { %11181 = vst [vmem:[#allocation188_spill] sm:$0xff] %v11180_v36  ;;  %vm7894_vm13 = vmand %vm11184_vm9, %vm11183_vm10  ;;  %v2233_v51 = vsub.f32 %v11187_v7, %v2130_v59  ;;  %v2234_v43 = vsub.f32 %v11188_v19, %v2130_v59  ;;  %vm11189_vm14 = vcmp.lt.s32.totalorder %v7315_v26, 400  ;;  %vm11190_vm11 = vcmp.ne.s32.totalorder %v7730_v0, %v7315_v26  ;;  %2618 = vadd.xlane.f32.xlu1 %v2617_v11  ;;  %v11193_v59 = vld [vmem:[#allocation58_spill] sm:$0xff]  ;;  %v7930_v7 = vpop.eup %5505 }
 0x355   : > { %v11186_v58 = vsel %vm7894_vm13, 4294967295, %v11185_v58  ;;  %vm7909_vm9 = vmand %vm11190_vm11, %vm11189_vm14  ;;  %v11191_v18 = vmov 0  ;;  %5511 = vpow2.f32 %v2365_v35  ;;  %v2236_v21 = vsub.f32 %v11193_v59, %v2135_v56 }
 0x356   : > { %v11192_v18 = vsel %vm7909_vm9, 4294967295, %v11191_v18  ;;  %v2337_v19 = vmul.f32 1.442695, %v2235_v10  ;;  %vm11194_vm11 = vmmov %vm11167_vm0  ;;  %vm11195_vm14 = vcmp.ne.s32.totalorder %v7628_v13, %v7313_v33  ;;  %v11196_v0 = vmov 0  ;;  %v5508_v11 = vpop.eup %5507 }
 0x357   : > { %vm7926_vm4 = vmand %vm11195_vm14, %vm11194_vm11  ;;  %5513 = vpow2.f32 %v2325_v47  ;;  %v2333_v35 = vmul.f32 1.442695, %v2233_v51  ;;  %v2415_v10 = vsel %vm7894_vm13, %v5502_v20, 0.0  ;;  %vm11199_vm10 = vcmp.lt.s32.totalorder %v7315_v26, 400  ;;  %v2150_v46 = vpop.permute.xlu1 %2149 }
 0x358   : > { %v11197_v0 = vsel %vm7926_vm4, 4294967295, %v11196_v0  ;;  %vm11200_vm8 = vcmp.ne.s32.totalorder %v7628_v13, %v7315_v26  ;;  %v11201_v52 = vmov 0  ;;  %v1854_v56 = vadd.s32 152, %v7301_v48  ;;  %vm11204_vm11 = vmmov %vm11199_vm10 }
 0x359   : > { %11198 = vst [vmem:[#allocation189_spill] sm:$0xff] %v11197_v0  ;;  %vm7939_vm0 = vmand %vm11200_vm8, %vm11199_vm10  ;;  %5515 = vpow2.f32 %v2327_v8  ;;  %v2255_v47 = vsub.f32 %v6994_v57, %v7900_v5  ;;  %v2335_v12 = vmul.f32 1.442695, %v2234_v43  ;;  %vm11205_vm14 = vcmp.ne.s32.totalorder %v7716_v16, %v7315_v26  ;;  %v5510_v57 = vpop.eup %5509  ;;  %v2145_v0 = vpop.permute.xlu0 %2144 }
 0x35a   : > { %v11202_v52 = vsel %vm7939_vm0, 4294967295, %v11201_v52  ;;  %vm7951_vm13 = vmand %vm11205_vm14, %vm11204_vm11  ;;  %v11206_v20 = vmov 0  ;;  %v2416_v13 = vsel %vm7909_vm9, %v5504_v39, 0.0  ;;  %5517 = vpow2.f32 %v2367_v4  ;;  %2633 = vadd.xlane.f32.xlu0 %v7847_v40 }
 0x35b   : > { %11203 = vst [vmem:[#allocation190_spill] sm:$0xff] %v11202_v52  ;;  %v11207_v20 = vsel %vm7951_vm13, 4294967295, %v11206_v20  ;;  %v7958_v8 = vadd.s32 %v7309_v9, %v1856_v42  ;;  %v2429_v51 = vsel %vm7926_vm4, %v7825_v30, 0.0  ;;  %v1858_v43 = vadd.s32 184, %v7301_v48  ;;  %v7972_v23 = vpop.eup %5511 }
 0x35c   : > { %11208 = vst [vmem:[#allocation191_spill] sm:$0xff] %v11207_v20  ;;  %5519 = vpow2.f32 %v2337_v19  ;;  %v2339_v16 = vmul.f32 1.442695, %v2236_v21  ;;  %v2419_v59 = vsel %vm7884_vm2, %v5508_v11, 0.0  ;;  %v2430_v39 = vsel %vm7939_vm0, %v7835_v62, 0.0  ;;  %v11210_v62 = vld [vmem:[#allocation63_spill] sm:$0xff] }
 0x35d   : > { %5521 = vpow2.f32 %v2333_v35  ;;  %v2420_v42 = vsel %vm7951_vm13, %v5510_v57, 0.0  ;;  %v2620_v4 = vadd.f32 %v2416_v13, %v2415_v10  ;;  %v1887_v30 = vadd.s32 %v7309_v9, %v1854_v56  ;;  %v5514_v36 = vpop.eup %5513  ;;  %v11216_v56 = vld [vmem:[#allocation48_spill] sm:$0xff] }
 0x35e   : > { %v2377_v19 = vmul.f32 1.442695, %v2255_v47  ;;  %5523 = vpow2.f32 %v2335_v12  ;;  %v2626_v21 = vadd.f32 %v2420_v42, %v2419_v59  ;;  %v1859_v11 = vadd.s32 192, %v7301_v48 }
 0x35f   : > { %v2241_v52 = vsub.f32 %v11209_v38, %v2150_v46  ;;  %v2239_v35 = vsub.f32 %v11210_v62, %v2145_v0  ;;  %v2240_v20 = vsub.f32 %v11211_v54, %v2145_v0  ;;  %vm11212_vm8 = vcmp.lt.s32.totalorder %v7313_v33, 400  ;;  %v5516_v10 = vpop.eup %5515  ;;  %2621 = vadd.xlane.f32.xlu2 %v2620_v4 }
 0x360   : > { %vm11213_vm10 = vcmp.ne.s32.totalorder %v7866_v6, %v7313_v33  ;;  %v11214_v57 = vmov 0  ;;  %v1891_v59 = vadd.s32 %v7309_v9, %v1858_v43  ;;  %5525 = vpow2.f32 %v2339_v16  ;;  %2627 = vadd.xlane.f32.xlu1 %v2626_v21  ;;  %v8003_v12 = vpop.eup %5517  ;;  %vm11222_vm13 = vmmov %vm11212_vm8 }
 0x361   : > { %vm7983_vm11 = vmand %vm11213_vm10, %vm11212_vm8  ;;  %v2242_v47 = vsub.f32 %v11216_v56, %v2150_v46  ;;  %vm11217_vm14 = vcmp.lt.s32.totalorder %v7315_v26, 400  ;;  %vm11218_vm0 = vcmp.ne.s32.totalorder %v7866_v6, %v7315_v26  ;;  %v11219_v0 = vmov 0 }
 0x362   : > { %v11215_v57 = vsel %vm7983_vm11, 4294967295, %v11214_v57  ;;  %vm7995_vm4 = vmand %vm11218_vm0, %vm11217_vm14  ;;  %v2256_v46 = vsub.f32 %v11221_v25, %v7900_v5  ;;  %v2345_v13 = vmul.f32 1.442695, %v2239_v35  ;;  %v2347_v43 = vmul.f32 1.442695, %v2240_v20  ;;  %v5520_v16 = vpop.eup %5519 }
 0x363   : > { %v11220_v0 = vsel %vm7995_vm4, 4294967295, %v11219_v0  ;;  %vm11223_vm0 = vcmp.ne.s32.totalorder %v7833_v2, %v7313_v33  ;;  %v11224_v6 = vmov 0  ;;  %vm1945_vm8 = vcmp.ne.s32.totalorder %v1887_v30, %v7313_v33  ;;  %v5522_v4 = vpop.eup %5521 }
 0x364   : > { %vm8012_vm14 = vmand %vm11223_vm0, %vm11222_vm13  ;;  %5527 = vpow2.f32 %v2377_v19  ;;  %vm11227_vm10 = vcmp.lt.s32.totalorder %v7315_v26, 400  ;;  %vm11228_vm2 = vcmp.ne.s32.totalorder %v7833_v2, %v7315_v26  ;;  %v11229_v5 = vmov 0  ;;  %v5524_v2 = vpop.eup %5523 }
 0x365   : > { %v11225_v6 = vsel %vm8012_vm14, 4294967295, %v11224_v6  ;;  %vm8022_vm9 = vmand %vm11228_vm2, %vm11227_vm10  ;;  %v2421_v20 = vsel %vm7983_vm11, %v5514_v36, 0.0  ;;  %v1857_v42 = vadd.s32 176, %v7301_v48  ;;  %v2349_v21 = vmul.f32 1.442695, %v2241_v52 }
 0x366   : > { %11226 = vst [vmem:[#allocation192_spill] sm:$0xff] %v11225_v6  ;;  %v11230_v5 = vsel %vm8022_vm9, 4294967295, %v11229_v5  ;;  %v2422_v19 = vsel %vm7995_vm4, %v5516_v10, 0.0  ;;  %v8033_v35 = vadd.s32 %v7309_v9, %v1859_v11  ;;  %v2351_v25 = vmul.f32 1.442695, %v2242_v47  ;;  %vm11232_vm10 = vmmov %vm11222_vm13  ;;  %v2165_v47 = vpop.permute.xlu1 %2164  ;;  %v5526_v62 = vpop.eup %5525 }
 0x367   : > { %11231 = vst [vmem:[#allocation193_spill] sm:$0xff] %v11230_v5  ;;  %5529 = vpow2.f32 %v2345_v13  ;;  %v2425_v36 = vsel %vm8012_vm14, %v5522_v4, 0.0  ;;  %vm8042_vm0 = vmand %vm1945_vm8, %vm11232_vm10  ;;  %v11233_v52 = vmov 0  ;;  %v8047_v11 = vmul.f32 1.442695, %v2256_v46  ;;  %v2160_v13 = vpop.permute.xlu0 %2159  ;;  %v11239_v46 = vld [vmem:[#allocation67_spill] sm:$0xff] }
 0x368   : > { %v11234_v52 = vsel %vm8042_vm0, 4294967295, %v11233_v52  ;;  %5531 = vpow2.f32 %v2347_v43  ;;  %v2426_v10 = vsel %vm8022_vm9, %v5524_v2, 0.0  ;;  %v2641_v54 = vadd.f32 %v2430_v39, %v2429_v51  ;;  %vm11240_vm8 = vmmov %vm11232_vm10  ;;  %v11245_v39 = vld [vmem:[#allocation68_spill] sm:$0xff]  ;;  %v11269_v5 = vld [vmem:[#allocation75_spill] sm:$0xff] }
 0x369   : > { %vm11235_vm2 = vcmp.lt.s32.totalorder %v7315_v26, 400  ;;  %vm11236_vm14 = vcmp.ne.s32.totalorder %v1887_v30, %v7315_v26  ;;  %v11237_v4 = vmov 0  ;;  %v2635_v56 = vadd.f32 %v2426_v10, %v2425_v36 }
 0x36a   : > { %vm8055_vm4 = vmand %vm11236_vm14, %vm11235_vm2  ;;  %v2629_v38 = vadd.f32 %v2422_v19, %v2421_v20  ;;  %v2245_v6 = vsub.f32 %v11239_v46, %v2160_v13  ;;  %vm11241_vm10 = vcmp.ne.s32.totalorder %v1891_v59, %v7313_v33  ;;  %v11242_v43 = vmov 0  ;;  %v8080_v36 = vpop.eup %5527  ;;  %2642 = vadd.xlane.f32.xlu0 %v2641_v54 }
 0x36b   : > { %v11238_v4 = vsel %vm8055_vm4, 4294967295, %v11237_v4  ;;  %vm8064_vm13 = vmand %vm11241_vm10, %vm11240_vm8  ;;  %v1890_v51 = vadd.s32 %v7309_v9, %v1857_v42  ;;  %5533 = vpow2.f32 %v2349_v21  ;;  %v2246_v30 = vsub.f32 %v11245_v39, %v2160_v13  ;;  %2636 = vadd.xlane.f32.xlu1 %v2635_v56  ;;  %v11255_v56 = vld [vmem:[#allocation100_spill] sm:$0xff]  ;;  %v11261_v13 = vld [vmem:[#allocation101_spill] sm:$0xff] }
 0x36c   : > { %v11243_v43 = vsel %vm8064_vm13, 4294967295, %v11242_v43  ;;  %vm11246_vm14 = vmmov %vm11235_vm2  ;;  %vm11247_vm2 = vcmp.ne.s32.totalorder %v1891_v59, %v7315_v26  ;;  %v11248_v20 = vmov 0  ;;  %v1862_v19 = vadd.s32 216, %v7301_v48  ;;  %2630 = vadd.xlane.f32.xlu2 %v2629_v38 }
 0x36d   : > { %11244 = vst [vmem:[#allocation194_spill] sm:$0xff] %v11243_v43  ;;  %vm8074_vm9 = vmand %vm11247_vm2, %vm11246_vm14  ;;  %v1861_v2 = vadd.s32 208, %v7301_v48  ;;  %5535 = vpow2.f32 %v2351_v25  ;;  %v2357_v42 = vmul.f32 1.442695, %v2245_v6  ;;  %vm11251_vm10 = vcmp.ne.s32.totalorder %v7958_v8, %v7313_v33  ;;  %v5530_v38 = vpop.eup %5529 }
 0x36e   : > { %v11249_v20 = vsel %vm8074_vm9, 4294967295, %v11248_v20  ;;  %vm8088_vm14 = vmand %vm11251_vm10, %vm11240_vm8  ;;  %v11252_v59 = vmov 0  ;;  %v2427_v21 = vsel %vm8042_vm0, %v5520_v16, 0.0  ;;  %vm1955_vm2 = vcmp.ne.s32.totalorder %v8033_v35, %v7313_v33 }
 0x36f   : > { %11250 = vst [vmem:[#allocation195_spill] sm:$0xff] %v11249_v20  ;;  %v11253_v59 = vsel %vm8088_vm14, 4294967295, %v11252_v59  ;;  %v2247_v25 = vsub.f32 %v11255_v56, %v2165_v47  ;;  %v2359_v40 = vmul.f32 1.442695, %v2246_v30  ;;  %vm11256_vm11 = vcmp.lt.s32.totalorder %v7315_v26, 400  ;;  %vm11262_vm10 = vmmov %vm11240_vm8  ;;  %v2180_v20 = vpop.permute.xlu1 %2179 }
 0x370   : > { %11254 = vst [vmem:[#allocation196_spill] sm:$0xff] %v11253_v59  ;;  %vm11257_vm7 = vcmp.ne.s32.totalorder %v7958_v8, %v7315_v26  ;;  %v11258_v6 = vmov 0  ;;  %v2428_v10 = vsel %vm8055_vm4, %v5526_v62, 0.0  ;;  %v2435_v16 = vsel %vm8064_vm13, %v7875_v55, 0.0  ;;  %v5532_v8 = vpop.eup %5531 }
 0x371   : > { %vm8102_vm15 = vmand %vm11257_vm7, %vm11256_vm11  ;;  %v2248_v39 = vsub.f32 %v11261_v13, %v2165_v47  ;;  %v2436_v30 = vsel %vm8074_vm9, %v7930_v7, 0.0  ;;  %v2431_v46 = vsel %vm8088_vm14, %v5530_v38, 0.0  ;;  %v1895_v62 = vadd.s32 %v7309_v9, %v1862_v19  ;;  %v2175_v13 = vpop.permute.xlu0 %2174 }
 0x372   : > { %v11259_v6 = vsel %vm8102_vm15, 4294967295, %v11258_v6  ;;  %v8121_v43 = vadd.s32 %v7309_v9, %v1861_v2  ;;  %v1860_v55 = vadd.s32 200, %v7301_v48  ;;  %5537 = vpow2.f32 %v2357_v42  ;;  %vm8133_vm7 = vmand %vm1955_vm2, %vm11262_vm10  ;;  %v5534_v2 = vpop.eup %5533 }
 0x373   : > { %11260 = vst [vmem:[#allocation197_spill] sm:$0xff] %v11259_v6  ;;  %v2432_v47 = vsel %vm8102_vm15, %v5532_v8, 0.0  ;;  %v2638_v7 = vadd.f32 %v2428_v10, %v2427_v21  ;;  %v11263_v19 = vmov 0  ;;  %v2361_v38 = vmul.f32 1.442695, %v2247_v25  ;;  %v5536_v8 = vpop.eup %5535  ;;  %v11268_v6 = vld [vmem:[#allocation74_spill] sm:$0xff] }
 0x374   : > { %v11264_v19 = vsel %vm8133_vm7, 4294967295, %v11263_v19  ;;  %5539 = vpow2.f32 %v2359_v40  ;;  %v2644_v42 = vadd.f32 %v2432_v47, %v2431_v46  ;;  %vm11265_vm9 = vcmp.ne.s32.totalorder %v1890_v51, %v7313_v33 }
 0x375   : > { %vm8141_vm11 = vmand %vm11265_vm9, %vm11240_vm8  ;;  %v11266_v21 = vmov 0  ;;  %v1865_v10 = vadd.s32 240, %v7301_v48  ;;  %v2363_v56 = vmul.f32 1.442695, %v2248_v39  ;;  %v2251_v59 = vsub.f32 %v11268_v6, %v2175_v13  ;;  %2639 = vadd.xlane.f32.xlu2 %v2638_v7  ;;  %v11296_v6 = vld [vmem:[#allocation84_spill] sm:$0xff] }
 0x376   : > { %v11267_v21 = vsel %vm8141_vm11, 4294967295, %v11266_v21  ;;  %v2252_v25 = vsub.f32 %v11269_v5, %v2175_v13  ;;  %v2650_v40 = vadd.f32 %v2436_v30, %v2435_v16  ;;  %vm11270_vm2 = vcmp.lt.s32.totalorder %v7315_v26, 400  ;;  %v11274_v16 = vld [vmem:[#allocation27_spill] sm:$0xff]  ;;  %2645 = vadd.xlane.f32.xlu1 %v2644_v42  ;;  %v11284_v42 = vld [vmem:[#allocation108_spill] sm:$0xff] }
 0x377   : > { %vm11271_vm10 = vcmp.ne.s32.totalorder %v1890_v51, %v7315_v26  ;;  %v11272_v46 = vmov 0  ;;  %vm1961_vm9 = vcmp.ne.s32.totalorder %v1895_v62, %v7313_v33  ;;  %vm1962_vm8 = vcmp.ne.s32.totalorder %v1895_v62, %v7315_v26 }
 0x378   : > { %vm8152_vm13 = vmand %vm11271_vm10, %vm11270_vm2  ;;  %v1893_v39 = vadd.s32 %v7309_v9, %v1860_v55  ;;  %vm11275_vm14 = vcmp.eq.s32.totalorder %v11274_v16, %v6378_v49  ;;  %v2369_v13 = vmul.f32 1.442695, %v2251_v59  ;;  %vm11278_vm10 = vcmp.ne.s32.totalorder %v8033_v35, %v7315_v26  ;;  %2651 = vadd.xlane.f32.xlu0 %v2650_v40 }
 0x379   : > { %v11273_v46 = vsel %vm8152_vm13, 4294967295, %v11272_v46  ;;  %vm8166_vm4 = vmand %vm11275_vm14, %vm7566_vm6  ;;  %v11279_v30 = vmov 0  ;;  %v2433_v15 = vsel %vm8141_vm11, %v5534_v2, 0.0  ;;  %v1864_v55 = vadd.s32 232, %v7301_v48  ;;  %v5538_v2 = vpop.eup %5537 }
 0x37a   : > { %vm8175_vm15 = vmand %vm11278_vm10, %vm11270_vm2  ;;  %5541 = vpow2.f32 %v2361_v38  ;;  %v2371_v54 = vmul.f32 1.442695, %v2252_v25  ;;  %v2434_v59 = vsel %vm8152_vm13, %v5536_v8, 0.0  ;;  %v1898_v35 = vadd.s32 %v7309_v9, %v1865_v10  ;;  %v5540_v10 = vpop.eup %5539  ;;  %v11285_v25 = vld [vmem:[#allocation109_spill] sm:$0xff] }
 0x37b   : > { %v11280_v30 = vsel %vm8175_vm15, 4294967295, %v11279_v30  ;;  %vm11281_vm14 = vcmp.eq.s32.totalorder %v11274_v16, %v6380_v50  ;;  %5543 = vpow2.f32 %v2363_v56  ;;  %v2253_v38 = vsub.f32 %v11284_v42, %v2180_v20 }
 0x37c   : > { %vm8192_vm2 = vmand %vm11281_vm14, %vm7580_vm3  ;;  %v1863_v7 = vadd.s32 224, %v7301_v48  ;;  %v2775_v8 = vsel %vm8166_vm4, %v11070_v45, 0.0  ;;  %v2254_v61 = vsub.f32 %v11285_v25, %v2180_v20  ;;  %v2437_v16 = vsel %vm8133_vm7, %v5538_v2, 0.0 }
 0x37d   : > { %vm11286_vm3 = vcmp.lt.s32.totalorder %v7313_v33, 400  ;;  %v11287_v56 = vmov 0  ;;  %5545 = vpow2.f32 %v2369_v13  ;;  %v2438_v45 = vsel %vm8175_vm15, %v5540_v10, 0.0  ;;  %v2190_v13 = vpop.permute.xlu0 %2189 }
 0x37e   : > { %vm8208_vm10 = vmand %vm1961_vm9, %vm11286_vm3  ;;  %vm11289_vm4 = vcmp.lt.s32.totalorder %v7315_v26, 400  ;;  %v11290_v20 = vmov 0  ;;  %v1897_v51 = vadd.s32 %v7309_v9, %v1864_v55  ;;  %v2776_v2 = vsel %vm8192_vm2, %v11071_v41, 0.0  ;;  %v11297_v41 = vld [vmem:[#allocation85_spill] sm:$0xff] }
 0x37f   : > { %v11288_v56 = vsel %vm8208_vm10, 4294967295, %v11287_v56  ;;  %vm8220_vm7 = vmand %vm1962_vm8, %vm11289_vm4  ;;  %5547 = vpow2.f32 %v2371_v54  ;;  %v2653_v5 = vadd.f32 %v2438_v45, %v2437_v16  ;;  %v11294_v62 = vmov 0 }
 0x380   : > { %v11291_v20 = vsel %vm8220_vm7, 4294967295, %v11290_v20  ;;  %vm11292_vm9 = vmmov %vm11286_vm3  ;;  %vm11293_vm3 = vcmp.ne.s32.totalorder %v8121_v43, %v7313_v33  ;;  %v8238_v10 = vadd.f32 %v2776_v2, %v2775_v8  ;;  %v2373_v55 = vmul.f32 1.442695, %v2253_v38  ;;  %v5542_v25 = vpop.eup %5541  ;;  %v2195_v2 = vpop.permute.xlu1 %2194 }
 0x381   : > { %vm8233_vm6 = vmand %vm11293_vm3, %vm11292_vm9  ;;  %v2257_v47 = vsub.f32 %v11296_v6, %v2190_v13  ;;  %v2258_v54 = vsub.f32 %v11297_v41, %v2190_v13  ;;  %v11300_v16 = vmov 0  ;;  %v1896_v45 = vadd.s32 %v7309_v9, %v1863_v7  ;;  %v5544_v13 = vpop.eup %5543  ;;  %2654 = vadd.xlane.f32.xlu1 %v2653_v5 }
 0x382   : > { %v11295_v62 = vsel %vm8233_vm6, 4294967295, %v11294_v62  ;;  %vm11298_vm2 = vmmov %vm11289_vm4  ;;  %vm11299_vm4 = vcmp.ne.s32.totalorder %v8121_v43, %v7315_v26  ;;  %v2375_v42 = vmul.f32 1.442695, %v2254_v61  ;;  %v2647_v8 = vadd.f32 %v2434_v59, %v2433_v15 }
 0x383   : > { %vm8247_vm14 = vmand %vm11299_vm4, %vm11298_vm2  ;;  %vm11302_vm3 = vcmp.ne.s32.totalorder %v1893_v39, %v7313_v33  ;;  %v11303_v38 = vmov 0  ;;  %v1866_v43 = vadd.s32 248, %v7301_v48  ;;  %5549 = vpow2.f32 %v8047_v11  ;;  %v5546_v40 = vpop.eup %5545 }
 0x384   : > { %v11301_v16 = vsel %vm8247_vm14, 4294967295, %v11300_v16  ;;  %vm8256_vm8 = vmand %vm11302_vm3, %vm11292_vm9  ;;  %v2381_v7 = vmul.f32 1.442695, %v2257_v47  ;;  %vm11305_vm4 = vcmp.ne.s32.totalorder %v1893_v39, %v7315_v26  ;;  %v11306_v15 = vmov 0  ;;  %2648 = vadd.xlane.f32.xlu2 %v2647_v8  ;;  %v11312_v39 = vld [vmem:[#allocation116_spill] sm:$0xff] }
 0x385   : > { %v11304_v38 = vsel %vm8256_vm8, 4294967295, %v11303_v38  ;;  %vm8267_vm13 = vmand %vm11305_vm4, %vm11298_vm2  ;;  %v2383_v59 = vmul.f32 1.442695, %v2258_v54  ;;  %v2441_v48 = vsel %vm8233_vm6, %v7972_v23, 0.0  ;;  %v2442_v5 = vsel %vm8247_vm14, %v8003_v12, 0.0  ;;  %v5548_v47 = vpop.eup %5547  ;;  %v11317_v54 = vld [vmem:[#allocation117_spill] sm:$0xff] }
 0x386   : > { %v11307_v15 = vsel %vm8267_vm13, 4294967295, %v11306_v15  ;;  %vm11308_vm3 = vmmov %vm11292_vm9  ;;  %vm11309_vm15 = vcmp.ne.s32.totalorder %v1898_v35, %v7313_v33  ;;  %v11310_v11 = vmov 0  ;;  %5551 = vpow2.f32 %v2373_v55 }
 0x387   : > { %vm8282_vm2 = vmand %vm11309_vm15, %vm11308_vm3  ;;  %v2259_v61 = vsub.f32 %v11312_v39, %v2195_v2  ;;  %vm11313_vm9 = vcmp.lt.s32.totalorder %v7315_v26, 400  ;;  %vm11314_vm6 = vcmp.ne.s32.totalorder %v1898_v35, %v7315_v26  ;;  %v11315_v23 = vmov 0 }
 0x388   : > { %v11311_v11 = vsel %vm8282_vm2, 4294967295, %v11310_v11  ;;  %vm8292_vm11 = vmand %vm11314_vm6, %vm11313_vm9  ;;  %v1899_v12 = vadd.s32 %v7309_v9, %v1866_v43  ;;  %5553 = vpow2.f32 %v2375_v42  ;;  %v2260_v8 = vsub.f32 %v11317_v54, %v2195_v2 }
 0x389   : > { %v11316_v23 = vsel %vm8292_vm11, 4294967295, %v11315_v23  ;;  %v2443_v55 = vsel %vm8208_vm10, %v5546_v40, 0.0  ;;  %vm11318_vm15 = vmmov %vm11308_vm3  ;;  %vm11319_vm3 = vcmp.ne.s32.totalorder %v1897_v51, %v7313_v33  ;;  %v11320_v35 = vmov 0 }
 0x38a   : > { %vm8305_vm4 = vmand %vm11319_vm3, %vm11318_vm15  ;;  %vm1964_vm6 = vcmp.ne.s32.totalorder %v1896_v45, %v7315_v26  ;;  %5555 = vpow2.f32 %v2381_v7  ;;  %v2444_v9 = vsel %vm8220_vm7, %v5548_v47, 0.0  ;;  %v2439_v42 = vsel %vm8256_vm8, %v5542_v25, 0.0  ;;  %v5550_v25 = vpop.eup %5549 }
 0x38b   : > { %v11321_v35 = vsel %vm8305_vm4, 4294967295, %v11320_v35  ;;  %v2440_v2 = vsel %vm8267_vm13, %v5544_v13, 0.0  ;;  %vm11322_vm14 = vcmp.ne.s32.totalorder %v1897_v51, %v7315_v26  ;;  %v11323_v43 = vmov 0  ;;  %vm11329_vm13 = vmmov %vm11313_vm9 }
 0x38c   : > { %vm8320_vm15 = vmand %vm11322_vm14, %vm11313_vm9  ;;  %5557 = vpow2.f32 %v2383_v59  ;;  %v2662_v40 = vadd.f32 %v2444_v9, %v2443_v55  ;;  %vm11325_vm3 = vcmp.lt.s32.totalorder %v7313_v33, 400  ;;  %vm11326_vm7 = vcmp.ne.s32.totalorder %v1896_v45, %v7313_v33  ;;  %v11332_v45 = vld [vmem:[#allocation28_spill] sm:$0xff] }
 0x38d   : > { %v11324_v43 = vsel %vm8320_vm15, 4294967295, %v11323_v43  ;;  %vm8328_vm10 = vmand %vm11326_vm7, %vm11325_vm3  ;;  %v11327_v7 = vmov 0  ;;  %v2385_v13 = vmul.f32 1.442695, %v2259_v61  ;;  %v2659_v47 = vadd.f32 %v2442_v5, %v2441_v48  ;;  %v5552_v48 = vpop.eup %5551  ;;  %v11597_v61 = vld [vmem:[#allocation56_spill] sm:$0xff] }
 0x38e   : > { %v11328_v7 = vsel %vm8328_vm10, 4294967295, %v11327_v7  ;;  %vm8334_vm8 = vmand %vm1964_vm6, %vm11329_vm13  ;;  %v11330_v51 = vmov 0  ;;  %vm1969_vm14 = vcmp.ne.s32.totalorder %v1899_v12, %v7313_v33  ;;  %v2387_v59 = vmul.f32 1.442695, %v2260_v8  ;;  %2663 = vadd.xlane.f32.xlu1 %v2662_v40  ;;  %v5554_v37 = vpop.eup %5553  ;;  %v11370_v33 = vld [vmem:[#allocation66_spill] sm:$0xff] }
 0x38f   : > { %v11331_v51 = vsel %vm8334_vm8, 4294967295, %v11330_v51  ;;  %v2656_v55 = vadd.f32 %v2440_v2, %v2439_v42  ;;  %vm11333_vm7 = vcmp.eq.s32.totalorder %v11332_v45, %v6378_v49  ;;  %2660 = vadd.xlane.f32.xlu0 %v2659_v47  ;;  %vm11336_vm13 = vcmp.eq.s32.totalorder %v11332_v45, %v6380_v50  ;;  %v11341_v2 = vld [vmem:[#allocation39_spill] sm:$0xff]  ;;  %v11351_v45 = vld [vmem:[#allocation34_spill] sm:$0xff] }
 0x390   : > { %vm8344_vm9 = vmand %vm11333_vm7, %vm7460_vm12  ;;  %v5556_v8 = vpop.eup %5555  ;;  %5559 = vpow2.f32 %v2385_v13  ;;  %v2447_v17 = vsel %vm8305_vm4, %v8080_v36, 0.0  ;;  %v2448_v42 = vsel %vm8320_vm15, %v5550_v25, 0.0  ;;  %v2445_v25 = vsel %vm8328_vm10, %v5552_v48, 0.0 }
 0x391   : > { %vm8353_vm6 = vmand %vm11336_vm13, %vm7481_vm1  ;;  %2657 = vadd.xlane.f32.xlu2 %v2656_v55  ;;  %vm11342_vm1 = vcmp.eq.s32.totalorder %v11341_v2, %v6378_v49  ;;  %5561 = vpow2.f32 %v2387_v59  ;;  %v2449_v13 = vsel %vm8282_vm2, %v5556_v8, 0.0  ;;  %vm11345_vm13 = vnez %v11140_v24  ;;  %v11348_v24 = vld [vmem:[#allocation17_spill] sm:$0xff] }
 0x392   : > { %vm8359_vm12 = vmand %vm1969_vm14, %vm11325_vm3  ;;  %v5558_v40 = vpop.eup %5557  ;;  %vm11346_vm3 = vcmp.eq.s32.totalorder %v11341_v2, %v6380_v50  ;;  %v2446_v47 = vsel %vm8334_vm8, %v5554_v37, 0.0  ;;  %vm11355_vm4 = vnez %v11061_v44  ;;  %v2668_v37 = vadd.f32 %v2448_v42, %v2447_v17  ;;  %v11366_v2 = vld [vmem:[#allocation35_spill] sm:$0xff] }
 0x393   : > { %vm8373_vm7 = vmand %vm11342_vm1, %vm7711_vm5  ;;  %v2450_v36 = vsel %vm8292_vm11, %v5558_v40, 0.0  ;;  %vm11347_vm5 = vnez %v11127_v31  ;;  %vm11349_vm1 = vcmp.eq.s32.totalorder %v11348_v24, %v6378_v49  ;;  %vm11362_vm2 = vcmp.ne.s32.totalorder %v1899_v12, %v7315_v26  ;;  %v11371_v42 = vld [vmem:[#allocation179_spill] sm:$0xff]  ;;  %v11377_v40 = vld [vmem:[#allocation41_spill] sm:$0xff] }
 0x394   : > { %vm2468_vm15 = vmand %vm11346_vm3, %vm11345_vm13  ;;  %v2787_v14 = vsel %vm8373_vm7, %v6624_v28, 0.0  ;;  %v2671_v55 = vadd.f32 %v2450_v36, %v2449_v13  ;;  %vm11350_vm7 = vnez %v11055_v22  ;;  %vm11352_vm3 = vcmp.eq.s32.totalorder %v11351_v45, %v6378_v49  ;;  %v11417_v31 = vld [vmem:[#allocation187_spill] sm:$0xff] }
 0x395   : > { %v2788_v59 = vsel %vm2468_vm15, %v6626_v60, 0.0  ;;  %vm2465_vm13 = vmand %vm11349_vm1, %vm11347_vm5  ;;  %vm11356_vm15 = vcmp.eq.s32.totalorder %v11351_v45, %v6380_v50  ;;  %vm11359_vm5 = vnez %v11131_v63  ;;  %vm11360_vm1 = vcmp.eq.s32.totalorder %v11348_v24, %v6380_v50  ;;  %v11422_v63 = vld [vmem:[#allocation32_spill] sm:$0xff] }
 0x396   : > { %vm8405_vm14 = vmand %vm11352_vm3, %vm11350_vm7  ;;  %v8418_v48 = vadd.f32 %v2788_v59, %v2787_v14  ;;  %v2785_v22 = vsel %vm2465_vm13, %v11088_v32, 0.0  ;;  %vm11361_vm3 = vcmp.lt.s32.totalorder %v7315_v26, 400  ;;  %v2665_v17 = vadd.f32 %v2446_v47, %v2445_v25  ;;  %v5560_v12 = vpop.eup %5559  ;;  %2672 = vadd.xlane.f32.xlu1 %v2671_v55  ;;  %v11379_v14 = vld [vmem:[#allocation19_spill] sm:$0xff]  ;;  %v11380_v25 = vld [vmem:[#allocation20_spill] sm:$0xff] }
 0x397   : > { %vm8414_vm11 = vmand %vm11356_vm15, %vm11355_vm4  ;;  %vm11365_vm4 = vnez %v11091_v53  ;;  %vm11367_vm15 = vcmp.eq.s32.totalorder %v11366_v2, %v6378_v49  ;;  %vm11372_vm13 = vnez %v11371_v42  ;;  %2669 = vadd.xlane.f32.xlu0 %v2668_v37  ;;  %v5562_v13 = vpop.eup %5561  ;;  %v2773_v36 = vsel %vm8344_vm9, %v11379_v14, 0.0  ;;  %v11383_v59 = vld [vmem:[#allocation105_spill] sm:$0xff]  ;;  %v11385_v55 = vld [vmem:[#allocation18_spill] sm:$0xff] }
 0x398   : > { %vm2466_vm7 = vmand %vm11360_vm1, %vm11359_vm5  ;;  %vm11376_vm1 = vnez %v11161_v29  ;;  %v2774_v47 = vsel %vm8353_vm6, %v11380_v25, 0.0  ;;  %vm11387_vm6 = vnez %v11157_v1  ;;  %v11390_v37 = vld [vmem:[#allocation175_spill] sm:$0xff]  ;;  %v11407_v14 = vld [vmem:[#allocation113_spill] sm:$0xff] }
 0x399   : > { %vm8430_vm8 = vmand %vm11362_vm2, %vm11361_vm3  ;;  %v2786_v32 = vsel %vm2466_vm7, %v11370_v33, 0.0  ;;  %vm11373_vm2 = vcmp.eq.s32.totalorder %v11366_v2, %v6380_v50  ;;  %vm11378_vm7 = vcmp.eq.s32.totalorder %v11377_v40, %v6378_v49  ;;  %2666 = vadd.xlane.f32.xlu2 %v2665_v17  ;;  %v2837_v45 = vadd.f32 %v2774_v47, %v2773_v36  ;;  %v11392_v2 = vld [vmem:[#allocation16_spill] sm:$0xff]  ;;  %v11396_v33 = vld [vmem:[#allocation71_spill] sm:$0xff] }
 0x39a   : > { %vm8439_vm10 = vmand %vm11367_vm15, %vm11365_vm4  ;;  %v8453_v53 = vadd.f32 %v2786_v32, %v2785_v22  ;;  %vm11381_vm4 = vnez %v11165_v34  ;;  %vm11382_vm15 = vcmp.eq.s32.totalorder %v11377_v40, %v6380_v50  ;;  %v11389_v34 = vld [vmem:[#allocation70_spill] sm:$0xff]  ;;  %v2451_v22 = vsel %vm8359_vm12, %v5560_v12, 0.0  ;;  %v11397_v17 = vld [vmem:[#allocation176_spill] sm:$0xff] }
 0x39b   : > { %vm8449_vm5 = vmand %vm11373_vm2, %vm11372_vm13  ;;  %vm11384_vm2 = vnez %v11154_v3  ;;  %v2452_v3 = vsel %vm8430_vm8, %v5562_v13, 0.0  ;;  %v11403_v40 = vld [vmem:[#allocation43_spill] sm:$0xff]  ;;  %v11408_v25 = vld [vmem:[#allocation61_spill] sm:$0xff] }
 0x39c   : > { %vm2473_vm3 = vmand %vm11378_vm7, %vm11376_vm1  ;;  %vm11386_vm1 = vcmp.eq.s32.totalorder %v11385_v55, %v6378_v49  ;;  %vm11388_vm7 = vcmp.eq.s32.totalorder %v11385_v55, %v6380_v50  ;;  %v2674_v13 = vadd.f32 %v2452_v3, %v2451_v22  ;;  %v11409_v47 = vld [vmem:[#allocation62_spill] sm:$0xff]  ;;  %v11413_v55 = vld [vmem:[#allocation21_spill] sm:$0xff] }
 0x39d   : > { %vm2474_vm13 = vmand %vm11382_vm15, %vm11381_vm4  ;;  %v2793_v29 = vsel %vm2473_vm3, %v6980_v27, 0.0  ;;  %vm11391_vm3 = vnez %v11390_v37  ;;  %vm11393_vm4 = vcmp.eq.s32.totalorder %v11392_v2, %v6378_v49  ;;  %v11420_v22 = vld [vmem:[#allocation79_spill] sm:$0xff]  ;;  %v11423_v26 = vld [vmem:[#allocation80_spill] sm:$0xff] }
 0x39e   : > { %v2794_v24 = vsel %vm2474_vm13, %v11383_v59, 0.0  ;;  %vm2471_vm9 = vmand %vm11386_vm1, %vm11384_vm2  ;;  %vm11398_vm13 = vnez %v11397_v17  ;;  %vm11399_vm2 = vcmp.eq.s32.totalorder %v11392_v2, %v6380_v50  ;;  %2841 = vadd.xlane.f32.xlu1 %v8238_v10  ;;  %v11410_v59 = vld [vmem:[#allocation112_spill] sm:$0xff]  ;;  %v11421_v37 = vld [vmem:[#allocation31_spill] sm:$0xff] }
 0x39f   : > { %v8478_v9 = vadd.f32 %v2794_v24, %v2793_v29  ;;  %vm2472_vm0 = vmand %vm11388_vm7, %vm11387_vm6  ;;  %v2791_v5 = vsel %vm2471_vm9, %v11389_v34, 0.0  ;;  %vm11402_vm9 = vnez %v11186_v58  ;;  %vm11404_vm6 = vcmp.eq.s32.totalorder %v11403_v40, %v6378_v49  ;;  %2838 = vadd.xlane.f32.xlu0 %v2837_v45  ;;  %v11415_v34 = vld [vmem:[#allocation53_spill] sm:$0xff]  ;;  %v11430_v1 = vld [vmem:[#allocation174_spill] sm:$0xff] }
 0x3a0   : > { %vm8495_vm15 = vmand %vm11393_vm4, %vm11391_vm3  ;;  %v2792_v32 = vsel %vm2472_vm0, %v11396_v33, 0.0  ;;  %vm11405_vm0 = vnez %v11192_v18  ;;  %vm11406_vm3 = vcmp.eq.s32.totalorder %v11403_v40, %v6380_v50  ;;  %v2781_v58 = vsel %vm8405_vm14, %v11408_v25, 0.0  ;;  %v11411_v18 = vld [vmem:[#allocation186_spill] sm:$0xff]  ;;  %v11426_v25 = vld [vmem:[#allocation40_spill] sm:$0xff] }
 0x3a1   : > { %vm8505_vm1 = vmand %vm11399_vm2, %vm11398_vm13  ;;  %v8509_v12 = vadd.f32 %v2792_v32, %v2791_v5  ;;  %v2782_v29 = vsel %vm8414_vm11, %v11409_v47, 0.0  ;;  %vm11412_vm13 = vnez %v11411_v18  ;;  %vm11414_vm2 = vcmp.eq.s32.totalorder %v11413_v55, %v6378_v49  ;;  %2675 = vadd.xlane.f32.xlu2 %v2674_v13  ;;  %v11416_v5 = vld [vmem:[#allocation54_spill] sm:$0xff] }
 0x3a2   : > { %vm2479_vm7 = vmand %vm11404_vm6, %vm11402_vm9  ;;  %v2779_v10 = vsel %vm8439_vm10, %v11415_v34, 0.0  ;;  %v2780_v8 = vsel %vm8449_vm5, %v11416_v5, 0.0  ;;  %vm11418_vm11 = vnez %v11417_v31  ;;  %vm11419_vm14 = vcmp.eq.s32.totalorder %v11413_v55, %v6380_v50  ;;  %v11442_v55 = vld [vmem:[#allocation188_spill] sm:$0xff]  ;;  %v11446_v34 = vld [vmem:[#allocation59_spill] sm:$0xff] }
 0x3a3   : > { %vm2480_vm4 = vmand %vm11406_vm3, %vm11405_vm0  ;;  %v2799_v36 = vsel %vm2479_vm7, %v11407_v14, 0.0  ;;  %v2777_v2 = vsel %vm8495_vm15, %v11421_v37, 0.0  ;;  %v2778_v33 = vsel %vm8505_vm1, %v11422_v63, 0.0  ;;  %v2849_v40 = vadd.f32 %v2782_v29, %v2781_v58  ;;  %v11436_v58 = vld [vmem:[#allocation45_spill] sm:$0xff]  ;;  %v11440_v29 = vld [vmem:[#allocation22_spill] sm:$0xff] }
 0x3a4   : > { %v2800_v24 = vsel %vm2480_vm4, %v11410_v59, 0.0  ;;  %vm2477_vm9 = vmand %vm11414_vm2, %vm11412_vm13  ;;  %v2846_v13 = vadd.f32 %v2780_v8, %v2779_v10  ;;  %v2843_v14 = vadd.f32 %v2778_v33, %v2777_v2  ;;  %vm11427_vm5 = vcmp.eq.s32.totalorder %v11426_v25, %v6378_v49  ;;  %v11448_v31 = vld [vmem:[#allocation191_spill] sm:$0xff]  ;;  %v11472_v42 = vld [vmem:[#allocation58_spill] sm:$0xff] }
 0x3a5   : > { %v8541_v45 = vadd.f32 %v2800_v24, %v2799_v36  ;;  %vm2478_vm6 = vmand %vm11419_vm14, %vm11418_vm11  ;;  %v2797_v3 = vsel %vm2477_vm9, %v11420_v22, 0.0  ;;  %v11424_v36 = vld [vmem:[#allocation173_spill] sm:$0xff]  ;;  %vm11431_vm15 = vnez %v11430_v1  ;;  %vm11432_vm1 = vcmp.eq.s32.totalorder %v11426_v25, %v6380_v50  ;;  %v11441_v24 = vld [vmem:[#allocation23_spill] sm:$0xff] }
 0x3a6   : > { %v2798_v32 = vsel %vm2478_vm6, %v11423_v26, 0.0  ;;  %vm11425_vm10 = vnez %v11424_v36  ;;  %vm8572_vm0 = vmand %vm11432_vm1, %vm11431_vm15  ;;  %vm11435_vm3 = vnez %v11215_v57  ;;  %vm11437_vm4 = vcmp.eq.s32.totalorder %v11436_v58, %v6378_v49  ;;  %2850 = vadd.xlane.f32.xlu1 %v2849_v40  ;;  %v11444_v57 = vld [vmem:[#allocation26_spill] sm:$0xff]  ;;  %v11451_v22 = vld [vmem:[#allocation92_spill] sm:$0xff] }
 0x3a7   : > { %v8556_v17 = vadd.f32 %v2798_v32, %v2797_v3  ;;  %vm8563_vm7 = vmand %vm11427_vm5, %vm11425_vm10  ;;  %2847 = vadd.xlane.f32.xlu0 %v2846_v13  ;;  %vm11438_vm2 = vnez %v11220_v0  ;;  %vm11439_vm9 = vcmp.eq.s32.totalorder %v11436_v58, %v6380_v50  ;;  %vm11443_vm14 = vnez %v11442_v55  ;;  %v11447_v0 = vld [vmem:[#allocation60_spill] sm:$0xff]  ;;  %v11452_v37 = vld [vmem:[#allocation91_spill] sm:$0xff] }
 0x3a8   : > { %vm2485_vm13 = vmand %vm11437_vm4, %vm11435_vm3  ;;  %vm11445_vm6 = vcmp.eq.s32.totalorder %v11444_v57, %v6378_v49  ;;  %v2783_v10 = vsel %vm8563_vm7, %v11446_v34, 0.0  ;;  %v2784_v5 = vsel %vm8572_vm0, %v11447_v0, 0.0  ;;  %vm11449_vm5 = vnez %v11448_v31  ;;  %v11453_v26 = vld [vmem:[#allocation177_spill] sm:$0xff]  ;;  %v11455_v32 = vld [vmem:[#allocation42_spill] sm:$0xff] }
 0x3a9   : > { %vm2486_vm11 = vmand %vm11439_vm9, %vm11438_vm2  ;;  %v2805_v59 = vsel %vm2485_vm13, %v11440_v29, 0.0  ;;  %2844 = vadd.xlane.f32.xlu2 %v2843_v14  ;;  %vm11450_vm15 = vcmp.eq.s32.totalorder %v11444_v57, %v6380_v50  ;;  %v2852_v33 = vadd.f32 %v2784_v5, %v2783_v10  ;;  %vm11454_vm7 = vnez %v11453_v26  ;;  %v11459_v13 = vld [vmem:[#allocation178_spill] sm:$0xff]  ;;  %v11465_v36 = vld [vmem:[#allocation49_spill] sm:$0xff] }
 0x3aa   : > { %v2806_v18 = vsel %vm2486_vm11, %v11441_v24, 0.0  ;;  %vm2483_vm10 = vmand %vm11445_vm6, %vm11443_vm14  ;;  %vm11456_vm0 = vcmp.eq.s32.totalorder %v11455_v32, %v6378_v49  ;;  %vm11460_vm4 = vnez %v11459_v13  ;;  %vm11461_vm13 = vcmp.eq.s32.totalorder %v11455_v32, %v6380_v50  ;;  %v11469_v25 = vld [vmem:[#allocation57_spill] sm:$0xff]  ;;  %v11473_v29 = vld [vmem:[#allocation192_spill] sm:$0xff] }
 0x3ab   : > { %v8599_v8 = vadd.f32 %v2806_v18, %v2805_v59  ;;  %vm2484_vm1 = vmand %vm11450_vm15, %vm11449_vm5  ;;  %v2803_v3 = vsel %vm2483_vm10, %v11451_v22, 0.0  ;;  %vm11464_vm9 = vnez %v11234_v52  ;;  %vm11466_vm11 = vcmp.eq.s32.totalorder %v11465_v36, %v6378_v49  ;;  %v11470_v1 = vld [vmem:[#allocation93_spill] sm:$0xff]  ;;  %v11480_v55 = vld [vmem:[#allocation36_spill] sm:$0xff] }
 0x3ac   : > { %v2804_v2 = vsel %vm2484_vm1, %v11452_v37, 0.0  ;;  %vm8615_vm3 = vmand %vm11456_vm0, %vm11454_vm7  ;;  %vm11467_vm6 = vnez %v11238_v4  ;;  %vm11468_vm10 = vcmp.eq.s32.totalorder %v11465_v36, %v6380_v50  ;;  %vm11474_vm15 = vnez %v11473_v29  ;;  %v11475_v59 = vld [vmem:[#allocation33_spill] sm:$0xff]  ;;  %v2519_v4 = vld [vmem:[#allocation3 + $0x10] sm:$0xff]  ;;  %v2589_v36 = vpop.xlane.xlu1 %2588 }
 0x3ad   : > { %v8608_v63 = vadd.f32 %v2804_v2, %v2803_v3  ;;  %vm8624_vm2 = vmand %vm11461_vm13, %vm11460_vm4  ;;  %vm11476_vm1 = vcmp.eq.s32.totalorder %v11475_v59, %v6378_v49  ;;  %v11477_v18 = vld [vmem:[#allocation193_spill] sm:$0xff]  ;;  %v2517_v5 = vld [vmem:[#allocation3] sm:$0xff] }
 0x3ae   : > { %2859 = vadd.xlane.f32.xlu1 %v8418_v48  ;;  %vm2491_vm14 = vmand %vm11466_vm11, %vm11464_vm9  ;;  %v2789_v48 = vsel %vm8615_vm3, %v11470_v1, 0.0  ;;  %vm11478_vm0 = vnez %v11477_v18  ;;  %vm11479_vm3 = vcmp.eq.s32.totalorder %v11475_v59, %v6380_v50  ;;  %v11481_v34 = vld [vmem:[#allocation37_spill] sm:$0xff]  ;;  %v11482_v22 = vld [vmem:[#allocation90_spill] sm:$0xff] }
 0x3af   : > { %2856 = vadd.xlane.f32.xlu0 %v8453_v53  ;;  %vm2492_vm5 = vmand %vm11468_vm10, %vm11467_vm6  ;;  %v2811_v47 = vsel %vm2491_vm14, %v11469_v25, 0.0  ;;  %v11471_v53 = vld [vmem:[#allocation94_spill] sm:$0xff]  ;;  %v2551_v3 = vmul.f32 %v11482_v22, %v2519_v4  ;;  %v11483_v37 = vld [vmem:[#allocation180_spill] sm:$0xff]  ;;  %vm11495_vm10 = vnez %v11267_v21 }
 0x3b0   : > { %v2790_v52 = vsel %vm8624_vm2, %v11471_v53, 0.0  ;;  %v2812_v58 = vsel %vm2492_vm5, %v11472_v42, 0.0  ;;  %vm2489_vm7 = vmand %vm11476_vm1, %vm11474_vm15  ;;  %vm11484_vm13 = vnez %v11483_v37  ;;  %v11485_v2 = vld [vmem:[#allocation44_spill] sm:$0xff]  ;;  %v11489_v26 = vld [vmem:[#allocation181_spill] sm:$0xff]  ;;  %vm11498_vm1 = vnez %v11273_v46 }
 0x3b1   : > { %2853 = vadd.xlane.f32.xlu2 %v2852_v33  ;;  %v8653_v24 = vadd.f32 %v2812_v58, %v2811_v47  ;;  %vm2490_vm4 = vmand %vm11479_vm3, %vm11478_vm0  ;;  %v2809_v57 = vsel %vm2489_vm7, %v11480_v55, 0.0  ;;  %v2861_v0 = vadd.f32 %v2790_v52, %v2789_v48  ;;  %vm11486_vm2 = vcmp.eq.s32.totalorder %v11485_v2, %v6378_v49  ;;  %v11494_v40 = vld [vmem:[#allocation76_spill] sm:$0xff]  ;;  %v11496_v14 = vld [vmem:[#allocation51_spill] sm:$0xff]  ;;  %v2583_v58 = vpop.xlane.xlu2 %2582 }
 0x3b2   : > { %v2810_v10 = vsel %vm2490_vm4, %v11481_v34, 0.0  ;;  %vm8670_vm9 = vmand %vm11486_vm2, %vm11484_vm13  ;;  %vm11490_vm11 = vnez %v11489_v26  ;;  %vm11491_vm14 = vcmp.eq.s32.totalorder %v11485_v2, %v6380_v50  ;;  %v2549_v13 = vmul.f32 %v11494_v40, %v2517_v5  ;;  %v11500_v25 = vld [vmem:[#allocation47_spill] sm:$0xff]  ;;  %v11503_v53 = vld [vmem:[#allocation48_spill] sm:$0xff] }
 0x3b3   : > { %v8662_v31 = vadd.f32 %v2810_v10, %v2809_v57  ;;  %vm8679_vm6 = vmand %vm11491_vm14, %vm11490_vm11  ;;  %vm11497_vm5 = vcmp.eq.s32.totalorder %v11496_v14, %v6378_v49  ;;  %vm11499_vm7 = vcmp.eq.s32.totalorder %v11496_v14, %v6380_v50  ;;  %v2679_v47 = vadd.f32 %v2589_v36, %v2551_v3  ;;  %v11502_v21 = vld [vmem:[#allocation103_spill] sm:$0xff]  ;;  %v11504_v42 = vld [vmem:[#allocation196_spill] sm:$0xff] }
 0x3b4   : > { %vm2497_vm15 = vmand %vm11497_vm5, %vm11495_vm10  ;;  %v2796_v48 = vsel %vm8679_vm6, %v11502_v21, 0.0  ;;  %vm11505_vm3 = vnez %v11504_v42  ;;  %v11506_v46 = vld [vmem:[#allocation38_spill] sm:$0xff]  ;;  %v11508_v59 = vld [vmem:[#allocation197_spill] sm:$0xff]  ;;  %vm11512_vm14 = vcmask 7168   ;;  %v2677_v55 = vadd.f32 %v2583_v58, %v2549_v13 }
 0x3b5   : > { %vm2498_vm0 = vmand %vm11499_vm7, %vm11498_vm1  ;;  %vm11507_vm4 = vcmp.eq.s32.totalorder %v11506_v46, %v6378_v49  ;;  %vm11509_vm2 = vnez %v11508_v59  ;;  %v11511_v4 = vld [vmem:[#allocation63_spill] sm:$0xff]  ;;  %2711 = vst.msk [vmem:[#allocation3 + $0x10] sm:$0xff] %vm11512_vm14, %v2679_v47  ;;  %v11513_v57 = vld [vmem:[#allocation64_spill] sm:$0xff] }
 0x3b6   : > { %2868 = vadd.xlane.f32.xlu1 %v8478_v9  ;;  %v2817_v9 = vsel %vm2497_vm15, %v11500_v25, 0.0  ;;  %v2818_v52 = vsel %vm2498_vm0, %v11503_v53, 0.0  ;;  %vm2495_vm13 = vmand %vm11507_vm4, %vm11505_vm3  ;;  %v2520_v5 = vld [vmem:[#allocation3 + $0x18] sm:$0xff]  ;;  %v11515_v3 = vld [vmem:[#allocation182_spill] sm:$0xff]  ;;  %vm11528_vm3 = vnez %v11304_v38 }
 0x3b7   : > { %2865 = vadd.xlane.f32.xlu0 %v8509_v12  ;;  %v11501_v12 = vld [vmem:[#allocation102_spill] sm:$0xff]  ;;  %v8709_v29 = vadd.f32 %v2818_v52, %v2817_v9  ;;  %v2815_v18 = vsel %vm2495_vm13, %v11511_v4, 0.0  ;;  %vm11514_vm6 = vmmov %vm11512_vm14  ;;  %vm11516_vm10 = vnez %v11515_v3  ;;  %v11521_v33 = vld [vmem:[#allocation183_spill] sm:$0xff]  ;;  %vm11537_vm14 = vnez %v11264_v19 }
 0x3b8   : > { %v2795_v1 = vsel %vm8670_vm9, %v11501_v12, 0.0  ;;  %vm11510_vm9 = vcmp.eq.s32.totalorder %v11506_v46, %v6380_v50  ;;  %2709 = vst.msk [vmem:[#allocation3] sm:$0xff] %vm11514_vm6, %v2677_v55  ;;  %v11517_v37 = vld [vmem:[#allocation46_spill] sm:$0xff]  ;;  %vm11522_vm1 = vnez %v11521_v33  ;;  %v11526_v32 = vld [vmem:[#allocation83_spill] sm:$0xff]  ;;  %v11536_v12 = vld [vmem:[#allocation101_spill] sm:$0xff] }
 0x3b9   : > { %2862 = vadd.xlane.f32.xlu2 %v2861_v0  ;;  %vm2496_vm11 = vmand %vm11510_vm9, %vm11509_vm2  ;;  %v2870_v10 = vadd.f32 %v2796_v48, %v2795_v1  ;;  %v2518_v0 = vld [vmem:[#allocation3 + $0x8] sm:$0xff]  ;;  %vm11518_vm5 = vcmp.eq.s32.totalorder %v11517_v37, %v6378_v49  ;;  %vm11523_vm7 = vcmp.eq.s32.totalorder %v11517_v37, %v6380_v50  ;;  %v11527_v13 = vld [vmem:[#allocation119_spill] sm:$0xff]  ;;  %vm11531_vm2 = vnez %v11307_v15  ;;  %v2586_v15 = vpop.xlane.xlu0 %2585  ;;  %v2592_v48 = vpop.xlane.xlu2 %2591 }
 0x3ba   : > { %v2816_v34 = vsel %vm2496_vm11, %v11513_v57, 0.0  ;;  %vm8727_vm15 = vmand %vm11518_vm5, %vm11516_vm10  ;;  %v2550_v40 = vmul.f32 %v11526_v32, %v2518_v0  ;;  %v2552_v14 = vmul.f32 %v11527_v13, %v2520_v5  ;;  %v11529_v36 = vld [vmem:[#allocation99_spill] sm:$0xff]  ;;  %v11535_v47 = vld [vmem:[#allocation110_spill] sm:$0xff]  ;;  %vm11540_vm5 = vnez %v11280_v30 }
 0x3bb   : > { %v8719_v22 = vadd.f32 %v2816_v34, %v2815_v18  ;;  %vm8736_vm0 = vmand %vm11523_vm7, %vm11522_vm1  ;;  %vm11530_vm4 = vcmp.eq.s32.totalorder %v11529_v36, %v6378_v49  ;;  %vm11532_vm9 = vcmp.eq.s32.totalorder %v11529_v36, %v6380_v50  ;;  %v11538_v21 = vld [vmem:[#allocation77_spill] sm:$0xff]  ;;  %v11542_v52 = vld [vmem:[#allocation67_spill] sm:$0xff]  ;;  %vm11544_vm7 = vcmask 7168  }
 0x3bc   : > { %vm2503_vm13 = vmand %vm11530_vm4, %vm11528_vm3  ;;  %v2802_v38 = vsel %vm8736_vm0, %v11535_v47, 0.0  ;;  %vm11539_vm6 = vcmp.eq.s32.totalorder %v11538_v21, %v6378_v49  ;;  %v2678_v46 = vadd.f32 %v2586_v15, %v2550_v40  ;;  %v2680_v58 = vadd.f32 %v2592_v48, %v2552_v14  ;;  %v11543_v59 = vld [vmem:[#allocation68_spill] sm:$0xff]  ;;  %v2523_v18 = vld [vmem:[#allocation3 + $0x30] sm:$0xff] }
 0x3bd   : > { %vm2504_vm11 = vmand %vm11532_vm9, %vm11531_vm2  ;;  %v2522_v55 = vld [vmem:[#allocation3 + $0x28] sm:$0xff]  ;;  %v2521_v34 = vld [vmem:[#allocation3 + $0x20] sm:$0xff] }
 0x3be   : > { %2877 = vadd.xlane.f32.xlu1 %v8541_v45  ;;  %v11533_v45 = vld [vmem:[#allocation100_spill] sm:$0xff]  ;;  %v2824_v1 = vsel %vm2504_vm11, %v11536_v12, 0.0  ;;  %vm2501_vm10 = vmand %vm11539_vm6, %vm11537_vm14  ;;  %2710 = vst.msk [vmem:[#allocation3 + $0x8] sm:$0xff] %vm11544_vm7, %v2678_v46  ;;  %v11547_v30 = vld [vmem:[#allocation50_spill] sm:$0xff]  ;;  %vm11559_vm14 = vnez %v11328_v7 }
 0x3bf   : > { %2874 = vadd.xlane.f32.xlu0 %v8556_v17  ;;  %v2823_v25 = vsel %vm2503_vm13, %v11533_v45, 0.0  ;;  %v11534_v17 = vld [vmem:[#allocation111_spill] sm:$0xff]  ;;  %v2821_v42 = vsel %vm2501_vm10, %v11542_v52, 0.0  ;;  %vm11548_vm3 = vcmp.eq.s32.totalorder %v11547_v30, %v6378_v49  ;;  %vm11551_vm13 = vmmov %vm11544_vm7  ;;  %v11552_v5 = vld [vmem:[#allocation185_spill] sm:$0xff]  ;;  %vm11554_vm9 = vcmp.eq.s32.totalorder %v11547_v30, %v6380_v50 }
 0x3c0   : > { %v2801_v9 = vsel %vm8727_vm15, %v11534_v17, 0.0  ;;  %v8767_v53 = vadd.f32 %v2824_v1, %v2823_v25  ;;  %vm11541_vm15 = vcmp.eq.s32.totalorder %v11538_v21, %v6380_v50  ;;  %2712 = vst.msk [vmem:[#allocation3 + $0x18] sm:$0xff] %vm11551_vm13, %v2680_v58  ;;  %vm11553_vm2 = vnez %v11552_v5  ;;  %v11557_v37 = vld [vmem:[#allocation132_spill] sm:$0xff]  ;;  %v11558_v33 = vld [vmem:[#allocation125_spill] sm:$0xff]  ;;  %v11562_v40 = vld [vmem:[#allocation127_spill] sm:$0xff] }
 0x3c1   : > { %2871 = vadd.xlane.f32.xlu2 %v2870_v10  ;;  %vm2502_vm1 = vmand %vm11541_vm15, %vm11540_vm5  ;;  %v2879_v4 = vadd.f32 %v2802_v38, %v2801_v9  ;;  %v11545_v10 = vld [vmem:[#allocation184_spill] sm:$0xff]  ;;  %v2555_v2 = vmul.f32 %v11557_v37, %v2523_v18  ;;  %v2554_v26 = vmul.f32 %v11558_v33, %v2522_v55  ;;  %v2553_v13 = vmul.f32 %v11562_v40, %v2521_v34  ;;  %v11566_v14 = vld [vmem:[#allocation29_spill] sm:$0xff]  ;;  %v2598_v47 = vpop.xlane.xlu0 %2597  ;;  %v2595_v48 = vpop.xlane.xlu2 %2594 }
 0x3c2   : > { %v2822_v19 = vsel %vm2502_vm1, %v11543_v59, 0.0  ;;  %vm11546_vm0 = vnez %v11545_v10  ;;  %vm8794_vm11 = vmand %vm11554_vm9, %vm11553_vm2  ;;  %v11560_v32 = vld [vmem:[#allocation104_spill] sm:$0xff]  ;;  %vm11563_vm5 = vnez %v11331_v51  ;;  %v11567_v7 = vld [vmem:[#allocation30_spill] sm:$0xff]  ;;  %vm11569_vm7 = vnez %v11288_v56  ;;  %v2601_v51 = vpop.xlane.xlu1 %2600 }
 0x3c3   : > { %v8776_v57 = vadd.f32 %v2822_v19, %v2821_v42  ;;  %vm8784_vm4 = vmand %vm11548_vm3, %vm11546_vm0  ;;  %vm11561_vm6 = vcmp.eq.s32.totalorder %v11560_v32, %v6378_v49  ;;  %vm11564_vm15 = vcmp.eq.s32.totalorder %v11560_v32, %v6380_v50  ;;  %v2808_v45 = vsel %vm8794_vm11, %v11567_v7, 0.0  ;;  %v11568_v25 = vld [vmem:[#allocation109_spill] sm:$0xff]  ;;  %v11570_v9 = vld [vmem:[#allocation124_spill] sm:$0xff] }
 0x3c4   : > { %vm2509_vm10 = vmand %vm11561_vm6, %vm11559_vm14  ;;  %v2807_v36 = vsel %vm8784_vm4, %v11566_v14, 0.0  ;;  %vm11571_vm0 = vcmp.eq.s32.totalorder %v11570_v9, %v6378_v49  ;;  %vm11572_vm13 = vnez %v11291_v20  ;;  %vm11573_vm4 = vcmp.eq.s32.totalorder %v11570_v9, %v6380_v50  ;;  %v11574_v12 = vld [vmem:[#allocation74_spill] sm:$0xff]  ;;  %v11575_v56 = vld [vmem:[#allocation75_spill] sm:$0xff] }
 0x3c5   : > { %vm2510_vm1 = vmand %vm11564_vm15, %vm11563_vm5  ;;  %v2683_v21 = vadd.f32 %v2601_v51, %v2555_v2  ;;  %v2682_v15 = vadd.f32 %v2598_v47, %v2554_v26  ;;  %v2681_v42 = vadd.f32 %v2595_v48, %v2553_v13  ;;  %v2888_v46 = vadd.f32 %v2808_v45, %v2807_v36  ;;  %v2526_v58 = vld [vmem:[#allocation3 + $0x48] sm:$0xff]  ;;  %v2525_v59 = vld [vmem:[#allocation3 + $0x40] sm:$0xff] }
 0x3c6   : > { %2886 = vadd.xlane.f32.xlu1 %v8599_v8  ;;  %v11565_v8 = vld [vmem:[#allocation108_spill] sm:$0xff]  ;;  %v2830_v17 = vsel %vm2510_vm1, %v11568_v25, 0.0  ;;  %vm2507_vm3 = vmand %vm11571_vm0, %vm11569_vm7  ;;  %vm11576_vm9 = vcmask 7168   ;;  %v2524_v20 = vld [vmem:[#allocation3 + $0x38] sm:$0xff] }
 0x3c7   : > { %2883 = vadd.xlane.f32.xlu0 %v8608_v63  ;;  %v2829_v63 = vsel %vm2509_vm10, %v11565_v8, 0.0  ;;  %vm2508_vm2 = vmand %vm11573_vm4, %vm11572_vm13  ;;  %v2827_v1 = vsel %vm2507_vm3, %v11574_v12, 0.0  ;;  %2715 = vst.msk [vmem:[#allocation3 + $0x30] sm:$0xff] %vm11576_vm9, %v2683_v21  ;;  %v11579_v18 = vld [vmem:[#allocation52_spill] sm:$0xff]  ;;  %v11584_v34 = vld [vmem:[#allocation190_spill] sm:$0xff] }
 0x3c8   : > { %v8826_v38 = vadd.f32 %v2830_v17, %v2829_v63  ;;  %v2828_v52 = vsel %vm2508_vm2, %v11575_v56, 0.0  ;;  %vm11580_vm14 = vcmp.eq.s32.totalorder %v11579_v18, %v6378_v49  ;;  %vm11583_vm10 = vmmov %vm11576_vm9  ;;  %vm11585_vm5 = vnez %v11584_v34  ;;  %v11590_v30 = vld [vmem:[#allocation136_spill] sm:$0xff]  ;;  %v11591_v5 = vld [vmem:[#allocation151_spill] sm:$0xff] }
 0x3c9   : > { %2880 = vadd.xlane.f32.xlu2 %v2879_v4  ;;  %v8835_v19 = vadd.f32 %v2828_v52, %v2827_v1  ;;  %v11577_v4 = vld [vmem:[#allocation189_spill] sm:$0xff]  ;;  %2714 = vst.msk [vmem:[#allocation3 + $0x28] sm:$0xff] %vm11583_vm10, %v2682_v15  ;;  %vm11586_vm15 = vcmp.eq.s32.totalorder %v11579_v18, %v6380_v50  ;;  %vm11589_vm7 = vmmov %vm11576_vm9  ;;  %v2558_v0 = vmul.f32 %v11590_v30, %v2526_v58  ;;  %v11594_v2 = vld [vmem:[#allocation154_spill] sm:$0xff]  ;;  %v2607_v8 = vpop.xlane.xlu0 %2606  ;;  %v2604_v36 = vpop.xlane.xlu2 %2603 }
 0x3ca   : > { %vm11578_vm11 = vnez %v11577_v4  ;;  %vm8853_vm1 = vmand %vm11586_vm15, %vm11585_vm5  ;;  %2713 = vst.msk [vmem:[#allocation3 + $0x20] sm:$0xff] %vm11589_vm7, %v2681_v42  ;;  %v2557_v3 = vmul.f32 %v11591_v5, %v2525_v59  ;;  %v11592_v37 = vld [vmem:[#allocation157_spill] sm:$0xff]  ;;  %v2556_v33 = vmul.f32 %v11594_v2, %v2524_v20  ;;  %v11599_v13 = vld [vmem:[#allocation171_spill] sm:$0xff]  ;;  %v2610_v44 = vpop.xlane.xlu1 %2609 }
 0x3cb   : > { %vm8843_vm6 = vmand %vm11580_vm14, %vm11578_vm11  ;;  %vm11593_vm0 = vcmp.eq.s32.totalorder %v11592_v37, %v6378_v49  ;;  %vm11595_vm13 = vcmp.eq.s32.totalorder %v11592_v37, %v6380_v50  ;;  %v2814_v32 = vsel %vm8853_vm1, %v11597_v61, 0.0  ;;  %vm11600_vm2 = vcmp.eq.s32.totalorder %v11599_v13, %v6378_v49  ;;  %v2529_v25 = vld [vmem:[#allocation3 + $0x60] sm:$0xff]  ;;  %v2528_v17 = vld [vmem:[#allocation3 + $0x58] sm:$0xff] }
 0x3cc   : > { %vm2515_vm3 = vmand %vm11593_vm0, %vm8359_vm12  ;;  %vm11598_vm12 = vnez %v11311_v11  ;;  %vm11602_vm11 = vcmp.eq.s32.totalorder %v11599_v13, %v6380_v50  ;;  %v2686_v14 = vadd.f32 %v2610_v44, %v2558_v0  ;;  %v2684_v7 = vadd.f32 %v2604_v36, %v2556_v33  ;;  %v11604_v51 = vld [vmem:[#allocation194_spill] sm:$0xff]  ;;  %v11606_v47 = vld [vmem:[#allocation95_spill] sm:$0xff] }
 0x3cd   : > { %vm2516_vm4 = vmand %vm11595_vm13, %vm8430_vm8  ;;  %vm11601_vm8 = vnez %v11316_v23  ;;  %v2527_v23 = vld [vmem:[#allocation3 + $0x50] sm:$0xff]  ;;  %vm11605_vm10 = vnez %v11604_v51  ;;  %vm11607_vm5 = vcmp.eq.s32.totalorder %v11606_v47, %v6378_v49  ;;  %vm11613_vm0 = vcmp.eq.s32.totalorder %v11606_v47, %v6380_v50  ;;  %v11617_v1 = vld [vmem:[#allocation141_spill] sm:$0xff] }
 0x3ce   : > { %2895 = vadd.xlane.f32.xlu1 %v8653_v24  ;;  %v2835_v24 = vsel %vm2515_vm3, %v11312_v39, 0.0  ;;  %v2836_v40 = vsel %vm2516_vm4, %v11317_v54, 0.0  ;;  %vm2513_vm9 = vmand %vm11600_vm2, %vm11598_vm12  ;;  %v2685_v54 = vadd.f32 %v2607_v8, %v2557_v3  ;;  %v2561_v21 = vmul.f32 %v11617_v1, %v2529_v25  ;;  %v11618_v15 = vld [vmem:[#allocation160_spill] sm:$0xff]  ;;  %v11619_v56 = vld [vmem:[#allocation163_spill] sm:$0xff] }
 0x3cf   : > { %2892 = vadd.xlane.f32.xlu0 %v8662_v31  ;;  %v11596_v31 = vld [vmem:[#allocation55_spill] sm:$0xff]  ;;  %v8886_v63 = vadd.f32 %v2836_v40, %v2835_v24  ;;  %vm2514_vm14 = vmand %vm11602_vm11, %vm11601_vm8  ;;  %v2833_v39 = vsel %vm2513_vm9, %v11296_v6, 0.0  ;;  %v2560_v48 = vmul.f32 %v11618_v15, %v2528_v17  ;;  %v2559_v52 = vmul.f32 %v11619_v56, %v2527_v23  ;;  %v11621_v58 = vld [vmem:[#allocation88_spill] sm:$0xff] }
 0x3d0   : > { %v2813_v26 = vsel %vm8843_vm6, %v11596_v31, 0.0  ;;  %v2834_v11 = vsel %vm2514_vm14, %v11297_v41, 0.0  ;;  %vm11603_vm6 = vmmov %vm11589_vm7  ;;  %v11611_v41 = vld [vmem:[#allocation195_spill] sm:$0xff]  ;;  %v2531_v30 = vld [vmem:[#allocation3 + $0x70] sm:$0xff]  ;;  %vm11623_vm12 = vnez %v11295_v62  ;;  %vm11629_vm11 = vnez %v11301_v16 }
 0x3d1   : > { %2889 = vadd.xlane.f32.xlu2 %v2888_v46  ;;  %v2897_v45 = vadd.f32 %v2814_v32, %v2813_v26  ;;  %v8895_v9 = vadd.f32 %v2834_v11, %v2833_v39  ;;  %2718 = vst.msk [vmem:[#allocation3 + $0x48] sm:$0xff] %vm11603_vm6, %v2686_v14  ;;  %vm8903_vm15 = vmand %vm11607_vm5, %vm11605_vm10  ;;  %vm11612_vm7 = vnez %v11611_v41  ;;  %v11620_v42 = vld [vmem:[#allocation87_spill] sm:$0xff]  ;;  %v2616_v4 = vpop.xlane.xlu0 %2615  ;;  %v2530_v0 = vld [vmem:[#allocation3 + $0x68] sm:$0xff] }
 0x3d2   : > { %vm11610_vm1 = vmmov %vm11603_vm6  ;;  %v2819_v46 = vsel %vm8903_vm15, %v11620_v42, 0.0  ;;  %v2619_v20 = vpop.xlane.xlu1 %2618  ;;  %v2688_v18 = vadd.f32 %v2616_v4, %v2560_v48  ;;  %v2532_v10 = vld [vmem:[#allocation3 + $0x78] sm:$0xff]  ;;  %v11624_v5 = vld [vmem:[#allocation128_spill] sm:$0xff]  ;;  %vm11640_vm15 = vnez %v11321_v35 }
 0x3d3   : > { %2717 = vst.msk [vmem:[#allocation3 + $0x40] sm:$0xff] %vm11610_vm1, %v2685_v54  ;;  %vm8913_vm3 = vmand %vm11613_vm0, %vm11612_vm7  ;;  %vm11625_vm2 = vcmp.eq.s32.totalorder %v11624_v5, %v6378_v49  ;;  %vm11630_vm14 = vcmp.eq.s32.totalorder %v11624_v5, %v6380_v50  ;;  %v11634_v62 = vld [vmem:[#allocation150_spill] sm:$0xff]  ;;  %v11635_v33 = vld [vmem:[#allocation167_spill] sm:$0xff] }
 0x3d4   : > { %vm11616_vm13 = vmmov %vm11610_vm1  ;;  %v2820_v59 = vsel %vm8913_vm3, %v11621_v58, 0.0  ;;  %v2564_v2 = vmul.f32 %v11634_v62, %v2532_v10  ;;  %v2563_v24 = vmul.f32 %v11635_v33, %v2531_v30  ;;  %v11636_v31 = vld [vmem:[#allocation169_spill] sm:$0xff]  ;;  %v11638_v32 = vld [vmem:[#allocation98_spill] sm:$0xff]  ;;  %vm11646_vm3 = vnez %v11324_v43 }
 0x3d5   : > { %2716 = vst.msk [vmem:[#allocation3 + $0x38] sm:$0xff] %vm11616_vm13, %v2684_v7  ;;  %v2906_v34 = vadd.f32 %v2820_v59, %v2819_v46  ;;  %vm11622_vm4 = vmmov %vm11610_vm1  ;;  %v2562_v16 = vmul.f32 %v11636_v31, %v2530_v0  ;;  %v11637_v26 = vld [vmem:[#allocation97_spill] sm:$0xff]  ;;  %v2535_v54 = vld [vmem:[#allocation3 + $0x90] sm:$0xff] }
 0x3d6   : > { %2904 = vadd.xlane.f32.xlu1 %v8709_v29  ;;  %v2689_v29 = vadd.f32 %v2619_v20, %v2561_v21  ;;  %vm8935_vm9 = vmand %vm11625_vm2, %vm11623_vm12  ;;  %v2534_v36 = vld [vmem:[#allocation3 + $0x88] sm:$0xff]  ;;  %v2533_v11 = vld [vmem:[#allocation3 + $0x80] sm:$0xff] }
 0x3d7   : > { %2901 = vadd.xlane.f32.xlu0 %v8719_v22  ;;  %v2613_v22 = vpop.xlane.xlu2 %2612  ;;  %vm11628_vm8 = vmmov %vm11610_vm1  ;;  %v2825_v61 = vsel %vm8935_vm9, %v11637_v26, 0.0  ;;  %v11641_v7 = vld [vmem:[#allocation170_spill] sm:$0xff]  ;;  %v11651_v35 = vld [vmem:[#allocation96_spill] sm:$0xff] }
 0x3d8   : > { %v2687_v55 = vadd.f32 %v2613_v22, %v2559_v52  ;;  %2721 = vst.msk [vmem:[#allocation3 + $0x60] sm:$0xff] %vm11622_vm4, %v2689_v29  ;;  %vm8945_vm6 = vmand %vm11630_vm14, %vm11629_vm11  ;;  %vm11647_vm13 = vcmp.eq.s32.totalorder %v11641_v7, %v6380_v50  ;;  %v2567_v17 = vmul.f32 %v11651_v35, %v2535_v54  ;;  %v11652_v23 = vld [vmem:[#allocation89_spill] sm:$0xff]  ;;  %v11653_v47 = vld [vmem:[#allocation82_spill] sm:$0xff] }
 0x3d9   : > { %2898 = vadd.xlane.f32.xlu2 %v2897_v45  ;;  %2720 = vst.msk [vmem:[#allocation3 + $0x58] sm:$0xff] %vm11628_vm8, %v2688_v18  ;;  %vm11633_vm10 = vmmov %vm11610_vm1  ;;  %v2826_v40 = vsel %vm8945_vm6, %v11638_v32, 0.0  ;;  %v2625_v44 = vpop.xlane.xlu0 %2624  ;;  %v2566_v51 = vmul.f32 %v11652_v23, %v2534_v36  ;;  %v2565_v43 = vmul.f32 %v11653_v47, %v2533_v11  ;;  %v11654_v6 = vld [vmem:[#allocation106_spill] sm:$0xff]  ;;  %v11655_v12 = vld [vmem:[#allocation107_spill] sm:$0xff] }
 0x3da   : > { %2719 = vst.msk [vmem:[#allocation3 + $0x50] sm:$0xff] %vm11633_vm10, %v2687_v55  ;;  %v2628_v13 = vpop.xlane.xlu1 %2627  ;;  %v2691_v8 = vadd.f32 %v2625_v44, %v2563_v24  ;;  %v2915_v14 = vadd.f32 %v2826_v40, %v2825_v61  ;;  %vm11639_vm5 = vmmov %vm11610_vm1  ;;  %vm11642_vm1 = vcmp.eq.s32.totalorder %v11641_v7, %v6378_v49  ;;  %v2538_v42 = vld [vmem:[#allocation3 + $0xa8] sm:$0xff]  ;;  %v2537_v46 = vld [vmem:[#allocation3 + $0xa0] sm:$0xff] }
 0x3db   : > { %vm8967_vm7 = vmand %vm11642_vm1, %vm11640_vm15  ;;  %v2536_v58 = vld [vmem:[#allocation3 + $0x98] sm:$0xff]  ;;  %v11659_v59 = vld [vmem:[#allocation130_spill] sm:$0xff] }
 0x3dc   : > { %vm11645_vm0 = vmmov %vm11622_vm4  ;;  %v2831_v41 = vsel %vm8967_vm7, %v11654_v6, 0.0  ;;  %v2570_v20 = vmul.f32 %v11659_v59, %v2538_v42  ;;  %v11660_v4 = vld [vmem:[#allocation122_spill] sm:$0xff]  ;;  %v11661_v18 = vld [vmem:[#allocation123_spill] sm:$0xff] }
 0x3dd   : > { %2723 = vst.msk [vmem:[#allocation3 + $0x70] sm:$0xff] %vm11645_vm0, %v2691_v8  ;;  %vm8977_vm4 = vmand %vm11647_vm13, %vm11646_vm3  ;;  %v2569_v29 = vmul.f32 %v11660_v4, %v2537_v46  ;;  %v2568_v22 = vmul.f32 %v11661_v18, %v2536_v58  ;;  %v2541_v3 = vld [vmem:[#allocation3 + $0xc0] sm:$0xff]  ;;  %v2540_v37 = vld [vmem:[#allocation3 + $0xb8] sm:$0xff] }
 0x3de   : > { %2913 = vadd.xlane.f32.xlu1 %v8767_v53  ;;  %v2692_v53 = vadd.f32 %v2628_v13, %v2564_v2  ;;  %vm11650_vm12 = vmmov %vm11645_vm0  ;;  %v2832_v1 = vsel %vm8977_vm4, %v11655_v12, 0.0  ;;  %v11666_v2 = vld [vmem:[#allocation146_spill] sm:$0xff]  ;;  %v11667_v24 = vld [vmem:[#allocation149_spill] sm:$0xff] }
 0x3df   : > { %2910 = vadd.xlane.f32.xlu0 %v8776_v57  ;;  %v2622_v57 = vpop.xlane.xlu2 %2621  ;;  %v2924_v52 = vadd.f32 %v2832_v1, %v2831_v41  ;;  %vm11656_vm2 = vmmov %vm11645_vm0  ;;  %v2572_v33 = vmul.f32 %v11666_v2, %v2540_v37  ;;  %v2544_v44 = vld [vmem:[#allocation3 + $0xd8] sm:$0xff]  ;;  %v2542_v8 = vld [vmem:[#allocation3 + $0xc8] sm:$0xff] }
 0x3e0   : > { %v2690_v39 = vadd.f32 %v2622_v57, %v2562_v16  ;;  %2724 = vst.msk [vmem:[#allocation3 + $0x78] sm:$0xff] %vm11639_vm5, %v2692_v53  ;;  %vm11657_vm9 = vmmov %vm11645_vm0  ;;  %v2543_v53 = vld [vmem:[#allocation3 + $0xd0] sm:$0xff]  ;;  %v11673_v36 = vld [vmem:[#allocation159_spill] sm:$0xff] }
 0x3e1   : > { %2907 = vadd.xlane.f32.xlu2 %v2906_v34  ;;  %v2634_v15 = vpop.xlane.xlu0 %2633  ;;  %vm11658_vm8 = vmmov %vm11645_vm0  ;;  %v11671_v57 = vld [vmem:[#allocation138_spill] sm:$0xff]  ;;  %v2574_v11 = vmul.f32 %v11673_v36, %v2542_v8  ;;  %v2546_v47 = vld [vmem:[#allocation3 + $0xe8] sm:$0xff] }
 0x3e2   : > { %2722 = vst.msk [vmem:[#allocation3 + $0x68] sm:$0xff] %vm11650_vm12, %v2690_v39  ;;  %v2637_v21 = vpop.xlane.xlu1 %2636  ;;  %v2694_v48 = vadd.f32 %v2634_v15, %v2566_v51  ;;  %vm11662_vm11 = vmmov %vm11645_vm0  ;;  %v2576_v39 = vmul.f32 %v11671_v57, %v2544_v44  ;;  %v2547_v51 = vld [vmem:[#allocation3 + $0xf0] sm:$0xff]  ;;  %v11676_v6 = vld [vmem:[#allocation145_spill] sm:$0xff] }
 0x3e3   : > { %vm11663_vm14 = vmmov %vm11645_vm0  ;;  %v2579_v41 = vmul.f32 %v11676_v6, %v2547_v51  ;;  %v11677_v12 = vld [vmem:[#allocation164_spill] sm:$0xff]  ;;  %v2548_v46 = vld [vmem:[#allocation3 + $0xf8] sm:$0xff] }
 0x3e4   : > { %2726 = vst.msk [vmem:[#allocation3 + $0x88] sm:$0xff] %vm11657_vm9, %v2694_v48  ;;  %vm11664_vm6 = vmmov %vm11645_vm0  ;;  %v2578_v1 = vmul.f32 %v11677_v12, %v2546_v47  ;;  %v2742_v58 = vld [vmem:[#allocation4 + $0x8] sm:$0xff]  ;;  %v2741_v59 = vld [vmem:[#allocation4] sm:$0xff] }
 0x3e5   : > { %vm11668_vm10 = vmmov %vm11645_vm0  ;;  %v2751_v44 = vld [vmem:[#allocation4 + $0x50] sm:$0xff]  ;;  %v2749_v8 = vld [vmem:[#allocation4 + $0x40] sm:$0xff] }
 0x3e6   : > { %2922 = vadd.xlane.f32.xlu1 %v8826_v38  ;;  %v2695_v38 = vadd.f32 %v2637_v21, %v2567_v17  ;;  %vm11669_vm5 = vmmov %vm11645_vm0  ;;  %v11678_v21 = vld [vmem:[#allocation166_spill] sm:$0xff]  ;;  %v2757_v6 = vld [vmem:[#allocation4 + $0x80] sm:$0xff] }
 0x3e7   : > { %2919 = vadd.xlane.f32.xlu0 %v8835_v19  ;;  %v2631_v19 = vpop.xlane.xlu2 %2630  ;;  %vm11670_vm15 = vmmov %vm11645_vm0  ;;  %v2755_v12 = vld [vmem:[#allocation4 + $0x70] sm:$0xff] }
 0x3e8   : > { %v2693_v56 = vadd.f32 %v2631_v19, %v2565_v43  ;;  %2727 = vst.msk [vmem:[#allocation3 + $0x90] sm:$0xff] %vm11656_vm2, %v2695_v38  ;;  %vm11674_vm1 = vmmov %vm11645_vm0  ;;  %v2545_v43 = vld [vmem:[#allocation3 + $0xe0] sm:$0xff] }
 0x3e9   : > { %2916 = vadd.xlane.f32.xlu2 %v2915_v14  ;;  %v2643_v34 = vpop.xlane.xlu0 %2642  ;;  %v11672_v14 = vld [vmem:[#allocation155_spill] sm:$0xff]  ;;  %vm11675_vm7 = vmmov %vm11645_vm0  ;;  %v2577_v15 = vmul.f32 %v11678_v21, %v2545_v43 }
 0x3ea   : > { %2725 = vst.msk [vmem:[#allocation3 + $0x80] sm:$0xff] %vm11658_vm8, %v2693_v56  ;;  %v2646_v55 = vpop.xlane.xlu1 %2645  ;;  %v2697_v30 = vadd.f32 %v2643_v34, %v2569_v29  ;;  %v2575_v54 = vmul.f32 %v11672_v14, %v2543_v53  ;;  %vm11679_vm3 = vmmov %vm11645_vm0  ;;  %v2750_v53 = vld [vmem:[#allocation4 + $0x48] sm:$0xff] }
 0x3eb   : > { %v2698_v10 = vadd.f32 %v2646_v55, %v2570_v20  ;;  %vm11680_vm13 = vmmov %vm11645_vm0  ;;  %v11682_v20 = vld [vmem:[#allocation172_spill] sm:$0xff] }
 0x3ec   : > { %2729 = vst.msk [vmem:[#allocation3 + $0xa0] sm:$0xff] %vm11663_vm14, %v2697_v30  ;;  %vm11681_vm4 = vmmov %vm11645_vm0  ;;  %v2580_v4 = vmul.f32 %v11682_v20, %v2548_v46  ;;  %v2745_v30 = vld [vmem:[#allocation4 + $0x20] sm:$0xff] }
 0x3ed   : > { %2730 = vst.msk [vmem:[#allocation3 + $0xa8] sm:$0xff] %vm11662_vm11, %v2698_v10  ;;  %vm11683_vm12 = vmmov %vm11645_vm0 }
 0x3ee   : > { %2931 = vadd.xlane.f32.xlu1 %v8886_v63  ;;  %v2539_v63 = vld [vmem:[#allocation3 + $0xb0] sm:$0xff]  ;;  %vm11684_vm2 = vmmov %vm11645_vm0 }
 0x3ef   : > { %2928 = vadd.xlane.f32.xlu0 %v8895_v9  ;;  %v2640_v0 = vpop.xlane.xlu2 %2639  ;;  %v11665_v9 = vld [vmem:[#allocation134_spill] sm:$0xff]  ;;  %v2571_v31 = vmul.f32 %v11667_v24, %v2539_v63  ;;  %vm11685_vm9 = vmmov %vm11645_vm0 }
 0x3f0   : > { %v2696_v5 = vadd.f32 %v2640_v0, %v2568_v22  ;;  %v2573_v62 = vmul.f32 %v11665_v9, %v2541_v3  ;;  %v2744_v0 = vld [vmem:[#allocation4 + $0x18] sm:$0xff]  ;;  %vm11686_vm8 = vmmov %vm11645_vm0  ;;  %v2747_v24 = vld [vmem:[#allocation4 + $0x30] sm:$0xff] }
 0x3f1   : > { %2925 = vadd.xlane.f32.xlu2 %v2924_v52  ;;  %v2652_v26 = vpop.xlane.xlu0 %2651  ;;  %vm11687_vm11 = vmmov %vm11645_vm0 }
 0x3f2   : > { %2728 = vst.msk [vmem:[#allocation3 + $0x98] sm:$0xff] %vm11664_vm6, %v2696_v5  ;;  %v2700_v32 = vadd.f32 %v2652_v26, %v2572_v33  ;;  %v2743_v5 = vld [vmem:[#allocation4 + $0x10] sm:$0xff]  ;;  %vm11688_vm14 = vmmov %vm11645_vm0  ;;  %v2748_v33 = vld [vmem:[#allocation4 + $0x38] sm:$0xff] }
 0x3f3   : > { %vm11689_vm6 = vmmov %vm11645_vm0 }
 0x3f4   : > { %v2655_v16 = vpop.xlane.xlu1 %2654  ;;  %2732 = vst.msk [vmem:[#allocation3 + $0xb8] sm:$0xff] %vm11669_vm5, %v2700_v32  ;;  %vm11691_vm5 = vmmov %vm11645_vm0 }
 0x3f5   : > { %v2701_v61 = vadd.f32 %v2655_v16, %v2573_v62 }
 0x3f7   : > { %v2649_v40 = vpop.xlane.xlu2 %2648  ;;  %2733 = vst.msk [vmem:[#allocation3 + $0xc0] sm:$0xff] %vm11668_vm10, %v2701_v61  ;;  %vm11690_vm10 = vmmov %vm11645_vm0 }
 0x3f8   : > { %v2699_v13 = vadd.f32 %v2649_v40, %v2571_v31  ;;  %v2746_v31 = vld [vmem:[#allocation4 + $0x28] sm:$0xff] }
 0x3fa   : > { %2731 = vst.msk [vmem:[#allocation3 + $0xb0] sm:$0xff] %vm11670_vm15, %v2699_v13  ;;  %vm11692_vm15 = vmmov %vm11645_vm0 }
 0x401   : > { %v2664_v7 = vpop.xlane.xlu1 %2663 }
 0x402   : > { %v2661_v45 = vpop.xlane.xlu0 %2660  ;;  %v2704_v25 = vadd.f32 %v2664_v7, %v2576_v39  ;;  %v2754_v7 = vld [vmem:[#allocation4 + $0x68] sm:$0xff] }
 0x403   : > { %v2703_v35 = vadd.f32 %v2661_v45, %v2575_v54  ;;  %v2753_v45 = vld [vmem:[#allocation4 + $0x60] sm:$0xff] }
 0x404   : > { %v2658_v17 = vpop.xlane.xlu2 %2657  ;;  %2736 = vst.msk [vmem:[#allocation3 + $0xd8] sm:$0xff] %vm11674_vm1, %v2704_v25  ;;  %vm11693_vm1 = vmmov %vm11645_vm0  ;;  %v2752_v25 = vld [vmem:[#allocation4 + $0x58] sm:$0xff] }
 0x405   : > { %v2702_v23 = vadd.f32 %v2658_v17, %v2574_v11  ;;  %2735 = vst.msk [vmem:[#allocation3 + $0xd0] sm:$0xff] %vm11675_vm7, %v2703_v35  ;;  %vm11694_vm7 = vmmov %vm11645_vm0 }
 0x407   : > { %2734 = vst.msk [vmem:[#allocation3 + $0xc8] sm:$0xff] %vm11645_vm0, %v2702_v23 }
 0x409   : > { %v2673_v38 = vpop.xlane.xlu1 %2672 }
 0x40a   : > { %v2670_v48 = vpop.xlane.xlu0 %2669  ;;  %v2707_v19 = vadd.f32 %v2673_v38, %v2579_v41  ;;  %v2756_v41 = vld [vmem:[#allocation4 + $0x78] sm:$0xff] }
 0x40b   : > { %v2706_v56 = vadd.f32 %v2670_v48, %v2578_v1 }
 0x40c   : > { %v2667_v52 = vpop.xlane.xlu2 %2666  ;;  %2739 = vst.msk [vmem:[#allocation3 + $0xf0] sm:$0xff] %vm11679_vm3, %v2707_v19  ;;  %vm11695_vm3 = vmmov %vm11645_vm0 }
 0x40d   : > { %v2705_v42 = vadd.f32 %v2667_v52, %v2577_v15  ;;  %2738 = vst.msk [vmem:[#allocation3 + $0xe8] sm:$0xff] %vm11680_vm13, %v2706_v56  ;;  %vm11696_vm13 = vmmov %vm11645_vm0  ;;  %v2760_v56 = vld [vmem:[#allocation4 + $0x98] sm:$0xff]  ;;  %v2759_v52 = vld [vmem:[#allocation4 + $0x90] sm:$0xff] }
 0x40f   : > { %2737 = vst.msk [vmem:[#allocation3 + $0xe0] sm:$0xff] %vm11681_vm4, %v2705_v42  ;;  %vm11697_vm4 = vmmov %vm11645_vm0  ;;  %v2758_v42 = vld [vmem:[#allocation4 + $0x88] sm:$0xff] }
 0x411   : > { %v2842_v29 = vpop.xlane.xlu1 %2841 }
 0x412   : > { %v2839_v18 = vpop.xlane.xlu0 %2838  ;;  %v2934_v22 = vadd.f32 %v2842_v29, %v2742_v58 }
 0x413   : > { %v2933_v55 = vadd.f32 %v2839_v18, %v2741_v59  ;;  %v2763_v18 = vld [vmem:[#allocation4 + $0xb0] sm:$0xff] }
 0x414   : > { %v2676_v34 = vpop.xlane.xlu2 %2675  ;;  %2966 = vst.msk [vmem:[#allocation4 + $0x8] sm:$0xff] %vm11683_vm12, %v2934_v22  ;;  %vm11698_vm12 = vmmov %vm11645_vm0  ;;  %v2762_v22 = vld [vmem:[#allocation4 + $0xa8] sm:$0xff] }
 0x415   : > { %v2708_v10 = vadd.f32 %v2676_v34, %v2580_v4  ;;  %2965 = vst.msk [vmem:[#allocation4] sm:$0xff] %vm11684_vm2, %v2933_v55  ;;  %vm11699_vm2 = vmmov %vm11645_vm0  ;;  %v2761_v55 = vld [vmem:[#allocation4 + $0xa0] sm:$0xff] }
 0x417   : > { %2740 = vst.msk [vmem:[#allocation3 + $0xf8] sm:$0xff] %vm11685_vm9, %v2708_v10  ;;  %vm11700_vm9 = vmmov %vm11645_vm0 }
 0x419   : > { %v2851_v3 = vpop.xlane.xlu1 %2850 }
 0x41a   : > { %v2848_v37 = vpop.xlane.xlu0 %2847  ;;  %v2937_v63 = vadd.f32 %v2851_v3, %v2745_v30 }
 0x41b   : > { %v2936_v9 = vadd.f32 %v2848_v37, %v2744_v0  ;;  %v2766_v37 = vld [vmem:[#allocation4 + $0xc8] sm:$0xff] }
 0x41c   : > { %v2845_v62 = vpop.xlane.xlu2 %2844  ;;  %2969 = vst.msk [vmem:[#allocation4 + $0x20] sm:$0xff] %vm11686_vm8, %v2937_v63  ;;  %vm11701_vm8 = vmmov %vm11645_vm0  ;;  %v2765_v63 = vld [vmem:[#allocation4 + $0xc0] sm:$0xff] }
 0x41d   : > { %v2935_v2 = vadd.f32 %v2845_v62, %v2743_v5  ;;  %2968 = vst.msk [vmem:[#allocation4 + $0x18] sm:$0xff] %vm11687_vm11, %v2936_v9  ;;  %vm11702_vm11 = vmmov %vm11645_vm0  ;;  %v2764_v9 = vld [vmem:[#allocation4 + $0xb8] sm:$0xff] }
 0x41f   : > { %2967 = vst.msk [vmem:[#allocation4 + $0x10] sm:$0xff] %vm11688_vm14, %v2935_v2  ;;  %vm11703_vm14 = vmmov %vm11645_vm0 }
 0x421   : > { %v2860_v16 = vpop.xlane.xlu1 %2859 }
 0x422   : > { %v2857_v26 = vpop.xlane.xlu0 %2856  ;;  %v2940_v61 = vadd.f32 %v2860_v16, %v2748_v33 }
 0x423   : > { %v2939_v32 = vadd.f32 %v2857_v26, %v2747_v24  ;;  %v2769_v26 = vld [vmem:[#allocation4 + $0xe0] sm:$0xff] }
 0x424   : > { %v2854_v40 = vpop.xlane.xlu2 %2853  ;;  %2972 = vst.msk [vmem:[#allocation4 + $0x38] sm:$0xff] %vm11689_vm6, %v2940_v61  ;;  %vm11704_vm6 = vmmov %vm11645_vm0  ;;  %v2768_v61 = vld [vmem:[#allocation4 + $0xd8] sm:$0xff] }
 0x425   : > { %v2938_v13 = vadd.f32 %v2854_v40, %v2746_v31  ;;  %2971 = vst.msk [vmem:[#allocation4 + $0x30] sm:$0xff] %vm11690_vm10, %v2939_v32  ;;  %vm11705_vm10 = vmmov %vm11645_vm0  ;;  %v2767_v32 = vld [vmem:[#allocation4 + $0xd0] sm:$0xff] }
 0x427   : > { %2970 = vst.msk [vmem:[#allocation4 + $0x28] sm:$0xff] %vm11691_vm5, %v2938_v13  ;;  %vm11706_vm5 = vmmov %vm11645_vm0 }
 0x429   : > { %v2869_v57 = vpop.xlane.xlu1 %2868 }
 0x42a   : > { %v2866_v39 = vpop.xlane.xlu0 %2865  ;;  %v2943_v14 = vadd.f32 %v2869_v57, %v2751_v44 }
 0x42b   : > { %v2942_v54 = vadd.f32 %v2866_v39, %v2750_v53  ;;  %v2772_v39 = vld [vmem:[#allocation4 + $0xf8] sm:$0xff] }
 0x42c   : > { %v2863_v36 = vpop.xlane.xlu2 %2862  ;;  %2975 = vst.msk [vmem:[#allocation4 + $0x50] sm:$0xff] %vm11692_vm15, %v2943_v14  ;;  %vm11707_vm15 = vmmov %vm11645_vm0  ;;  %v2771_v14 = vld [vmem:[#allocation4 + $0xf0] sm:$0xff] }
 0x42d   : > { %v2941_v11 = vadd.f32 %v2863_v36, %v2749_v8  ;;  %2974 = vst.msk [vmem:[#allocation4 + $0x48] sm:$0xff] %vm11693_vm1, %v2942_v54  ;;  %vm11708_vm1 = vmmov %vm11645_vm0  ;;  %v2770_v54 = vld [vmem:[#allocation4 + $0xe8] sm:$0xff] }
 0x42f   : > { %2973 = vst.msk [vmem:[#allocation4 + $0x40] sm:$0xff] %vm11694_vm7, %v2941_v11  ;;  %vm11709_vm7 = vmmov %vm11645_vm0 }
 0x431   : > { %v2878_v35 = vpop.xlane.xlu1 %2877 }
 0x432   : > { %v2875_v17 = vpop.xlane.xlu0 %2874  ;;  %v2946_v23 = vadd.f32 %v2878_v35, %v2754_v7 }
 0x433   : > { %v2945_v51 = vadd.f32 %v2875_v17, %v2753_v45 }
 0x434   : > { %v2872_v47 = vpop.xlane.xlu2 %2871  ;;  %2978 = vst.msk [vmem:[#allocation4 + $0x68] sm:$0xff] %vm11645_vm0, %v2946_v23 }
 0x435   : > { %v2944_v43 = vadd.f32 %v2872_v47, %v2752_v25  ;;  %2977 = vst.msk [vmem:[#allocation4 + $0x60] sm:$0xff] %vm11695_vm3, %v2945_v51  ;;  %vm11710_vm3 = vmmov %vm11645_vm0 }
 0x437   : > { %2976 = vst.msk [vmem:[#allocation4 + $0x58] sm:$0xff] %vm11696_vm13, %v2944_v43  ;;  %vm11711_vm13 = vmmov %vm11645_vm0 }
 0x439   : > { %v2887_v1 = vpop.xlane.xlu1 %2886 }
 0x43a   : > { %v2884_v21 = vpop.xlane.xlu0 %2883  ;;  %v2949_v15 = vadd.f32 %v2887_v1, %v2757_v6 }
 0x43b   : > { %v2948_v38 = vadd.f32 %v2884_v21, %v2756_v41 }
 0x43c   : > { %v2881_v48 = vpop.xlane.xlu2 %2880  ;;  %2981 = vst.msk [vmem:[#allocation4 + $0x80] sm:$0xff] %vm11697_vm4, %v2949_v15  ;;  %vm11712_vm4 = vmmov %vm11645_vm0 }
 0x43d   : > { %v2947_v19 = vadd.f32 %v2881_v48, %v2755_v12  ;;  %2980 = vst.msk [vmem:[#allocation4 + $0x78] sm:$0xff] %vm11698_vm12, %v2948_v38  ;;  %vm11713_vm12 = vmmov %vm11645_vm0 }
 0x43f   : > { %2979 = vst.msk [vmem:[#allocation4 + $0x70] sm:$0xff] %vm11699_vm2, %v2947_v19 }
 0x441   : > { %v2896_v46 = vpop.xlane.xlu1 %2895 }
 0x442   : > { %v2893_v58 = vpop.xlane.xlu0 %2892  ;;  %v2952_v59 = vadd.f32 %v2896_v46, %v2760_v56 }
 0x443   : > { %v2951_v20 = vadd.f32 %v2893_v58, %v2759_v52 }
 0x444   : > { %v2890_v4 = vpop.xlane.xlu2 %2889  ;;  %2984 = vst.msk [vmem:[#allocation4 + $0x98] sm:$0xff] %vm11700_vm9, %v2952_v59 }
 0x445   : > { %v2950_v29 = vadd.f32 %v2890_v4, %v2758_v42  ;;  %2983 = vst.msk [vmem:[#allocation4 + $0x90] sm:$0xff] %vm11701_vm8, %v2951_v20 }
 0x447   : > { %2982 = vst.msk [vmem:[#allocation4 + $0x88] sm:$0xff] %vm11702_vm11, %v2950_v29 }
 0x449   : > { %v2905_v34 = vpop.xlane.xlu1 %2904 }
 0x44a   : > { %v2902_v10 = vpop.xlane.xlu0 %2901  ;;  %v2955_v30 = vadd.f32 %v2905_v34, %v2763_v18 }
 0x44b   : > { %v2954_v0 = vadd.f32 %v2902_v10, %v2762_v22 }
 0x44c   : > { %v2899_v5 = vpop.xlane.xlu2 %2898  ;;  %2987 = vst.msk [vmem:[#allocation4 + $0xb0] sm:$0xff] %vm11703_vm14, %v2955_v30 }
 0x44d   : > { %v2953_v3 = vadd.f32 %v2899_v5, %v2761_v55  ;;  %2986 = vst.msk [vmem:[#allocation4 + $0xa8] sm:$0xff] %vm11704_vm6, %v2954_v0 }
 0x44f   : > { %2985 = vst.msk [vmem:[#allocation4 + $0xa0] sm:$0xff] %vm11705_vm10, %v2953_v3 }
 0x451   : > { %v2914_v62 = vpop.xlane.xlu1 %2913 }
 0x452   : > { %v2911_v2 = vpop.xlane.xlu0 %2910  ;;  %v2958_v33 = vadd.f32 %v2914_v62, %v2766_v37 }
 0x453   : > { %v2957_v24 = vadd.f32 %v2911_v2, %v2765_v63 }
 0x454   : > { %v2908_v31 = vpop.xlane.xlu2 %2907  ;;  %2990 = vst.msk [vmem:[#allocation4 + $0xc8] sm:$0xff] %vm11706_vm5, %v2958_v33 }
 0x455   : > { %v2956_v16 = vadd.f32 %v2908_v31, %v2764_v9  ;;  %2989 = vst.msk [vmem:[#allocation4 + $0xc0] sm:$0xff] %vm11707_vm15, %v2957_v24 }
 0x457   : > { %2988 = vst.msk [vmem:[#allocation4 + $0xb8] sm:$0xff] %vm11708_vm1, %v2956_v16 }
 0x459   : > { %v2923_v40 = vpop.xlane.xlu1 %2922 }
 0x45a   : > { %v2920_v13 = vpop.xlane.xlu0 %2919  ;;  %v2961_v44 = vadd.f32 %v2923_v40, %v2769_v26 }
 0x45b   : > { %v2960_v53 = vadd.f32 %v2920_v13, %v2768_v61 }
 0x45c   : > { %v2917_v8 = vpop.xlane.xlu2 %2916  ;;  %2993 = vst.msk [vmem:[#allocation4 + $0xe0] sm:$0xff] %vm11709_vm7, %v2961_v44 }
 0x45d   : > { %v2959_v57 = vadd.f32 %v2917_v8, %v2767_v32  ;;  %2992 = vst.msk [vmem:[#allocation4 + $0xd8] sm:$0xff] %vm11645_vm0, %v2960_v53 }
 0x45f   : > { %2991 = vst.msk [vmem:[#allocation4 + $0xd0] sm:$0xff] %vm11710_vm3, %v2959_v57 }
 0x461   : > { %v2932_v36 = vpop.xlane.xlu1 %2931 }
 0x462   : > { %v2929_v11 = vpop.xlane.xlu0 %2928  ;;  %v2964_v7 = vadd.f32 %v2932_v36, %v2772_v39 }
 0x463   : > { %v2963_v45 = vadd.f32 %v2929_v11, %v2771_v14 }
 0x464   : > { %v2926_v25 = vpop.xlane.xlu2 %2925  ;;  %2996 = vst.msk [vmem:[#allocation4 + $0xf8] sm:$0xff] %vm11711_vm13, %v2964_v7 }
 0x465   : > { %v2962_v35 = vadd.f32 %v2926_v25, %v2770_v54  ;;  %2995 = vst.msk [vmem:[#allocation4 + $0xf0] sm:$0xff] %vm11712_vm4, %v2963_v45 }
 0x467   : > { %2994 = vst.msk [vmem:[#allocation4 + $0xe8] sm:$0xff] %vm11713_vm12, %v2962_v35 }
 0x468 PF: > { %2999 = sbr.rel (%p7062_p5) target bundleno = 1555 (0x613), region = 60 }
 0x46d   : > { %v5925_v17 = vmov 0   ;;  %v11714_v23 = vld [vmem:[#allocation121_spill] sm:$0xff]  ;;  %v11717_v43 = vld [vmem:[#allocation120_spill] sm:$0xff]  ;;  %v11718_v6 = vld [vmem:[#allocation114_spill] sm:$0xff] }
 0x46e   : > { %5565 = vset.pattern.permute.xlu2 %v5925_v17  ;;  %5564 = vset.pattern.permute.xlu1 %v5925_v17  ;;  %v11715_v51 = vld [vmem:[#allocation81_spill] sm:$0xff]  ;;  %v11720_v12 = vld [vmem:[#allocation144_spill] sm:$0xff]  ;;  %v11721_v1 = vld [vmem:[#allocation147_spill] sm:$0xff] }
 0x46f   : > { %5563 = vset.pattern.permute.xlu0 %v5925_v17  ;;  %3022 = vperm.xlu2 %5565, %v11714_v23   ;;  %v11716_v47 = vld [vmem:[#allocation69_spill] sm:$0xff]  ;;  %v11724_v38 = vld [vmem:[#allocation156_spill] sm:$0xff]  ;;  %v11726_v19 = vld [vmem:[#allocation162_spill] sm:$0xff] }
 0x470   : > { %3012 = vperm.xlu1 %5564, %v11715_v51   ;;  %3002 = vperm.xlu0 %5563, %v11716_v47   ;;  %v11719_v41 = vld [vmem:[#allocation73_spill] sm:$0xff]  ;;  %v11729_v42 = vld [vmem:[#allocation78_spill] sm:$0xff]  ;;  %v11730_v46 = vld [vmem:[#allocation72_spill] sm:$0xff] }
 0x471   : > { %v11722_v21 = vld [vmem:[#allocation129_spill] sm:$0xff]  ;;  %v11731_v58 = vld [vmem:[#allocation143_spill] sm:$0xff]  ;;  %v11733_v20 = vld [vmem:[#allocation118_spill] sm:$0xff] }
 0x472   : > { %v11723_v15 = vld [vmem:[#allocation153_spill] sm:$0xff]  ;;  %v11732_v59 = vld [vmem:[#allocation115_spill] sm:$0xff]  ;;  %v11734_v4 = vld [vmem:[#allocation86_spill] sm:$0xff] }
 0x473   : > { %v11725_v48 = vld [vmem:[#allocation133_spill] sm:$0xff]  ;;  %v11735_v29 = vld [vmem:[#allocation140_spill] sm:$0xff]  ;;  %v11736_v18 = vld [vmem:[#allocation142_spill] sm:$0xff] }
 0x474   : > { %v11727_v56 = vld [vmem:[#allocation165_spill] sm:$0xff]  ;;  %v11737_v22 = vld [vmem:[#allocation126_spill] sm:$0xff]  ;;  %v11738_v55 = vld [vmem:[#allocation148_spill] sm:$0xff] }
 0x475   : > { %v11728_v52 = vld [vmem:[#allocation137_spill] sm:$0xff]  ;;  %v11739_v34 = vld [vmem:[#allocation152_spill] sm:$0xff]  ;;  %v11740_v10 = vld [vmem:[#allocation131_spill] sm:$0xff] }
 0x476   : > { %v11741_v30 = vld [vmem:[#allocation158_spill] sm:$0xff]  ;;  %v11742_v0 = vld [vmem:[#allocation161_spill] sm:$0xff]  ;;  %v11743_v5 = vld [vmem:[#allocation135_spill] sm:$0xff] }
 0x477   : > { %3027 = vperm.xlu2 %5565, %v11717_v43   ;;  %v11744_v3 = vld [vmem:[#allocation168_spill] sm:$0xff]  ;;  %v11745_v37 = vld [vmem:[#allocation139_spill] sm:$0xff]  ;;  %v11750_v54 = vld [vmem:[#allocation53_spill] sm:$0xff] }
 0x478   : > { %3017 = vperm.xlu1 %5564, %v11718_v6   ;;  %3007 = vperm.xlu0 %5563, %v11719_v41   ;;  %v11746_v24 = vld [vmem:[#allocation31_spill] sm:$0xff]  ;;  %v11747_v16 = vld [vmem:[#allocation32_spill] sm:$0xff]  ;;  %v11751_v11 = vld [vmem:[#allocation54_spill] sm:$0xff] }
 0x479   : > { %v11748_v61 = vld [vmem:[#allocation19_spill] sm:$0xff]  ;;  %v11749_v40 = vld [vmem:[#allocation20_spill] sm:$0xff]  ;;  %v11753_v35 = vld [vmem:[#allocation25_spill] sm:$0xff] }
 0x47a   : > { %v11752_v45 = vld [vmem:[#allocation24_spill] sm:$0xff]  ;;  %v11754_v6 = vld [vmem:[#allocation61_spill] sm:$0xff] }
 0x47f   : > { %3042 = vperm.xlu2 %5565, %v11720_v12  }
 0x480   : > { %3037 = vperm.xlu1 %5564, %v11721_v1   ;;  %3032 = vperm.xlu0 %5563, %v11722_v21   ;;  %v11755_v21 = vld [vmem:[#allocation62_spill] sm:$0xff] }
 0x487   : > { %3057 = vperm.xlu2 %5565, %v11723_v15  }
 0x488   : > { %3052 = vperm.xlu1 %5564, %v11724_v38   ;;  %3047 = vperm.xlu0 %5563, %v11725_v48  }
 0x48f   : > { %3072 = vperm.xlu2 %5565, %v11726_v19   ;;  %v11756_v19 = vld [vmem:[#allocation59_spill] sm:$0xff] }
 0x490   : > { %3067 = vperm.xlu1 %5564, %v11727_v56   ;;  %3062 = vperm.xlu0 %5563, %v11728_v52  }
 0x497   : > { %3087 = vperm.xlu2 %5565, %v11729_v42  }
 0x498   : > { %3082 = vperm.xlu1 %5564, %v11730_v46   ;;  %3077 = vperm.xlu0 %5563, %v11731_v58   ;;  %v11757_v46 = vld [vmem:[#allocation60_spill] sm:$0xff] }
 0x49f   : > { %3102 = vperm.xlu2 %5565, %v11732_v59  }
 0x4a0   : > { %3097 = vperm.xlu1 %5564, %v11733_v20   ;;  %3092 = vperm.xlu0 %5563, %v11734_v4  }
 0x4a7   : > { %3117 = vperm.xlu2 %5565, %v11735_v29  }
 0x4a8   : > { %3112 = vperm.xlu1 %5564, %v11736_v18   ;;  %3107 = vperm.xlu0 %5563, %v11737_v22   ;;  %v11758_v22 = vld [vmem:[#allocation65_spill] sm:$0xff] }
 0x4af   : > { %3132 = vperm.xlu2 %5565, %v11738_v55  }
 0x4b0   : > { %3127 = vperm.xlu1 %5564, %v11739_v34   ;;  %3122 = vperm.xlu0 %5563, %v11740_v10   ;;  %v11759_v10 = vld [vmem:[#allocation66_spill] sm:$0xff] }
 0x4b7   : > { %3147 = vperm.xlu2 %5565, %v11741_v30  }
 0x4b8   : > { %3142 = vperm.xlu1 %5564, %v11742_v0   ;;  %3137 = vperm.xlu0 %5563, %v11743_v5  }
 0x4c0   : > { %3157 = vperm.xlu1 %5564, %v11744_v3   ;;  %3152 = vperm.xlu0 %5563, %v11745_v37   ;;  %v11760_v3 = vld [vmem:[#allocation93_spill] sm:$0xff] }
 0x4c9   : > { %v3023_v63 = vpop.permute.xlu2 %3022 }
 0x4ca   : > { %v3168_v41 = vsub.f32 %v11754_v6, %v3023_v63  ;;  %v3169_v15 = vsub.f32 %v11755_v21, %v3023_v63 }
 0x4cc   : > { %v3240_v59 = vmul.f32 1.442695, %v3168_v41  ;;  %v3242_v18 = vmul.f32 1.442695, %v3169_v15  ;;  %v11764_v15 = vld [vmem:[#allocation102_spill] sm:$0xff] }
 0x4d1   : > { %v3028_v9 = vpop.permute.xlu2 %3027 }
 0x4d2   : > { %v3170_v56 = vsub.f32 %v11756_v19, %v3028_v9  ;;  %v3171_v58 = vsub.f32 %v11757_v46, %v3028_v9 }
 0x4d4   : > { %v3244_v34 = vmul.f32 1.442695, %v3170_v56  ;;  %v3246_v0 = vmul.f32 1.442695, %v3171_v58 }
 0x4d9   : > { %v9090_v33 = vpop.permute.xlu2 %3042 }
 0x4da   : > { %v3176_v37 = vsub.f32 %v11760_v3, %v9090_v33 }
 0x4e1   : > { %v9100_v23 = vpop.permute.xlu2 %3057 }
 0x4e2   : > { %v3013_v62 = vpop.permute.xlu1 %3012  ;;  %v3003_v2 = vpop.permute.xlu0 %3002 }
 0x4e3   : > { %v3164_v31 = vsub.f32 %v11746_v24, %v3013_v62  ;;  %v3165_v26 = vsub.f32 %v11747_v16, %v3013_v62  ;;  %v3160_v32 = vsub.f32 %v11748_v61, %v3003_v2  ;;  %v3161_v13 = vsub.f32 %v11749_v40, %v3003_v2  ;;  %v11761_v62 = vld [vmem:[#allocation94_spill] sm:$0xff] }
 0x4e4   : > { %v3177_v2 = vsub.f32 %v11761_v62, %v9090_v33  ;;  %v11762_v33 = vld [vmem:[#allocation70_spill] sm:$0xff] }
 0x4e5   : > { %v3232_v44 = vmul.f32 1.442695, %v3164_v31  ;;  %v3234_v53 = vmul.f32 1.442695, %v3165_v26  ;;  %v3224_v8 = vmul.f32 1.442695, %v3160_v32 }
 0x4e6   : > { %v3226_v57 = vmul.f32 1.442695, %v3161_v13 }
 0x4e7   : > { %5566 = vpow2.f32 %v3232_v44 }
 0x4e8   : > { %5568 = vpow2.f32 %v3234_v53 }
 0x4e9   : > { %5570 = vpow2.f32 %v3224_v8  ;;  %v9112_v31 = vpop.permute.xlu2 %3072 }
 0x4ea   : > { %v3018_v39 = vpop.permute.xlu1 %3017  ;;  %v3008_v14 = vpop.permute.xlu0 %3007  ;;  %5572 = vpow2.f32 %v3226_v57  ;;  %v3256_v57 = vmul.f32 1.442695, %v3176_v37 }
 0x4eb   : > { %v3166_v36 = vsub.f32 %v11750_v54, %v3018_v39  ;;  %v3167_v7 = vsub.f32 %v11751_v11, %v3018_v39  ;;  %v3162_v25 = vsub.f32 %v11752_v45, %v3008_v14  ;;  %v3163_v17 = vsub.f32 %v11753_v35, %v3008_v14 }
 0x4ed   : > { %v3236_v51 = vmul.f32 1.442695, %v3166_v36  ;;  %v3238_v47 = vmul.f32 1.442695, %v3167_v7  ;;  %v5567_v43 = vpop.eup %5566  ;;  %v3228_v12 = vmul.f32 1.442695, %v3162_v25 }
 0x4ee   : > { %v5569_v1 = vpop.eup %5568  ;;  %v3230_v38 = vmul.f32 1.442695, %v3163_v17  ;;  %v3258_v7 = vmul.f32 1.442695, %v3177_v2 }
 0x4ef   : > { %v5571_v48 = vpop.eup %5570  ;;  %5574 = vpow2.f32 %v3236_v51  ;;  %v3422_v52 = vadd.f32 %v5569_v1, %v5567_v43 }
 0x4f0   : > { %v5573_v42 = vpop.eup %5572  ;;  %5576 = vpow2.f32 %v3238_v47  ;;  %v11763_v47 = vld [vmem:[#allocation71_spill] sm:$0xff] }
 0x4f1   : > { %5578 = vpow2.f32 %v3228_v12  ;;  %3423 = vadd.xlane.f32.xlu1 %v3422_v52  ;;  %v3416_v20 = vadd.f32 %v5573_v42, %v5571_v48  ;;  %v11765_v52 = vld [vmem:[#allocation103_spill] sm:$0xff] }
 0x4f2   : > { %v3038_v4 = vpop.permute.xlu1 %3037  ;;  %v3033_v29 = vpop.permute.xlu0 %3032  ;;  %5580 = vpow2.f32 %v3230_v38  ;;  %v3182_v38 = vsub.f32 %v11764_v15, %v9100_v23  ;;  %v3183_v42 = vsub.f32 %v11765_v52, %v9100_v23  ;;  %v11767_v23 = vld [vmem:[#allocation79_spill] sm:$0xff] }
 0x4f3   : > { %v3172_v55 = vsub.f32 %v11758_v22, %v3033_v29  ;;  %3417 = vadd.xlane.f32.xlu2 %v3416_v20  ;;  %v3173_v30 = vsub.f32 %v11759_v10, %v3033_v29  ;;  %5582 = vpow2.f32 %v3240_v59  ;;  %v3174_v13 = vsub.f32 %v6624_v28, %v3038_v4  ;;  %v9123_v29 = vpop.permute.xlu2 %3087 }
 0x4f4   : > { %5584 = vpow2.f32 %v3242_v18  ;;  %v3175_v8 = vsub.f32 %v6626_v60, %v3038_v4  ;;  %v11766_v18 = vld [vmem:[#allocation105_spill] sm:$0xff] }
 0x4f5   : > { %v5575_v5 = vpop.eup %5574  ;;  %v3248_v63 = vmul.f32 1.442695, %v3172_v55  ;;  %v3250_v26 = vmul.f32 1.442695, %v3173_v30  ;;  %5586 = vpow2.f32 %v3244_v34  ;;  %v3252_v51 = vmul.f32 1.442695, %v3174_v13 }
 0x4f6   : > { %v5577_v9 = vpop.eup %5576  ;;  %5588 = vpow2.f32 %v3246_v0  ;;  %v3254_v12 = vmul.f32 1.442695, %v3175_v8  ;;  %v3268_v30 = vmul.f32 1.442695, %v3182_v38  ;;  %v11768_v13 = vld [vmem:[#allocation80_spill] sm:$0xff] }
 0x4f7   : > { %v5579_v32 = vpop.eup %5578  ;;  %v3425_v44 = vadd.f32 %v5577_v9, %v5575_v5  ;;  %5590 = vpow2.f32 %v3248_v63  ;;  %v3270_v9 = vmul.f32 1.442695, %v3183_v42  ;;  %v11772_v38 = vld [vmem:[#allocation112_spill] sm:$0xff] }
 0x4f8   : > { %v5581_v53 = vpop.eup %5580  ;;  %5592 = vpow2.f32 %v3250_v26 }
 0x4f9   : > { %v3419_v39 = vadd.f32 %v5581_v53, %v5579_v32  ;;  %v5583_v17 = vpop.eup %5582  ;;  %5594 = vpow2.f32 %v3256_v57 }
 0x4fa   : > { %v3053_v14 = vpop.permute.xlu1 %3052  ;;  %v3048_v36 = vpop.permute.xlu0 %3047  ;;  %5596 = vpow2.f32 %v3258_v7 }
 0x4fb   : > { %v3178_v25 = vsub.f32 %v11762_v33, %v3048_v36  ;;  %3426 = vadd.xlane.f32.xlu2 %v3425_v44  ;;  %3420 = vadd.xlane.f32.xlu0 %v3419_v39  ;;  %v3179_v43 = vsub.f32 %v11763_v47, %v3048_v36  ;;  %v5585_v41 = vpop.eup %5584  ;;  %5598 = vpow2.f32 %v3252_v51  ;;  %v3180_v20 = vsub.f32 %v6980_v27, %v3053_v14  ;;  %v11769_v39 = vld [vmem:[#allocation111_spill] sm:$0xff] }
 0x4fc   : > { %v5587_v1 = vpop.eup %5586  ;;  %5600 = vpow2.f32 %v3254_v12  ;;  %v3181_v55 = vsub.f32 %v11766_v18, %v3053_v14  ;;  %v3428_v34 = vadd.f32 %v5585_v41, %v5583_v17  ;;  %v3188_v14 = vsub.f32 %v11769_v39, %v9112_v31  ;;  %v11771_v41 = vld [vmem:[#allocation113_spill] sm:$0xff] }
 0x4fd   : > { %v3260_v48 = vmul.f32 1.442695, %v3178_v25  ;;  %v5589_v56 = vpop.eup %5588  ;;  %v3262_v58 = vmul.f32 1.442695, %v3179_v43  ;;  %v3264_v32 = vmul.f32 1.442695, %v3180_v20 }
 0x4fe   : > { %v5591_v59 = vpop.eup %5590  ;;  %v3431_v0 = vadd.f32 %v5589_v56, %v5587_v1  ;;  %v3266_v8 = vmul.f32 1.442695, %v3181_v55  ;;  %v11770_v25 = vld [vmem:[#allocation110_spill] sm:$0xff]  ;;  %v3280_v42 = vmul.f32 1.442695, %v3188_v14 }
 0x4ff   : > { %v5593_v4 = vpop.eup %5592  ;;  %5602 = vpow2.f32 %v3260_v48  ;;  %v3189_v17 = vsub.f32 %v11770_v25, %v9112_v31 }
 0x500   : > { %v3434_v5 = vadd.f32 %v5593_v4, %v5591_v59  ;;  %5604 = vpow2.f32 %v3262_v58  ;;  %v5595_v26 = vpop.eup %5594 }
 0x501   : > { %v5597_v53 = vpop.eup %5596  ;;  %5606 = vpow2.f32 %v3268_v30  ;;  %v3282_v55 = vmul.f32 1.442695, %v3189_v17  ;;  %v11777_v17 = vld [vmem:[#allocation22_spill] sm:$0xff] }
 0x502   : > { %v3068_v37 = vpop.permute.xlu1 %3067  ;;  %v3063_v63 = vpop.permute.xlu0 %3062  ;;  %3435 = vadd.xlane.f32.xlu1 %v3434_v5  ;;  %5608 = vpow2.f32 %v3270_v9  ;;  %v3440_v56 = vadd.f32 %v5597_v53, %v5595_v26 }
 0x503   : > { %v3184_v2 = vsub.f32 %v11767_v23, %v3063_v63  ;;  %3429 = vadd.xlane.f32.xlu2 %v3428_v34  ;;  %3432 = vadd.xlane.f32.xlu0 %v3431_v0  ;;  %v3185_v44 = vsub.f32 %v11768_v13, %v3063_v63  ;;  %v5599_v57 = vpop.eup %5598  ;;  %5610 = vpow2.f32 %v3264_v32  ;;  %v3186_v12 = vsub.f32 %v11771_v41, %v3068_v37  ;;  %v11773_v34 = vld [vmem:[#allocation92_spill] sm:$0xff]  ;;  %v3103_v0 = vpop.permute.xlu2 %3102  ;;  %v11774_v63 = vld [vmem:[#allocation91_spill] sm:$0xff]  ;;  %v11775_v32 = vld [vmem:[#allocation29_spill] sm:$0xff] }
 0x504   : > { %v5601_v7 = vpop.eup %5600  ;;  %5612 = vpow2.f32 %v3266_v8  ;;  %v3187_v48 = vsub.f32 %v11772_v38, %v3068_v37 }
 0x505   : > { %v3272_v36 = vmul.f32 1.442695, %v3184_v2  ;;  %v3274_v51 = vmul.f32 1.442695, %v3185_v44  ;;  %v5603_v43 = vpop.eup %5602  ;;  %v3437_v58 = vadd.f32 %v5601_v7, %v5599_v57  ;;  %v3276_v5 = vmul.f32 1.442695, %v3186_v12 }
 0x506   : > { %v5605_v1 = vpop.eup %5604  ;;  %v3278_v37 = vmul.f32 1.442695, %v3187_v48  ;;  %v3194_v44 = vsub.f32 %v11775_v32, %v9123_v29  ;;  %v11776_v57 = vld [vmem:[#allocation30_spill] sm:$0xff]  ;;  %v11778_v12 = vld [vmem:[#allocation23_spill] sm:$0xff] }
 0x507   : > { %5614 = vpow2.f32 %v3272_v36  ;;  %v3443_v59 = vadd.f32 %v5605_v1, %v5603_v43  ;;  %v5607_v30 = vpop.eup %5606  ;;  %v3195_v14 = vsub.f32 %v11776_v57, %v9123_v29 }
 0x508   : > { %5616 = vpow2.f32 %v3274_v51  ;;  %v5609_v2 = vpop.eup %5608 }
 0x509   : > { %v5611_v26 = vpop.eup %5610  ;;  %5618 = vpow2.f32 %v3280_v42  ;;  %v3449_v48 = vadd.f32 %v5609_v2, %v5607_v30 }
 0x50a   : > { %v3083_v20 = vpop.permute.xlu1 %3082  ;;  %v3078_v4 = vpop.permute.xlu0 %3077  ;;  %3444 = vadd.xlane.f32.xlu1 %v3443_v59  ;;  %5620 = vpow2.f32 %v3282_v55  ;;  %v3294_v55 = vmul.f32 1.442695, %v3195_v14 }
 0x50b   : > { %v3190_v31 = vsub.f32 %v11773_v34, %v3078_v4  ;;  %3438 = vadd.xlane.f32.xlu2 %v3437_v58  ;;  %3441 = vadd.xlane.f32.xlu0 %v3440_v56  ;;  %v3191_v9 = vsub.f32 %v11774_v63, %v3078_v4  ;;  %v5613_v8 = vpop.eup %5612  ;;  %5622 = vpow2.f32 %v3276_v5  ;;  %v3192_v51 = vsub.f32 %v11777_v17, %v3083_v20  ;;  %v11780_v5 = vld [vmem:[#allocation37_spill] sm:$0xff]  ;;  %v11781_v17 = vld [vmem:[#allocation55_spill] sm:$0xff] }
 0x50c   : > { %5624 = vpow2.f32 %v3278_v37  ;;  %v3193_v1 = vsub.f32 %v11778_v12, %v3083_v20  ;;  %v3292_v56 = vmul.f32 1.442695, %v3194_v44  ;;  %v3446_v42 = vadd.f32 %v5613_v8, %v5611_v26  ;;  %v11782_v26 = vld [vmem:[#allocation56_spill] sm:$0xff] }
 0x50d   : > { %v3284_v53 = vmul.f32 1.442695, %v3190_v31  ;;  %v3286_v36 = vmul.f32 1.442695, %v3191_v9  ;;  %v5615_v7 = vpop.eup %5614  ;;  %v11779_v31 = vld [vmem:[#allocation36_spill] sm:$0xff]  ;;  %v3200_v20 = vsub.f32 %v11781_v17, %v3103_v0  ;;  %v3201_v44 = vsub.f32 %v11782_v26, %v3103_v0 }
 0x50e   : > { %v5617_v43 = vpop.eup %5616  ;;  %v3288_v57 = vmul.f32 1.442695, %v3192_v51  ;;  %v3290_v30 = vmul.f32 1.442695, %v3193_v1 }
 0x50f   : > { %5626 = vpow2.f32 %v3284_v53  ;;  %v3452_v58 = vadd.f32 %v5617_v43, %v5615_v7  ;;  %v5619_v9 = vpop.eup %5618  ;;  %v3118_v53 = vpop.permute.xlu2 %3117 }
 0x510   : > { %5628 = vpow2.f32 %v3286_v36  ;;  %v5621_v37 = vpop.eup %5620  ;;  %v11783_v36 = vld [vmem:[#allocation57_spill] sm:$0xff] }
 0x511   : > { %v5623_v2 = vpop.eup %5622  ;;  %5630 = vpow2.f32 %v3292_v56  ;;  %v3458_v1 = vadd.f32 %v5621_v37, %v5619_v9 }
 0x512   : > { %v3098_v59 = vpop.permute.xlu1 %3097  ;;  %v3093_v4 = vpop.permute.xlu0 %3092  ;;  %3453 = vadd.xlane.f32.xlu1 %v3452_v58  ;;  %5632 = vpow2.f32 %v3294_v55  ;;  %v3306_v58 = vmul.f32 1.442695, %v3201_v44  ;;  %v11785_v55 = vld [vmem:[#allocation63_spill] sm:$0xff] }
 0x513   : > { %v3196_v29 = vsub.f32 %v11779_v31, %v3093_v4  ;;  %3447 = vadd.xlane.f32.xlu2 %v3446_v42  ;;  %3450 = vadd.xlane.f32.xlu0 %v3449_v48  ;;  %v3197_v32 = vsub.f32 %v11780_v5, %v3093_v4  ;;  %v5625_v14 = vpop.eup %5624  ;;  %v3198_v7 = vsub.f32 %v11783_v36, %v3098_v59  ;;  %5634 = vpow2.f32 %v3288_v57  ;;  %v11784_v48 = vld [vmem:[#allocation58_spill] sm:$0xff]  ;;  %v11786_v57 = vld [vmem:[#allocation64_spill] sm:$0xff] }
 0x514   : > { %v3199_v42 = vsub.f32 %v11784_v48, %v3098_v59  ;;  %v3304_v5 = vmul.f32 1.442695, %v3200_v20  ;;  %5636 = vpow2.f32 %v3290_v30  ;;  %v3455_v56 = vadd.f32 %v5625_v14, %v5623_v2  ;;  %v11787_v20 = vld [vmem:[#allocation87_spill] sm:$0xff]  ;;  %v11788_v2 = vld [vmem:[#allocation88_spill] sm:$0xff] }
 0x515   : > { %v3296_v8 = vmul.f32 1.442695, %v3196_v29  ;;  %v3298_v51 = vmul.f32 1.442695, %v3197_v32  ;;  %v5627_v43 = vpop.eup %5626  ;;  %v3300_v29 = vmul.f32 1.442695, %v3198_v7  ;;  %v3206_v9 = vsub.f32 %v11787_v20, %v3118_v53 }
 0x516   : > { %v5629_v4 = vpop.eup %5628  ;;  %v3302_v32 = vmul.f32 1.442695, %v3199_v42  ;;  %v3207_v44 = vsub.f32 %v11788_v2, %v3118_v53  ;;  %v11789_v7 = vld [vmem:[#allocation47_spill] sm:$0xff] }
 0x517   : > { %5638 = vpow2.f32 %v3296_v8  ;;  %v3461_v17 = vadd.f32 %v5629_v4, %v5627_v43  ;;  %v5631_v36 = vpop.eup %5630  ;;  %v3133_v42 = vpop.permute.xlu2 %3132  ;;  %v11790_v4 = vld [vmem:[#allocation48_spill] sm:$0xff] }
 0x518   : > { %5640 = vpow2.f32 %v3298_v51  ;;  %v5633_v48 = vpop.eup %5632 }
 0x519   : > { %5642 = vpow2.f32 %v3304_v5  ;;  %v5635_v30 = vpop.eup %5634  ;;  %v3316_v5 = vmul.f32 1.442695, %v3206_v9  ;;  %v11793_v9 = vld [vmem:[#allocation97_spill] sm:$0xff] }
 0x51a   : > { %v3113_v0 = vpop.permute.xlu1 %3112  ;;  %v3108_v26 = vpop.permute.xlu0 %3107  ;;  %3462 = vadd.xlane.f32.xlu1 %v3461_v17  ;;  %5644 = vpow2.f32 %v3306_v58  ;;  %v3318_v17 = vmul.f32 1.442695, %v3207_v44 }
 0x51b   : > { %v3202_v31 = vsub.f32 %v11785_v55, %v3108_v26  ;;  %3456 = vadd.xlane.f32.xlu2 %v3455_v56  ;;  %3459 = vadd.xlane.f32.xlu0 %v3458_v1  ;;  %v3203_v59 = vsub.f32 %v11786_v57, %v3108_v26  ;;  %v5637_v14 = vpop.eup %5636  ;;  %5646 = vpow2.f32 %v3300_v29  ;;  %v3204_v51 = vsub.f32 %v11789_v7, %v3113_v0  ;;  %v11791_v29 = vld [vmem:[#allocation67_spill] sm:$0xff]  ;;  %v11792_v7 = vld [vmem:[#allocation68_spill] sm:$0xff] }
 0x51c   : > { %5648 = vpow2.f32 %v3302_v32  ;;  %v3205_v26 = vsub.f32 %v11790_v4, %v3113_v0  ;;  %v3467_v56 = vadd.f32 %v5633_v48, %v5631_v36  ;;  %v3212_v36 = vsub.f32 %v11793_v9, %v3133_v42 }
 0x51d   : > { %v3308_v37 = vmul.f32 1.442695, %v3202_v31  ;;  %v3310_v8 = vmul.f32 1.442695, %v3203_v59  ;;  %v5639_v43 = vpop.eup %5638  ;;  %v3464_v31 = vadd.f32 %v5637_v14, %v5635_v30  ;;  %v3312_v2 = vmul.f32 1.442695, %v3204_v51 }
 0x51e   : > { %v5641_v1 = vpop.eup %5640  ;;  %v3314_v32 = vmul.f32 1.442695, %v3205_v26  ;;  %v11794_v30 = vld [vmem:[#allocation98_spill] sm:$0xff]  ;;  %v11795_v51 = vld [vmem:[#allocation100_spill] sm:$0xff]  ;;  %v11796_v26 = vld [vmem:[#allocation101_spill] sm:$0xff] }
 0x51f   : > { %5650 = vpow2.f32 %v3308_v37  ;;  %v3470_v58 = vadd.f32 %v5641_v1, %v5639_v43  ;;  %v5643_v59 = vpop.eup %5642  ;;  %v3213_v44 = vsub.f32 %v11794_v30, %v3133_v42  ;;  %v3148_v9 = vpop.permute.xlu2 %3147  ;;  %v11797_v30 = vld [vmem:[#allocation74_spill] sm:$0xff] }
 0x520   : > { %5652 = vpow2.f32 %v3310_v8  ;;  %v5645_v12 = vpop.eup %5644 }
 0x521   : > { %v5647_v0 = vpop.eup %5646  ;;  %5654 = vpow2.f32 %v3316_v5 }
 0x522   : > { %v3128_v20 = vpop.permute.xlu1 %3127  ;;  %v3123_v53 = vpop.permute.xlu0 %3122  ;;  %3471 = vadd.xlane.f32.xlu1 %v3470_v58  ;;  %5656 = vpow2.f32 %v3318_v17  ;;  %v3476_v58 = vadd.f32 %v5645_v12, %v5643_v59  ;;  %v11800_v12 = vld [vmem:[#allocation107_spill] sm:$0xff] }
 0x523   : > { %v3208_v57 = vsub.f32 %v11791_v29, %v3123_v53  ;;  %v3209_v55 = vsub.f32 %v11792_v7, %v3123_v53  ;;  %3465 = vadd.xlane.f32.xlu2 %v3464_v31  ;;  %3468 = vadd.xlane.f32.xlu0 %v3467_v56  ;;  %v5649_v37 = vpop.eup %5648  ;;  %5658 = vpow2.f32 %v3312_v2  ;;  %v3210_v43 = vsub.f32 %v11795_v51, %v3128_v20  ;;  %v11798_v29 = vld [vmem:[#allocation75_spill] sm:$0xff] }
 0x524   : > { %5660 = vpow2.f32 %v3314_v32  ;;  %v3211_v31 = vsub.f32 %v11796_v26, %v3128_v20  ;;  %v3328_v56 = vmul.f32 1.442695, %v3212_v36  ;;  %v3330_v53 = vmul.f32 1.442695, %v3213_v44  ;;  %v11799_v36 = vld [vmem:[#allocation106_spill] sm:$0xff] }
 0x525   : > { %v3320_v48 = vmul.f32 1.442695, %v3208_v57  ;;  %v3322_v8 = vmul.f32 1.442695, %v3209_v55  ;;  %v5651_v14 = vpop.eup %5650  ;;  %v3473_v57 = vadd.f32 %v5649_v37, %v5647_v0  ;;  %v3324_v42 = vmul.f32 1.442695, %v3210_v43 }
 0x526   : > { %v5653_v1 = vpop.eup %5652  ;;  %v3326_v32 = vmul.f32 1.442695, %v3211_v31  ;;  %v3219_v59 = vsub.f32 %v11800_v12, %v3148_v9  ;;  %v11802_v31 = vld [vmem:[#allocation109_spill] sm:$0xff] }
 0x527   : > { %5662 = vpow2.f32 %v3320_v48  ;;  %v3479_v5 = vadd.f32 %v5653_v1, %v5651_v14  ;;  %v5655_v7 = vpop.eup %5654  ;;  %v3218_v48 = vsub.f32 %v11799_v36, %v3148_v9  ;;  %v11801_v14 = vld [vmem:[#allocation108_spill] sm:$0xff]  ;;  %v11804_v12 = vld [vmem:[#allocation85_spill] sm:$0xff] }
 0x528   : > { %5664 = vpow2.f32 %v3322_v8  ;;  %v5657_v4 = vpop.eup %5656  ;;  %v11803_v9 = vld [vmem:[#allocation84_spill] sm:$0xff] }
 0x529   : > { %v5659_v20 = vpop.eup %5658  ;;  %5666 = vpow2.f32 %v3328_v56 }
 0x52a   : > { %v3138_v17 = vpop.permute.xlu0 %3137  ;;  %v3143_v55 = vpop.permute.xlu1 %3142  ;;  %3480 = vadd.xlane.f32.xlu1 %v3479_v5  ;;  %5668 = vpow2.f32 %v3330_v53 }
 0x52b   : > { %v3214_v2 = vsub.f32 %v11797_v30, %v3138_v17  ;;  %v3215_v51 = vsub.f32 %v11798_v29, %v3138_v17  ;;  %3474 = vadd.xlane.f32.xlu2 %v3473_v57  ;;  %3477 = vadd.xlane.f32.xlu0 %v3476_v58  ;;  %v5661_v0 = vpop.eup %5660  ;;  %5670 = vpow2.f32 %v3324_v42  ;;  %v3216_v43 = vsub.f32 %v11801_v14, %v3143_v55 }
 0x52c   : > { %5672 = vpow2.f32 %v3326_v32  ;;  %v3217_v57 = vsub.f32 %v11802_v31, %v3143_v55  ;;  %v3340_v58 = vmul.f32 1.442695, %v3218_v48  ;;  %v3342_v17 = vmul.f32 1.442695, %v3219_v59 }
 0x52d   : > { %v3332_v44 = vmul.f32 1.442695, %v3214_v2  ;;  %v3334_v37 = vmul.f32 1.442695, %v3215_v51  ;;  %v5663_v8 = vpop.eup %5662  ;;  %v3482_v5 = vadd.f32 %v5661_v0, %v5659_v20  ;;  %v3485_v2 = vadd.f32 %v5657_v4, %v5655_v7  ;;  %v11805_v0 = vld [vmem:[#allocation116_spill] sm:$0xff] }
 0x52e   : > { %v5665_v1 = vpop.eup %5664  ;;  %v3336_v29 = vmul.f32 1.442695, %v3216_v43  ;;  %v3338_v14 = vmul.f32 1.442695, %v3217_v57 }
 0x52f   : > { %5674 = vpow2.f32 %v3332_v44  ;;  %v3488_v56 = vadd.f32 %v5665_v1, %v5663_v8  ;;  %v5667_v53 = vpop.eup %5666 }
 0x530   : > { %5676 = vpow2.f32 %v3334_v37  ;;  %v5669_v30 = vpop.eup %5668  ;;  %v11806_v37 = vld [vmem:[#allocation117_spill] sm:$0xff] }
 0x531   : > { %v5671_v32 = vpop.eup %5670  ;;  %5678 = vpow2.f32 %v3340_v58  ;;  %v3494_v1 = vadd.f32 %v5669_v30, %v5667_v53  ;;  %v11807_v30 = vld [vmem:[#allocation28_spill] sm:$0xff] }
 0x532   : > { %v3153_v36 = vpop.permute.xlu0 %3152  ;;  %3489 = vadd.xlane.f32.xlu1 %v3488_v56  ;;  %v3158_v55 = vpop.permute.xlu1 %3157  ;;  %5680 = vpow2.f32 %v3342_v17  ;;  %vm11808_vm2 = vcmp.eq.s32.totalorder %v11807_v30, %v6378_v49  ;;  %vm11809_vm9 = vcmp.eq.s32.totalorder %v11807_v30, %v6380_v50 }
 0x533   : > { %v3220_v51 = vsub.f32 %v11803_v9, %v3153_v36  ;;  %v3221_v42 = vsub.f32 %v11804_v12, %v3153_v36  ;;  %3483 = vadd.xlane.f32.xlu2 %v3482_v5  ;;  %3486 = vadd.xlane.f32.xlu0 %v3485_v2  ;;  %v5673_v44 = vpop.eup %5672  ;;  %5682 = vpow2.f32 %v3336_v29  ;;  %v3222_v59 = vsub.f32 %v11805_v0, %v3158_v55 }
 0x534   : > { %5684 = vpow2.f32 %v3338_v14  ;;  %v3223_v36 = vsub.f32 %v11806_v37, %v3158_v55  ;;  %v3491_v43 = vadd.f32 %v5673_v44, %v5671_v32  ;;  %v3608_v53 = vsel %vm11808_vm2, %v11748_v61, 0.0  ;;  %v11810_v44 = vld [vmem:[#allocation27_spill] sm:$0xff] }
 0x535   : > { %v3344_v48 = vmul.f32 1.442695, %v3220_v51  ;;  %v3346_v20 = vmul.f32 1.442695, %v3221_v42  ;;  %v5675_v7 = vpop.eup %5674  ;;  %v3348_v56 = vmul.f32 1.442695, %v3222_v59  ;;  %vm11811_vm8 = vcmp.eq.s32.totalorder %v11810_v44, %v6378_v49 }
 0x536   : > { %v5677_v4 = vpop.eup %5676  ;;  %v3350_v5 = vmul.f32 1.442695, %v3223_v36  ;;  %v3609_v32 = vsel %vm11809_vm9, %v11749_v40, 0.0  ;;  %vm11812_vm11 = vcmp.eq.s32.totalorder %v11810_v44, %v6380_v50  ;;  %v11813_v40 = vld [vmem:[#allocation16_spill] sm:$0xff] }
 0x537   : > { %5686 = vpow2.f32 %v3344_v48  ;;  %v3497_v8 = vadd.f32 %v5677_v4, %v5675_v7  ;;  %v5679_v57 = vpop.eup %5678  ;;  %v3611_v7 = vsel %vm11812_vm11, %v11753_v35, 0.0  ;;  %v3672_v59 = vadd.f32 %v3609_v32, %v3608_v53  ;;  %v11837_v53 = vld [vmem:[#allocation41_spill] sm:$0xff]  ;;  %v3354_v32 = vld [vmem:[#allocation3 + $0x10] sm:$0xff] }
 0x538   : > { %5688 = vpow2.f32 %v3346_v20  ;;  %v5681_v58 = vpop.eup %5680  ;;  %v3610_v20 = vsel %vm11811_vm8, %v11752_v45, 0.0  ;;  %vm11814_vm14 = vcmp.eq.s32.totalorder %v11813_v40, %v6378_v49  ;;  %vm11815_vm6 = vcmp.eq.s32.totalorder %v11813_v40, %v6380_v50  ;;  %v11845_v40 = vld [vmem:[#allocation21_spill] sm:$0xff] }
 0x539   : > { %v5683_v17 = vpop.eup %5682  ;;  %5690 = vpow2.f32 %v3348_v56  ;;  %v3503_v55 = vadd.f32 %v5681_v58, %v5679_v57  ;;  %v3675_v36 = vadd.f32 %v3611_v7, %v3610_v20  ;;  %v3613_v45 = vsel %vm11815_vm6, %v11747_v16, 0.0  ;;  %v11819_v57 = vld [vmem:[#allocation34_spill] sm:$0xff] }
 0x53a   : > { %3498 = vadd.xlane.f32.xlu1 %v3497_v8  ;;  %v5685_v29 = vpop.eup %5684  ;;  %5692 = vpow2.f32 %v3350_v5  ;;  %v3612_v8 = vsel %vm11814_vm14, %v11746_v24, 0.0  ;;  %vm11820_vm15 = vcmp.eq.s32.totalorder %v11819_v57, %v6378_v49  ;;  %vm11821_vm1 = vcmp.eq.s32.totalorder %v11819_v57, %v6380_v50  ;;  %v11825_v5 = vld [vmem:[#allocation17_spill] sm:$0xff]  ;;  %v11840_v7 = vld [vmem:[#allocation90_spill] sm:$0xff] }
 0x53b   : > { %3492 = vadd.xlane.f32.xlu2 %v3491_v43  ;;  %3495 = vadd.xlane.f32.xlu0 %v3494_v1  ;;  %v3500_v42 = vadd.f32 %v5685_v29, %v5683_v17  ;;  %v11816_v43 = vld [vmem:[#allocation35_spill] sm:$0xff]  ;;  %v3616_v24 = vsel %vm11820_vm15, %v11754_v6, 0.0  ;;  %v3617_v16 = vsel %vm11821_vm1, %v11755_v21, 0.0  ;;  %v3678_v58 = vadd.f32 %v3613_v45, %v3612_v8 }
 0x53c   : > { %vm11817_vm10 = vcmp.eq.s32.totalorder %v11816_v43, %v6378_v49  ;;  %vm11818_vm5 = vcmp.eq.s32.totalorder %v11816_v43, %v6380_v50  ;;  %v3684_v17 = vadd.f32 %v3617_v16, %v3616_v24  ;;  %vm11826_vm3 = vcmp.eq.s32.totalorder %v11825_v5, %v6378_v49 }
 0x53d   : > { %v5687_v2 = vpop.eup %5686  ;;  %v3614_v35 = vsel %vm11817_vm10, %v11750_v54, 0.0  ;;  %v3615_v1 = vsel %vm11818_vm5, %v11751_v11, 0.0  ;;  %v11822_v54 = vld [vmem:[#allocation40_spill] sm:$0xff]  ;;  %v3620_v21 = vsel %vm11826_vm3, %v11758_v22, 0.0  ;;  %vm11827_vm13 = vcmp.eq.s32.totalorder %v11825_v5, %v6380_v50  ;;  %v11831_v22 = vld [vmem:[#allocation42_spill] sm:$0xff] }
 0x53e   : > { %v5689_v14 = vpop.eup %5688  ;;  %v3681_v56 = vadd.f32 %v3615_v1, %v3614_v35  ;;  %vm11823_vm7 = vcmp.eq.s32.totalorder %v11822_v54, %v6378_v49  ;;  %vm11824_vm0 = vcmp.eq.s32.totalorder %v11822_v54, %v6380_v50  ;;  %v3621_v29 = vsel %vm11827_vm13, %v11759_v10, 0.0  ;;  %v11848_v35 = vld [vmem:[#allocation43_spill] sm:$0xff]  ;;  %v11858_v5 = vld [vmem:[#allocation26_spill] sm:$0xff] }
 0x53f   : > { %v3506_v51 = vadd.f32 %v5689_v14, %v5687_v2  ;;  %v5691_v48 = vpop.eup %5690  ;;  %v3618_v11 = vsel %vm11823_vm7, %v11756_v19, 0.0  ;;  %v3619_v6 = vsel %vm11824_vm0, %v11757_v46, 0.0  ;;  %v11828_v2 = vld [vmem:[#allocation39_spill] sm:$0xff]  ;;  %vm11832_vm2 = vcmp.eq.s32.totalorder %v11831_v22, %v6378_v49 }
 0x540   : > { %v5693_v4 = vpop.eup %5692  ;;  %vm11829_vm4 = vcmp.eq.s32.totalorder %v11828_v2, %v6378_v49  ;;  %vm11830_vm12 = vcmp.eq.s32.totalorder %v11828_v2, %v6380_v50  ;;  %v3687_v14 = vadd.f32 %v3619_v6, %v3618_v11  ;;  %v3624_v10 = vsel %vm11832_vm2, %v11760_v3, 0.0  ;;  %v11861_v2 = vld [vmem:[#allocation22_spill] sm:$0xff] }
 0x541   : > { %v3509_v61 = vadd.f32 %v5693_v4, %v5691_v48  ;;  %v3622_v19 = vsel %vm11829_vm4, %v6624_v28, 0.0  ;;  %v3623_v46 = vsel %vm11830_vm12, %v6626_v60, 0.0  ;;  %vm11833_vm9 = vcmp.eq.s32.totalorder %v11831_v22, %v6380_v50 }
 0x542   : > { %3507 = vadd.xlane.f32.xlu1 %v3506_v51  ;;  %v3690_v51 = vadd.f32 %v3621_v29, %v3620_v21  ;;  %v3625_v28 = vsel %vm11833_vm9, %v11761_v62, 0.0  ;;  %vm11838_vm14 = vcmp.eq.s32.totalorder %v11837_v53, %v6378_v49  ;;  %vm11839_vm6 = vcmp.eq.s32.totalorder %v11837_v53, %v6380_v50 }
 0x543   : > { %3501 = vadd.xlane.f32.xlu2 %v3500_v42  ;;  %3504 = vadd.xlane.f32.xlu0 %v3503_v55  ;;  %v3693_v42 = vadd.f32 %v3623_v46, %v3622_v19  ;;  %v11834_v55 = vld [vmem:[#allocation18_spill] sm:$0xff]  ;;  %v3628_v3 = vsel %vm11838_vm14, %v6980_v27, 0.0  ;;  %v3629_v62 = vsel %vm11839_vm6, %v11766_v18, 0.0  ;;  %v3696_v48 = vadd.f32 %v3625_v28, %v3624_v10  ;;  %v11842_v27 = vld [vmem:[#allocation44_spill] sm:$0xff]  ;;  %v11862_v19 = vld [vmem:[#allocation45_spill] sm:$0xff] }
 0x544   : > { %vm11835_vm8 = vcmp.eq.s32.totalorder %v11834_v55, %v6378_v49  ;;  %vm11836_vm11 = vcmp.eq.s32.totalorder %v11834_v55, %v6380_v50  ;;  %v3702_v20 = vadd.f32 %v3629_v62, %v3628_v3  ;;  %v3386_v4 = vmul.f32 %v11840_v7, %v3354_v32  ;;  %v11864_v46 = vld [vmem:[#allocation23_spill] sm:$0xff]  ;;  %v3356_v55 = vld [vmem:[#allocation3 + $0x20] sm:$0xff]  ;;  %v11870_v32 = vld [vmem:[#allocation125_spill] sm:$0xff] }
 0x545   : > { %v3626_v60 = vsel %vm11835_vm8, %v11762_v33, 0.0  ;;  %v3627_v30 = vsel %vm11836_vm11, %v11763_v47, 0.0  ;;  %v3352_v33 = vld [vmem:[#allocation3] sm:$0xff]  ;;  %vm11843_vm10 = vcmp.eq.s32.totalorder %v11842_v27, %v6378_v49  ;;  %vm11844_vm5 = vcmp.eq.s32.totalorder %v11842_v27, %v6380_v50  ;;  %v11874_v7 = vld [vmem:[#allocation30_spill] sm:$0xff]  ;;  %v11879_v27 = vld [vmem:[#allocation37_spill] sm:$0xff] }
 0x546   : > { %v3699_v44 = vadd.f32 %v3627_v30, %v3626_v60  ;;  %v11841_v47 = vld [vmem:[#allocation76_spill] sm:$0xff]  ;;  %v3631_v18 = vsel %vm11844_vm5, %v11765_v52, 0.0  ;;  %vm11846_vm15 = vcmp.eq.s32.totalorder %v11845_v40, %v6378_v49  ;;  %vm11847_vm1 = vcmp.eq.s32.totalorder %v11845_v40, %v6380_v50  ;;  %v3358_v60 = vld [vmem:[#allocation3 + $0x30] sm:$0xff]  ;;  %v11868_v30 = vld [vmem:[#allocation127_spill] sm:$0xff] }
 0x547   : > { %v3632_v8 = vsel %vm11846_vm15, %v11767_v23, 0.0  ;;  %v3633_v45 = vsel %vm11847_vm1, %v11768_v13, 0.0  ;;  %vm11849_vm7 = vcmp.eq.s32.totalorder %v11848_v35, %v6378_v49  ;;  %vm11850_vm0 = vcmp.eq.s32.totalorder %v11848_v35, %v6380_v50  ;;  %v3353_v13 = vld [vmem:[#allocation3 + $0x8] sm:$0xff]  ;;  %v11869_v3 = vld [vmem:[#allocation132_spill] sm:$0xff] }
 0x548   : > { %v3635_v52 = vsel %vm11850_vm0, %v11772_v38, 0.0  ;;  %vm11851_vm3 = vcmask 7168   ;;  %v3708_v24 = vadd.f32 %v3633_v45, %v3632_v8  ;;  %v11855_v38 = vld [vmem:[#allocation46_spill] sm:$0xff]  ;;  %vm11859_vm2 = vcmp.eq.s32.totalorder %v11858_v5, %v6378_v49  ;;  %v11882_v40 = vld [vmem:[#allocation49_spill] sm:$0xff] }
 0x549   : > { %vm11852_vm13 = vmmov %vm11851_vm3  ;;  %vm11856_vm4 = vcmp.eq.s32.totalorder %v11855_v38, %v6378_v49  ;;  %vm11857_vm12 = vcmp.eq.s32.totalorder %v11855_v38, %v6380_v50  ;;  %v3638_v21 = vsel %vm11859_vm2, %v11773_v34, 0.0  ;;  %vm11860_vm9 = vcmp.eq.s32.totalorder %v11858_v5, %v6380_v50  ;;  %v11884_v45 = vld [vmem:[#allocation58_spill] sm:$0xff]  ;;  %v11889_v38 = vld [vmem:[#allocation136_spill] sm:$0xff] }
 0x54a   : > { %3676 = vadd.xlane.f32.xlu1 %v3675_v36  ;;  %v3636_v11 = vsel %vm11856_vm4, %v11769_v39, 0.0  ;;  %v3637_v6 = vsel %vm11857_vm12, %v11770_v25, 0.0  ;;  %v3639_v29 = vsel %vm11860_vm9, %v11774_v63, 0.0  ;;  %vm11863_vm8 = vcmp.eq.s32.totalorder %v11862_v19, %v6378_v49  ;;  %v3357_v63 = vld [vmem:[#allocation3 + $0x28] sm:$0xff]  ;;  %vm11866_vm14 = vmmov %vm11851_vm3 }
 0x54b   : > { %3510 = vadd.xlane.f32.xlu2 %v3509_v61  ;;  %3673 = vadd.xlane.f32.xlu0 %v3672_v59  ;;  %v3384_v59 = vmul.f32 %v11841_v47, %v3352_v33  ;;  %v3630_v61 = vsel %vm11843_vm10, %v11764_v15, 0.0  ;;  %v3634_v15 = vsel %vm11849_vm7, %v11771_v41, 0.0  ;;  %v3640_v39 = vsel %vm11863_vm8, %v11861_v2, 0.0  ;;  %vm11867_vm6 = vmmov %vm11851_vm3  ;;  %v11876_v47 = vld [vmem:[#allocation36_spill] sm:$0xff] }
 0x54c   : > { %v3705_v57 = vadd.f32 %v3631_v18, %v3630_v61  ;;  %v3711_v16 = vadd.f32 %v3635_v52, %v3634_v15  ;;  %vm11865_vm11 = vcmp.eq.s32.totalorder %v11862_v19, %v6380_v50  ;;  %v3714_v34 = vadd.f32 %v3637_v6, %v3636_v11  ;;  %v11881_v18 = vld [vmem:[#allocation57_spill] sm:$0xff]  ;;  %vm11887_vm4 = vmmov %vm11851_vm3  ;;  %v11890_v6 = vld [vmem:[#allocation151_spill] sm:$0xff] }
 0x54d   : > { %v3641_v25 = vsel %vm11865_vm11, %v11864_v46, 0.0  ;;  %v3717_v10 = vadd.f32 %v3639_v29, %v3638_v21  ;;  %v3388_v53 = vmul.f32 %v11868_v30, %v3356_v55  ;;  %v3390_v62 = vmul.f32 %v11869_v3, %v3358_v60  ;;  %v11891_v21 = vld [vmem:[#allocation55_spill] sm:$0xff]  ;;  %v11892_v29 = vld [vmem:[#allocation52_spill] sm:$0xff] }
 0x54e   : > { %v3720_v28 = vadd.f32 %v3641_v25, %v3640_v39  ;;  %vm11883_vm7 = vcmp.eq.s32.totalorder %v11882_v40, %v6378_v49  ;;  %vm11885_vm0 = vcmp.eq.s32.totalorder %v11882_v40, %v6380_v50  ;;  %vm11893_vm12 = vcmp.eq.s32.totalorder %v11892_v29, %v6378_v49  ;;  %v11894_v19 = vld [vmem:[#allocation56_spill] sm:$0xff]  ;;  %v11896_v46 = vld [vmem:[#allocation63_spill] sm:$0xff]  ;;  %v11897_v25 = vld [vmem:[#allocation38_spill] sm:$0xff] }
 0x54f   : > { %v3646_v8 = vsel %vm11883_vm7, %v11881_v18, 0.0  ;;  %v3648_v2 = vsel %vm11893_vm12, %v11891_v21, 0.0  ;;  %vm11895_vm2 = vcmp.eq.s32.totalorder %v11892_v29, %v6380_v50  ;;  %vm11898_vm9 = vcmp.eq.s32.totalorder %v11897_v25, %v6378_v49  ;;  %v11912_v18 = vld [vmem:[#allocation87_spill] sm:$0xff]  ;;  %v3365_v21 = vld [vmem:[#allocation3 + $0x68] sm:$0xff]  ;;  %vm11926_vm12 = vmmov %vm11887_vm4 }
 0x550   : > { %v3649_v39 = vsel %vm11895_vm2, %v11894_v19, 0.0  ;;  %vm11900_vm8 = vcmp.eq.s32.totalorder %v11897_v25, %v6380_v50  ;;  %v11913_v40 = vld [vmem:[#allocation95_spill] sm:$0xff]  ;;  %vm11927_vm2 = vmmov %vm11887_vm4 }
 0x551   : > { %v3367_v29 = vld [vmem:[#allocation3 + $0x78] sm:$0xff] }
 0x552   : > { %3685 = vadd.xlane.f32.xlu1 %v3684_v17  ;;  %v11854_v17 = vld [vmem:[#allocation83_spill] sm:$0xff] }
 0x553   : > { %3679 = vadd.xlane.f32.xlu2 %v3678_v58  ;;  %3682 = vadd.xlane.f32.xlu0 %v3681_v56  ;;  %v3355_v58 = vld [vmem:[#allocation3 + $0x18] sm:$0xff]  ;;  %v3385_v54 = vmul.f32 %v11854_v17, %v3353_v13  ;;  %v11888_v17 = vld [vmem:[#allocation154_spill] sm:$0xff] }
 0x554   : > { %v11853_v56 = vld [vmem:[#allocation119_spill] sm:$0xff] }
 0x555   : > { %v3387_v41 = vmul.f32 %v11853_v56, %v3355_v58  ;;  %v3359_v13 = vld [vmem:[#allocation3 + $0x38] sm:$0xff]  ;;  %v3361_v56 = vld [vmem:[#allocation3 + $0x48] sm:$0xff] }
 0x556   : > { %v3393_v11 = vmul.f32 %v11889_v38, %v3361_v56  ;;  %v11930_v25 = vld [vmem:[#allocation167_spill] sm:$0xff] }
 0x55a   : > { %3694 = vadd.xlane.f32.xlu1 %v3693_v42 }
 0x55b   : > { %3688 = vadd.xlane.f32.xlu2 %v3687_v14  ;;  %3691 = vadd.xlane.f32.xlu0 %v3690_v51 }
 0x562   : > { %3703 = vadd.xlane.f32.xlu1 %v3702_v20  ;;  %v11872_v20 = vld [vmem:[#allocation50_spill] sm:$0xff] }
 0x563   : > { %3697 = vadd.xlane.f32.xlu2 %v3696_v48  ;;  %3700 = vadd.xlane.f32.xlu0 %v3699_v44  ;;  %v3389_v48 = vmul.f32 %v11870_v32, %v3357_v63  ;;  %v11871_v44 = vld [vmem:[#allocation29_spill] sm:$0xff]  ;;  %vm11873_vm10 = vcmp.eq.s32.totalorder %v11872_v20, %v6378_v49  ;;  %vm11875_vm5 = vcmp.eq.s32.totalorder %v11872_v20, %v6380_v50  ;;  %v3362_v20 = vld [vmem:[#allocation3 + $0x50] sm:$0xff] }
 0x564   : > { %v3424_v36 = vpop.xlane.xlu1 %3423  ;;  %v3642_v33 = vsel %vm11873_vm10, %v11871_v44, 0.0  ;;  %vm11907_vm10 = vmmov %vm11851_vm3 }
 0x565   : > { %v3514_v43 = vadd.f32 %v3424_v36, %v3386_v4  ;;  %v3643_v4 = vsel %vm11875_vm5, %v11874_v7, 0.0  ;;  %v3363_v7 = vld [vmem:[#allocation3 + $0x58] sm:$0xff]  ;;  %vm11908_vm5 = vmmov %vm11851_vm3 }
 0x566   : > { %v3418_v1 = vpop.xlane.xlu2 %3417 }
 0x567   : > { %3546 = vst.msk [vmem:[#allocation3 + $0x10] sm:$0xff] %vm11851_vm3, %v3514_v43  ;;  %v3512_v23 = vadd.f32 %v3418_v1, %v3384_v59  ;;  %v11877_v59 = vld [vmem:[#allocation33_spill] sm:$0xff]  ;;  %v3647_v43 = vsel %vm11885_vm0, %v11884_v45, 0.0  ;;  %v11915_v45 = vld [vmem:[#allocation88_spill] sm:$0xff] }
 0x568   : > { %vm11878_vm15 = vcmp.eq.s32.totalorder %v11877_v59, %v6378_v49  ;;  %vm11880_vm1 = vcmp.eq.s32.totalorder %v11877_v59, %v6380_v50  ;;  %v3729_v58 = vadd.f32 %v3647_v43, %v3646_v8  ;;  %v11910_v59 = vld [vmem:[#allocation141_spill] sm:$0xff] }
 0x569   : > { %3544 = vst.msk [vmem:[#allocation3] sm:$0xff] %vm11852_vm13, %v3512_v23  ;;  %v3644_v36 = vsel %vm11878_vm15, %v11876_v47, 0.0  ;;  %v3645_v61 = vsel %vm11880_vm1, %v11879_v27, 0.0  ;;  %vm11886_vm13 = vmmov %vm11851_vm3  ;;  %v11911_v27 = vld [vmem:[#allocation160_spill] sm:$0xff]  ;;  %vm11914_vm15 = vcmp.eq.s32.totalorder %v11913_v40, %v6378_v49  ;;  %vm11916_vm1 = vcmp.eq.s32.totalorder %v11913_v40, %v6380_v50 }
 0x56a   : > { %3712 = vadd.xlane.f32.xlu1 %v3711_v16  ;;  %v3654_v8 = vsel %vm11914_vm15, %v11912_v18, 0.0  ;;  %v3655_v43 = vsel %vm11916_vm1, %v11915_v45, 0.0  ;;  %v3369_v18 = vld [vmem:[#allocation3 + $0x88] sm:$0xff]  ;;  %vm11946_vm15 = vmmov %vm11927_vm2 }
 0x56b   : > { %3706 = vadd.xlane.f32.xlu2 %v3705_v57  ;;  %3709 = vadd.xlane.f32.xlu0 %v3708_v24  ;;  %v3723_v57 = vadd.f32 %v3643_v4, %v3642_v33  ;;  %v3726_v24 = vadd.f32 %v3645_v61, %v3644_v36  ;;  %v3364_v33 = vld [vmem:[#allocation3 + $0x60] sm:$0xff]  ;;  %v11909_v4 = vld [vmem:[#allocation163_spill] sm:$0xff]  ;;  %v3395_v61 = vmul.f32 %v11911_v27, %v3363_v7  ;;  %vm11947_vm1 = vmmov %vm11927_vm2 }
 0x56c   : > { %v3394_v47 = vmul.f32 %v11909_v4, %v3362_v20  ;;  %v3396_v36 = vmul.f32 %v11910_v59, %v3364_v33  ;;  %v3741_v38 = vadd.f32 %v3655_v43, %v3654_v8  ;;  %v3368_v27 = vld [vmem:[#allocation3 + $0x80] sm:$0xff]  ;;  %v11950_v43 = vld [vmem:[#allocation89_spill] sm:$0xff] }
 0x56d   : > { %v11949_v8 = vld [vmem:[#allocation96_spill] sm:$0xff] }
 0x56e   : > { %v3427_v14 = vpop.xlane.xlu2 %3426  ;;  %v3421_v51 = vpop.xlane.xlu0 %3420 }
 0x56f   : > { %v3515_v42 = vadd.f32 %v3427_v14, %v3387_v41  ;;  %v3513_v22 = vadd.f32 %v3421_v51, %v3385_v54  ;;  %v3360_v41 = vld [vmem:[#allocation3 + $0x40] sm:$0xff]  ;;  %v3391_v54 = vmul.f32 %v11888_v17, %v3359_v13  ;;  %v3650_v14 = vsel %vm11898_vm9, %v11896_v46, 0.0 }
 0x570   : > { %v3392_v5 = vmul.f32 %v11890_v6, %v3360_v41  ;;  %v11899_v51 = vld [vmem:[#allocation64_spill] sm:$0xff] }
 0x571   : > { %3547 = vst.msk [vmem:[#allocation3 + $0x18] sm:$0xff] %vm11866_vm14, %v3515_v42  ;;  %v3651_v42 = vsel %vm11900_vm8, %v11899_v51, 0.0  ;;  %v11931_v51 = vld [vmem:[#allocation97_spill] sm:$0xff] }
 0x572   : > { %3545 = vst.msk [vmem:[#allocation3 + $0x8] sm:$0xff] %vm11867_vm6, %v3513_v22  ;;  %3721 = vadd.xlane.f32.xlu1 %v3720_v28  ;;  %v11901_v22 = vld [vmem:[#allocation47_spill] sm:$0xff]  ;;  %v11904_v28 = vld [vmem:[#allocation48_spill] sm:$0xff]  ;;  %v3735_v32 = vadd.f32 %v3651_v42, %v3650_v14  ;;  %vm11906_vm6 = vmmov %vm11851_vm3 }
 0x573   : > { %3715 = vadd.xlane.f32.xlu2 %v3714_v34  ;;  %3718 = vadd.xlane.f32.xlu0 %v3717_v10  ;;  %v11902_v34 = vld [vmem:[#allocation51_spill] sm:$0xff]  ;;  %v11932_v42 = vld [vmem:[#allocation128_spill] sm:$0xff] }
 0x574   : > { %vm11903_vm11 = vcmp.eq.s32.totalorder %v11902_v34, %v6378_v49  ;;  %vm11905_vm14 = vcmp.eq.s32.totalorder %v11902_v34, %v6380_v50  ;;  %vm11933_vm9 = vcmp.eq.s32.totalorder %v11932_v42, %v6378_v49  ;;  %v11934_v34 = vld [vmem:[#allocation98_spill] sm:$0xff]  ;;  %vm11935_vm8 = vcmp.eq.s32.totalorder %v11932_v42, %v6380_v50 }
 0x575   : > { %v3436_v1 = vpop.xlane.xlu1 %3435  ;;  %v3652_v10 = vsel %vm11903_vm11, %v11901_v22, 0.0  ;;  %v3653_v55 = vsel %vm11905_vm14, %v11904_v28, 0.0  ;;  %v3660_v22 = vsel %vm11933_vm9, %v11931_v51, 0.0  ;;  %v11936_v28 = vld [vmem:[#allocation74_spill] sm:$0xff]  ;;  %vm11963_vm9 = vmmov %vm11947_vm1 }
 0x576   : > { %v3430_v35 = vpop.xlane.xlu2 %3429  ;;  %v3433_v15 = vpop.xlane.xlu0 %3432  ;;  %v3518_v16 = vadd.f32 %v3436_v1, %v3390_v62  ;;  %v3732_v62 = vadd.f32 %v3649_v39, %v3648_v2  ;;  %v3738_v44 = vadd.f32 %v3653_v55, %v3652_v10  ;;  %v11920_v1 = vld [vmem:[#allocation68_spill] sm:$0xff]  ;;  %v3366_v2 = vld [vmem:[#allocation3 + $0x70] sm:$0xff]  ;;  %v3661_v10 = vsel %vm11935_vm8, %v11934_v34, 0.0  ;;  %vm11964_vm8 = vmmov %vm11947_vm1 }
 0x577   : > { %v3516_v52 = vadd.f32 %v3430_v35, %v3388_v53  ;;  %v3517_v23 = vadd.f32 %v3433_v15, %v3389_v48  ;;  %v11917_v35 = vld [vmem:[#allocation67_spill] sm:$0xff]  ;;  %v11918_v15 = vld [vmem:[#allocation77_spill] sm:$0xff]  ;;  %v11929_v39 = vld [vmem:[#allocation150_spill] sm:$0xff]  ;;  %v3398_v14 = vmul.f32 %v11930_v25, %v3366_v2  ;;  %v3750_v4 = vadd.f32 %v3661_v10, %v3660_v22 }
 0x578   : > { %3550 = vst.msk [vmem:[#allocation3 + $0x30] sm:$0xff] %vm11886_vm13, %v3518_v16  ;;  %vm11919_vm7 = vcmp.eq.s32.totalorder %v11918_v15, %v6378_v49  ;;  %vm11921_vm0 = vcmp.eq.s32.totalorder %v11918_v15, %v6380_v50  ;;  %v3399_v46 = vmul.f32 %v11929_v39, %v3367_v29  ;;  %v11937_v55 = vld [vmem:[#allocation124_spill] sm:$0xff]  ;;  %v11951_v15 = vld [vmem:[#allocation106_spill] sm:$0xff]  ;;  %v3375_v10 = vld [vmem:[#allocation3 + $0xb8] sm:$0xff] }
 0x579   : > { %3548 = vst.msk [vmem:[#allocation3 + $0x20] sm:$0xff] %vm11851_vm3, %v3516_v52  ;;  %v3656_v52 = vsel %vm11919_vm7, %v11917_v35, 0.0  ;;  %vm11938_vm11 = vcmp.eq.s32.totalorder %v11937_v55, %v6378_v49  ;;  %vm11940_vm14 = vcmp.eq.s32.totalorder %v11937_v55, %v6380_v50  ;;  %v3401_v35 = vmul.f32 %v11950_v43, %v3369_v18  ;;  %v3372_v2 = vld [vmem:[#allocation3 + $0xa0] sm:$0xff]  ;;  %v3374_v34 = vld [vmem:[#allocation3 + $0xb0] sm:$0xff]  ;;  %v11971_v55 = vld [vmem:[#allocation149_spill] sm:$0xff] }
 0x57a   : > { %3549 = vst.msk [vmem:[#allocation3 + $0x28] sm:$0xff] %vm11887_vm4, %v3517_v23  ;;  %3730 = vadd.xlane.f32.xlu1 %v3729_v58  ;;  %v3657_v23 = vsel %vm11921_vm0, %v11920_v1, 0.0  ;;  %v11979_v18 = vld [vmem:[#allocation138_spill] sm:$0xff] }
 0x57b   : > { %3724 = vadd.xlane.f32.xlu2 %v3723_v57  ;;  %3727 = vadd.xlane.f32.xlu0 %v3726_v24  ;;  %v11922_v57 = vld [vmem:[#allocation100_spill] sm:$0xff]  ;;  %v11923_v24 = vld [vmem:[#allocation99_spill] sm:$0xff] }
 0x57c   : > { %vm11924_vm3 = vcmp.eq.s32.totalorder %v11923_v24, %v6378_v49  ;;  %vm11925_vm13 = vcmp.eq.s32.totalorder %v11923_v24, %v6380_v50  ;;  %v11956_v24 = vld [vmem:[#allocation171_spill] sm:$0xff] }
 0x57d   : > { %v3445_v53 = vpop.xlane.xlu1 %3444  ;;  %v3658_v16 = vsel %vm11924_vm3, %v11922_v57, 0.0  ;;  %v3659_v58 = vsel %vm11925_vm13, %v11796_v26, 0.0  ;;  %v11928_v26 = vld [vmem:[#allocation169_spill] sm:$0xff]  ;;  %vm11957_vm3 = vcmp.eq.s32.totalorder %v11956_v24, %v6378_v49  ;;  %vm11958_vm13 = vcmp.eq.s32.totalorder %v11956_v24, %v6380_v50 }
 0x57e   : > { %v3439_v60 = vpop.xlane.xlu2 %3438  ;;  %v3442_v63 = vpop.xlane.xlu0 %3441  ;;  %v3521_v48 = vadd.f32 %v3445_v53, %v3393_v11  ;;  %v3744_v11 = vadd.f32 %v3657_v23, %v3656_v52  ;;  %v3397_v19 = vmul.f32 %v11928_v26, %v3365_v21  ;;  %v11941_v53 = vld [vmem:[#allocation108_spill] sm:$0xff]  ;;  %v11952_v52 = vld [vmem:[#allocation170_spill] sm:$0xff]  ;;  %v11954_v23 = vld [vmem:[#allocation107_spill] sm:$0xff] }
 0x57f   : > { %v3519_v30 = vadd.f32 %v3439_v60, %v3391_v54  ;;  %v3520_v3 = vadd.f32 %v3442_v63, %v3392_v5  ;;  %v3747_v5 = vadd.f32 %v3659_v58, %v3658_v16  ;;  %v3662_v60 = vsel %vm11938_vm11, %v11936_v28, 0.0  ;;  %v11939_v63 = vld [vmem:[#allocation75_spill] sm:$0xff]  ;;  %vm11968_vm11 = vmmov %vm11947_vm1  ;;  %v3376_v28 = vld [vmem:[#allocation3 + $0xc0] sm:$0xff] }
 0x580   : > { %3553 = vst.msk [vmem:[#allocation3 + $0x48] sm:$0xff] %vm11907_vm10, %v3521_v48  ;;  %vm11953_vm7 = vcmp.eq.s32.totalorder %v11952_v52, %v6378_v49  ;;  %vm11955_vm0 = vcmp.eq.s32.totalorder %v11952_v52, %v6380_v50  ;;  %v3668_v16 = vsel %vm11957_vm3, %v11803_v9, 0.0  ;;  %v3669_v58 = vsel %vm11958_vm13, %v11804_v12, 0.0  ;;  %v3371_v12 = vld [vmem:[#allocation3 + $0x98] sm:$0xff]  ;;  %v3380_v52 = vld [vmem:[#allocation3 + $0xe0] sm:$0xff] }
 0x581   : > { %3551 = vst.msk [vmem:[#allocation3 + $0x38] sm:$0xff] %vm11906_vm6, %v3519_v30  ;;  %v3663_v30 = vsel %vm11940_vm14, %v11939_v63, 0.0  ;;  %v3666_v1 = vsel %vm11953_vm7, %v11951_v15, 0.0  ;;  %v3667_v57 = vsel %vm11955_vm0, %v11954_v23, 0.0  ;;  %vm11969_vm14 = vmmov %vm11947_vm1  ;;  %v11972_v63 = vld [vmem:[#allocation146_spill] sm:$0xff] }
 0x582   : > { %3552 = vst.msk [vmem:[#allocation3 + $0x40] sm:$0xff] %vm11908_vm5, %v3520_v3  ;;  %3739 = vadd.xlane.f32.xlu1 %v3738_v44  ;;  %v11942_v3 = vld [vmem:[#allocation104_spill] sm:$0xff]  ;;  %vm11945_vm5 = vmmov %vm11927_vm2  ;;  %v3382_v23 = vld [vmem:[#allocation3 + $0xf0] sm:$0xff] }
 0x583   : > { %3733 = vadd.xlane.f32.xlu2 %v3732_v62  ;;  %3736 = vadd.xlane.f32.xlu0 %v3735_v32  ;;  %vm11943_vm6 = vcmp.eq.s32.totalorder %v11942_v3, %v6378_v49  ;;  %vm11944_vm10 = vcmp.eq.s32.totalorder %v11942_v3, %v6380_v50  ;;  %vm11980_vm7 = vmmov %vm11947_vm1 }
 0x584   : > { %v3664_v62 = vsel %vm11943_vm6, %v11941_v53, 0.0  ;;  %v3665_v32 = vsel %vm11944_vm10, %v11802_v31, 0.0  ;;  %v11948_v31 = vld [vmem:[#allocation82_spill] sm:$0xff]  ;;  %vm11970_vm6 = vmmov %vm11947_vm1 }
 0x585   : > { %v3454_v17 = vpop.xlane.xlu1 %3453  ;;  %v3400_v40 = vmul.f32 %v11948_v31, %v3368_v27  ;;  %v11973_v53 = vld [vmem:[#allocation134_spill] sm:$0xff]  ;;  %vm11974_vm10 = vmmov %vm11947_vm1  ;;  %v11978_v27 = vld [vmem:[#allocation155_spill] sm:$0xff] }
 0x586   : > { %v3448_v13 = vpop.xlane.xlu2 %3447  ;;  %v3451_v56 = vpop.xlane.xlu0 %3450  ;;  %v3524_v6 = vadd.f32 %v3454_v17, %v3396_v36  ;;  %v3756_v36 = vadd.f32 %v3665_v32, %v3664_v62  ;;  %v3408_v3 = vmul.f32 %v11973_v53, %v3376_v28  ;;  %vm11981_vm0 = vmmov %vm11947_vm1  ;;  %v3582_v28 = vld [vmem:[#allocation4 + $0x30] sm:$0xff] }
 0x587   : > { %v3522_v41 = vadd.f32 %v3448_v13, %v3394_v47  ;;  %v3523_v54 = vadd.f32 %v3451_v56, %v3395_v61  ;;  %v3753_v47 = vadd.f32 %v3663_v30, %v3662_v60  ;;  %v3370_v61 = vld [vmem:[#allocation3 + $0x90] sm:$0xff]  ;;  %v11959_v13 = vld [vmem:[#allocation157_spill] sm:$0xff]  ;;  %v3406_v60 = vmul.f32 %v11971_v55, %v3374_v34  ;;  %vm11985_vm3 = vmmov %vm11981_vm0 }
 0x588   : > { %3556 = vst.msk [vmem:[#allocation3 + $0x60] sm:$0xff] %vm11926_vm12, %v3524_v6  ;;  %v3402_v45 = vmul.f32 %v11949_v8, %v3370_v61  ;;  %vm11961_vm12 = vcmp.eq.s32.totalorder %v11959_v13, %v6380_v50  ;;  %v3759_v6 = vadd.f32 %v3667_v57, %v3666_v1  ;;  %v11965_v50 = vld [vmem:[#allocation123_spill] sm:$0xff]  ;;  %v3407_v30 = vmul.f32 %v11972_v63, %v3375_v10  ;;  %v3381_v1 = vld [vmem:[#allocation3 + $0xe8] sm:$0xff]  ;;  %v11982_v57 = vld [vmem:[#allocation166_spill] sm:$0xff] }
 0x589   : > { %3554 = vst.msk [vmem:[#allocation3 + $0x50] sm:$0xff] %vm11887_vm4, %v3522_v41  ;;  %vm11960_vm4 = vcmp.eq.s32.totalorder %v11959_v13, %v6378_v49  ;;  %v3671_v41 = vsel %vm11961_vm12, %v11806_v37, 0.0  ;;  %v3373_v49 = vld [vmem:[#allocation3 + $0xa8] sm:$0xff]  ;;  %v11966_v37 = vld [vmem:[#allocation122_spill] sm:$0xff]  ;;  %v3412_v24 = vmul.f32 %v11982_v57, %v3380_v52  ;;  %vm11986_vm13 = vmmov %vm11981_vm0 }
 0x58a   : > { %3555 = vst.msk [vmem:[#allocation3 + $0x58] sm:$0xff] %vm11927_vm2, %v3523_v54  ;;  %3748 = vadd.xlane.f32.xlu1 %v3747_v5  ;;  %v3670_v56 = vsel %vm11960_vm4, %v11805_v0, 0.0  ;;  %v3762_v5 = vadd.f32 %v3669_v58, %v3668_v16  ;;  %vm11962_vm2 = vmmov %vm11947_vm1  ;;  %v3403_v0 = vmul.f32 %v11965_v50, %v3371_v12  ;;  %v3404_v26 = vmul.f32 %v11966_v37, %v3372_v2  ;;  %v11983_v16 = vld [vmem:[#allocation164_spill] sm:$0xff]  ;;  %v11984_v13 = vld [vmem:[#allocation145_spill] sm:$0xff] }
 0x58b   : > { %3742 = vadd.xlane.f32.xlu2 %v3741_v38  ;;  %3745 = vadd.xlane.f32.xlu0 %v3744_v11  ;;  %v3765_v29 = vadd.f32 %v3671_v41, %v3670_v56  ;;  %v3413_v58 = vmul.f32 %v11983_v16, %v3381_v1  ;;  %v3414_v56 = vmul.f32 %v11984_v13, %v3382_v23  ;;  %vm11987_vm4 = vmmov %vm11981_vm0  ;;  %v3577_v12 = vld [vmem:[#allocation4 + $0x8] sm:$0xff]  ;;  %v3583_v55 = vld [vmem:[#allocation4 + $0x38] sm:$0xff] }
 0x58c   : > { %vm11989_vm12 = vmmov %vm11981_vm0  ;;  %v3581_v10 = vld [vmem:[#allocation4 + $0x28] sm:$0xff]  ;;  %v3592_v52 = vld [vmem:[#allocation4 + $0x80] sm:$0xff] }
 0x58d   : > { %v3463_v33 = vpop.xlane.xlu1 %3462  ;;  %v3593_v13 = vld [vmem:[#allocation4 + $0x88] sm:$0xff] }
 0x58e   : > { %v3457_v48 = vpop.xlane.xlu2 %3456  ;;  %v3460_v44 = vpop.xlane.xlu0 %3459  ;;  %v3527_v59 = vadd.f32 %v3463_v33, %v3399_v46 }
 0x58f   : > { %v3525_v20 = vadd.f32 %v3457_v48, %v3397_v19  ;;  %v3526_v7 = vadd.f32 %v3460_v44, %v3398_v14  ;;  %v11967_v19 = vld [vmem:[#allocation130_spill] sm:$0xff] }
 0x590   : > { %3559 = vst.msk [vmem:[#allocation3 + $0x78] sm:$0xff] %vm11946_vm15, %v3527_v59  ;;  %v3405_v39 = vmul.f32 %v11967_v19, %v3373_v49  ;;  %vm11976_vm15 = vmmov %vm11947_vm1  ;;  %v11977_v59 = vld [vmem:[#allocation159_spill] sm:$0xff]  ;;  %v3578_v19 = vld [vmem:[#allocation4 + $0x10] sm:$0xff] }
 0x591   : > { %3557 = vst.msk [vmem:[#allocation3 + $0x68] sm:$0xff] %vm11945_vm5, %v3525_v20  ;;  %vm11975_vm5 = vmmov %vm11947_vm1 }
 0x592   : > { %3558 = vst.msk [vmem:[#allocation3 + $0x70] sm:$0xff] %vm11947_vm1, %v3526_v7  ;;  %3757 = vadd.xlane.f32.xlu1 %v3756_v36  ;;  %v3377_v7 = vld [vmem:[#allocation3 + $0xc8] sm:$0xff] }
 0x593   : > { %3751 = vadd.xlane.f32.xlu2 %v3750_v4  ;;  %3754 = vadd.xlane.f32.xlu0 %v3753_v47  ;;  %v3378_v4 = vld [vmem:[#allocation3 + $0xd0] sm:$0xff]  ;;  %v3379_v47 = vld [vmem:[#allocation3 + $0xd8] sm:$0xff]  ;;  %v3409_v36 = vmul.f32 %v11977_v59, %v3377_v7 }
 0x594   : > { %v3410_v61 = vmul.f32 %v11978_v27, %v3378_v4  ;;  %v3411_v31 = vmul.f32 %v11979_v18, %v3379_v47  ;;  %v3588_v27 = vld [vmem:[#allocation4 + $0x60] sm:$0xff] }
 0x595   : > { %v3472_v11 = vpop.xlane.xlu1 %3471 }
 0x596   : > { %v3466_v17 = vpop.xlane.xlu2 %3465  ;;  %v3469_v54 = vpop.xlane.xlu0 %3468  ;;  %v3530_v21 = vadd.f32 %v3472_v11, %v3402_v45 }
 0x597   : > { %v3528_v38 = vadd.f32 %v3466_v17, %v3400_v40  ;;  %v3529_v9 = vadd.f32 %v3469_v54, %v3401_v35 }
 0x598   : > { %3562 = vst.msk [vmem:[#allocation3 + $0x90] sm:$0xff] %vm11963_vm9, %v3530_v21  ;;  %vm11991_vm9 = vmmov %vm11981_vm0 }
 0x599   : > { %3560 = vst.msk [vmem:[#allocation3 + $0x80] sm:$0xff] %vm11962_vm2, %v3528_v38  ;;  %vm11990_vm2 = vmmov %vm11981_vm0 }
 0x59a   : > { %3561 = vst.msk [vmem:[#allocation3 + $0x88] sm:$0xff] %vm11964_vm8, %v3529_v9  ;;  %3766 = vadd.xlane.f32.xlu1 %v3765_v29  ;;  %v3576_v29 = vld [vmem:[#allocation4] sm:$0xff]  ;;  %vm11992_vm8 = vmmov %vm11981_vm0 }
 0x59b   : > { %3760 = vadd.xlane.f32.xlu2 %v3759_v6  ;;  %3763 = vadd.xlane.f32.xlu0 %v3762_v5  ;;  %v3383_v6 = vld [vmem:[#allocation3 + $0xf8] sm:$0xff]  ;;  %v11988_v5 = vld [vmem:[#allocation172_spill] sm:$0xff] }
 0x59c   : > { %v3415_v21 = vmul.f32 %v11988_v5, %v3383_v6  ;;  %v3596_v5 = vld [vmem:[#allocation4 + $0xa0] sm:$0xff] }
 0x59d   : > { %v3481_v51 = vpop.xlane.xlu1 %3480 }
 0x59e   : > { %v3475_v46 = vpop.xlane.xlu2 %3474  ;;  %v3478_v25 = vpop.xlane.xlu0 %3477  ;;  %v3533_v22 = vadd.f32 %v3481_v51, %v3405_v39  ;;  %v3579_v39 = vld [vmem:[#allocation4 + $0x18] sm:$0xff] }
 0x59f   : > { %v3531_v14 = vadd.f32 %v3475_v46, %v3403_v0  ;;  %v3532_v42 = vadd.f32 %v3478_v25, %v3404_v26  ;;  %v3580_v46 = vld [vmem:[#allocation4 + $0x20] sm:$0xff] }
 0x5a0   : > { %3565 = vst.msk [vmem:[#allocation3 + $0xa8] sm:$0xff] %vm11969_vm14, %v3533_v22  ;;  %vm11994_vm14 = vmmov %vm11981_vm0 }
 0x5a1   : > { %3563 = vst.msk [vmem:[#allocation3 + $0x98] sm:$0xff] %vm11968_vm11, %v3531_v14  ;;  %vm11993_vm11 = vmmov %vm11981_vm0 }
 0x5a2   : > { %3564 = vst.msk [vmem:[#allocation3 + $0xa0] sm:$0xff] %vm11970_vm6, %v3532_v42  ;;  %vm11995_vm6 = vmmov %vm11981_vm0 }
 0x5a5   : > { %v3490_v44 = vpop.xlane.xlu1 %3489 }
 0x5a6   : > { %v3484_v62 = vpop.xlane.xlu2 %3483  ;;  %v3487_v32 = vpop.xlane.xlu0 %3486  ;;  %v3536_v33 = vadd.f32 %v3490_v44, %v3408_v3  ;;  %v3586_v44 = vld [vmem:[#allocation4 + $0x50] sm:$0xff] }
 0x5a7   : > { %v3534_v48 = vadd.f32 %v3484_v62, %v3406_v60  ;;  %v3535_v20 = vadd.f32 %v3487_v32, %v3407_v30  ;;  %v3584_v32 = vld [vmem:[#allocation4 + $0x40] sm:$0xff] }
 0x5a8   : > { %3568 = vst.msk [vmem:[#allocation3 + $0xc0] sm:$0xff] %vm11975_vm5, %v3536_v33  ;;  %vm11997_vm5 = vmmov %vm11981_vm0 }
 0x5a9   : > { %3566 = vst.msk [vmem:[#allocation3 + $0xb0] sm:$0xff] %vm11974_vm10, %v3534_v48  ;;  %vm11996_vm10 = vmmov %vm11981_vm0  ;;  %v3585_v48 = vld [vmem:[#allocation4 + $0x48] sm:$0xff] }
 0x5aa   : > { %3567 = vst.msk [vmem:[#allocation3 + $0xb8] sm:$0xff] %vm11976_vm15, %v3535_v20  ;;  %vm11998_vm15 = vmmov %vm11981_vm0 }
 0x5ad   : > { %v3499_v43 = vpop.xlane.xlu1 %3498 }
 0x5ae   : > { %v3493_v40 = vpop.xlane.xlu2 %3492  ;;  %v3496_v8 = vpop.xlane.xlu0 %3495  ;;  %v3539_v15 = vadd.f32 %v3499_v43, %v3411_v31 }
 0x5af   : > { %v3537_v45 = vadd.f32 %v3493_v40, %v3409_v36  ;;  %v3538_v35 = vadd.f32 %v3496_v8, %v3410_v61  ;;  %v3587_v36 = vld [vmem:[#allocation4 + $0x58] sm:$0xff]  ;;  %v3589_v61 = vld [vmem:[#allocation4 + $0x68] sm:$0xff] }
 0x5b0   : > { %3571 = vst.msk [vmem:[#allocation3 + $0xd8] sm:$0xff] %vm11980_vm7, %v3539_v15  ;;  %vm12000_vm7 = vmmov %vm11981_vm0  ;;  %v3591_v15 = vld [vmem:[#allocation4 + $0x78] sm:$0xff] }
 0x5b1   : > { %3569 = vst.msk [vmem:[#allocation3 + $0xc8] sm:$0xff] %vm11947_vm1, %v3537_v45  ;;  %vm11999_vm1 = vmmov %vm11981_vm0 }
 0x5b2   : > { %3570 = vst.msk [vmem:[#allocation3 + $0xd0] sm:$0xff] %vm11981_vm0, %v3538_v35  ;;  %v3590_v35 = vld [vmem:[#allocation4 + $0x70] sm:$0xff] }
 0x5b5   : > { %v3508_v38 = vpop.xlane.xlu1 %3507 }
 0x5b6   : > { %v3502_v41 = vpop.xlane.xlu2 %3501  ;;  %v3505_v17 = vpop.xlane.xlu0 %3504  ;;  %v3542_v9 = vadd.f32 %v3508_v38, %v3414_v56  ;;  %v3594_v56 = vld [vmem:[#allocation4 + $0x90] sm:$0xff] }
 0x5b7   : > { %v3540_v54 = vadd.f32 %v3502_v41, %v3412_v24  ;;  %v3541_v11 = vadd.f32 %v3505_v17, %v3413_v58  ;;  %v3595_v41 = vld [vmem:[#allocation4 + $0x98] sm:$0xff] }
 0x5b8   : > { %3574 = vst.msk [vmem:[#allocation3 + $0xf0] sm:$0xff] %vm11986_vm13, %v3542_v9  ;;  %vm12002_vm13 = vmmov %vm11981_vm0 }
 0x5b9   : > { %3572 = vst.msk [vmem:[#allocation3 + $0xe0] sm:$0xff] %vm11985_vm3, %v3540_v54  ;;  %vm12001_vm3 = vmmov %vm11981_vm0 }
 0x5ba   : > { %3573 = vst.msk [vmem:[#allocation3 + $0xe8] sm:$0xff] %vm11987_vm4, %v3541_v11  ;;  %vm12003_vm4 = vmmov %vm11981_vm0 }
 0x5bd   : > { %v3677_v0 = vpop.xlane.xlu1 %3676 }
 0x5be   : > { %v3511_v2 = vpop.xlane.xlu2 %3510  ;;  %v3674_v49 = vpop.xlane.xlu0 %3673  ;;  %v3769_v26 = vadd.f32 %v3677_v0, %v3577_v12 }
 0x5bf   : > { %v3543_v50 = vadd.f32 %v3511_v2, %v3415_v21  ;;  %v3768_v37 = vadd.f32 %v3674_v49, %v3576_v29  ;;  %v3597_v21 = vld [vmem:[#allocation4 + $0xa8] sm:$0xff]  ;;  %v3598_v29 = vld [vmem:[#allocation4 + $0xb0] sm:$0xff] }
 0x5c0   : > { %3801 = vst.msk [vmem:[#allocation4 + $0x8] sm:$0xff] %vm11990_vm2, %v3769_v26  ;;  %vm12005_vm2 = vmmov %vm11981_vm0  ;;  %v3599_v26 = vld [vmem:[#allocation4 + $0xb8] sm:$0xff] }
 0x5c1   : > { %3575 = vst.msk [vmem:[#allocation3 + $0xf8] sm:$0xff] %vm11989_vm12, %v3543_v50  ;;  %vm12004_vm12 = vmmov %vm11981_vm0 }
 0x5c2   : > { %3800 = vst.msk [vmem:[#allocation4] sm:$0xff] %vm11991_vm9, %v3768_v37  ;;  %vm12006_vm9 = vmmov %vm11981_vm0 }
 0x5c5   : > { %v3686_v42 = vpop.xlane.xlu1 %3685 }
 0x5c6   : > { %v3680_v25 = vpop.xlane.xlu2 %3679  ;;  %v3683_v14 = vpop.xlane.xlu0 %3682  ;;  %v3772_v34 = vadd.f32 %v3686_v42, %v3580_v46 }
 0x5c7   : > { %v3770_v51 = vadd.f32 %v3680_v25, %v3578_v19  ;;  %v3771_v22 = vadd.f32 %v3683_v14, %v3579_v39  ;;  %v3600_v19 = vld [vmem:[#allocation4 + $0xc0] sm:$0xff]  ;;  %v3601_v39 = vld [vmem:[#allocation4 + $0xc8] sm:$0xff] }
 0x5c8   : > { %3804 = vst.msk [vmem:[#allocation4 + $0x20] sm:$0xff] %vm11993_vm11, %v3772_v34  ;;  %vm12008_vm11 = vmmov %vm11981_vm0  ;;  %v3602_v34 = vld [vmem:[#allocation4 + $0xd0] sm:$0xff] }
 0x5c9   : > { %3802 = vst.msk [vmem:[#allocation4 + $0x10] sm:$0xff] %vm11992_vm8, %v3770_v51  ;;  %vm12007_vm8 = vmmov %vm11981_vm0 }
 0x5ca   : > { %3803 = vst.msk [vmem:[#allocation4 + $0x18] sm:$0xff] %vm11994_vm14, %v3771_v22  ;;  %vm12009_vm14 = vmmov %vm11981_vm0 }
 0x5cd   : > { %v3695_v53 = vpop.xlane.xlu1 %3694 }
 0x5ce   : > { %v3689_v60 = vpop.xlane.xlu2 %3688  ;;  %v3692_v63 = vpop.xlane.xlu0 %3691  ;;  %v3775_v62 = vadd.f32 %v3695_v53, %v3583_v55 }
 0x5cf   : > { %v3773_v30 = vadd.f32 %v3689_v60, %v3581_v10  ;;  %v3774_v3 = vadd.f32 %v3692_v63, %v3582_v28  ;;  %v3603_v10 = vld [vmem:[#allocation4 + $0xd8] sm:$0xff]  ;;  %v3604_v28 = vld [vmem:[#allocation4 + $0xe0] sm:$0xff] }
 0x5d0   : > { %3807 = vst.msk [vmem:[#allocation4 + $0x38] sm:$0xff] %vm11996_vm10, %v3775_v62  ;;  %vm12011_vm10 = vmmov %vm11981_vm0  ;;  %v3605_v62 = vld [vmem:[#allocation4 + $0xe8] sm:$0xff] }
 0x5d1   : > { %3805 = vst.msk [vmem:[#allocation4 + $0x28] sm:$0xff] %vm11995_vm6, %v3773_v30  ;;  %vm12010_vm6 = vmmov %vm11981_vm0 }
 0x5d2   : > { %3806 = vst.msk [vmem:[#allocation4 + $0x30] sm:$0xff] %vm11997_vm5, %v3774_v3  ;;  %vm12012_vm5 = vmmov %vm11981_vm0 }
 0x5d5   : > { %v3704_v4 = vpop.xlane.xlu1 %3703 }
 0x5d6   : > { %v3698_v20 = vpop.xlane.xlu2 %3697  ;;  %v3701_v33 = vpop.xlane.xlu0 %3700  ;;  %v3778_v59 = vadd.f32 %v3704_v4, %v3586_v44 }
 0x5d7   : > { %v3776_v7 = vadd.f32 %v3698_v20, %v3584_v32  ;;  %v3777_v47 = vadd.f32 %v3701_v33, %v3585_v48  ;;  %v3606_v32 = vld [vmem:[#allocation4 + $0xf0] sm:$0xff]  ;;  %v3607_v48 = vld [vmem:[#allocation4 + $0xf8] sm:$0xff] }
 0x5d8   : > { %3810 = vst.msk [vmem:[#allocation4 + $0x50] sm:$0xff] %vm11999_vm1, %v3778_v59  ;;  %vm12014_vm1 = vmmov %vm11981_vm0 }
 0x5d9   : > { %3808 = vst.msk [vmem:[#allocation4 + $0x40] sm:$0xff] %vm11998_vm15, %v3776_v7  ;;  %vm12013_vm15 = vmmov %vm11981_vm0 }
 0x5da   : > { %3809 = vst.msk [vmem:[#allocation4 + $0x48] sm:$0xff] %vm12000_vm7, %v3777_v47  ;;  %vm12015_vm7 = vmmov %vm11981_vm0 }
 0x5dd   : > { %v3713_v8 = vpop.xlane.xlu1 %3712 }
 0x5de   : > { %v3707_v18 = vpop.xlane.xlu2 %3706  ;;  %v3710_v31 = vpop.xlane.xlu0 %3709  ;;  %v3781_v43 = vadd.f32 %v3713_v8, %v3589_v61 }
 0x5df   : > { %v3779_v40 = vadd.f32 %v3707_v18, %v3587_v36  ;;  %v3780_v45 = vadd.f32 %v3710_v31, %v3588_v27 }
 0x5e0   : > { %3813 = vst.msk [vmem:[#allocation4 + $0x68] sm:$0xff] %vm12001_vm3, %v3781_v43  ;;  %vm12016_vm3 = vmmov %vm11981_vm0 }
 0x5e1   : > { %3811 = vst.msk [vmem:[#allocation4 + $0x58] sm:$0xff] %vm11981_vm0, %v3779_v40 }
 0x5e2   : > { %3812 = vst.msk [vmem:[#allocation4 + $0x60] sm:$0xff] %vm12002_vm13, %v3780_v45  ;;  %vm12017_vm13 = vmmov %vm11981_vm0 }
 0x5e5   : > { %v3722_v24 = vpop.xlane.xlu1 %3721 }
 0x5e6   : > { %v3716_v1 = vpop.xlane.xlu2 %3715  ;;  %v3719_v23 = vpop.xlane.xlu0 %3718  ;;  %v3784_v58 = vadd.f32 %v3722_v24, %v3592_v52 }
 0x5e7   : > { %v3782_v57 = vadd.f32 %v3716_v1, %v3590_v35  ;;  %v3783_v16 = vadd.f32 %v3719_v23, %v3591_v15 }
 0x5e8   : > { %3816 = vst.msk [vmem:[#allocation4 + $0x80] sm:$0xff] %vm12004_vm12, %v3784_v58  ;;  %vm12019_vm12 = vmmov %vm11981_vm0 }
 0x5e9   : > { %3814 = vst.msk [vmem:[#allocation4 + $0x70] sm:$0xff] %vm12003_vm4, %v3782_v57  ;;  %vm12018_vm4 = vmmov %vm11981_vm0 }
 0x5ea   : > { %3815 = vst.msk [vmem:[#allocation4 + $0x78] sm:$0xff] %vm12005_vm2, %v3783_v16 }
 0x5ed   : > { %v3731_v11 = vpop.xlane.xlu1 %3730 }
 0x5ee   : > { %v3725_v17 = vpop.xlane.xlu2 %3724  ;;  %v3728_v54 = vpop.xlane.xlu0 %3727  ;;  %v3787_v6 = vadd.f32 %v3731_v11, %v3595_v41 }
 0x5ef   : > { %v3785_v38 = vadd.f32 %v3725_v17, %v3593_v13  ;;  %v3786_v9 = vadd.f32 %v3728_v54, %v3594_v56 }
 0x5f0   : > { %3819 = vst.msk [vmem:[#allocation4 + $0x98] sm:$0xff] %vm12007_vm8, %v3787_v6 }
 0x5f1   : > { %3817 = vst.msk [vmem:[#allocation4 + $0x88] sm:$0xff] %vm12006_vm9, %v3785_v38 }
 0x5f2   : > { %3818 = vst.msk [vmem:[#allocation4 + $0x90] sm:$0xff] %vm12008_vm11, %v3786_v9 }
 0x5f5   : > { %v3740_v50 = vpop.xlane.xlu1 %3739 }
 0x5f6   : > { %v3734_v12 = vpop.xlane.xlu2 %3733  ;;  %v3737_v2 = vpop.xlane.xlu0 %3736  ;;  %v3790_v37 = vadd.f32 %v3740_v50, %v3598_v29 }
 0x5f7   : > { %v3788_v49 = vadd.f32 %v3734_v12, %v3596_v5  ;;  %v3789_v0 = vadd.f32 %v3737_v2, %v3597_v21 }
 0x5f8   : > { %3822 = vst.msk [vmem:[#allocation4 + $0xb0] sm:$0xff] %vm12010_vm6, %v3790_v37 }
 0x5f9   : > { %3820 = vst.msk [vmem:[#allocation4 + $0xa0] sm:$0xff] %vm12009_vm14, %v3788_v49 }
 0x5fa   : > { %3821 = vst.msk [vmem:[#allocation4 + $0xa8] sm:$0xff] %vm12011_vm10, %v3789_v0 }
 0x5fd   : > { %v3749_v51 = vpop.xlane.xlu1 %3748 }
 0x5fe   : > { %v3743_v46 = vpop.xlane.xlu2 %3742  ;;  %v3746_v25 = vpop.xlane.xlu0 %3745  ;;  %v3793_v22 = vadd.f32 %v3749_v51, %v3601_v39 }
 0x5ff   : > { %v3791_v14 = vadd.f32 %v3743_v46, %v3599_v26  ;;  %v3792_v42 = vadd.f32 %v3746_v25, %v3600_v19 }
 0x600   : > { %3825 = vst.msk [vmem:[#allocation4 + $0xc8] sm:$0xff] %vm12013_vm15, %v3793_v22 }
 0x601   : > { %3823 = vst.msk [vmem:[#allocation4 + $0xb8] sm:$0xff] %vm12012_vm5, %v3791_v14 }
 0x602   : > { %3824 = vst.msk [vmem:[#allocation4 + $0xc0] sm:$0xff] %vm12014_vm1, %v3792_v42 }
 0x605   : > { %v3758_v30 = vpop.xlane.xlu1 %3757 }
 0x606   : > { %v3752_v55 = vpop.xlane.xlu2 %3751  ;;  %v3755_v60 = vpop.xlane.xlu0 %3754  ;;  %v3796_v3 = vadd.f32 %v3758_v30, %v3604_v28 }
 0x607   : > { %v3794_v63 = vadd.f32 %v3752_v55, %v3602_v34  ;;  %v3795_v53 = vadd.f32 %v3755_v60, %v3603_v10 }
 0x608   : > { %3828 = vst.msk [vmem:[#allocation4 + $0xe0] sm:$0xff] %vm11981_vm0, %v3796_v3 }
 0x609   : > { %3826 = vst.msk [vmem:[#allocation4 + $0xd0] sm:$0xff] %vm12015_vm7, %v3794_v63 }
 0x60a   : > { %3827 = vst.msk [vmem:[#allocation4 + $0xd8] sm:$0xff] %vm12016_vm3, %v3795_v53 }
 0x60d   : > { %v3767_v7 = vpop.xlane.xlu1 %3766 }
 0x60e   : > { %v3761_v44 = vpop.xlane.xlu2 %3760  ;;  %v3764_v20 = vpop.xlane.xlu0 %3763  ;;  %v3799_v47 = vadd.f32 %v3767_v7, %v3607_v48 }
 0x60f   : > { %v3797_v33 = vadd.f32 %v3761_v44, %v3605_v62  ;;  %v3798_v4 = vadd.f32 %v3764_v20, %v3606_v32 }
 0x610   : > { %3831 = vst.msk [vmem:[#allocation4 + $0xf8] sm:$0xff] %vm12018_vm4, %v3799_v47 }
 0x611   : > { %3829 = vst.msk [vmem:[#allocation4 + $0xe8] sm:$0xff] %vm12017_vm13, %v3797_v33 }
 0x612   : > { %3830 = vst.msk [vmem:[#allocation4 + $0xf0] sm:$0xff] %vm12019_vm12, %v3798_v4 }
 0x613 PF: > { %p5230_p6 = scmp.ne.s32.totalorder %s5903_s27, 1 }
 0x614   : > { %s5231_s16 = sshll.u32 (!%p5230_p6), %s5907_s28, 8 }
 0x615   : > { %3834 = sbr.rel (%p5230_p6) target bundleno = 1871 (0x74f), region = 64 }
 0x61a   : > { %v3871_v59 = vld [vmem:[%s6062_s24 + $0x20] sm:$0xff]  ;;  %v4604_v36 = vlaneseq  ;;  %v5926_v27 = vmov 0   ;;  %v9525_v18 = vld [vmem:[%s6062_s24 + $0x10] sm:$0xff]  ;;  %v9536_v52 = vstv %s5231_s16  ;;  %v9542_v57 = vld [vmem:[%s6062_s24 + $0x28] sm:$0xff] }
 0x61b   : > { %5696 = vset.pattern.permute.xlu2 %v5926_v27  ;;  %5695 = vset.pattern.permute.xlu1 %v5926_v27  ;;  %5697 = vrcp.f32 %v3871_v59  ;;  %v4447_v61 = vld [vmem:[#allocation3 + $0x20] sm:$0xff]  ;;  %v3968_v40 = vand.u32 2147483647, %v3871_v59  ;;  %v3970_v8 = vand.u32 2147483648, %v3871_v59  ;;  %v4445_v45 = vld [vmem:[#allocation3 + $0x10] sm:$0xff]  ;;  %v3940_v1 = vand.u32 2147483648, %v9525_v18 }
 0x61c   : > { %5694 = vset.pattern.permute.xlu0 %v5926_v27  ;;  %v9528_v31 = vshrl.u32 %v4604_v36, 7  ;;  %5699 = vrcp.f32 %v9525_v18  ;;  %v9532_v43 = vld [vmem:[%s6062_s24] sm:$0xff]  ;;  %v3938_v15 = vand.u32 2147483647, %v9525_v18  ;;  %vm3964_vm2 = vweird.f32 %v3871_v59  ;;  %v9565_v12 = vld [vmem:[%s6062_s24 + $0x18] sm:$0xff]  ;;  %v4448_v46 = vld [vmem:[#allocation3 + $0x28] sm:$0xff] }
 0x61d   : > { %5701 = vlog2.f32 %v4447_v61  ;;  %vm9544_vm9 = vcmp.eq.f32.partialorder %v3968_v40, 8.507059e+37  ;;  %v3971_v58 = vor.u32 1.1754944e-38, %v3970_v8  ;;  %vm3934_vm8 = vweird.f32 %v9525_v18  ;;  %v4443_v56 = vld [vmem:[#allocation3] sm:$0xff]  ;;  %v3837_v7 = vld [vmem:[#allocation4 + $0x10] sm:$0xff]  ;;  %v4446_v40 = vld [vmem:[#allocation3 + $0x18] sm:$0xff] }
 0x61e   : > { %v4609_v35 = vadd.s32 32, %v9528_v31  ;;  %v4607_v23 = vadd.s32 16, %v9528_v31  ;;  %5703 = vrcp.f32 %v9532_v43  ;;  %v3908_v13 = vand.u32 2147483647, %v9532_v43  ;;  %v3839_v55 = vld [vmem:[#allocation4 + $0x20] sm:$0xff]  ;;  %v3840_v49 = vld [vmem:[#allocation4 + $0x28] sm:$0xff] }
 0x61f   : > { %5705 = vlog2.f32 %v4445_v45  ;;  %vm9553_vm11 = vcmp.eq.f32.partialorder %v3938_v15, 8.507059e+37  ;;  %vm3904_vm14 = vweird.f32 %v9532_v43  ;;  %v3941_v11 = vor.u32 1.1754944e-38, %v3940_v1  ;;  %v4383_v33 = vld [vmem:[#allocation2 + $0x20] sm:$0xff]  ;;  %v4384_v25 = vld [vmem:[#allocation2 + $0x28] sm:$0xff] }
 0x620   : > { %v9551_v17 = vadd.s32 %v9536_v52, %v4609_v35  ;;  %v9559_v9 = vadd.s32 %v9536_v52, %v4607_v23  ;;  %v3910_v6 = vand.u32 2147483648, %v9532_v43  ;;  %5707 = vrcp.f32 %v9542_v57  ;;  %v3835_v35 = vld [vmem:[#allocation4] sm:$0xff] }
 0x621   : > { %v5698_v24 = vpop.eup %5697  ;;  %5709 = vlog2.f32 %v4443_v56  ;;  %vm9567_vm10 = vcmp.eq.f32.partialorder %v3908_v13, 8.507059e+37  ;;  %v9573_v50 = vadd.s32 %v9536_v52, %v9528_v31  ;;  %vm3979_vm5 = vweird.f32 %v9542_v57  ;;  %v9626_v13 = vld [vmem:[%s6062_s24 + $0x8] sm:$0xff]  ;;  %v4379_v54 = vld [vmem:[#allocation2] sm:$0xff] }
 0x622   : > { %v3960_v41 = vmul.f32 %v5698_v24, %v3871_v59  ;;  %v5700_v38 = vpop.eup %5699  ;;  %vm3965_vm6 = vweird.f32 %v5698_v24  ;;  %v3983_v0 = vand.u32 2147483647, %v9542_v57  ;;  %v3985_v51 = vand.u32 2147483648, %v9542_v57 }
 0x623   : > { %v5702_v5 = vpop.eup %5701  ;;  %v3930_v29 = vmul.f32 %v5700_v38, %v9525_v18  ;;  %vm3935_vm15 = vweird.f32 %v5700_v38  ;;  %vm9580_vm1 = vmor %vm3964_vm2, %vm3965_vm6  ;;  %v4610_v42 = vadd.s32 40, %v9528_v31  ;;  %5711 = vrcp.f32 %v9565_v12 }
 0x624   : > { %v3961_v21 = vsub.f32 1.0, %v3960_v41  ;;  %v5704_v2 = vpop.eup %5703  ;;  %v4484_v14 = vmul.f32 0.6931472, %v5702_v5  ;;  %vm4674_vm0 = vcmp.lt.s32.totalorder %v9551_v17, 400  ;;  %vm9591_vm3 = vmor %vm3934_vm8, %vm3935_vm15  ;;  %v3911_v30 = vor.u32 1.1754944e-38, %v3910_v6 }
 0x625   : > { %v5706_v37 = vpop.eup %5705  ;;  %v3931_v19 = vsub.f32 1.0, %v3930_v29  ;;  %v3900_v39 = vmul.f32 %v5704_v2, %v9532_v43  ;;  %vm3905_vm7 = vweird.f32 %v5704_v2  ;;  %vm9595_vm13 = vcmp.eq.f32.partialorder %v3983_v0, 8.507059e+37  ;;  %v4381_v43 = vld [vmem:[#allocation2 + $0x10] sm:$0xff] }
 0x626   : > { %v3962_v26 = vmul.f32 %v5698_v24, %v3961_v21  ;;  %v5708_v28 = vpop.eup %5707  ;;  %v4480_v63 = vmul.f32 0.6931472, %v5706_v37  ;;  %5713 = vlog2.f32 %v4448_v46  ;;  %vm4672_vm4 = vcmp.lt.s32.totalorder %v9559_v9, 400  ;;  %vm9608_vm12 = vmor %vm3904_vm14, %vm3905_vm7 }
 0x627   : > { %v3932_v34 = vmul.f32 %v5700_v38, %v3931_v19  ;;  %v3901_v10 = vsub.f32 1.0, %v3900_v39  ;;  %v5710_v3 = vpop.eup %5709  ;;  %v3975_v44 = vmul.f32 %v5708_v28, %v9542_v57  ;;  %vm3980_vm2 = vweird.f32 %v5708_v28 }
 0x628   : > { %v3963_v22 = vadd.f32 %v5698_v24, %v3962_v26  ;;  %v3986_v47 = vor.u32 1.1754944e-38, %v3985_v51  ;;  %v9613_v59 = vadd.s32 %v9536_v52, %v4610_v42  ;;  %v4476_v15 = vmul.f32 0.6931472, %v5710_v3  ;;  %vm9633_vm8 = vmor %vm3979_vm5, %vm3980_vm2 }
 0x629   : > { %v3933_v32 = vadd.f32 %v5700_v38, %v3932_v34  ;;  %v3902_v48 = vmul.f32 %v5704_v2, %v3901_v10  ;;  %v3976_v18 = vsub.f32 1.0, %v3975_v44  ;;  %v9617_v8 = vpop.eup %5711  ;;  %v3955_v1 = vand.u32 2147483648, %v9565_v12 }
 0x62a   : > { %v3967_v62 = vsel %vm9580_vm1, %v5698_v24, %v3963_v22  ;;  %v3953_v6 = vand.u32 2147483647, %v9565_v12  ;;  %5715 = vlog2.f32 %v4446_v40  ;;  %v4608_v42 = vadd.s32 24, %v9528_v31  ;;  %v4444_v22 = vld [vmem:[#allocation3 + $0x8] sm:$0xff] }
 0x62b   : > { %v3972_v20 = vsel %vm9544_vm9, %v3971_v58, %v3967_v62  ;;  %v3937_v27 = vsel %vm9591_vm3, %v5700_v38, %v3933_v32  ;;  %v3903_v61 = vadd.f32 %v5704_v2, %v3902_v48  ;;  %vm3949_vm9 = vweird.f32 %v9565_v12  ;;  %v3838_v62 = vld [vmem:[#allocation4 + $0x18] sm:$0xff] }
 0x62c   : > { %v3973_v36 = vmul.f32 %v3972_v20, %v3839_v55  ;;  %v3942_v45 = vsel %vm9553_vm11, %v3941_v11, %v3937_v27  ;;  %v3977_v58 = vmul.f32 %v5708_v28, %v3976_v18  ;;  %v5714_v56 = vpop.eup %5713  ;;  %v3945_v11 = vmul.f32 %v9617_v8, %v9565_v12  ;;  %v9676_v18 = vld [vmem:[%s6062_s24 + $0x38] sm:$0xff] }
 0x62d   : > { %v3943_v24 = vmul.f32 %v3942_v45, %v3837_v7  ;;  %v3907_v16 = vsel %vm9608_vm12, %v5704_v2, %v3903_v61  ;;  %vm3950_vm11 = vweird.f32 %v9617_v8  ;;  %v3956_v37 = vor.u32 1.1754944e-38, %v3955_v1  ;;  %v4382_v7 = vld [vmem:[#allocation2 + $0x18] sm:$0xff] }
 0x62e   : > { %v4415_v23 = vsub.f32 %v3973_v36, %v4383_v33  ;;  %v3912_v41 = vsel %vm9567_vm10, %v3911_v30, %v3907_v16  ;;  %v3978_v2 = vadd.f32 %v5708_v28, %v3977_v58  ;;  %v3946_v0 = vsub.f32 1.0, %v3945_v11  ;;  %vm9654_vm14 = vmor %vm3949_vm9, %vm3950_vm11  ;;  %v4386_v58 = vld [vmem:[#allocation2 + $0x38] sm:$0xff] }
 0x62f   : > { %v4413_v21 = vsub.f32 %v3943_v24, %v4381_v43  ;;  %v3913_v29 = vmul.f32 %v3912_v41, %v3835_v35  ;;  %5717 = vrcp.f32 %v9626_v13  ;;  %vm4670_vm6 = vcmp.lt.s32.totalorder %v9573_v50, 400 }
 0x630   : > { %v4543_v5 = vsub.f32 %v4415_v23, %v4484_v14  ;;  %v3982_v39 = vsel %vm9633_vm8, %v5708_v28, %v3978_v2  ;;  %v4486_v14 = vmul.f32 0.6931472, %v5714_v56  ;;  %v3947_v51 = vmul.f32 %v9617_v8, %v3946_v0  ;;  %v5716_v30 = vpop.eup %5715 }
 0x631   : > { %v4541_v26 = vsub.f32 %v4413_v21, %v4480_v63  ;;  %v4411_v19 = vsub.f32 %v3913_v29, %v4379_v54  ;;  %v3987_v46 = vsel %vm9595_vm13, %v3986_v47, %v3982_v39  ;;  %v9659_v63 = vld [vmem:[%s6062_s24 + $0x40] sm:$0xff]  ;;  %vm4675_vm10 = vcmp.lt.s32.totalorder %v9613_v59, 400  ;;  %v3836_v54 = vld [vmem:[#allocation4 + $0x8] sm:$0xff] }
 0x632   : > { %v4575_v57 = vsub.f32 0.0, %v4543_v5  ;;  %v3988_v60 = vmul.f32 %v3987_v46, %v3840_v49  ;;  %v3948_v17 = vadd.f32 %v9617_v8, %v3947_v51  ;;  %vm3954_vm5 = vcmp.eq.f32.partialorder %v3953_v6, 8.507059e+37  ;;  %v4451_v47 = vld [vmem:[#allocation3 + $0x40] sm:$0xff]  ;;  %v9698_v5 = vld [vmem:[%s6062_s24 + $0x30] sm:$0xff]  ;;  %v4450_v49 = vld [vmem:[#allocation3 + $0x38] sm:$0xff] }
 0x633   : > { %v4573_v10 = vsub.f32 0.0, %v4541_v26  ;;  %v4539_v55 = vsub.f32 %v4411_v19, %v4476_v15  ;;  %5719 = vlog2.f32 %v4444_v22  ;;  %v4641_v50 = vadd.s32 %v9536_v52, %v4608_v42  ;;  %v4380_v26 = vld [vmem:[#allocation2 + $0x8] sm:$0xff]  ;;  %v4453_v22 = vld [vmem:[#allocation3 + $0x50] sm:$0xff] }
 0x634   : > { %v4706_v34 = vsel %vm4674_vm0, %v4575_v57, 0.0  ;;  %v4416_v12 = vsub.f32 %v3988_v60, %v4384_v25  ;;  %v3952_v48 = vsel %vm9654_vm14, %v9617_v8, %v3948_v17  ;;  %v4606_v44 = vadd.s32 8, %v9528_v31 }
 0x635   : > { %4756 = vperm.xlu2 %5696, %v4706_v34   ;;  %v4704_v53 = vsel %vm4672_vm4, %v4573_v10, 0.0  ;;  %v4571_v3 = vsub.f32 0.0, %v4539_v55  ;;  %v5718_v32 = vpop.eup %5717  ;;  %5721 = vrcp.f32 %v9659_v63  ;;  %v3957_v33 = vsel %vm3954_vm5, %v3956_v37, %v3952_v48 }
 0x636   : > { %4746 = vperm.xlu1 %5695, %v4704_v53   ;;  %v4544_v9 = vsub.f32 %v4416_v12, %v4486_v14  ;;  %v3915_v4 = vmul.f32 %v5718_v32, %v9626_v13  ;;  %v3958_v36 = vmul.f32 %v3957_v33, %v3838_v62  ;;  %v4482_v27 = vmul.f32 0.6931472, %v5716_v30  ;;  %v9723_v30 = vld [vmem:[%s6062_s24 + $0x58] sm:$0xff] }
 0x637   : > { %v4702_v20 = vsel %vm4670_vm6, %v4571_v3, 0.0  ;;  %vm3919_vm15 = vweird.f32 %v9626_v13  ;;  %v3925_v61 = vand.u32 2147483648, %v9626_v13  ;;  %vm3920_vm1 = vweird.f32 %v5718_v32  ;;  %v4449_v3 = vld [vmem:[#allocation3 + $0x30] sm:$0xff] }
 0x638   : > { %4736 = vperm.xlu0 %5694, %v4702_v20   ;;  %v4576_v40 = vsub.f32 0.0, %v4544_v9  ;;  %v3916_v8 = vsub.f32 1.0, %v3915_v4  ;;  %v3923_v45 = vand.u32 2147483647, %v9626_v13  ;;  %v4414_v43 = vsub.f32 %v3958_v36, %v4382_v7  ;;  %vm9687_vm0 = vmor %vm3919_vm15, %vm3920_vm1 }
 0x639   : > { %v9680_v35 = vadd.s32 %v9536_v52, %v4606_v44  ;;  %5723 = vlog2.f32 %v4451_v47  ;;  %v5720_v15 = vpop.eup %5719  ;;  %vm4673_vm7 = vcmp.lt.s32.totalorder %v4641_v50, 400  ;;  %v3926_v56 = vor.u32 1.1754944e-38, %v3925_v61  ;;  %v4387_v44 = vld [vmem:[#allocation2 + $0x40] sm:$0xff] }
 0x63a   : > { %v4707_v1 = vsel %vm4675_vm10, %v4576_v40, 0.0  ;;  %v3917_v23 = vmul.f32 %v5718_v32, %v3916_v8  ;;  %5725 = vrcp.f32 %v9676_v18  ;;  %v4542_v16 = vsub.f32 %v4414_v43, %v4482_v27 }
 0x63b   : > { %v5722_v24 = vpop.eup %5721  ;;  %v4613_v41 = vadd.s32 64, %v9528_v31  ;;  %vm3924_vm3 = vcmp.eq.f32.partialorder %v3923_v45, 8.507059e+37  ;;  %vm4024_vm13 = vweird.f32 %v9659_v63  ;;  %vm4671_vm4 = vcmp.lt.s32.totalorder %v9680_v35, 400 }
 0x63c   : > { %v3918_v59 = vadd.f32 %v5718_v32, %v3917_v23  ;;  %v4020_v38 = vmul.f32 %v5722_v24, %v9659_v63  ;;  %v4574_v11 = vsub.f32 0.0, %v4542_v16  ;;  %v4028_v6 = vand.u32 2147483647, %v9659_v63 }
 0x63d   : > { %4761 = vperm.xlu2 %5696, %v4707_v1   ;;  %v4030_v13 = vand.u32 2147483648, %v9659_v63  ;;  %v4478_v29 = vmul.f32 0.6931472, %v5720_v15  ;;  %vm4025_vm12 = vweird.f32 %v5722_v24  ;;  %v9704_v19 = vadd.s32 %v9536_v52, %v4613_v41  ;;  %v3843_v63 = vld [vmem:[#allocation4 + $0x40] sm:$0xff]  ;;  %v3842_v15 = vld [vmem:[#allocation4 + $0x38] sm:$0xff] }
 0x63e   : > { %v3922_v21 = vsel %vm9687_vm0, %v5718_v32, %v3918_v59  ;;  %v4021_v2 = vsub.f32 1.0, %v4020_v38  ;;  %v4705_v37 = vsel %vm4673_vm7, %v4574_v11, 0.0  ;;  %v4015_v39 = vand.u32 2147483648, %v9676_v18  ;;  %vm9711_vm2 = vmor %vm4024_vm13, %vm4025_vm12 }
 0x63f   : > { %v5724_v0 = vpop.eup %5723  ;;  %v3927_v57 = vsel %vm3924_vm3, %v3926_v56, %v3922_v21  ;;  %4751 = vperm.xlu1 %5695, %v4705_v37   ;;  %v4612_v51 = vadd.s32 56, %v9528_v31  ;;  %5727 = vrcp.f32 %v9698_v5  ;;  %vm9715_vm9 = vcmp.eq.f32.partialorder %v4028_v6, 8.507059e+37 }
 0x640   : > { %v5726_v46 = vpop.eup %5725  ;;  %v3928_v25 = vmul.f32 %v3927_v57, %v3836_v54  ;;  %v4022_v14 = vmul.f32 %v5722_v24, %v4021_v2  ;;  %v4031_v34 = vor.u32 1.1754944e-38, %v4030_v13  ;;  %5729 = vlog2.f32 %v4450_v49  ;;  %v4454_v54 = vld [vmem:[#allocation3 + $0x58] sm:$0xff] }
 0x641   : > { %v4005_v10 = vmul.f32 %v5726_v46, %v9676_v18  ;;  %vm4009_vm8 = vweird.f32 %v9676_v18  ;;  %v4013_v28 = vand.u32 2147483647, %v9676_v18  ;;  %v4492_v17 = vmul.f32 0.6931472, %v5724_v0  ;;  %v9749_v18 = vld [vmem:[%s6062_s24 + $0x50] sm:$0xff] }
 0x642   : > { %v4412_v55 = vsub.f32 %v3928_v25, %v4380_v26  ;;  %v4023_v60 = vadd.f32 %v5722_v24, %v4022_v14  ;;  %vm4678_vm11 = vcmp.lt.s32.totalorder %v9704_v19, 400  ;;  %vm4010_vm14 = vweird.f32 %v5726_v46  ;;  %v9776_v25 = vld [vmem:[%s6062_s24 + $0x48] sm:$0xff] }
 0x643   : > { %v4006_v53 = vsub.f32 1.0, %v4005_v10  ;;  %v4016_v32 = vor.u32 1.1754944e-38, %v4015_v39  ;;  %v9729_v48 = vadd.s32 %v9536_v52, %v4612_v51  ;;  %v3998_v9 = vand.u32 2147483647, %v9698_v5  ;;  %vm9737_vm6 = vmor %vm4009_vm8, %vm4010_vm14  ;;  %v3841_v39 = vld [vmem:[#allocation4 + $0x30] sm:$0xff] }
 0x644   : > { %v4540_v12 = vsub.f32 %v4412_v55, %v4478_v29  ;;  %v4027_v62 = vsel %vm9711_vm2, %v5722_v24, %v4023_v60  ;;  %5731 = vrcp.f32 %v9723_v30  ;;  %v4000_v36 = vand.u32 2147483648, %v9698_v5 }
 0x645   : > { %v4032_v50 = vsel %vm9715_vm9, %v4031_v34, %v4027_v62  ;;  %v4007_v20 = vmul.f32 %v5726_v46, %v4006_v53  ;;  %v5728_v33 = vpop.eup %5727  ;;  %5733 = vlog2.f32 %v4449_v3  ;;  %vm4014_vm10 = vcmp.eq.f32.partialorder %v4013_v28, 8.507059e+37  ;;  %v4385_v34 = vld [vmem:[#allocation2 + $0x30] sm:$0xff] }
 0x646   : > { %v4572_v7 = vsub.f32 0.0, %v4540_v12  ;;  %v4033_v4 = vmul.f32 %v4032_v50, %v3843_v63  ;;  %v5730_v27 = vpop.eup %5729  ;;  %v3990_v40 = vmul.f32 %v5728_v33, %v9698_v5  ;;  %v4611_v8 = vadd.s32 48, %v9528_v31 }
 0x647   : > { %v4008_v61 = vadd.f32 %v5726_v46, %v4007_v20  ;;  %vm4677_vm5 = vcmp.lt.s32.totalorder %v9729_v48, 400  ;;  %vm3994_vm15 = vweird.f32 %v9698_v5  ;;  %vm3995_vm1 = vweird.f32 %v5728_v33  ;;  %v3846_v20 = vld [vmem:[#allocation4 + $0x58] sm:$0xff] }
 0x648   : > { %v4703_v45 = vsel %vm4671_vm4, %v4572_v7, 0.0  ;;  %v4419_v43 = vsub.f32 %v4033_v4, %v4387_v44  ;;  %v3991_v23 = vsub.f32 1.0, %v3990_v40  ;;  %vm9753_vm7 = vcmp.eq.f32.partialorder %v3998_v9, 8.507059e+37  ;;  %vm9764_vm0 = vmor %vm3994_vm15, %vm3995_vm1  ;;  %v4452_v7 = vld [vmem:[#allocation3 + $0x48] sm:$0xff] }
 0x649   : > { %4741 = vperm.xlu0 %5694, %v4703_v45   ;;  %v4012_v1 = vsel %vm9737_vm6, %v5726_v46, %v4008_v61  ;;  %v4490_v56 = vmul.f32 0.6931472, %v5730_v27  ;;  %v4001_v41 = vor.u32 1.1754944e-38, %v4000_v36  ;;  %v9758_v6 = vadd.s32 %v9536_v52, %v4611_v8  ;;  %v9808_v36 = vld [vmem:[%s6062_s24 + $0x70] sm:$0xff]  ;;  %v4390_v61 = vld [vmem:[#allocation2 + $0x58] sm:$0xff] }
 0x64a   : > { %v4547_v35 = vsub.f32 %v4419_v43, %v4492_v17  ;;  %v4017_v16 = vsel %vm4014_vm10, %v4016_v32, %v4012_v1  ;;  %v5732_v59 = vpop.eup %5731  ;;  %v3992_v11 = vmul.f32 %v5728_v33, %v3991_v23  ;;  %5735 = vrcp.f32 %v9749_v18 }
 0x64b   : > { %v4018_v38 = vmul.f32 %v4017_v16, %v3842_v15  ;;  %v5734_v13 = vpop.eup %5733  ;;  %v4065_v2 = vmul.f32 %v5732_v59, %v9723_v30  ;;  %v4075_v49 = vand.u32 2147483648, %v9723_v30  ;;  %v4616_v0 = vadd.s32 88, %v9528_v31 }
 0x64c   : > { %v4579_v21 = vsub.f32 0.0, %v4547_v35  ;;  %v3993_v57 = vadd.f32 %v5728_v33, %v3992_v11  ;;  %vm4069_vm3 = vweird.f32 %v9723_v30  ;;  %5737 = vlog2.f32 %v4454_v54 }
 0x64d   : > { %v4418_v37 = vsub.f32 %v4018_v38, %v4386_v58  ;;  %v4066_v5 = vsub.f32 1.0, %v4065_v2  ;;  %vm4070_vm13 = vweird.f32 %v5732_v59  ;;  %v4073_v46 = vand.u32 2147483647, %v9723_v30  ;;  %v3845_v58 = vld [vmem:[#allocation4 + $0x50] sm:$0xff] }
 0x64e   : > { %v4710_v26 = vsel %vm4678_vm11, %v4579_v21, 0.0  ;;  %v3997_v51 = vsel %vm9764_vm0, %v5728_v33, %v3993_v57  ;;  %v4488_v42 = vmul.f32 0.6931472, %v5734_v13  ;;  %vm4676_vm4 = vcmp.lt.s32.totalorder %v9758_v6, 400  ;;  %vm9789_vm12 = vmor %vm4069_vm3, %vm4070_vm13  ;;  %v4457_v13 = vld [vmem:[#allocation3 + $0x70] sm:$0xff] }
 0x64f   : > { %4776 = vperm.xlu2 %5696, %v4710_v26   ;;  %v4546_v14 = vsub.f32 %v4418_v37, %v4490_v56  ;;  %v4002_v19 = vsel %vm9753_vm7, %v4001_v41, %v3997_v51  ;;  %v4067_v10 = vmul.f32 %v5732_v59, %v4066_v5  ;;  %v4076_v55 = vor.u32 1.1754944e-38, %v4075_v49  ;;  %v9835_v49 = vld [vmem:[%s6062_s24 + $0x68] sm:$0xff] }
 0x650   : > { %v9784_v60 = vadd.s32 %v9536_v52, %v4616_v0  ;;  %v5736_v28 = vpop.eup %5735  ;;  %v4003_v17 = vmul.f32 %v4002_v19, %v3841_v39  ;;  %v4058_v3 = vand.u32 2147483647, %v9749_v18  ;;  %5739 = vrcp.f32 %v9776_v25  ;;  %v4389_v0 = vld [vmem:[#allocation2 + $0x50] sm:$0xff] }
 0x651   : > { %v4578_v63 = vsub.f32 0.0, %v4546_v14  ;;  %v4068_v12 = vadd.f32 %v5732_v59, %v4067_v10  ;;  %vm9795_vm2 = vcmp.eq.f32.partialorder %v4073_v46, 8.507059e+37  ;;  %v4050_v32 = vmul.f32 %v5736_v28, %v9749_v18 }
 0x652   : > { %5741 = vlog2.f32 %v4453_v22  ;;  %v5738_v50 = vpop.eup %5737  ;;  %v4417_v44 = vsub.f32 %v4003_v17, %v4385_v34  ;;  %v4060_v9 = vand.u32 2147483648, %v9749_v18  ;;  %v4615_v33 = vadd.s32 80, %v9528_v31 }
 0x653   : > { %v4709_v30 = vsel %vm4677_vm5, %v4578_v63, 0.0  ;;  %v4072_v4 = vsel %vm9789_vm12, %v5732_v59, %v4068_v12  ;;  %v4051_v47 = vsub.f32 1.0, %v4050_v32  ;;  %vm4054_vm9 = vweird.f32 %v9749_v18 }
 0x654   : > { %4771 = vperm.xlu1 %5695, %v4709_v30   ;;  %vm4055_vm8 = vweird.f32 %v5736_v28  ;;  %v4545_v27 = vsub.f32 %v4417_v44, %v4488_v42  ;;  %v4077_v48 = vsel %vm9795_vm2, %v4076_v55, %v4072_v4  ;;  %vm4681_vm11 = vcmp.lt.s32.totalorder %v9784_v60, 400  ;;  %v4456_v4 = vld [vmem:[#allocation3 + $0x68] sm:$0xff] }
 0x655   : > { %vm9813_vm14 = vcmp.eq.f32.partialorder %v4058_v3, 8.507059e+37  ;;  %v4078_v8 = vmul.f32 %v4077_v48, %v3846_v20  ;;  %v4498_v45 = vmul.f32 0.6931472, %v5738_v50  ;;  %v4052_v43 = vmul.f32 %v5736_v28, %v4051_v47  ;;  %vm9817_vm6 = vmor %vm4054_vm9, %vm4055_vm8  ;;  %v9865_v3 = vld [vmem:[%s6062_s24 + $0x60] sm:$0xff]  ;;  %v4388_v50 = vld [vmem:[#allocation2 + $0x48] sm:$0xff] }
 0x656   : > { %5743 = vlog2.f32 %v4452_v7  ;;  %v5740_v15 = vpop.eup %5739  ;;  %v4577_v18 = vsub.f32 0.0, %v4545_v27  ;;  %v4061_v23 = vor.u32 1.1754944e-38, %v4060_v9  ;;  %v9822_v24 = vadd.s32 %v9536_v52, %v4615_v33  ;;  %v10088_v27 = vld [vmem:[%s6062_s24 + $0xb0] sm:$0xff] }
 0x657   : > { %5745 = vrcp.f32 %v9808_v36  ;;  %v4422_v16 = vsub.f32 %v4078_v8, %v4390_v61  ;;  %v4053_v56 = vadd.f32 %v5736_v28, %v4052_v43  ;;  %v4035_v41 = vmul.f32 %v5740_v15, %v9776_v25 }
 0x658   : > { %v5742_v35 = vpop.eup %5741  ;;  %vm4039_vm10 = vweird.f32 %v9776_v25  ;;  %v4708_v54 = vsel %vm4676_vm4, %v4577_v18, 0.0  ;;  %v4043_v59 = vand.u32 2147483647, %v9776_v25  ;;  %v4045_v38 = vand.u32 2147483648, %v9776_v25  ;;  %v9888_v18 = vld [vmem:[%s6062_s24 + $0x88] sm:$0xff] }
 0x659   : > { %v4614_v11 = vadd.s32 72, %v9528_v31  ;;  %4766 = vperm.xlu0 %5694, %v4708_v54   ;;  %v4550_v21 = vsub.f32 %v4422_v16, %v4498_v45  ;;  %v4057_v29 = vsel %vm9817_vm6, %v5736_v28, %v4053_v56  ;;  %v4036_v2 = vsub.f32 1.0, %v4035_v41  ;;  %v3844_v28 = vld [vmem:[#allocation4 + $0x48] sm:$0xff]  ;;  %v4455_v56 = vld [vmem:[#allocation3 + $0x60] sm:$0xff]  ;;  %v4393_v54 = vld [vmem:[#allocation2 + $0x70] sm:$0xff] }
 0x65a   : > { %vm4040_vm5 = vweird.f32 %v5740_v15  ;;  %v4062_v6 = vsel %vm9813_vm14, %v4061_v23, %v4057_v29  ;;  %v4496_v37 = vmul.f32 0.6931472, %v5742_v35  ;;  %vm4680_vm15 = vcmp.lt.s32.totalorder %v9822_v24, 400 }
 0x65b   : > { %v4118_v57 = vand.u32 2147483647, %v9808_v36  ;;  %v4582_v39 = vsub.f32 0.0, %v4550_v21  ;;  %v4063_v5 = vmul.f32 %v4062_v6, %v3845_v58  ;;  %v4037_v46 = vmul.f32 %v5740_v15, %v4036_v2  ;;  %vm9843_vm1 = vmor %vm4039_vm10, %vm4040_vm5 }
 0x65c   : > { %v5744_v26 = vpop.eup %5743  ;;  %5747 = vlog2.f32 %v4457_v13  ;;  %vm9847_vm7 = vcmp.eq.f32.partialorder %v4043_v59, 8.507059e+37  ;;  %v4046_v22 = vor.u32 1.1754944e-38, %v4045_v38  ;;  %v9852_v19 = vadd.s32 %v9536_v52, %v4614_v11 }
 0x65d   : > { %v5746_v14 = vpop.eup %5745  ;;  %5749 = vrcp.f32 %v9835_v49  ;;  %v4713_v34 = vsel %vm4681_vm11, %v4582_v39, 0.0  ;;  %v4421_v10 = vsub.f32 %v4063_v5, %v4389_v0  ;;  %v4038_v25 = vadd.f32 %v5740_v15, %v4037_v46  ;;  %v9916_v5 = vld [vmem:[%s6062_s24 + $0x80] sm:$0xff] }
 0x65e   : > { %v4110_v55 = vmul.f32 %v5746_v14, %v9808_v36  ;;  %4791 = vperm.xlu2 %5696, %v4713_v34   ;;  %v4494_v63 = vmul.f32 0.6931472, %v5744_v26  ;;  %vm4114_vm0 = vweird.f32 %v9808_v36  ;;  %vm9859_vm3 = vcmp.eq.f32.partialorder %v4118_v57, 8.507059e+37 }
 0x65f   : > { %v4120_v53 = vand.u32 2147483648, %v9808_v36  ;;  %v4549_v12 = vsub.f32 %v4421_v10, %v4496_v37  ;;  %v4042_v60 = vsel %vm9843_vm1, %v5740_v15, %v4038_v25  ;;  %vm4115_vm13 = vweird.f32 %v5746_v14  ;;  %v3849_v36 = vld [vmem:[#allocation4 + $0x70] sm:$0xff]  ;;  %v4460_v25 = vld [vmem:[#allocation3 + $0x88] sm:$0xff] }
 0x660   : > { %v4111_v62 = vsub.f32 1.0, %v4110_v55  ;;  %v4047_v32 = vsel %vm9847_vm7, %v4046_v22, %v4042_v60  ;;  %vm4679_vm4 = vcmp.lt.s32.totalorder %v9852_v19, 400  ;;  %v4619_v30 = vadd.s32 112, %v9528_v31  ;;  %vm9877_vm12 = vmor %vm4114_vm0, %vm4115_vm13 }
 0x661   : > { %v4103_v44 = vand.u32 2147483647, %v9835_v49  ;;  %v4581_v9 = vsub.f32 0.0, %v4549_v12  ;;  %v4048_v33 = vmul.f32 %v4047_v32, %v3844_v28  ;;  %5751 = vrcp.f32 %v9865_v3  ;;  %v10005_v32 = vld [vmem:[%s6062_s24 + $0x98] sm:$0xff] }
 0x662   : > { %v5748_v20 = vpop.eup %5747  ;;  %v4112_v7 = vmul.f32 %v5746_v14, %v4111_v62  ;;  %v4121_v48 = vor.u32 1.1754944e-38, %v4120_v53  ;;  %vm4099_vm2 = vweird.f32 %v9835_v49  ;;  %v4105_v61 = vand.u32 2147483648, %v9835_v49 }
 0x663   : > { %v5750_v47 = vpop.eup %5749  ;;  %v4618_v40 = vadd.s32 104, %v9528_v31  ;;  %v4712_v8 = vsel %vm4680_vm15, %v4581_v9, 0.0  ;;  %v4420_v45 = vsub.f32 %v4048_v33, %v4388_v50  ;;  %v4504_v1 = vmul.f32 0.6931472, %v5748_v20 }
 0x664   : > { %v4113_v43 = vadd.f32 %v5746_v14, %v4112_v7  ;;  %v4095_v15 = vmul.f32 %v5750_v47, %v9835_v49  ;;  %4786 = vperm.xlu1 %5695, %v4712_v8   ;;  %v4652_v23 = vadd.s32 %v9536_v52, %v4619_v30  ;;  %vm9891_vm9 = vcmp.eq.f32.partialorder %v4103_v44, 8.507059e+37  ;;  %v3848_v49 = vld [vmem:[#allocation4 + $0x68] sm:$0xff]  ;;  %v3847_v7 = vld [vmem:[#allocation4 + $0x60] sm:$0xff] }
 0x665   : > { %5753 = vlog2.f32 %v4456_v4  ;;  %v4548_v16 = vsub.f32 %v4420_v45, %v4494_v63  ;;  %vm4100_vm8 = vweird.f32 %v5750_v47  ;;  %v9900_v59 = vadd.s32 %v9536_v52, %v4618_v40  ;;  %v4392_v63 = vld [vmem:[#allocation2 + $0x68] sm:$0xff]  ;;  %v4459_v40 = vld [vmem:[#allocation3 + $0x80] sm:$0xff] }
 0x666   : > { %v4117_v24 = vsel %vm9877_vm12, %v5746_v14, %v4113_v43  ;;  %v4096_v58 = vsub.f32 1.0, %v4095_v15  ;;  %v4088_v38 = vand.u32 2147483647, %v9865_v3  ;;  %5755 = vrcp.f32 %v9888_v18  ;;  %vm9907_vm14 = vmor %vm4099_vm2, %vm4100_vm8  ;;  %v4391_v43 = vld [vmem:[#allocation2 + $0x60] sm:$0xff] }
 0x667   : > { %v4122_v41 = vsel %vm9859_vm3, %v4121_v48, %v4117_v24  ;;  %v5752_v11 = vpop.eup %5751  ;;  %v4580_v13 = vsub.f32 0.0, %v4548_v16  ;;  %v4090_v2 = vand.u32 2147483648, %v9865_v3  ;;  %vm4684_vm11 = vcmp.lt.s32.totalorder %v4652_v23, 400 }
 0x668   : > { %v4123_v21 = vmul.f32 %v4122_v41, %v3849_v36  ;;  %v4097_v29 = vmul.f32 %v5750_v47, %v4096_v58  ;;  %v4106_v0 = vor.u32 1.1754944e-38, %v4105_v61  ;;  %v4080_v37 = vmul.f32 %v5752_v11, %v9865_v3 }
 0x669   : > { %5757 = vlog2.f32 %v4455_v56  ;;  %v4711_v57 = vsel %vm4679_vm4, %v4580_v13, 0.0  ;;  %vm4084_vm6 = vweird.f32 %v9865_v3  ;;  %vm4683_vm10 = vcmp.lt.s32.totalorder %v9900_v59, 400  ;;  %v9945_v3 = vld [vmem:[%s6062_s24 + $0x78] sm:$0xff] }
 0x66a   : > { %v4425_v26 = vsub.f32 %v4123_v21, %v4393_v54  ;;  %v4098_v39 = vadd.f32 %v5750_v47, %v4097_v29  ;;  %4781 = vperm.xlu0 %5694, %v4711_v57   ;;  %v4081_v14 = vsub.f32 1.0, %v4080_v37  ;;  %vm4085_vm5 = vweird.f32 %v5752_v11  ;;  %v4396_v37 = vld [vmem:[#allocation2 + $0x88] sm:$0xff] }
 0x66b   : > { %v5754_v46 = vpop.eup %5753  ;;  %vm9919_vm15 = vcmp.eq.f32.partialorder %v4088_v38, 8.507059e+37  ;;  %v4617_v42 = vadd.s32 96, %v9528_v31  ;;  %v4091_v34 = vor.u32 1.1754944e-38, %v4090_v2  ;;  %v4163_v10 = vand.u32 2147483647, %v9888_v18  ;;  %vm9934_vm1 = vmor %vm4084_vm6, %vm4085_vm5  ;;  %v4458_v2 = vld [vmem:[#allocation3 + $0x78] sm:$0xff] }
 0x66c   : > { %v4553_v22 = vsub.f32 %v4425_v26, %v4504_v1  ;;  %v4102_v19 = vsel %vm9907_vm14, %v5750_v47, %v4098_v39  ;;  %v5756_v55 = vpop.eup %5755  ;;  %v4082_v17 = vmul.f32 %v5752_v11, %v4081_v14  ;;  %v4165_v53 = vand.u32 2147483648, %v9888_v18  ;;  %v9982_v14 = vld [vmem:[%s6062_s24 + $0xa0] sm:$0xff] }
 0x66d   : > { %v4107_v28 = vsel %vm9891_vm9, %v4106_v0, %v4102_v19  ;;  %5759 = vrcp.f32 %v9916_v5  ;;  %v4502_v62 = vmul.f32 0.6931472, %v5754_v46  ;;  %v4155_v50 = vmul.f32 %v5756_v55, %v9888_v18 }
 0x66e   : > { %v4585_v12 = vsub.f32 0.0, %v4553_v22  ;;  %v4108_v60 = vmul.f32 %v4107_v28, %v3848_v49  ;;  %v4083_v44 = vadd.f32 %v5752_v11, %v4082_v17  ;;  %v9940_v20 = vadd.s32 %v9536_v52, %v4617_v42 }
 0x66f   : > { %v5758_v30 = vpop.eup %5757  ;;  %vm4159_vm7 = vweird.f32 %v9888_v18  ;;  %5761 = vlog2.f32 %v4460_v25  ;;  %v4156_v4 = vsub.f32 1.0, %v4155_v50  ;;  %vm4160_vm0 = vweird.f32 %v5756_v55  ;;  %v3852_v18 = vld [vmem:[#allocation4 + $0x88] sm:$0xff] }
 0x670   : > { %v4716_v9 = vsel %vm4684_vm11, %v4585_v12, 0.0  ;;  %v4424_v33 = vsub.f32 %v4108_v60, %v4392_v63  ;;  %v4087_v47 = vsel %vm9934_vm1, %v5752_v11, %v4083_v44  ;;  %vm9949_vm3 = vcmp.eq.f32.partialorder %v4163_v10, 8.507059e+37  ;;  %vm9959_vm13 = vmor %vm4159_vm7, %vm4160_vm0  ;;  %v3851_v63 = vld [vmem:[#allocation4 + $0x80] sm:$0xff] }
 0x671   : > { %4806 = vperm.xlu2 %5696, %v4716_v9   ;;  %v4166_v48 = vor.u32 1.1754944e-38, %v4165_v53  ;;  %v4622_v61 = vadd.s32 136, %v9528_v31  ;;  %v4092_v45 = vsel %vm9919_vm15, %v4091_v34, %v4087_v47  ;;  %v4500_v15 = vmul.f32 0.6931472, %v5758_v30  ;;  %v4395_v30 = vld [vmem:[#allocation2 + $0x80] sm:$0xff] }
 0x672   : > { %v4552_v8 = vsub.f32 %v4424_v33, %v4502_v62  ;;  %v4157_v36 = vmul.f32 %v5756_v55, %v4156_v4  ;;  %v4093_v23 = vmul.f32 %v4092_v45, %v3847_v7  ;;  %v4148_v16 = vand.u32 2147483647, %v9916_v5 }
 0x673   : > { %v5760_v1 = vpop.eup %5759  ;;  %v4150_v24 = vand.u32 2147483648, %v9916_v5  ;;  %5763 = vrcp.f32 %v9945_v3  ;;  %vm4682_vm4 = vcmp.lt.s32.totalorder %v9940_v20, 400  ;;  %vm4144_vm12 = vweird.f32 %v9916_v5  ;;  %v4463_v20 = vld [vmem:[#allocation3 + $0xa0] sm:$0xff] }
 0x674   : > { %v4584_v58 = vsub.f32 0.0, %v4552_v8  ;;  %v4158_v56 = vadd.f32 %v5756_v55, %v4157_v36  ;;  %v4140_v41 = vmul.f32 %v5760_v1, %v9916_v5  ;;  %5765 = vlog2.f32 %v4459_v40 }
 0x675   : > { %v5762_v54 = vpop.eup %5761  ;;  %v4423_v38 = vsub.f32 %v4093_v23, %v4391_v43  ;;  %v4621_v11 = vadd.s32 128, %v9528_v31  ;;  %vm4145_vm2 = vweird.f32 %v5760_v1  ;;  %v4655_v57 = vadd.s32 %v9536_v52, %v4622_v61  ;;  %v4462_v43 = vld [vmem:[#allocation3 + $0x98] sm:$0xff] }
 0x676   : > { %v4715_v13 = vsel %vm4683_vm10, %v4584_v58, 0.0  ;;  %v4162_v21 = vsel %vm9959_vm13, %v5756_v55, %v4158_v56  ;;  %v4141_v29 = vsub.f32 1.0, %v4140_v41  ;;  %vm9977_vm9 = vcmp.eq.f32.partialorder %v4148_v16, 8.507059e+37  ;;  %vm9987_vm8 = vmor %vm4144_vm12, %vm4145_vm2  ;;  %v10033_v58 = vld [vmem:[%s6062_s24 + $0x90] sm:$0xff]  ;;  %v4394_v41 = vld [vmem:[#allocation2 + $0x78] sm:$0xff] }
 0x677   : > { %4801 = vperm.xlu1 %5695, %v4715_v13   ;;  %v4551_v6 = vsub.f32 %v4423_v38, %v4500_v15  ;;  %v4167_v0 = vsel %vm9949_vm3, %v4166_v48, %v4162_v21  ;;  %v4510_v39 = vmul.f32 0.6931472, %v5762_v54  ;;  %v4151_v49 = vor.u32 1.1754944e-38, %v4150_v24 }
 0x678   : > { %v4168_v59 = vmul.f32 %v4167_v0, %v3852_v18  ;;  %v4142_v46 = vmul.f32 %v5760_v1, %v4141_v29  ;;  %v9992_v19 = vadd.s32 %v9536_v52, %v4621_v11  ;;  %vm4129_vm11 = vweird.f32 %v9945_v3 }
 0x679   : > { %v5764_v51 = vpop.eup %5763  ;;  %v4583_v42 = vsub.f32 0.0, %v4551_v6  ;;  %5767 = vlog2.f32 %v4458_v2  ;;  %v4620_v28 = vadd.s32 120, %v9528_v31  ;;  %v4133_v17 = vand.u32 2147483647, %v9945_v3 }
 0x67a   : > { %v5766_v34 = vpop.eup %5765  ;;  %v4428_v10 = vsub.f32 %v4168_v59, %v4396_v37  ;;  %v4143_v25 = vadd.f32 %v5760_v1, %v4142_v46  ;;  %v4125_v55 = vmul.f32 %v5764_v51, %v9945_v3  ;;  %v4135_v53 = vand.u32 2147483648, %v9945_v3  ;;  %v3850_v3 = vld [vmem:[#allocation4 + $0x78] sm:$0xff]  ;;  %v10125_v46 = vld [vmem:[%s6062_s24 + $0xa8] sm:$0xff] }
 0x67b   : > { %v4714_v5 = vsel %vm4682_vm4, %v4583_v42, 0.0  ;;  %5769 = vrcp.f32 %v9982_v14  ;;  %vm4130_vm14 = vweird.f32 %v5764_v51  ;;  %vm4687_vm6 = vcmp.lt.s32.totalorder %v4655_v57, 400  ;;  %v10063_v42 = vld [vmem:[%s6062_s24 + $0xb8] sm:$0xff] }
 0x67c   : > { %4796 = vperm.xlu0 %5694, %v4714_v5   ;;  %v4556_v12 = vsub.f32 %v4428_v10, %v4510_v39  ;;  %v4147_v60 = vsel %vm9987_vm8, %v5760_v1, %v4143_v25  ;;  %v4126_v62 = vsub.f32 1.0, %v4125_v55  ;;  %v4508_v44 = vmul.f32 0.6931472, %v5766_v34  ;;  %vm10015_vm5 = vmor %vm4129_vm11, %vm4130_vm14  ;;  %v4461_v34 = vld [vmem:[#allocation3 + $0x90] sm:$0xff]  ;;  %v3855_v25 = vld [vmem:[#allocation4 + $0xa0] sm:$0xff] }
 0x67d   : > { %v4152_v50 = vsel %vm9977_vm9, %v4151_v49, %v4147_v60  ;;  %v10010_v4 = vadd.s32 %v9536_v52, %v4620_v28  ;;  %vm4686_vm10 = vcmp.lt.s32.totalorder %v9992_v19, 400  ;;  %vm10019_vm15 = vcmp.eq.f32.partialorder %v4133_v17, 8.507059e+37 }
 0x67e   : > { %v4588_v9 = vsub.f32 0.0, %v4556_v12  ;;  %v4153_v33 = vmul.f32 %v4152_v50, %v3851_v63  ;;  %v4127_v7 = vmul.f32 %v5764_v51, %v4126_v62  ;;  %v4136_v61 = vor.u32 1.1754944e-38, %v4135_v53  ;;  %v4399_v50 = vld [vmem:[#allocation2 + $0xa0] sm:$0xff] }
 0x67f   : > { %v5768_v47 = vpop.eup %5767  ;;  %5771 = vrcp.f32 %v10005_v32  ;;  %vm4204_vm1 = vweird.f32 %v9982_v14  ;;  %v4208_v36 = vand.u32 2147483647, %v9982_v14  ;;  %v4210_v1 = vand.u32 2147483648, %v9982_v14 }
 0x680   : > { %v4719_v40 = vsel %vm4687_vm6, %v4588_v9, 0.0  ;;  %v4427_v8 = vsub.f32 %v4153_v33, %v4395_v30  ;;  %v4128_v45 = vadd.f32 %v5764_v51, %v4127_v7  ;;  %5773 = vlog2.f32 %v4463_v20  ;;  %v3854_v33 = vld [vmem:[#allocation4 + $0x98] sm:$0xff]  ;;  %v10150_v30 = vld [vmem:[%s6062_s24 + $0xd0] sm:$0xff] }
 0x681   : > { %v5770_v15 = vpop.eup %5769  ;;  %4821 = vperm.xlu2 %5696, %v4719_v40   ;;  %v4625_v23 = vadd.s32 160, %v9528_v31  ;;  %vm4685_vm7 = vcmp.lt.s32.totalorder %v10010_v4, 400  ;;  %v4506_v54 = vmul.f32 0.6931472, %v5768_v47  ;;  %v4193_v38 = vand.u32 2147483647, %v10005_v32 }
 0x682   : > { %v4555_v35 = vsub.f32 %v4427_v8, %v4508_v44  ;;  %v4132_v16 = vsel %vm10015_vm5, %v5764_v51, %v4128_v45  ;;  %v4200_v24 = vmul.f32 %v5770_v15, %v9982_v14  ;;  %5775 = vlog2.f32 %v4462_v43 }
 0x683   : > { %v4137_v56 = vsel %vm10019_vm15, %v4136_v61, %v4132_v16  ;;  %vm4205_vm0 = vweird.f32 %v5770_v15  ;;  %v10039_v29 = vadd.s32 %v9536_v52, %v4625_v23  ;;  %v4195_v2 = vand.u32 2147483648, %v10005_v32 }
 0x684   : > { %v4587_v18 = vsub.f32 0.0, %v4555_v35  ;;  %v4138_v11 = vmul.f32 %v4137_v56, %v3850_v3  ;;  %v4201_v13 = vsub.f32 1.0, %v4200_v24  ;;  %v4624_v6 = vadd.s32 152, %v9528_v31  ;;  %vm10049_vm3 = vmor %vm4204_vm1, %vm4205_vm0 }
 0x685   : > { %v5772_v21 = vpop.eup %5771  ;;  %5777 = vrcp.f32 %v10033_v58  ;;  %vm10053_vm13 = vcmp.eq.f32.partialorder %v4208_v36, 8.507059e+37  ;;  %v4211_v49 = vor.u32 1.1754944e-38, %v4210_v1  ;;  %vm4189_vm4 = vweird.f32 %v10005_v32  ;;  %v4466_v1 = vld [vmem:[#allocation3 + $0xb8] sm:$0xff] }
 0x686   : > { %v5774_v0 = vpop.eup %5773  ;;  %v4718_v37 = vsel %vm4686_vm10, %v4587_v18, 0.0  ;;  %v4426_v57 = vsub.f32 %v4138_v11, %v4394_v41  ;;  %v4202_v26 = vmul.f32 %v5770_v15, %v4201_v13  ;;  %v4185_v59 = vmul.f32 %v5772_v21, %v10005_v32  ;;  %v10176_v41 = vld [vmem:[%s6062_s24 + $0xc8] sm:$0xff] }
 0x687   : > { %4816 = vperm.xlu1 %5695, %v4718_v37   ;;  %vm10058_vm12 = vcmp.eq.f32.partialorder %v4193_v38, 8.507059e+37  ;;  %vm4190_vm2 = vweird.f32 %v5772_v21  ;;  %v4516_v55 = vmul.f32 0.6931472, %v5774_v0  ;;  %vm4690_vm9 = vcmp.lt.s32.totalorder %v10039_v29, 400  ;;  %v4465_v37 = vld [vmem:[#allocation3 + $0xb0] sm:$0xff] }
 0x688   : > { %v4554_v22 = vsub.f32 %v4426_v57, %v4506_v54  ;;  %v4203_v19 = vadd.f32 %v5770_v15, %v4202_v26  ;;  %v4186_v14 = vsub.f32 1.0, %v4185_v59  ;;  %v5776_v10 = vpop.eup %5775  ;;  %v4196_v28 = vor.u32 1.1754944e-38, %v4195_v2  ;;  %vm10078_vm8 = vmor %vm4189_vm4, %vm4190_vm2 }
 0x689   : > { %v10067_v5 = vadd.s32 %v9536_v52, %v4624_v6  ;;  %v4178_v63 = vand.u32 2147483647, %v10033_v58  ;;  %5779 = vrcp.f32 %v10063_v42  ;;  %vm4174_vm11 = vweird.f32 %v10033_v58 }
 0x68a   : > { %v4586_v17 = vsub.f32 0.0, %v4554_v22  ;;  %v4207_v53 = vsel %vm10049_vm3, %v5770_v15, %v4203_v19  ;;  %v4187_v12 = vmul.f32 %v5772_v21, %v4186_v14  ;;  %v4180_v44 = vand.u32 2147483648, %v10033_v58  ;;  %v4398_v15 = vld [vmem:[#allocation2 + $0x98] sm:$0xff]  ;;  %v4397_v22 = vld [vmem:[#allocation2 + $0x90] sm:$0xff] }
 0x68b   : > { %v5778_v60 = vpop.eup %5777  ;;  %v4212_v62 = vsel %vm10053_vm13, %v4211_v49, %v4207_v53  ;;  %5781 = vlog2.f32 %v4461_v34  ;;  %v4514_v32 = vmul.f32 0.6931472, %v5776_v10  ;;  %vm4689_vm14 = vcmp.lt.s32.totalorder %v10067_v5, 400 }
 0x68c   : > { %v4717_v20 = vsel %vm4685_vm7, %v4586_v17, 0.0  ;;  %v4213_v9 = vmul.f32 %v4212_v62, %v3855_v25  ;;  %v4188_v7 = vadd.f32 %v5772_v21, %v4187_v12  ;;  %v4170_v47 = vmul.f32 %v5778_v60, %v10033_v58  ;;  %v3853_v58 = vld [vmem:[#allocation4 + $0x90] sm:$0xff] }
 0x68d   : > { %4811 = vperm.xlu0 %5694, %v4717_v20   ;;  %vm10091_vm6 = vcmp.eq.f32.partialorder %v4178_v63, 8.507059e+37  ;;  %v4623_v61 = vadd.s32 144, %v9528_v31  ;;  %v4253_v4 = vand.u32 2147483647, %v10063_v42  ;;  %vm4175_vm10 = vweird.f32 %v5778_v60 }
 0x68e   : > { %v4431_v40 = vsub.f32 %v4213_v9, %v4399_v50  ;;  %v4192_v8 = vsel %vm10078_vm8, %v5772_v21, %v4188_v7  ;;  %v4171_v45 = vsub.f32 1.0, %v4170_v47  ;;  %v4181_v3 = vor.u32 1.1754944e-38, %v4180_v44  ;;  %vm10106_vm15 = vmor %vm4174_vm11, %vm4175_vm10  ;;  %v4402_v9 = vld [vmem:[#allocation2 + $0xb8] sm:$0xff] }
 0x68f   : > { %v4197_v43 = vsel %vm10058_vm12, %v4196_v28, %v4192_v8  ;;  %v4255_v36 = vand.u32 2147483648, %v10063_v42  ;;  %5783 = vrcp.f32 %v10088_v27  ;;  %v5780_v23 = vpop.eup %5779  ;;  %vm4249_vm5 = vweird.f32 %v10063_v42  ;;  %v4464_v8 = vld [vmem:[#allocation3 + $0xa8] sm:$0xff] }
 0x690   : > { %v4559_v35 = vsub.f32 %v4431_v40, %v4516_v55  ;;  %v4198_v16 = vmul.f32 %v4197_v43, %v3854_v33  ;;  %v4172_v24 = vmul.f32 %v5778_v60, %v4171_v45  ;;  %v10111_v54 = vadd.s32 %v9536_v52, %v4623_v61 }
 0x691   : > { %v5782_v56 = vpop.eup %5781  ;;  %v4245_v38 = vmul.f32 %v5780_v23, %v10063_v42  ;;  %vm10114_vm1 = vcmp.eq.f32.partialorder %v4253_v4, 8.507059e+37  ;;  %v4628_v11 = vadd.s32 184, %v9528_v31  ;;  %5785 = vlog2.f32 %v4466_v1 }
 0x692   : > { %v4591_v13 = vsub.f32 0.0, %v4559_v35  ;;  %v4430_v21 = vsub.f32 %v4198_v16, %v4398_v15  ;;  %v4173_v2 = vadd.f32 %v5778_v60, %v4172_v24  ;;  %vm4250_vm7 = vweird.f32 %v5780_v23  ;;  %v3857_v15 = vld [vmem:[#allocation4 + $0xb0] sm:$0xff] }
 0x693   : > { %v4246_v6 = vsub.f32 1.0, %v4245_v38  ;;  %v4256_v0 = vor.u32 1.1754944e-38, %v4255_v36  ;;  %vm4234_vm0 = vweird.f32 %v10088_v27  ;;  %v4512_v39 = vmul.f32 0.6931472, %v5782_v56  ;;  %vm10136_vm3 = vmor %vm4249_vm5, %vm4250_vm7  ;;  %v4401_v56 = vld [vmem:[#allocation2 + $0xb0] sm:$0xff] }
 0x694   : > { %v4722_v57 = vsel %vm4690_vm9, %v4591_v13, 0.0  ;;  %v4558_v26 = vsub.f32 %v4430_v21, %v4514_v32  ;;  %v4177_v59 = vsel %vm10106_vm15, %v5778_v60, %v4173_v2  ;;  %v10130_v14 = vadd.s32 %v9536_v52, %v4628_v11  ;;  %v3858_v60 = vld [vmem:[#allocation4 + $0xb8] sm:$0xff]  ;;  %v4469_v11 = vld [vmem:[#allocation3 + $0xd0] sm:$0xff]  ;;  %v3860_v21 = vld [vmem:[#allocation4 + $0xc8] sm:$0xff] }
 0x695   : > { %v5784_v49 = vpop.eup %5783  ;;  %4836 = vperm.xlu2 %5696, %v4722_v57   ;;  %v4182_v51 = vsel %vm10091_vm6, %v4181_v3, %v4177_v59  ;;  %v4247_v19 = vmul.f32 %v5780_v23, %v4246_v6  ;;  %v4238_v29 = vand.u32 2147483647, %v10088_v27  ;;  %5787 = vlog2.f32 %v4465_v37 }
 0x696   : > { %v4590_v34 = vsub.f32 0.0, %v4558_v26  ;;  %v4183_v10 = vmul.f32 %v4182_v51, %v3853_v58  ;;  %v4230_v55 = vmul.f32 %v5784_v49, %v10088_v27  ;;  %v4240_v63 = vand.u32 2147483648, %v10088_v27  ;;  %v10198_v51 = vld [vmem:[%s6062_s24 + $0xc0] sm:$0xff] }
 0x697   : > { %v4248_v28 = vadd.f32 %v5780_v23, %v4247_v19  ;;  %v4627_v17 = vadd.s32 176, %v9528_v31  ;;  %5789 = vrcp.f32 %v10125_v46  ;;  %v5786_v53 = vpop.eup %5785  ;;  %vm4235_vm13 = vweird.f32 %v5784_v49 }
 0x698   : > { %v4721_v12 = vsel %vm4689_vm14, %v4590_v34, 0.0  ;;  %v4429_v42 = vsub.f32 %v4183_v10, %v4397_v22  ;;  %v4231_v62 = vsub.f32 1.0, %v4230_v55  ;;  %vm4688_vm4 = vcmp.lt.s32.totalorder %v10111_v54, 400  ;;  %vm10157_vm2 = vmor %vm4234_vm0, %vm4235_vm13  ;;  %v3856_v34 = vld [vmem:[#allocation4 + $0xa8] sm:$0xff] }
 0x699   : > { %4831 = vperm.xlu1 %5695, %v4721_v12   ;;  %v4252_v50 = vsel %vm10136_vm3, %v5780_v23, %v4248_v28  ;;  %vm4693_vm12 = vcmp.lt.s32.totalorder %v10130_v14, 400  ;;  %v4522_v7 = vmul.f32 0.6931472, %v5786_v53  ;;  %v4241_v32 = vor.u32 1.1754944e-38, %v4240_v63  ;;  %v4400_v12 = vld [vmem:[#allocation2 + $0xa8] sm:$0xff] }
 0x69a   : > { %v4557_v44 = vsub.f32 %v4429_v42, %v4512_v39  ;;  %v4257_v20 = vsel %vm10114_vm1, %v4256_v0, %v4252_v50  ;;  %v4232_v5 = vmul.f32 %v5784_v49, %v4231_v62  ;;  %v10162_v48 = vadd.s32 %v9536_v52, %v4627_v17 }
 0x69b   : > { %v4258_v33 = vmul.f32 %v4257_v20, %v3858_v60  ;;  %v5788_v61 = vpop.eup %5787  ;;  %vm4239_vm9 = vcmp.eq.f32.partialorder %v4238_v29, 8.507059e+37  ;;  %5791 = vrcp.f32 %v10150_v30  ;;  %vm4219_vm8 = vweird.f32 %v10125_v46  ;;  %v4468_v29 = vld [vmem:[#allocation3 + $0xc8] sm:$0xff] }
 0x69c   : > { %v4589_v4 = vsub.f32 0.0, %v4557_v44  ;;  %v4233_v40 = vadd.f32 %v5784_v49, %v4232_v5  ;;  %v4223_v27 = vand.u32 2147483647, %v10125_v46  ;;  %v4626_v3 = vadd.s32 168, %v9528_v31 }
 0x69d   : > { %v5790_v45 = vpop.eup %5789  ;;  %v4434_v43 = vsub.f32 %v4258_v33, %v4402_v9  ;;  %v4225_v35 = vand.u32 2147483648, %v10125_v46  ;;  %vm4692_vm11 = vcmp.lt.s32.totalorder %v10162_v48, 400  ;;  %5793 = vlog2.f32 %v4464_v8  ;;  %v10227_v33 = vld [vmem:[%s6062_s24 + $0xe8] sm:$0xff] }
 0x69e   : > { %v4720_v36 = vsel %vm4688_vm4, %v4589_v4, 0.0  ;;  %v4237_v1 = vsel %vm10157_vm2, %v5784_v49, %v4233_v40  ;;  %v4215_v23 = vmul.f32 %v5790_v45, %v10125_v46  ;;  %v4520_v18 = vmul.f32 0.6931472, %v5788_v61 }
 0x69f   : > { %4826 = vperm.xlu0 %5694, %v4720_v36   ;;  %v4562_v16 = vsub.f32 %v4434_v43, %v4522_v7  ;;  %v4242_v24 = vsel %vm4239_vm9, %v4241_v32, %v4237_v1  ;;  %vm4220_vm14 = vweird.f32 %v5790_v45  ;;  %vm10178_vm6 = vcmp.eq.f32.partialorder %v4223_v27, 8.507059e+37  ;;  %v4467_v43 = vld [vmem:[#allocation3 + $0xc0] sm:$0xff]  ;;  %v4405_v36 = vld [vmem:[#allocation2 + $0xd0] sm:$0xff] }
 0x6a0   : > { %v4243_v38 = vmul.f32 %v4242_v24, %v3857_v15  ;;  %v4216_v54 = vsub.f32 1.0, %v4215_v23  ;;  %v10183_v2 = vadd.s32 %v9536_v52, %v4626_v3  ;;  %v4631_v58 = vadd.s32 208, %v9528_v31  ;;  %vm10191_vm10 = vmor %vm4219_vm8, %vm4220_vm14 }
 0x6a1   : > { %v4594_v13 = vsub.f32 0.0, %v4562_v16  ;;  %v5792_v6 = vpop.eup %5791  ;;  %v4226_v57 = vor.u32 1.1754944e-38, %v4225_v35  ;;  %5795 = vrcp.f32 %v10176_v41  ;;  %v4298_v49 = vand.u32 2147483647, %v10150_v30 }
 0x6a2   : > { %v4433_v0 = vsub.f32 %v4243_v38, %v4401_v56  ;;  %v4217_v37 = vmul.f32 %v5790_v45, %v4216_v54  ;;  %v4290_v39 = vmul.f32 %v5792_v6, %v10150_v30  ;;  %5797 = vlog2.f32 %v4469_v11 }
 0x6a3   : > { %v4725_v26 = vsel %vm4693_vm12, %v4594_v13, 0.0  ;;  %vm4294_vm5 = vweird.f32 %v10150_v30  ;;  %v4300_v14 = vand.u32 2147483648, %v10150_v30  ;;  %v5794_v46 = vpop.eup %5793  ;;  %vm4691_vm15 = vcmp.lt.s32.totalorder %v10183_v2, 400  ;;  %v3861_v30 = vld [vmem:[#allocation4 + $0xd0] sm:$0xff] }
 0x6a4   : > { %4851 = vperm.xlu2 %5696, %v4725_v26   ;;  %v4561_v22 = vsub.f32 %v4433_v0, %v4520_v18  ;;  %v4218_v19 = vadd.f32 %v5790_v45, %v4217_v37  ;;  %v4291_v10 = vsub.f32 1.0, %v4290_v39  ;;  %vm4295_vm1 = vweird.f32 %v5792_v6  ;;  %v4472_v26 = vld [vmem:[#allocation3 + $0xe8] sm:$0xff] }
 0x6a5   : > { %v10204_v25 = vadd.s32 %v9536_v52, %v4631_v58  ;;  %v4283_v55 = vand.u32 2147483647, %v10176_v41  ;;  %v4285_v17 = vand.u32 2147483648, %v10176_v41  ;;  %5799 = vrcp.f32 %v10198_v51  ;;  %vm10222_vm0 = vmor %vm4294_vm5, %vm4295_vm1 }
 0x6a6   : > { %v4593_v28 = vsub.f32 0.0, %v4561_v22  ;;  %v4222_v63 = vsel %vm10191_vm10, %v5790_v45, %v4218_v19  ;;  %v4292_v42 = vmul.f32 %v5792_v6, %v4291_v10  ;;  %vm10213_vm7 = vcmp.eq.f32.partialorder %v4298_v49, 8.507059e+37 }
 0x6a7   : > { %v4227_v53 = vsel %vm10178_vm6, %v4226_v57, %v4222_v63  ;;  %5801 = vlog2.f32 %v4468_v29  ;;  %v5796_v62 = vpop.eup %5795  ;;  %v4518_v20 = vmul.f32 0.6931472, %v5794_v46  ;;  %v4301_v5 = vor.u32 1.1754944e-38, %v4300_v14  ;;  %v10266_v14 = vld [vmem:[%s6062_s24 + $0xe0] sm:$0xff]  ;;  %v4404_v29 = vld [vmem:[#allocation2 + $0xc8] sm:$0xff] }
 0x6a8   : > { %v4724_v50 = vsel %vm4692_vm11, %v4593_v28, 0.0  ;;  %v4228_v44 = vmul.f32 %v4227_v53, %v3856_v34  ;;  %v5798_v7 = vpop.eup %5797  ;;  %v4293_v47 = vadd.f32 %v5792_v6, %v4292_v42  ;;  %v4275_v32 = vmul.f32 %v5796_v62, %v10176_v41  ;;  %v3859_v53 = vld [vmem:[#allocation4 + $0xc0] sm:$0xff] }
 0x6a9   : > { %4846 = vperm.xlu1 %5695, %v4724_v50   ;;  %vm4279_vm3 = vweird.f32 %v10176_v41  ;;  %vm10231_vm13 = vcmp.eq.f32.partialorder %v4283_v55, 8.507059e+37  ;;  %vm4696_vm4 = vcmp.lt.s32.totalorder %v10204_v25, 400  ;;  %v4286_v4 = vor.u32 1.1754944e-38, %v4285_v17 }
 0x6aa   : > { %v4432_v61 = vsub.f32 %v4228_v44, %v4400_v12  ;;  %v4630_v40 = vadd.s32 200, %v9528_v31  ;;  %v4297_v8 = vsel %vm10222_vm0, %v5792_v6, %v4293_v47  ;;  %v4276_v45 = vsub.f32 1.0, %v4275_v32 }
 0x6ab   : > { %vm4280_vm12 = vweird.f32 %v5796_v62  ;;  %5803 = vrcp.f32 %v10227_v33  ;;  %v5800_v15 = vpop.eup %5799  ;;  %v4302_v3 = vsel %vm10213_vm7, %v4301_v5, %v4297_v8  ;;  %v4528_v1 = vmul.f32 0.6931472, %v5798_v7  ;;  %v10291_v7 = vld [vmem:[%s6062_s24 + $0xd8] sm:$0xff] }
 0x6ac   : > { %v4560_v27 = vsub.f32 %v4432_v61, %v4518_v20  ;;  %v4268_v23 = vand.u32 2147483647, %v10198_v51  ;;  %v4303_v16 = vmul.f32 %v4302_v3, %v3861_v30  ;;  %v4277_v24 = vmul.f32 %v5796_v62, %v4276_v45  ;;  %vm10248_vm2 = vmor %vm4279_vm3, %vm4280_vm12  ;;  %v4403_v20 = vld [vmem:[#allocation2 + $0xc0] sm:$0xff]  ;;  %v3864_v45 = vld [vmem:[#allocation4 + $0xe8] sm:$0xff] }
 0x6ad   : > { %v5802_v35 = vpop.eup %5801  ;;  %v4260_v56 = vmul.f32 %v5800_v15, %v10198_v51  ;;  %v4270_v38 = vand.u32 2147483648, %v10198_v51  ;;  %v10253_v11 = vadd.s32 %v9536_v52, %v4630_v40  ;;  %vm4264_vm9 = vweird.f32 %v10198_v51 }
 0x6ae   : > { %v4592_v18 = vsub.f32 0.0, %v4560_v27  ;;  %5805 = vlog2.f32 %v4467_v43  ;;  %v4437_v13 = vsub.f32 %v4303_v16, %v4405_v36  ;;  %v4278_v58 = vadd.f32 %v5796_v62, %v4277_v24  ;;  %v4471_v43 = vld [vmem:[#allocation3 + $0xe0] sm:$0xff]  ;;  %v10309_v24 = vld [vmem:[%s6062_s24 + $0xf8] sm:$0xff] }
 0x6af   : > { %v4261_v6 = vsub.f32 1.0, %v4260_v56  ;;  %vm4265_vm8 = vweird.f32 %v5800_v15  ;;  %v4526_v41 = vmul.f32 0.6931472, %v5802_v35  ;;  %vm10258_vm11 = vcmp.eq.f32.partialorder %v4268_v23, 8.507059e+37  ;;  %v4408_v35 = vld [vmem:[#allocation2 + $0xe8] sm:$0xff] }
 0x6b0   : > { %v4723_v0 = vsel %vm4691_vm15, %v4592_v18, 0.0  ;;  %v4629_v57 = vadd.s32 192, %v9528_v31  ;;  %v4565_v39 = vsub.f32 %v4437_v13, %v4528_v1  ;;  %v4282_v49 = vsel %vm10248_vm2, %v5796_v62, %v4278_v58  ;;  %vm10273_vm14 = vmor %vm4264_vm9, %vm4265_vm8  ;;  %v4747_v58 = vpop.permute.xlu1 %4746 }
 0x6b1   : > { %v5804_v59 = vpop.eup %5803  ;;  %4841 = vperm.xlu0 %5694, %v4723_v0   ;;  %v4262_v22 = vmul.f32 %v5800_v15, %v4261_v6  ;;  %v4271_v19 = vor.u32 1.1754944e-38, %v4270_v38  ;;  %v4287_v2 = vsel %vm10231_vm13, %v4286_v4, %v4282_v49  ;;  %vm4339_vm6 = vweird.f32 %v10227_v33  ;;  %v4470_v0 = vld [vmem:[#allocation3 + $0xd8] sm:$0xff]  ;;  %4896 = vst [vmem:[%s6079_s14 + $0x10] sm:$0xff] %v4747_v58 }
 0x6b2   : > { %v4335_v34 = vmul.f32 %v5804_v59, %v10227_v33  ;;  %v4345_v10 = vand.u32 2147483648, %v10227_v33  ;;  %v4597_v55 = vsub.f32 0.0, %v4565_v39  ;;  %v4288_v28 = vmul.f32 %v4287_v2, %v3860_v21  ;;  %v4757_v21 = vpop.permute.xlu2 %4756 }
 0x6b3   : > { %v4263_v63 = vadd.f32 %v5800_v15, %v4262_v22  ;;  %5807 = vlog2.f32 %v4472_v26  ;;  %vm4340_vm10 = vweird.f32 %v5804_v59  ;;  %v4343_v51 = vand.u32 2147483647, %v10227_v33  ;;  %4898 = vst [vmem:[%s6079_s14 + $0x20] sm:$0xff] %v4757_v21 }
 0x6b4   : > { %v5806_v17 = vpop.eup %5805  ;;  %v4336_v12 = vsub.f32 1.0, %v4335_v34  ;;  %5809 = vrcp.f32 %v10266_v14  ;;  %v4728_v42 = vsel %vm4696_vm4, %v4597_v55, 0.0  ;;  %v4436_v60 = vsub.f32 %v4288_v28, %v4404_v29  ;;  %vm10296_vm5 = vmor %vm4339_vm6, %vm4340_vm10  ;;  %v10334_v29 = vld [vmem:[%s6062_s24 + $0xf0] sm:$0xff]  ;;  %v3863_v55 = vld [vmem:[#allocation4 + $0xe0] sm:$0xff] }
 0x6b5   : > { %v4267_v62 = vsel %vm10273_vm14, %v5800_v15, %v4263_v63  ;;  %v4662_v50 = vadd.s32 %v9536_v52, %v4629_v57  ;;  %4866 = vperm.xlu2 %5696, %v4728_v42   ;;  %v4634_v5 = vadd.s32 232, %v9528_v31  ;;  %v4524_v25 = vmul.f32 0.6931472, %v5806_v17 }
 0x6b6   : > { %v4272_v44 = vsel %vm10258_vm11, %v4271_v19, %v4267_v62  ;;  %v4337_v9 = vmul.f32 %v5804_v59, %v4336_v12  ;;  %v4564_v47 = vsub.f32 %v4436_v60, %v4526_v41  ;;  %v4346_v61 = vor.u32 1.1754944e-38, %v4345_v10  ;;  %v4737_v41 = vpop.permute.xlu0 %4736 }
 0x6b7   : > { %v4273_v32 = vmul.f32 %v4272_v44, %v3859_v53  ;;  %vm4695_vm15 = vcmp.lt.s32.totalorder %v10253_v11, 400  ;;  %vm4344_vm1 = vcmp.eq.f32.partialorder %v4343_v51, 8.507059e+37  ;;  %vm4694_vm7 = vcmp.lt.s32.totalorder %v4662_v50, 400  ;;  %4894 = vst [vmem:[%s6079_s14] sm:$0xff] %v4737_v41  ;;  %v4474_v51 = vld [vmem:[#allocation3 + $0xf8] sm:$0xff]  ;;  %v4407_v50 = vld [vmem:[#allocation2 + $0xe0] sm:$0xff] }
 0x6b8   : > { %v4338_v30 = vadd.f32 %v5804_v59, %v4337_v9  ;;  %v4596_v40 = vsub.f32 0.0, %v4564_v47  ;;  %5811 = vrcp.f32 %v10291_v7  ;;  %v4667_v27 = vadd.s32 %v9536_v52, %v4634_v5 }
 0x6b9   : > { %v5808_v4 = vpop.eup %5807  ;;  %v4435_v8 = vsub.f32 %v4273_v32, %v4403_v20  ;;  %vm4324_vm0 = vweird.f32 %v10266_v14  ;;  %v4328_v3 = vand.u32 2147483647, %v10266_v14  ;;  %v4330_v18 = vand.u32 2147483648, %v10266_v14 }
 0x6ba   : > { %v5810_v15 = vpop.eup %5809  ;;  %v4342_v33 = vsel %vm10296_vm5, %v5804_v59, %v4338_v30  ;;  %v4727_v36 = vsel %vm4695_vm15, %v4596_v40, 0.0  ;;  %v4534_v38 = vmul.f32 0.6931472, %v5808_v4  ;;  %5813 = vlog2.f32 %v4471_v43  ;;  %v4762_v48 = vpop.permute.xlu2 %4761 }
 0x6bb   : > { %v4563_v1 = vsub.f32 %v4435_v8, %v4524_v25  ;;  %v4347_v23 = vsel %vm4344_vm1, %v4346_v61, %v4342_v33  ;;  %v4320_v16 = vmul.f32 %v5810_v15, %v10266_v14  ;;  %4861 = vperm.xlu1 %5695, %v4727_v36   ;;  %vm4325_vm3 = vweird.f32 %v5810_v15  ;;  %v4752_v61 = vpop.permute.xlu1 %4751  ;;  %4899 = vst [vmem:[%s6079_s14 + $0x28] sm:$0xff] %v4762_v48  ;;  %v4473_v36 = vld [vmem:[#allocation3 + $0xf0] sm:$0xff] }
 0x6bc   : > { %v4348_v56 = vmul.f32 %v4347_v23, %v3864_v45  ;;  %v4633_v13 = vadd.s32 224, %v9528_v31  ;;  %5815 = vrcp.f32 %v10309_v24  ;;  %vm10318_vm13 = vcmp.eq.f32.partialorder %v4328_v3, 8.507059e+37  ;;  %vm10327_vm12 = vmor %vm4324_vm0, %vm4325_vm3  ;;  %v3862_v45 = vld [vmem:[#allocation4 + $0xd8] sm:$0xff]  ;;  %4897 = vst [vmem:[%s6079_s14 + $0x18] sm:$0xff] %v4752_v61 }
 0x6bd   : > { %v4595_v54 = vsub.f32 0.0, %v4563_v1  ;;  %v4321_v11 = vsub.f32 1.0, %v4320_v16  ;;  %v4315_v39 = vand.u32 2147483648, %v10291_v7  ;;  %vm4699_vm4 = vcmp.lt.s32.totalorder %v4667_v27, 400  ;;  %v4406_v16 = vld [vmem:[#allocation2 + $0xd8] sm:$0xff] }
 0x6be   : > { %v4440_v6 = vsub.f32 %v4348_v56, %v4408_v35  ;;  %v10315_v37 = vpop.eup %5811  ;;  %v4331_v19 = vor.u32 1.1754944e-38, %v4330_v18  ;;  %v10338_v34 = vadd.s32 %v9536_v52, %v4633_v13  ;;  %vm4309_vm2 = vweird.f32 %v10291_v7 }
 0x6bf   : > { %v4726_v57 = vsel %vm4694_vm7, %v4595_v54, 0.0  ;;  %v4322_v26 = vmul.f32 %v5810_v15, %v4321_v11  ;;  %v4305_v2 = vmul.f32 %v10315_v37, %v10291_v7  ;;  %5817 = vlog2.f32 %v4470_v0 }
 0x6c0   : > { %4856 = vperm.xlu0 %5694, %v4726_v57   ;;  %v4568_v49 = vsub.f32 %v4440_v6, %v4534_v38  ;;  %v5814_v10 = vpop.eup %5813  ;;  %vm4310_vm9 = vweird.f32 %v10315_v37  ;;  %v4313_v63 = vand.u32 2147483647, %v10291_v7  ;;  %v4316_v53 = vor.u32 1.1754944e-38, %v4315_v39  ;;  %v4742_v7 = vpop.permute.xlu0 %4741 }
 0x6c1   : > { %v4323_v46 = vadd.f32 %v5810_v15, %v4322_v26  ;;  %v4306_v28 = vsub.f32 1.0, %v4305_v2  ;;  %v4632_v12 = vadd.s32 216, %v9528_v31  ;;  %5819 = vrcp.f32 %v10334_v29  ;;  %vm10356_vm8 = vmor %vm4309_vm2, %vm4310_vm9  ;;  %4895 = vst [vmem:[%s6079_s14 + $0x8] sm:$0xff] %v4742_v7  ;;  %v4410_v2 = vld [vmem:[#allocation2 + $0xf8] sm:$0xff] }
 0x6c2   : > { %v4600_v14 = vsub.f32 0.0, %v4568_v49  ;;  %v5816_v42 = vpop.eup %5815  ;;  %v4373_v20 = vand.u32 2147483647, %v10309_v24  ;;  %v4532_v5 = vmul.f32 0.6931472, %v5814_v10  ;;  %v4375_v25 = vand.u32 2147483648, %v10309_v24  ;;  %v4777_v39 = vpop.permute.xlu2 %4776 }
 0x6c3   : > { %v4327_v17 = vsel %vm10327_vm12, %v5810_v15, %v4323_v46  ;;  %v4307_v44 = vmul.f32 %v10315_v37, %v4306_v28  ;;  %v4365_v32 = vmul.f32 %v5816_v42, %v10309_v24  ;;  %vm4698_vm11 = vcmp.lt.s32.totalorder %v10338_v34, 400  ;;  %4902 = vst [vmem:[%s6079_s14 + $0x40] sm:$0xff] %v4777_v39 }
 0x6c4   : > { %v4731_v60 = vsel %vm4699_vm4, %v4600_v14, 0.0  ;;  %v4332_v62 = vsel %vm10318_vm13, %v4331_v19, %v4327_v17  ;;  %vm10364_vm14 = vcmp.eq.f32.partialorder %v4313_v63, 8.507059e+37  ;;  %5821 = vlog2.f32 %v4474_v51 }
 0x6c5   : > { %4881 = vperm.xlu2 %5696, %v4731_v60   ;;  %v4333_v9 = vmul.f32 %v4332_v62, %v3863_v55  ;;  %v4308_v30 = vadd.f32 %v10315_v37, %v4307_v44  ;;  %v5818_v40 = vpop.eup %5817  ;;  %v4366_v43 = vsub.f32 1.0, %v4365_v32  ;;  %vm4369_vm6 = vweird.f32 %v10309_v24 }
 0x6c6   : > { %vm4370_vm10 = vweird.f32 %v5816_v42  ;;  %v4665_v33 = vadd.s32 %v9536_v52, %v4632_v12  ;;  %vm10375_vm5 = vcmp.eq.f32.partialorder %v4373_v20, 8.507059e+37  ;;  %v4636_v3 = vadd.s32 248, %v9528_v31  ;;  %v4772_v49 = vpop.permute.xlu1 %4771  ;;  %v4409_v20 = vld [vmem:[#allocation2 + $0xf0] sm:$0xff] }
 0x6c7   : > { %v4439_v8 = vsub.f32 %v4333_v9, %v4407_v50  ;;  %v4312_v15 = vsel %vm10356_vm8, %v10315_v37, %v4308_v30  ;;  %v5820_v1 = vpop.eup %5819  ;;  %v4367_v56 = vmul.f32 %v5816_v42, %v4366_v43  ;;  %v4376_v38 = vor.u32 1.1754944e-38, %v4375_v25  ;;  %vm10386_vm15 = vmor %vm4369_vm6, %vm4370_vm10  ;;  %v3866_v37 = vld [vmem:[#allocation4 + $0xf8] sm:$0xff]  ;;  %4901 = vst [vmem:[%s6079_s14 + $0x38] sm:$0xff] %v4772_v49 }
 0x6c8   : > { %v4317_v35 = vsel %vm10364_vm14, %v4316_v53, %v4312_v15  ;;  %v4530_v54 = vmul.f32 0.6931472, %v5818_v40  ;;  %v4350_v13 = vmul.f32 %v5820_v1, %v10334_v29  ;;  %vm4354_vm1 = vweird.f32 %v10334_v29 }
 0x6c9   : > { %v4567_v23 = vsub.f32 %v4439_v8, %v4532_v5  ;;  %v4318_v18 = vmul.f32 %v4317_v35, %v3862_v45  ;;  %v4368_v58 = vadd.f32 %v5816_v42, %v4367_v56  ;;  %v4360_v6 = vand.u32 2147483648, %v10334_v29 }
 0x6ca   : > { %5823 = vlog2.f32 %v4473_v36  ;;  %v5822_v0 = vpop.eup %5821  ;;  %v4351_v57 = vsub.f32 1.0, %v4350_v13  ;;  %vm4355_vm7 = vweird.f32 %v5820_v1  ;;  %v4358_v24 = vand.u32 2147483647, %v10334_v29  ;;  %v4792_v25 = vpop.permute.xlu2 %4791 }
 0x6cb   : > { %v4599_v21 = vsub.f32 0.0, %v4567_v23  ;;  %v4438_v41 = vsub.f32 %v4318_v18, %v4406_v16  ;;  %v4372_v59 = vsel %vm10386_vm15, %v5816_v42, %v4368_v58  ;;  %v4767_v10 = vpop.permute.xlu0 %4766  ;;  %vm4697_vm0 = vcmp.lt.s32.totalorder %v4665_v33, 400  ;;  %vm10404_vm3 = vmor %vm4354_vm1, %vm4355_vm7  ;;  %v3865_v42 = vld [vmem:[#allocation4 + $0xf0] sm:$0xff]  ;;  %4905 = vst [vmem:[%s6079_s14 + $0x58] sm:$0xff] %v4792_v25 }
 0x6cc   : > { %v4377_v19 = vsel %vm10375_vm5, %v4376_v38, %v4372_v59  ;;  %v4352_v46 = vmul.f32 %v5820_v1, %v4351_v57  ;;  %v4538_v34 = vmul.f32 0.6931472, %v5822_v0  ;;  %v4361_v28 = vor.u32 1.1754944e-38, %v4360_v6  ;;  %4900 = vst [vmem:[%s6079_s14 + $0x30] sm:$0xff] %v4767_v10 }
 0x6cd   : > { %v4730_v26 = vsel %vm4698_vm11, %v4599_v21, 0.0  ;;  %v4566_v22 = vsub.f32 %v4438_v41, %v4530_v54  ;;  %v4378_v14 = vmul.f32 %v4377_v19, %v3866_v37  ;;  %v4669_v17 = vadd.s32 %v9536_v52, %v4636_v3 }
 0x6ce   : > { %4876 = vperm.xlu1 %5695, %v4730_v26   ;;  %v4353_v53 = vadd.f32 %v5820_v1, %v4352_v46  ;;  %vm4359_vm13 = vcmp.eq.f32.partialorder %v4358_v24, 8.507059e+37  ;;  %v4635_v60 = vadd.s32 240, %v9528_v31 }
 0x6cf   : > { %v4598_v63 = vsub.f32 0.0, %v4566_v22  ;;  %v4442_v51 = vsub.f32 %v4378_v14, %v4410_v2  ;;  %vm4701_vm4 = vcmp.lt.s32.totalorder %v4669_v17, 400 }
 0x6d0   : > { %v5824_v12 = vpop.eup %5823  ;;  %v4357_v29 = vsel %vm10404_vm3, %v5820_v1, %v4353_v53  ;;  %v4668_v32 = vadd.s32 %v9536_v52, %v4635_v60 }
 0x6d1   : > { %v4729_v62 = vsel %vm4697_vm0, %v4598_v63, 0.0  ;;  %v4570_v50 = vsub.f32 %v4442_v51, %v4538_v34  ;;  %v4362_v44 = vsel %vm4359_vm13, %v4361_v28, %v4357_v29  ;;  %v4536_v5 = vmul.f32 0.6931472, %v5824_v12 }
 0x6d2   : > { %4871 = vperm.xlu0 %5694, %v4729_v62   ;;  %v4363_v9 = vmul.f32 %v4362_v44, %v3865_v42  ;;  %vm4700_vm12 = vcmp.lt.s32.totalorder %v4668_v32, 400  ;;  %v4807_v52 = vpop.permute.xlu2 %4806 }
 0x6d3   : > { %v4602_v47 = vsub.f32 0.0, %v4570_v50  ;;  %4908 = vst [vmem:[%s6079_s14 + $0x70] sm:$0xff] %v4807_v52 }
 0x6d4   : > { %v4441_v48 = vsub.f32 %v4363_v9, %v4409_v20 }
 0x6d5   : > { %v4733_v31 = vsel %vm4701_vm4, %v4602_v47, 0.0 }
 0x6d6   : > { %v4787_v61 = vpop.permute.xlu1 %4786  ;;  %4891 = vperm.xlu1 %5695, %v4733_v31   ;;  %v4569_v30 = vsub.f32 %v4441_v48, %v4536_v5 }
 0x6d7   : > { %4904 = vst [vmem:[%s6079_s14 + $0x50] sm:$0xff] %v4787_v61 }
 0x6d8   : > { %v4601_v4 = vsub.f32 0.0, %v4569_v30 }
 0x6da   : > { %v4732_v7 = vsel %vm4700_vm12, %v4601_v4, 0.0 }
 0x6db   : > { %4886 = vperm.xlu0 %5694, %v4732_v7   ;;  %v4822_v8 = vpop.permute.xlu2 %4821 }
 0x6dc   : > { %v4782_v40 = vpop.permute.xlu0 %4781  ;;  %4911 = vst [vmem:[%s6079_s14 + $0x88] sm:$0xff] %v4822_v8 }
 0x6dd   : > { %4903 = vst [vmem:[%s6079_s14 + $0x48] sm:$0xff] %v4782_v40 }
 0x6e9   : > { %v4802_v45 = vpop.permute.xlu1 %4801 }
 0x6ea   : > { %4907 = vst [vmem:[%s6079_s14 + $0x68] sm:$0xff] %v4802_v45 }
 0x6ee   : > { %v4797_v43 = vpop.permute.xlu0 %4796 }
 0x6ef   : > { %v4837_v15 = vpop.permute.xlu2 %4836  ;;  %4906 = vst [vmem:[%s6079_s14 + $0x60] sm:$0xff] %v4797_v43 }
 0x6f0   : > { %4914 = vst [vmem:[%s6079_s14 + $0xa0] sm:$0xff] %v4837_v15 }
 0x6f9   : > { %v4817_v33 = vpop.permute.xlu1 %4816 }
 0x6fa   : > { %4910 = vst [vmem:[%s6079_s14 + $0x80] sm:$0xff] %v4817_v33 }
 0x6fe   : > { %v4852_v27 = vpop.permute.xlu2 %4851 }
 0x6ff   : > { %4917 = vst [vmem:[%s6079_s14 + $0xb8] sm:$0xff] %v4852_v27  ;;  %v4812_v3 = vpop.permute.xlu0 %4811 }
 0x700   : > { %4909 = vst [vmem:[%s6079_s14 + $0x78] sm:$0xff] %v4812_v3 }
 0x70b   : > { %v4832_v36 = vpop.permute.xlu1 %4831 }
 0x70c   : > { %4913 = vst [vmem:[%s6079_s14 + $0x98] sm:$0xff] %v4832_v36 }
 0x70f   : > { %v4867_v1 = vpop.permute.xlu2 %4866 }
 0x710   : > { %4920 = vst [vmem:[%s6079_s14 + $0xd0] sm:$0xff] %v4867_v1 }
 0x711   : > { %v4827_v23 = vpop.permute.xlu0 %4826 }
 0x712   : > { %4912 = vst [vmem:[%s6079_s14 + $0x90] sm:$0xff] %v4827_v23 }
 0x71b   : > { %v4847_v35 = vpop.permute.xlu1 %4846 }
 0x71c   : > { %4916 = vst [vmem:[%s6079_s14 + $0xb0] sm:$0xff] %v4847_v35 }
 0x71f   : > { %v4882_v16 = vpop.permute.xlu2 %4881 }
 0x720   : > { %4923 = vst [vmem:[%s6079_s14 + $0xe8] sm:$0xff] %v4882_v16 }
 0x723   : > { %v4842_v56 = vpop.permute.xlu0 %4841 }
 0x724   : > { %4915 = vst [vmem:[%s6079_s14 + $0xa8] sm:$0xff] %v4842_v56 }
 0x72d   : > { %v4862_v38 = vpop.permute.xlu1 %4861 }
 0x72e   : > { %4919 = vst [vmem:[%s6079_s14 + $0xc8] sm:$0xff] %v4862_v38 }
 0x732   : > { %v4857_v18 = vpop.permute.xlu0 %4856 }
 0x733   : > { %4918 = vst [vmem:[%s6079_s14 + $0xc0] sm:$0xff] %v4857_v18 }
 0x740   : > { %v4877_v54 = vpop.permute.xlu1 %4876 }
 0x741   : > { %4922 = vst [vmem:[%s6079_s14 + $0xe0] sm:$0xff] %v4877_v54 }
 0x744   : > { %v4872_v11 = vpop.permute.xlu0 %4871 }
 0x745   : > { %4921 = vst [vmem:[%s6079_s14 + $0xd8] sm:$0xff] %v4872_v11 }
 0x748   : > { %v4892_v13 = vpop.permute.xlu1 %4891 }
 0x749   : > { %4925 = vst [vmem:[%s6079_s14 + $0xf8] sm:$0xff] %v4892_v13 }
 0x74d   : > { %v4887_v21 = vpop.permute.xlu0 %4886 }
 0x74e   : > { %4924 = vst [vmem:[%s6079_s14 + $0xf0] sm:$0xff] %v4887_v21 }
 0x74f PF: > { %s5269_s24 = sshll.u32 %s5907_s28, 8  ;;  %s4939_s10 = sshll.u32 %s6079_s14, 4  ;;  %s4940_s10 = int_to_ptr.vmem [resolvable:$true] %s4939_s10 }
 0x750   : > { %s4938_s23 = scalar_lea.hbm %s10490_s7, %s5269_s24  ;;  %s12136_s11 = sand.u32 1, %s5895_s25  }
 0x751   : > { %s4941_s15 = sshll.u32 %s4938_s23, 4  ;;  %s4927_s12 = scalar_lea.sflag [#allocation6], %s12136_s11  ;;  %s4942_s15 = int_to_ptr.hbm [resolvable:$true] %s4941_s15 }
 0x752   : > { %s5839_s29 = sshra.s32 %s4942_s15, 4  ;;  %s5845_s28 = scalar_lea.hbm %s10490_s7, 512  ;;  %s5840_s29 = int_to_ptr.hbm [resolvable:$true] %s5839_s29 }
 0x753   : > { %s5841_s18 = scalar_lea.hbm %s5840_s29, 256  ;;  %p5846_p11 = scmp.lt.s32.totalorder %s5840_s29, %s10490_s7 }
 0x754   : > { %p5842_p7 = scmp.ne.s32.totalorder %s5840_s29, %s5841_s18  ;;  %p5847_p12 = scmp.lt.s32.totalorder %s5845_s28, %s5841_s18 }
 0x756   : > { %p5843_p8 = pnand %p5842_p7, %p6018_p3  ;;  %p5848_p13 = por %p5847_p12, %p5846_p11 }
 0x758   : > { %p5844_p10 = pneg %p5843_p8 }
 0x75a   : > { %p5849_p0 = pnand %p5848_p13, %p5844_p10 }
 0x75c   : > { %5852 = shalt.err (!%p5849_p0)
}
 0x75d   : > { %s5927_s14 = smov 128   ;;  %s5928_s9 = smov 8  }
 0x75e   : > { %5286 = dma.vmem_to_hbm [thread:$0]  (%p6018_p3), %s4940_s10, 4096, %s4942_s15, %s4927_s12, %s5927_s14, %s5927_s14, %s5928_s9  }
 0x75f PF: > { %s12137_s0 = sld [smem:[#allocation8_spill]]  ;;  %p5292_p1 = scmp.ge.s32.totalorder %s5919_s8, 2 }
 0x761   : > { %p5289_p2 = pnand %p5292_p1, %p6028_p9 }
 0x763   : > { %p5290_p4 = pneg %p5289_p2 }
 0x765   : > { %s4956_s22 = sand.u32 1, %s12137_s0  }
 0x766   : > { %s4957_s16 = scalar_lea.sflag [#allocation6], %s4956_s22 }
 0x767   : > { %5886 = dma.done.wait (%p5290_p4), %s4957_s16, 4096  }
 0x768   : > { %5888 = vsyncadd (%p5290_p4), %s4957_s16, 4294963200  ;;  %s20_s8 = sadd.s32 1, %s5919_s8   ;;  %s12139_s27 = sld [smem:[#allocation9_spill]] }
 0x769   : > { %p17_p5 = scmp.ge.s32.totalorder %s20_s8, 6   ;;  %s12140_s26 = sld [smem:[#allocation15_spill]] }
 0x76a   : > { %s12141_s13 = sld [smem:[#allocation10_spill]]  ;;  %s12145_s24 = smov %s5895_s25 }
 0x76b   : > { %s12142_s28 = sld [smem:[#allocation11_spill]] }
 0x76c   : > { %s12143_s29 = sld [smem:[#allocation12_spill]]  ;;  %19 = sbr.rel (!%p17_p5) target bundleno = 7 (0x7), region = 117 }
 0x76d   : > { %s12144_s30 = sld [smem:[#allocation13_spill]] }
 0x76e   : > { %s12146_s25 = smov %s12139_s27 }
 0x770   : > { %s12147_s27 = smov %s12141_s13 }
 0x771   :  { %4963 = vsyncpa [#allocation6], 1 }
 0x772   :  { %4965 = vsyncpa [#allocation6 + $0x1], 1 }

</bundles_post_ra>
